<compile_context>
chip_gen: v6e
topology: v6e:2x2x1
jax: 0.10.0
libtpu: 0.0.40
codegen_flags: <defaults>
</compile_context>

<pallas_src>
from functools import partial

import jax
import jax.numpy as jnp
from jax.experimental import pallas as pl
from jax.experimental.pallas import tpu as pltpu

EPS = 1e-5
COUT_PAD = 128  # lane-dense padded output channels (real Cout = 32)


def _make_fused_kernel(R_valid, Hp, Wp, C1):
    """R_valid = N*H*W real pixels, (Hp,Wp) = padded spatial, C1 = 1x1-conv out channels."""
    RP = Hp * Wp
    inv_r = 1.0 / R_valid

    def kernel(x_ref, g1_ref, b1_ref, w1_ref, g2_ref, b2_ref, w2_ref, o_ref):
        # ---- validity mask for the zero halo (iota-built; hoisted out of the tap loop) ----
        r = jax.lax.broadcasted_iota(jnp.int32, (RP, C1), 0)     # flat padded-row index
        j = r % Wp                                               # column inside padded row
        valid = (j >= 1) & (j <= Wp - 2) & (r >= Wp) & (r < Wp * (Hp - 1))
        vmask = valid.astype(jnp.float32)                        # (RP, C1) 0/1

        # ---- stage 1: BN(1152) batch stats (one f32 pass) folded to scale/shift + ReLU ----
        x = x_ref[...]                           # (RP, Cin) bf16; halo rows are exact zeros
        xf = x.astype(jnp.float32)
        s1 = jnp.sum(xf, axis=0, keepdims=True)
        q1 = jnp.sum(xf * xf, axis=0, keepdims=True)
        m1 = s1 * inv_r
        v1 = q1 * inv_r - m1 * m1                                # biased variance
        scale1 = jax.lax.rsqrt(v1 + EPS) * g1_ref[...]
        shift1 = b1_ref[...] - m1 * scale1
        a1 = jnp.maximum(x * scale1 + shift1, 0.0)               # f32 (bf16*f32 promotes)

        # ---- 1x1 conv on the MXU ----
        y1 = jnp.dot(a1.astype(jnp.bfloat16), w1_ref[...],
                     preferred_element_type=jnp.float32)         # (RP, C1) f32

        # ---- stage 2: BN(128) batch stats (two-pass, halo masked) + ReLU ----
        y1m = y1 * vmask
        m2 = jnp.sum(y1m, axis=0, keepdims=True) * inv_r
        d2 = (y1 - m2) * vmask
        v2 = jnp.sum(d2 * d2, axis=0, keepdims=True) * inv_r
        scale2 = jax.lax.rsqrt(v2 + EPS) * g2_ref[...]
        shift2 = b2_ref[...] - m2 * scale2
        a2 = jnp.maximum(y1 * scale2 + shift2, 0.0) * vmask      # halo rows forced to 0

        # ---- stage 3: 3x3 conv (pad=1) = 9 accumulating MXU dots over rolled taps ----
        acc = None
        for dy in range(3):
            for dx in range(3):
                idx = dy * 3 + dx
                off = (dy - 1) * Wp + (dx - 1)                   # flat row shift, padded layout
                if off == 0:
                    tap = a2
                else:
                    # tap[rp] = a2[rp + off] for all valid output rows (no wrap there)
                    tap = pltpu.roll(a2, shift=(-off) % RP, axis=0)
                w_tap = w2_ref[idx * C1:(idx + 1) * C1, :]       # (C1, COUT_PAD) bf16, static
                c = jnp.dot(tap.astype(jnp.bfloat16), w_tap,
                            preferred_element_type=jnp.float32)
                acc = c if acc is None else acc + c
        o_ref[...] = acc        # halo output rows hold garbage; wrapper slices the valid 14x14

    return kernel


def fused_bn_relu_conv(x2d, g1, b1, w1b, g2, b2, w2p, R_valid, Hp, Wp):
    RP, Cin = x2d.shape
    C1 = w1b.shape[1]
    cout_pad = w2p.shape[1]
    kernel = _make_fused_kernel(R_valid, Hp, Wp, C1)
    return pl.pallas_call(
        kernel,
        out_shape=jax.ShapeDtypeStruct((RP, cout_pad), jnp.float32),
        grid=(1,),
        in_specs=[
            pl.BlockSpec((RP, Cin), lambda i: (0, 0)),
            pl.BlockSpec((1, Cin), lambda i: (0, 0)),
            pl.BlockSpec((1, Cin), lambda i: (0, 0)),
            pl.BlockSpec((Cin, C1), lambda i: (0, 0)),
            pl.BlockSpec((1, C1), lambda i: (0, 0)),
            pl.BlockSpec((1, C1), lambda i: (0, 0)),
            pl.BlockSpec((9 * C1, cout_pad), lambda i: (0, 0)),
        ],
        out_specs=pl.BlockSpec((RP, cout_pad), lambda i: (0, 0)),
        compiler_params=pltpu.CompilerParams(dimension_semantics=("arbitrary",)),
    )(x2d, g1, b1, w1b, g2, b2, w2p)


# --------------------------------- Module wrapper ---------------------------------
def prepare_params(p):
    """One-time weight prep (hoisted out of the per-call path)."""
    C1 = p["w1"].shape[1]
    Cout = p["w2"].shape[-1]
    w1b = p["w1"].astype(jnp.bfloat16)                                   # (1152, 128)
    w2_flat = p["w2"].reshape(9 * C1, Cout)                              # tap-major (dy,dx,cin)
    w2p = jnp.pad(w2_flat, ((0, 0), (0, COUT_PAD - Cout))).astype(jnp.bfloat16)
    return dict(g1=p["g1"], b1=p["b1"], w1b=w1b,
                g2=p["g2"], b2=p["b2"], w2p=w2p), Cout


@partial(jax.jit, static_argnames=("cout",))
def forward(x_nchw, g1, b1, w1b, g2, b2, w2p, cout):
    N, Cin, H, W = x_nchw.shape
    assert N == 1  # TODO(synk): batch>1 needs a per-image halo in the flattened row layout
    Hp, Wp = H + 2, W + 2
    # NCHW -> NHWC, zero spatial halo, flatten to padded rows, cast to bf16 (fused by XLA).
    xh = jnp.transpose(x_nchw, (0, 2, 3, 1))                             # (1, 14, 14, 1152)
    xp = jnp.pad(xh, ((0, 0), (1, 1), (1, 1), (0, 0)))                   # (1, 16, 16, 1152)
    x2d = xp.reshape(Hp * Wp, Cin).astype(jnp.bfloat16)                  # (256, 1152) bf16

    out = fused_bn_relu_conv(x2d, g1, b1, w1b, g2, b2, w2p,
                             N * H * W, Hp, Wp)                          # (256, 128) f32
    y = out.reshape(Hp, Wp, -1)[1:Hp - 1, 1:Wp - 1, :cout]               # (14, 14, 32)
    return jnp.transpose(y, (2, 0, 1))[None]                             # (1, 32, 14, 14)


# --------------------------------- Pure-JAX reference ---------------------------------
def reference(x_nchw, p):
    hp = jax.lax.Precision.HIGHEST
    x = jnp.transpose(x_nchw, (0, 2, 3, 1))
    m = x.mean(axis=(0, 1, 2))
    v = ((x - m) ** 2).mean(axis=(0, 1, 2))
    a = jnp.maximum((x - m) * jax.lax.rsqrt(v + EPS) * p["g1"].reshape(-1)
                    + p["b1"].reshape(-1), 0.0)
    y = jnp.einsum("nhwc,co->nhwo", a, p["w1"], precision=hp)
    m2 = y.mean(axis=(0, 1, 2))
    v2 = ((y - m2) ** 2).mean(axis=(0, 1, 2))
    a2 = jnp.maximum((y - m2) * jax.lax.rsqrt(v2 + EPS) * p["g2"].reshape(-1)
                     + p["b2"].reshape(-1), 0.0)
    out = jax.lax.conv_general_dilated(
        a2, p["w2"], window_strides=(1, 1), padding="SAME",
        dimension_numbers=("NHWC", "HWIO", "NHWC"), precision=hp)
    return jnp.transpose(out, (0, 3, 1, 2))


if __name__ == "__main__":
    key = jax.random.PRNGKey(0)
    k_x, k_w1, k_w2, k_g1, k_b1, k_g2, k_b2 = jax.random.split(key, 7)

    # deterministic parameters (shapes from the module's __init__)
    params = {
        "g1": 1.0 + 0.1 * jax.random.normal(k_g1, (1, 1152), jnp.float32),
        "b1": 0.1 * jax.random.normal(k_b1, (1, 1152), jnp.float32),
        "w1": 0.03 * jax.random.normal(k_w1, (1152, 128), jnp.float32),      # Conv2d(1152,128,1x1)
        "g2": 1.0 + 0.1 * jax.random.normal(k_g2, (1, 128), jnp.float32),
        "b2": 0.1 * jax.random.normal(k_b2, (1, 128), jnp.float32),
        "w2": 0.05 * jax.random.normal(k_w2, (3, 3, 128, 32), jnp.float32),  # Conv2d(128,32,3x3) HWIO
    }

    x = jax.random.normal(k_x, (1, 1152, 14, 14), jnp.float32)  # torch.Size([1,1152,14,14])

    pp, cout = prepare_params(params)   # one-time weight prep (bf16 / tap-major / lane-padded)

    out = jax.block_until_ready(
        forward(x, pp["g1"], pp["b1"], pp["w1b"], pp["g2"], pp["b2"], pp["w2p"], cout=cout))
    assert out.shape == (1, 32, 14, 14)

    ref = jax.block_until_ready(reference(x, params))
    # bf16 input + bf16 MXU operands (f32 accumulation) vs f32-HIGHEST reference
    assert jnp.allclose(out, ref, atol=3e-2, rtol=2e-2), "mismatch vs JAX reference"

    print("KERNEL_OK")
</pallas_src>

<mosaic_0001>
module attributes {stable_mosaic.version = 11 : i64} {
  func.func @kernel(%arg0: i32, %arg1: memref<256x1152xbf16, #tpu.memory_space<vmem>>, %arg2: memref<1x1152xf32, #tpu.memory_space<vmem>>, %arg3: memref<1x1152xf32, #tpu.memory_space<vmem>>, %arg4: memref<1152x128xbf16, #tpu.memory_space<vmem>>, %arg5: memref<1x128xf32, #tpu.memory_space<vmem>>, %arg6: memref<1x128xf32, #tpu.memory_space<vmem>>, %arg7: memref<1152x128xbf16, #tpu.memory_space<vmem>>, %arg8: memref<256x128xf32, #tpu.memory_space<vmem>>) attributes {dimension_semantics = [#tpu.dimension_semantics<arbitrary>], iteration_bounds = array<i64: 1>, scalar_prefetch = 0 : i64, scratch_operands = 0 : i64, tpu.core_type = #tpu.core_type<tc>, window_params = [{pipeline_mode = #tpu.pipeline_mode<synchronous>, transform_indices = @transform_0, window_bounds = array<i64: 256, 1152>}, {pipeline_mode = #tpu.pipeline_mode<synchronous>, transform_indices = @transform_1, window_bounds = array<i64: 1, 1152>}, {pipeline_mode = #tpu.pipeline_mode<synchronous>, transform_indices = @transform_2, window_bounds = array<i64: 1, 1152>}, {pipeline_mode = #tpu.pipeline_mode<synchronous>, transform_indices = @transform_3, window_bounds = array<i64: 1152, 128>}, {pipeline_mode = #tpu.pipeline_mode<synchronous>, transform_indices = @transform_4, window_bounds = array<i64: 1, 128>}, {pipeline_mode = #tpu.pipeline_mode<synchronous>, transform_indices = @transform_5, window_bounds = array<i64: 1, 128>}, {pipeline_mode = #tpu.pipeline_mode<synchronous>, transform_indices = @transform_6, window_bounds = array<i64: 1152, 128>}, {pipeline_mode = #tpu.pipeline_mode<synchronous>, transform_indices = @transform_7, window_bounds = array<i64: 256, 128>}]} {
    %0 = tpu.iota {dimensions = array<i32: 0>} : vector<256x128xi32>
    %c16_i32 = arith.constant 16 : i32
    %c0_i32 = arith.constant 0 : i32
    %1 = arith.cmpi eq, %c16_i32, %c0_i32 : i32
    %c1_i32 = arith.constant 1 : i32
    %2 = arith.select %1, %c1_i32, %c16_i32 : i32
    %3 = vector.broadcast %2 : i32 to vector<256x128xi32>
    %4 = arith.remsi %0, %3 : vector<256x128xi32>
    %c0_i32_0 = arith.constant 0 : i32
    %5 = vector.broadcast %c0_i32_0 : i32 to vector<256x128xi32>
    %6 = arith.cmpi ne, %4, %5 : vector<256x128xi32>
    %c0_i32_1 = arith.constant 0 : i32
    %7 = vector.broadcast %c0_i32_1 : i32 to vector<256x128xi32>
    %8 = arith.cmpi slt, %4, %7 : vector<256x128xi32>
    %c0_i32_2 = arith.constant 0 : i32
    %9 = arith.cmpi slt, %2, %c0_i32_2 : i32
    %10 = vector.broadcast %9 : i1 to vector<256x128xi1>
    %11 = vector.broadcast %10 : vector<256x128xi1> to vector<256x128xi1>
    %12 = arith.xori %8, %11 : vector<256x128xi1>
    %13 = arith.andi %12, %6 : vector<256x128xi1>
    %14 = vector.broadcast %2 : i32 to vector<256x128xi32>
    %15 = arith.addi %4, %14 : vector<256x128xi32>
    %16 = arith.select %13, %15, %4 : vector<256x128xi1>, vector<256x128xi32>
    %c1_i32_3 = arith.constant 1 : i32
    %17 = vector.broadcast %c1_i32_3 : i32 to vector<256x128xi32>
    %18 = arith.cmpi sge, %16, %17 : vector<256x128xi32>
    %c14_i32 = arith.constant 14 : i32
    %19 = vector.broadcast %c14_i32 : i32 to vector<256x128xi32>
    %20 = arith.cmpi sle, %16, %19 : vector<256x128xi32>
    %21 = arith.andi %18, %20 : vector<256x128xi1>
    %c16_i32_4 = arith.constant 16 : i32
    %22 = vector.broadcast %c16_i32_4 : i32 to vector<256x128xi32>
    %23 = arith.cmpi sge, %0, %22 : vector<256x128xi32>
    %24 = arith.andi %21, %23 : vector<256x128xi1>
    %c240_i32 = arith.constant 240 : i32
    %25 = vector.broadcast %c240_i32 : i32 to vector<256x128xi32>
    %26 = arith.cmpi slt, %0, %25 : vector<256x128xi32>
    %27 = arith.andi %24, %26 : vector<256x128xi1>
    %28 = arith.extui %27 : vector<256x128xi1> to vector<256x128xi32>
    %29 = arith.sitofp %28 : vector<256x128xi32> to vector<256x128xf32>
    %c0 = arith.constant 0 : index
    %c0_5 = arith.constant 0 : index
    %30 = vector.load %arg1[%c0, %c0_5] : memref<256x1152xbf16, #tpu.memory_space<vmem>>, vector<256x1152xbf16>
    %31 = arith.extf %30 : vector<256x1152xbf16> to vector<256x1152xf32>
    %cst = arith.constant dense<0.000000e+00> : vector<1152xf32>
    %32 = vector.multi_reduction <add>, %31, %cst [0] : vector<256x1152xf32> to vector<1152xf32>
    %33 = vector.shape_cast %32 : vector<1152xf32> to vector<1x1152xf32>
    %34 = arith.mulf %31, %31 : vector<256x1152xf32>
    %cst_6 = arith.constant dense<0.000000e+00> : vector<1152xf32>
    %35 = vector.multi_reduction <add>, %34, %cst_6 [0] : vector<256x1152xf32> to vector<1152xf32>
    %36 = vector.shape_cast %35 : vector<1152xf32> to vector<1x1152xf32>
    %cst_7 = arith.constant 0.00510204071 : f32
    %37 = vector.broadcast %cst_7 : f32 to vector<1x1152xf32>
    %38 = arith.mulf %33, %37 : vector<1x1152xf32>
    %cst_8 = arith.constant 0.00510204071 : f32
    %39 = vector.broadcast %cst_8 : f32 to vector<1x1152xf32>
    %40 = arith.mulf %36, %39 : vector<1x1152xf32>
    %41 = arith.mulf %38, %38 : vector<1x1152xf32>
    %42 = arith.subf %40, %41 : vector<1x1152xf32>
    %cst_9 = arith.constant 9.99999974E-6 : f32
    %43 = vector.broadcast %cst_9 : f32 to vector<1x1152xf32>
    %44 = arith.addf %42, %43 : vector<1x1152xf32>
    %45 = math.rsqrt %44 : vector<1x1152xf32>
    %c0_10 = arith.constant 0 : index
    %c0_11 = arith.constant 0 : index
    %46 = vector.load %arg2[%c0_10, %c0_11] : memref<1x1152xf32, #tpu.memory_space<vmem>>, vector<1x1152xf32>
    %47 = arith.mulf %45, %46 : vector<1x1152xf32>
    %c0_12 = arith.constant 0 : index
    %c0_13 = arith.constant 0 : index
    %48 = vector.load %arg3[%c0_12, %c0_13] : memref<1x1152xf32, #tpu.memory_space<vmem>>, vector<1x1152xf32>
    %49 = arith.mulf %38, %47 : vector<1x1152xf32>
    %50 = arith.subf %48, %49 : vector<1x1152xf32>
    %51 = arith.extf %30 : vector<256x1152xbf16> to vector<256x1152xf32>
    %52 = vector.broadcast %47 : vector<1x1152xf32> to vector<256x1152xf32>
    %53 = arith.mulf %51, %52 : vector<256x1152xf32>
    %54 = vector.broadcast %50 : vector<1x1152xf32> to vector<256x1152xf32>
    %55 = arith.addf %53, %54 : vector<256x1152xf32>
    %cst_14 = arith.constant 0.000000e+00 : f32
    %56 = vector.broadcast %cst_14 : f32 to vector<256x1152xf32>
    %57 = arith.maximumf %55, %56 : vector<256x1152xf32>
    %58 = arith.truncf %57 : vector<256x1152xf32> to vector<256x1152xbf16>
    %c0_15 = arith.constant 0 : index
    %c0_16 = arith.constant 0 : index
    %59 = vector.load %arg4[%c0_15, %c0_16] : memref<1152x128xbf16, #tpu.memory_space<vmem>>, vector<1152x128xbf16>
    %cst_17 = arith.constant dense<0.000000e+00> : vector<256x128xf32>
    %60 = tpu.matmul %58, %59, %cst_17 {dimension_numbers = #tpu.dot_dimension_numbers<[1], [0], [0], [1], [0, 0, 1, 1], [], []>} : vector<256x1152xbf16>, vector<1152x128xbf16>, vector<256x128xf32> -> vector<256x128xf32>
    %61 = arith.mulf %60, %29 : vector<256x128xf32>
    %cst_18 = arith.constant dense<0.000000e+00> : vector<128xf32>
    %62 = vector.multi_reduction <add>, %61, %cst_18 [0] : vector<256x128xf32> to vector<128xf32>
    %63 = vector.shape_cast %62 : vector<128xf32> to vector<1x128xf32>
    %cst_19 = arith.constant 0.00510204071 : f32
    %64 = vector.broadcast %cst_19 : f32 to vector<1x128xf32>
    %65 = arith.mulf %63, %64 : vector<1x128xf32>
    %66 = vector.broadcast %65 : vector<1x128xf32> to vector<256x128xf32>
    %67 = arith.subf %60, %66 : vector<256x128xf32>
    %68 = arith.mulf %67, %29 : vector<256x128xf32>
    %69 = arith.mulf %68, %68 : vector<256x128xf32>
    %cst_20 = arith.constant dense<0.000000e+00> : vector<128xf32>
    %70 = vector.multi_reduction <add>, %69, %cst_20 [0] : vector<256x128xf32> to vector<128xf32>
    %71 = vector.shape_cast %70 : vector<128xf32> to vector<1x128xf32>
    %cst_21 = arith.constant 0.00510204071 : f32
    %72 = vector.broadcast %cst_21 : f32 to vector<1x128xf32>
    %73 = arith.mulf %71, %72 : vector<1x128xf32>
    %cst_22 = arith.constant 9.99999974E-6 : f32
    %74 = vector.broadcast %cst_22 : f32 to vector<1x128xf32>
    %75 = arith.addf %73, %74 : vector<1x128xf32>
    %76 = math.rsqrt %75 : vector<1x128xf32>
    %c0_23 = arith.constant 0 : index
    %c0_24 = arith.constant 0 : index
    %77 = vector.load %arg5[%c0_23, %c0_24] : memref<1x128xf32, #tpu.memory_space<vmem>>, vector<1x128xf32>
    %78 = arith.mulf %76, %77 : vector<1x128xf32>
    %c0_25 = arith.constant 0 : index
    %c0_26 = arith.constant 0 : index
    %79 = vector.load %arg6[%c0_25, %c0_26] : memref<1x128xf32, #tpu.memory_space<vmem>>, vector<1x128xf32>
    %80 = arith.mulf %65, %78 : vector<1x128xf32>
    %81 = arith.subf %79, %80 : vector<1x128xf32>
    %82 = vector.broadcast %78 : vector<1x128xf32> to vector<256x128xf32>
    %83 = arith.mulf %60, %82 : vector<256x128xf32>
    %84 = vector.broadcast %81 : vector<1x128xf32> to vector<256x128xf32>
    %85 = arith.addf %83, %84 : vector<256x128xf32>
    %cst_27 = arith.constant 0.000000e+00 : f32
    %86 = vector.broadcast %cst_27 : f32 to vector<256x128xf32>
    %87 = arith.maximumf %85, %86 : vector<256x128xf32>
    %88 = arith.mulf %87, %29 : vector<256x128xf32>
    %c17_i32 = arith.constant 17 : i32
    %89 = tpu.dynamic_rotate %88 by %c17_i32 dim 0 : vector<256x128xf32>, i32 -> vector<256x128xf32>
    %c0_28 = arith.constant 0 : index
    %c0_29 = arith.constant 0 : index
    %90 = vector.load %arg7[%c0_28, %c0_29] : memref<1152x128xbf16, #tpu.memory_space<vmem>>, vector<128x128xbf16>
    %91 = arith.truncf %89 : vector<256x128xf32> to vector<256x128xbf16>
    %cst_30 = arith.constant dense<0.000000e+00> : vector<256x128xf32>
    %92 = tpu.matmul %91, %90, %cst_30 {dimension_numbers = #tpu.dot_dimension_numbers<[1], [0], [0], [1], [0, 0, 1, 1], [], []>} : vector<256x128xbf16>, vector<128x128xbf16>, vector<256x128xf32> -> vector<256x128xf32>
    %c16_i32_31 = arith.constant 16 : i32
    %93 = tpu.dynamic_rotate %88 by %c16_i32_31 dim 0 : vector<256x128xf32>, i32 -> vector<256x128xf32>
    %c128 = arith.constant 128 : index
    %c0_32 = arith.constant 0 : index
    %94 = vector.load %arg7[%c128, %c0_32] : memref<1152x128xbf16, #tpu.memory_space<vmem>>, vector<128x128xbf16>
    %95 = arith.truncf %93 : vector<256x128xf32> to vector<256x128xbf16>
    %cst_33 = arith.constant dense<0.000000e+00> : vector<256x128xf32>
    %96 = tpu.matmul %95, %94, %cst_33 {dimension_numbers = #tpu.dot_dimension_numbers<[1], [0], [0], [1], [0, 0, 1, 1], [], []>} : vector<256x128xbf16>, vector<128x128xbf16>, vector<256x128xf32> -> vector<256x128xf32>
    %97 = arith.addf %92, %96 : vector<256x128xf32>
    %c15_i32 = arith.constant 15 : i32
    %98 = tpu.dynamic_rotate %88 by %c15_i32 dim 0 : vector<256x128xf32>, i32 -> vector<256x128xf32>
    %c256 = arith.constant 256 : index
    %c0_34 = arith.constant 0 : index
    %99 = vector.load %arg7[%c256, %c0_34] : memref<1152x128xbf16, #tpu.memory_space<vmem>>, vector<128x128xbf16>
    %100 = arith.truncf %98 : vector<256x128xf32> to vector<256x128xbf16>
    %cst_35 = arith.constant dense<0.000000e+00> : vector<256x128xf32>
    %101 = tpu.matmul %100, %99, %cst_35 {dimension_numbers = #tpu.dot_dimension_numbers<[1], [0], [0], [1], [0, 0, 1, 1], [], []>} : vector<256x128xbf16>, vector<128x128xbf16>, vector<256x128xf32> -> vector<256x128xf32>
    %102 = arith.addf %97, %101 : vector<256x128xf32>
    %c1_i32_36 = arith.constant 1 : i32
    %103 = tpu.dynamic_rotate %88 by %c1_i32_36 dim 0 : vector<256x128xf32>, i32 -> vector<256x128xf32>
    %c384 = arith.constant 384 : index
    %c0_37 = arith.constant 0 : index
    %104 = vector.load %arg7[%c384, %c0_37] : memref<1152x128xbf16, #tpu.memory_space<vmem>>, vector<128x128xbf16>
    %105 = arith.truncf %103 : vector<256x128xf32> to vector<256x128xbf16>
    %cst_38 = arith.constant dense<0.000000e+00> : vector<256x128xf32>
    %106 = tpu.matmul %105, %104, %cst_38 {dimension_numbers = #tpu.dot_dimension_numbers<[1], [0], [0], [1], [0, 0, 1, 1], [], []>} : vector<256x128xbf16>, vector<128x128xbf16>, vector<256x128xf32> -> vector<256x128xf32>
    %107 = arith.addf %102, %106 : vector<256x128xf32>
    %c512 = arith.constant 512 : index
    %c0_39 = arith.constant 0 : index
    %108 = vector.load %arg7[%c512, %c0_39] : memref<1152x128xbf16, #tpu.memory_space<vmem>>, vector<128x128xbf16>
    %109 = arith.truncf %88 : vector<256x128xf32> to vector<256x128xbf16>
    %cst_40 = arith.constant dense<0.000000e+00> : vector<256x128xf32>
    %110 = tpu.matmul %109, %108, %cst_40 {dimension_numbers = #tpu.dot_dimension_numbers<[1], [0], [0], [1], [0, 0, 1, 1], [], []>} : vector<256x128xbf16>, vector<128x128xbf16>, vector<256x128xf32> -> vector<256x128xf32>
    %111 = arith.addf %107, %110 : vector<256x128xf32>
    %c255_i32 = arith.constant 255 : i32
    %112 = tpu.dynamic_rotate %88 by %c255_i32 dim 0 : vector<256x128xf32>, i32 -> vector<256x128xf32>
    %c640 = arith.constant 640 : index
    %c0_41 = arith.constant 0 : index
    %113 = vector.load %arg7[%c640, %c0_41] : memref<1152x128xbf16, #tpu.memory_space<vmem>>, vector<128x128xbf16>
    %114 = arith.truncf %112 : vector<256x128xf32> to vector<256x128xbf16>
    %cst_42 = arith.constant dense<0.000000e+00> : vector<256x128xf32>
    %115 = tpu.matmul %114, %113, %cst_42 {dimension_numbers = #tpu.dot_dimension_numbers<[1], [0], [0], [1], [0, 0, 1, 1], [], []>} : vector<256x128xbf16>, vector<128x128xbf16>, vector<256x128xf32> -> vector<256x128xf32>
    %116 = arith.addf %111, %115 : vector<256x128xf32>
    %c241_i32 = arith.constant 241 : i32
    %117 = tpu.dynamic_rotate %88 by %c241_i32 dim 0 : vector<256x128xf32>, i32 -> vector<256x128xf32>
    %c768 = arith.constant 768 : index
    %c0_43 = arith.constant 0 : index
    %118 = vector.load %arg7[%c768, %c0_43] : memref<1152x128xbf16, #tpu.memory_space<vmem>>, vector<128x128xbf16>
    %119 = arith.truncf %117 : vector<256x128xf32> to vector<256x128xbf16>
    %cst_44 = arith.constant dense<0.000000e+00> : vector<256x128xf32>
    %120 = tpu.matmul %119, %118, %cst_44 {dimension_numbers = #tpu.dot_dimension_numbers<[1], [0], [0], [1], [0, 0, 1, 1], [], []>} : vector<256x128xbf16>, vector<128x128xbf16>, vector<256x128xf32> -> vector<256x128xf32>
    %121 = arith.addf %116, %120 : vector<256x128xf32>
    %c240_i32_45 = arith.constant 240 : i32
    %122 = tpu.dynamic_rotate %88 by %c240_i32_45 dim 0 : vector<256x128xf32>, i32 -> vector<256x128xf32>
    %c896 = arith.constant 896 : index
    %c0_46 = arith.constant 0 : index
    %123 = vector.load %arg7[%c896, %c0_46] : memref<1152x128xbf16, #tpu.memory_space<vmem>>, vector<128x128xbf16>
    %124 = arith.truncf %122 : vector<256x128xf32> to vector<256x128xbf16>
    %cst_47 = arith.constant dense<0.000000e+00> : vector<256x128xf32>
    %125 = tpu.matmul %124, %123, %cst_47 {dimension_numbers = #tpu.dot_dimension_numbers<[1], [0], [0], [1], [0, 0, 1, 1], [], []>} : vector<256x128xbf16>, vector<128x128xbf16>, vector<256x128xf32> -> vector<256x128xf32>
    %126 = arith.addf %121, %125 : vector<256x128xf32>
    %c239_i32 = arith.constant 239 : i32
    %127 = tpu.dynamic_rotate %88 by %c239_i32 dim 0 : vector<256x128xf32>, i32 -> vector<256x128xf32>
    %c1024 = arith.constant 1024 : index
    %c0_48 = arith.constant 0 : index
    %128 = vector.load %arg7[%c1024, %c0_48] : memref<1152x128xbf16, #tpu.memory_space<vmem>>, vector<128x128xbf16>
    %129 = arith.truncf %127 : vector<256x128xf32> to vector<256x128xbf16>
    %cst_49 = arith.constant dense<0.000000e+00> : vector<256x128xf32>
    %130 = tpu.matmul %129, %128, %cst_49 {dimension_numbers = #tpu.dot_dimension_numbers<[1], [0], [0], [1], [0, 0, 1, 1], [], []>} : vector<256x128xbf16>, vector<128x128xbf16>, vector<256x128xf32> -> vector<256x128xf32>
    %131 = arith.addf %126, %130 : vector<256x128xf32>
    %c0_50 = arith.constant 0 : index
    %c0_51 = arith.constant 0 : index
    %132 = vector.load %arg8[%c0_50, %c0_51] : memref<256x128xf32, #tpu.memory_space<vmem>>, vector<256x128xf32>
    tpu.vector_store %arg8[%c0_50, %c0_51], %131 {strides = array<i32>} : memref<256x128xf32, #tpu.memory_space<vmem>>, vector<256x128xf32>,
    return
  }
  func.func @transform_0(%arg0: i32) -> (i32, i32) {
    %c0_i32 = arith.constant 0 : i32
    %c0_i32_0 = arith.constant 0 : i32
    %c0_i32_1 = arith.constant 0 : i32
    return %c0_i32, %c0_i32_0 : i32, i32
  }
  func.func @transform_1(%arg0: i32) -> (i32, i32) {
    %c0_i32 = arith.constant 0 : i32
    %c0_i32_0 = arith.constant 0 : i32
    %c0_i32_1 = arith.constant 0 : i32
    return %c0_i32, %c0_i32_0 : i32, i32
  }
  func.func @transform_2(%arg0: i32) -> (i32, i32) {
    %c0_i32 = arith.constant 0 : i32
    %c0_i32_0 = arith.constant 0 : i32
    %c0_i32_1 = arith.constant 0 : i32
    return %c0_i32, %c0_i32_0 : i32, i32
  }
  func.func @transform_3(%arg0: i32) -> (i32, i32) {
    %c0_i32 = arith.constant 0 : i32
    %c0_i32_0 = arith.constant 0 : i32
    %c0_i32_1 = arith.constant 0 : i32
    return %c0_i32, %c0_i32_0 : i32, i32
  }
  func.func @transform_4(%arg0: i32) -> (i32, i32) {
    %c0_i32 = arith.constant 0 : i32
    %c0_i32_0 = arith.constant 0 : i32
    %c0_i32_1 = arith.constant 0 : i32
    return %c0_i32, %c0_i32_0 : i32, i32
  }
  func.func @transform_5(%arg0: i32) -> (i32, i32) {
    %c0_i32 = arith.constant 0 : i32
    %c0_i32_0 = arith.constant 0 : i32
    %c0_i32_1 = arith.constant 0 : i32
    return %c0_i32, %c0_i32_0 : i32, i32
  }
  func.func @transform_6(%arg0: i32) -> (i32, i32) {
    %c0_i32 = arith.constant 0 : i32
    %c0_i32_0 = arith.constant 0 : i32
    %c0_i32_1 = arith.constant 0 : i32
    return %c0_i32, %c0_i32_0 : i32, i32
  }
  func.func @transform_7(%arg0: i32) -> (i32, i32) {
    %c0_i32 = arith.constant 0 : i32
    %c0_i32_0 = arith.constant 0 : i32
    %c0_i32_1 = arith.constant 0 : i32
    return %c0_i32, %c0_i32_0 : i32, i32
  }
}

</mosaic_0001>

<bundles_post_ra>
// kernel: forward.1
= control target key start
LH: loop header
LB: loop body
LE: loop exit
PB: predicated region body
PF: predicated region fallthrough
CT: control target
= control target key end

     0   :  { %s15280_s3 = inlined_call_operand.vmem [shape: bf16[1152,128], index: 3, kind: input, shape index: {}]   ;;  %s15281_s0 = inlined_call_operand.vmem [shape: bf16[256,1152], index: 0, kind: input, shape index: {}]   ;;  %s15282_s1 = inlined_call_operand.vmem [shape: f32[1,1152], index: 1, kind: input, shape index: {}]   ;;  %s15283_s2 = inlined_call_operand.vmem [shape: f32[1,1152], index: 2, kind: input, shape index: {}]   ;;  %s15284_s6 = inlined_call_operand.vmem [shape: bf16[1152,128], index: 6, kind: input, shape index: {}]   ;;  %s15285_s4 = inlined_call_operand.vmem [shape: f32[1,128], index: 4, kind: input, shape index: {}]   ;;  %s15286_s5 = inlined_call_operand.vmem [shape: f32[1,128], index: 5, kind: input, shape index: {}]   ;;  %s15287_s7 = inlined_call_operand.vmem [shape: f32[256,128], index: 7, kind: output, shape index: {}]  }
   0x1   :  { %v8960_v0 = vld [vmem:[%s15280_s3 + $0x78] sm:$0xff]   ;;  %v8964_v4 = vld [vmem:[%s15280_s3 + $0x70] sm:$0xff]   ;;  %v8968_v8 = vld [vmem:[%s15280_s3 + $0x68] sm:$0xff]  }
   0x2   :  { %v8961_v1 = vld [vmem:[%s15280_s3 + $0x38] sm:$0xff]   ;;  %7790 = vmatprep.subr.bf16.mxu0 %v8960_v0  ;;  %v8965_v5 = vld [vmem:[%s15280_s3 + $0x30] sm:$0xff]   ;;  %v8969_v9 = vld [vmem:[%s15280_s3 + $0x28] sm:$0xff]  }
   0x3   :  { %v8962_v2 = vld [vmem:[%s15280_s3 + $0xf8] sm:$0xff]   ;;  %7791 = vmatpush3.bf16.msra.mxu0 %v8961_v1  ;;  %v8966_v6 = vld [vmem:[%s15280_s3 + $0xf0] sm:$0xff]   ;;  %v8970_v10 = vld [vmem:[%s15280_s3 + $0xe8] sm:$0xff]  }
   0x4   :  { %v8963_v3 = vld [vmem:[%s15280_s3 + $0xb8] sm:$0xff]   ;;  %7902 = vmatprep.subr.bf16.mxu1 %v8962_v2  ;;  %7792 = vmatprep.subr.bf16.mxu0 %v8964_v4  ;;  %v8967_v7 = vld [vmem:[%s15280_s3 + $0xb0] sm:$0xff]   ;;  %v8971_v11 = vld [vmem:[%s15280_s3 + $0xa8] sm:$0xff]  }
   0x5   :  { %7903 = vmatpush3.bf16.msra.mxu1 %v8963_v3  ;;  %v8972_v12 = vld [vmem:[%s15280_s3 + $0x60] sm:$0xff]   ;;  %v8976_v16 = vld [vmem:[%s15280_s3 + $0x58] sm:$0xff]   ;;  %v8980_v20 = vld [vmem:[%s15280_s3 + $0x50] sm:$0xff]  }
   0x6   :  { %7904 = vmatprep.subr.bf16.mxu1 %v8966_v6  ;;  %v8973_v13 = vld [vmem:[%s15280_s3 + $0x20] sm:$0xff]   ;;  %v8977_v17 = vld [vmem:[%s15280_s3 + $0x18] sm:$0xff]   ;;  %v8981_v21 = vld [vmem:[%s15280_s3 + $0x10] sm:$0xff]  }
   0x7   :  { %7793 = vmatpush3.bf16.msra.mxu0 %v8965_v5  ;;  %v8974_v14 = vld [vmem:[%s15280_s3 + $0xe0] sm:$0xff]   ;;  %v8978_v18 = vld [vmem:[%s15280_s3 + $0xd8] sm:$0xff]   ;;  %v8982_v22 = vld [vmem:[%s15280_s3 + $0xd0] sm:$0xff]  }
   0x8   :  { %7794 = vmatprep.subr.bf16.mxu0 %v8968_v8  ;;  %v8975_v15 = vld [vmem:[%s15280_s3 + $0xa0] sm:$0xff]   ;;  %v8979_v19 = vld [vmem:[%s15280_s3 + $0x98] sm:$0xff]   ;;  %v8983_v23 = vld [vmem:[%s15280_s3 + $0x90] sm:$0xff]  }
   0x9   :  { %7905 = vmatpush3.bf16.msra.mxu1 %v8967_v7  ;;  %v8984_v24 = vld [vmem:[%s15280_s3 + $0x48] sm:$0xff]   ;;  %v8988_v28 = vld [vmem:[%s15280_s3 + $0x40] sm:$0xff]   ;;  %v9468_v34 = vld [vmem:[%s15281_s0 + $0x10] sm:$0xff] }
   0xa   :  { %7906 = vmatprep.subr.bf16.mxu1 %v8970_v10  ;;  %v8985_v25 = vld [vmem:[%s15280_s3 + $0x8] sm:$0xff]   ;;  %v8989_v29 = vld [vmem:[%s15280_s3] sm:$0xff]   ;;  %15689 = vst [vmem:[#allocation4_spill] sm:$0xff] %v9468_v34  ;;  %v9473_v35 = vld [vmem:[%s15281_s0 + $0x18] sm:$0xff] }
   0xb   :  { %7795 = vmatpush3.bf16.msra.mxu0 %v8969_v9  ;;  %v8986_v26 = vld [vmem:[%s15280_s3 + $0xc8] sm:$0xff]   ;;  %v8990_v30 = vld [vmem:[%s15280_s3 + $0xc0] sm:$0xff]   ;;  %15690 = vst [vmem:[#allocation5_spill] sm:$0xff] %v9473_v35  ;;  %v9492_v42 = vld [vmem:[%s15281_s0 + $0x34] sm:$0xff] }
   0xc   :  { %7796 = vmatprep.subr.bf16.mxu0 %v8972_v12  ;;  %v8987_v27 = vld [vmem:[%s15280_s3 + $0x88] sm:$0xff]   ;;  %v8991_v31 = vld [vmem:[%s15280_s3 + $0x80] sm:$0xff]   ;;  %15693 = vst [vmem:[#allocation8_spill] sm:$0xff] %v9492_v42  ;;  %v9511_v49 = vld [vmem:[%s15281_s0 + $0x50] sm:$0xff] }
   0xd   :  { %7907 = vmatpush3.bf16.msra.mxu1 %v8971_v11  ;;  %v9458_v32 = vld [vmem:[%s15281_s0] sm:$0xff]  ;;  %v9463_v33 = vld [vmem:[%s15281_s0 + $0x8] sm:$0xff]  ;;  %v9516_v50 = vld [vmem:[%s15281_s0 + $0x58] sm:$0xff] }
   0xe   :  { %7908 = vmatprep.subr.bf16.mxu1 %v8974_v14  ;;  %15687 = vst [vmem:[#allocation2_spill] sm:$0xff] %v9458_v32  ;;  %15688 = vst [vmem:[#allocation3_spill] sm:$0xff] %v9463_v33  ;;  %v9478_v36 = vld [vmem:[%s15281_s0 + $0x24] sm:$0xff]  ;;  %v9483_v37 = vld [vmem:[%s15281_s0 + $0x2c] sm:$0xff] }
   0xf   :  { %7797 = vmatpush3.bf16.msra.mxu0 %v8973_v13  ;;  %15691 = vst [vmem:[#allocation6_spill] sm:$0xff] %v9478_v36  ;;  %15692 = vst [vmem:[#allocation7_spill] sm:$0xff] %v9483_v37  ;;  %v9497_v43 = vld [vmem:[%s15281_s0 + $0x3c] sm:$0xff]  ;;  %v9502_v44 = vld [vmem:[%s15281_s0 + $0x48] sm:$0xff] }
  0x10   :  { %7798 = vmatprep.subr.bf16.mxu0 %v8976_v16  ;;  %15694 = vst [vmem:[#allocation9_spill] sm:$0xff] %v9497_v43  ;;  %15695 = vst [vmem:[#allocation10_spill] sm:$0xff] %v9516_v50  ;;  %v9521_v51 = vld [vmem:[%s15281_s0 + $0x60] sm:$0xff]  ;;  %v9530_v56 = vld [vmem:[%s15281_s0 + $0x6c] sm:$0xff] }
  0x11   :  { %7909 = vmatpush3.bf16.msra.mxu1 %v8975_v15  ;;  %15696 = vst [vmem:[#allocation11_spill] sm:$0xff] %v9521_v51  ;;  %v9535_v57 = vld [vmem:[%s15281_s0 + $0x74] sm:$0xff]  ;;  %v9544_v62 = vld [vmem:[%s15281_s0 + $0x7c] sm:$0xff]  ;;  %v9549_v63 = vld [vmem:[%s15281_s0 + $0x84] sm:$0xff] }
  0x12   :  { %7910 = vmatprep.subr.bf16.mxu1 %v8978_v18  ;;  %15697 = vst [vmem:[#allocation12_spill] sm:$0xff] %v9544_v62  ;;  %15698 = vst [vmem:[#allocation13_spill] sm:$0xff] %v9549_v63  ;;  %v9558_v4 = vld [vmem:[%s15281_s0 + $0x90] sm:$0xff]  ;;  %v9563_v5 = vld [vmem:[%s15281_s0 + $0x98] sm:$0xff] }
  0x13   :  { %7799 = vmatpush3.bf16.msra.mxu0 %v8977_v17  ;;  %v9572_v10 = vld [vmem:[%s15281_s0 + $0xa0] sm:$0xff]  ;;  %v9577_v11 = vld [vmem:[%s15281_s0 + $0xa8] sm:$0xff]  ;;  %v9586_v16 = vld [vmem:[%s15281_s0 + $0xb4] sm:$0xff] }
  0x14   :  { %7800 = vmatprep.subr.bf16.mxu0 %v8980_v20  ;;  %15699 = vst [vmem:[#allocation14_spill] sm:$0xff] %v9572_v10  ;;  %15700 = vst [vmem:[#allocation15_spill] sm:$0xff] %v9577_v11  ;;  %v9591_v17 = vld [vmem:[%s15281_s0 + $0xbc] sm:$0xff]  ;;  %v9647_v20 = vld [vmem:[%s15281_s0 + $0x104] sm:$0xff] }
  0x15   :  { %7911 = vmatpush3.bf16.msra.mxu1 %v8979_v19  ;;  %v9661_v18 = vld [vmem:[%s15281_s0 + $0x114] sm:$0xff]  ;;  %v9675_v14 = vld [vmem:[%s15281_s0 + $0x128] sm:$0xff]  ;;  %v9717_v6 = vld [vmem:[%s15281_s0 + $0x15c] sm:$0xff] }
  0x16   :  { %7912 = vmatprep.subr.bf16.mxu1 %v8982_v22  ;;  %v9600_v22 = vld [vmem:[%s15281_s0 + $0xc4] sm:$0xff]  ;;  %15706 = vst [vmem:[#allocation21_spill] sm:$0xff] %v9661_v18  ;;  %v9689_v12 = vld [vmem:[%s15281_s0 + $0x138] sm:$0xff]  ;;  %v9703_v8 = vld [vmem:[%s15281_s0 + $0x14c] sm:$0xff] }
  0x17   :  { %7801 = vmatpush3.bf16.msra.mxu0 %v8981_v21  ;;  %15701 = vst [vmem:[#allocation16_spill] sm:$0xff] %v9600_v22  ;;  %15708 = vst [vmem:[#allocation23_spill] sm:$0xff] %v9689_v12  ;;  %v9698_v21 = vld [vmem:[%s15281_s0 + $0x144] sm:$0xff]  ;;  %v9712_v19 = vld [vmem:[%s15281_s0 + $0x154] sm:$0xff] }
  0x18   :  { %7802 = vmatprep.subr.bf16.mxu0 %v8984_v24  ;;  %v9633_v24 = vld [vmem:[%s15281_s0 + $0xf0] sm:$0xff]  ;;  %15709 = vst [vmem:[#allocation24_spill] sm:$0xff] %v9698_v21  ;;  %15710 = vst [vmem:[#allocation25_spill] sm:$0xff] %v9703_v8  ;;  %v9726_v15 = vld [vmem:[%s15281_s0 + $0x168] sm:$0xff] }
  0x19   :  { %7913 = vmatpush3.bf16.msra.mxu1 %v8983_v23  ;;  %v9605_v23 = vld [vmem:[%s15281_s0 + $0xcc] sm:$0xff]  ;;  %15704 = vst [vmem:[#allocation19_spill] sm:$0xff] %v9633_v24  ;;  %15711 = vst [vmem:[#allocation26_spill] sm:$0xff] %v9712_v19  ;;  %v9740_v13 = vld [vmem:[%s15281_s0 + $0x178] sm:$0xff] }
  0x1a   :  { %7914 = vmatprep.subr.bf16.mxu1 %v8986_v26  ;;  %15702 = vst [vmem:[#allocation17_spill] sm:$0xff] %v9605_v23  ;;  %v9642_v26 = vld [vmem:[%s15281_s0 + $0xfc] sm:$0xff]  ;;  %15712 = vst [vmem:[#allocation27_spill] sm:$0xff] %v9717_v6  ;;  %v9731_v2 = vld [vmem:[%s15281_s0 + $0x170] sm:$0xff] }
  0x1b   :  { %7803 = vmatpush3.bf16.msra.mxu0 %v8985_v25  ;;  %v9656_v25 = vld [vmem:[%s15281_s0 + $0x10c] sm:$0xff]  ;;  %15713 = vst [vmem:[#allocation28_spill] sm:$0xff] %v9726_v15  ;;  %15714 = vst [vmem:[#allocation29_spill] sm:$0xff] %v9731_v2  ;;  %v9745_v0 = vld [vmem:[%s15281_s0 + $0x180] sm:$0xff] }
  0x1c   :  { %7804 = vmatprep.subr.bf16.mxu0 %v8988_v28  ;;  %v9614_v28 = vld [vmem:[%s15281_s0 + $0xd8] sm:$0xff]  ;;  %15705 = vst [vmem:[#allocation20_spill] sm:$0xff] %v9656_v25  ;;  %15715 = vst [vmem:[#allocation30_spill] sm:$0xff] %v9740_v13  ;;  %v9754_v9 = vld [vmem:[%s15281_s0 + $0x18c] sm:$0xff]  ;;  %v15805_v13 = vunpack.c.l.bf16 %v9463_v33 }
  0x1d   :  { %7915 = vmatpush3.bf16.msra.mxu1 %v8987_v27  ;;  %v9628_v27 = vld [vmem:[%s15281_s0 + $0xe8] sm:$0xff]  ;;  %15716 = vst [vmem:[#allocation31_spill] sm:$0xff] %v9745_v0  ;;  %15717 = vst [vmem:[#allocation32_spill] sm:$0xff] %v9754_v9  ;;  %v9759_v48 = vld [vmem:[%s15281_s0 + $0x194] sm:$0xff]  ;;  %v15804_v9 = vunpack.c.h.bf16 %v9478_v36 }
  0x1e   :  { %7916 = vmatprep.subr.bf16.mxu1 %v8990_v30  ;;  %15703 = vst [vmem:[#allocation18_spill] sm:$0xff] %v9628_v27  ;;  %v9684_v30 = vld [vmem:[%s15281_s0 + $0x130] sm:$0xff]  ;;  %15718 = vst [vmem:[#allocation33_spill] sm:$0xff] %v9759_v48  ;;  %v9768_v7 = vld [vmem:[%s15281_s0 + $0x19c] sm:$0xff] }
  0x1f   :  { %7805 = vmatpush3.bf16.msra.mxu0 %v8989_v29  ;;  %v9619_v29 = vld [vmem:[%s15281_s0 + $0xe0] sm:$0xff]  ;;  %15707 = vst [vmem:[#allocation22_spill] sm:$0xff] %v9684_v30  ;;  %15719 = vst [vmem:[#allocation34_spill] sm:$0xff] %v9768_v7  ;;  %v9782_v3 = vld [vmem:[%s15281_s0 + $0x1b0] sm:$0xff] }
  0x20   :  { %v9773_v47 = vld [vmem:[%s15281_s0 + $0x1a4] sm:$0xff]  ;;  %15721 = vst [vmem:[#allocation36_spill] sm:$0xff] %v9782_v3  ;;  %v9787_v46 = vld [vmem:[%s15281_s0 + $0x1b8] sm:$0xff]  ;;  %v9829_v40 = vld [vmem:[%s15281_s0 + $0x1ec] sm:$0xff] }
  0x21   :  { %7917 = vmatpush3.bf16.msra.mxu1 %v8991_v31  ;;  %v9670_v31 = vld [vmem:[%s15281_s0 + $0x120] sm:$0xff]  ;;  %15720 = vst [vmem:[#allocation35_spill] sm:$0xff] %v9773_v47  ;;  %15722 = vst [vmem:[#allocation37_spill] sm:$0xff] %v9787_v46  ;;  %v9801_v45 = vld [vmem:[%s15281_s0 + $0x1c8] sm:$0xff] }
  0x22   :  { %v9796_v1 = vld [vmem:[%s15281_s0 + $0x1c0] sm:$0xff]  ;;  %15724 = vst [vmem:[#allocation39_spill] sm:$0xff] %v9801_v45  ;;  %v9810_v61 = vld [vmem:[%s15281_s0 + $0x1d4] sm:$0xff]  ;;  %15728 = vst [vmem:[#allocation43_spill] sm:$0xff] %v9829_v40 }
  0x23   :  { %15723 = vst [vmem:[#allocation38_spill] sm:$0xff] %v9796_v1  ;;  %15725 = vst [vmem:[#allocation40_spill] sm:$0xff] %v9810_v61  ;;  %v9815_v41 = vld [vmem:[%s15281_s0 + $0x1dc] sm:$0xff]  ;;  %v9824_v60 = vld [vmem:[%s15281_s0 + $0x1e4] sm:$0xff] }
  0x24   :  { %15726 = vst [vmem:[#allocation41_spill] sm:$0xff] %v9815_v41  ;;  %15727 = vst [vmem:[#allocation42_spill] sm:$0xff] %v9824_v60  ;;  %v9838_v59 = vld [vmem:[%s15281_s0 + $0x1f8] sm:$0xff]  ;;  %v9843_v39 = vld [vmem:[%s15281_s0 + $0x200] sm:$0xff] }
  0x25   :  { %15729 = vst [vmem:[#allocation44_spill] sm:$0xff] %v9838_v59  ;;  %15730 = vst [vmem:[#allocation45_spill] sm:$0xff] %v9843_v39  ;;  %v9852_v58 = vld [vmem:[%s15281_s0 + $0x208] sm:$0xff]  ;;  %v9857_v38 = vld [vmem:[%s15281_s0 + $0x210] sm:$0xff] }
  0x26   :  { %15731 = vst [vmem:[#allocation46_spill] sm:$0xff] %v9852_v58  ;;  %15732 = vst [vmem:[#allocation47_spill] sm:$0xff] %v9857_v38  ;;  %v9866_v55 = vld [vmem:[%s15281_s0 + $0x21c] sm:$0xff]  ;;  %v9871_v45 = vld [vmem:[%s15281_s0 + $0x224] sm:$0xff] }
  0x27   :  { %15733 = vst [vmem:[#allocation48_spill] sm:$0xff] %v9866_v55  ;;  %15734 = vst [vmem:[#allocation49_spill] sm:$0xff] %v9871_v45  ;;  %v9880_v54 = vld [vmem:[%s15281_s0 + $0x22c] sm:$0xff]  ;;  %v9885_v41 = vld [vmem:[%s15281_s0 + $0x234] sm:$0xff] }
  0x28   :  { %15735 = vst [vmem:[#allocation50_spill] sm:$0xff] %v9880_v54  ;;  %15736 = vst [vmem:[#allocation51_spill] sm:$0xff] %v9885_v41  ;;  %v9894_v53 = vld [vmem:[%s15281_s0 + $0x240] sm:$0xff]  ;;  %v9899_v40 = vld [vmem:[%s15281_s0 + $0x248] sm:$0xff] }
  0x29   :  { %15737 = vst [vmem:[#allocation52_spill] sm:$0xff] %v9894_v53  ;;  %15738 = vst [vmem:[#allocation53_spill] sm:$0xff] %v9899_v40  ;;  %v9908_v52 = vld [vmem:[%s15281_s0 + $0x250] sm:$0xff]  ;;  %v9913_v39 = vld [vmem:[%s15281_s0 + $0x258] sm:$0xff] }
  0x2a   :  { %15739 = vst [vmem:[#allocation54_spill] sm:$0xff] %v9908_v52  ;;  %15740 = vst [vmem:[#allocation55_spill] sm:$0xff] %v9913_v39  ;;  %v9922_v46 = vld [vmem:[%s15281_s0 + $0x264] sm:$0xff]  ;;  %v9927_v38 = vld [vmem:[%s15281_s0 + $0x26c] sm:$0xff] }
  0x2b   :  { %15741 = vst [vmem:[#allocation56_spill] sm:$0xff] %v9922_v46  ;;  %15742 = vst [vmem:[#allocation57_spill] sm:$0xff] %v9927_v38  ;;  %v9936_v1 = vld [vmem:[%s15281_s0 + $0x274] sm:$0xff]  ;;  %v9941_v45 = vld [vmem:[%s15281_s0 + $0x27c] sm:$0xff] }
  0x2c   :  { %15743 = vst [vmem:[#allocation58_spill] sm:$0xff] %v9936_v1  ;;  %15744 = vst [vmem:[#allocation59_spill] sm:$0xff] %v9941_v45  ;;  %v9950_v61 = vld [vmem:[%s15281_s0 + $0x288] sm:$0xff]  ;;  %v9955_v41 = vld [vmem:[%s15281_s0 + $0x290] sm:$0xff] }
  0x2d   :  { %15745 = vst [vmem:[#allocation60_spill] sm:$0xff] %v9950_v61  ;;  %15746 = vst [vmem:[#allocation61_spill] sm:$0xff] %v9955_v41  ;;  %v9964_v60 = vld [vmem:[%s15281_s0 + $0x298] sm:$0xff]  ;;  %v9969_v40 = vld [vmem:[%s15281_s0 + $0x2a0] sm:$0xff] }
  0x2e   :  { %15747 = vst [vmem:[#allocation62_spill] sm:$0xff] %v9964_v60  ;;  %15748 = vst [vmem:[#allocation63_spill] sm:$0xff] %v9969_v40  ;;  %v9978_v59 = vld [vmem:[%s15281_s0 + $0x2ac] sm:$0xff]  ;;  %v9983_v39 = vld [vmem:[%s15281_s0 + $0x2b4] sm:$0xff] }
  0x2f   :  { %15749 = vst [vmem:[#allocation64_spill] sm:$0xff] %v9978_v59  ;;  %15750 = vst [vmem:[#allocation65_spill] sm:$0xff] %v9983_v39  ;;  %v9992_v58 = vld [vmem:[%s15281_s0 + $0x2bc] sm:$0xff]  ;;  %v9997_v38 = vld [vmem:[%s15281_s0 + $0x2c4] sm:$0xff] }
  0x30   :  { %15751 = vst [vmem:[#allocation66_spill] sm:$0xff] %v9992_v58  ;;  %15752 = vst [vmem:[#allocation67_spill] sm:$0xff] %v9997_v38  ;;  %v10006_v55 = vld [vmem:[%s15281_s0 + $0x2d0] sm:$0xff]  ;;  %v10011_v45 = vld [vmem:[%s15281_s0 + $0x2d8] sm:$0xff] }
  0x31   :  { %15753 = vst [vmem:[#allocation68_spill] sm:$0xff] %v10006_v55  ;;  %15754 = vst [vmem:[#allocation69_spill] sm:$0xff] %v10011_v45  ;;  %v10016_v46 = vld [vmem:[%s15281_s0 + $0x2e0] sm:$0xff]  ;;  %v10025_v61 = vld [vmem:[%s15281_s0 + $0x2e8] sm:$0xff] }
  0x32   :  { %15755 = vst [vmem:[#allocation70_spill] sm:$0xff] %v10016_v46  ;;  %15756 = vst [vmem:[#allocation71_spill] sm:$0xff] %v10025_v61  ;;  %v10030_v1 = vld [vmem:[%s15281_s0 + $0x2f4] sm:$0xff]  ;;  %v10035_v52 = vld [vmem:[%s15281_s0 + $0x2fc] sm:$0xff] }
  0x33   :  { %15757 = vst [vmem:[#allocation72_spill] sm:$0xff] %v10030_v1  ;;  %15758 = vst [vmem:[#allocation73_spill] sm:$0xff] %v10035_v52  ;;  %v10044_v60 = vld [vmem:[%s15281_s0 + $0x304] sm:$0xff]  ;;  %v10049_v3 = vld [vmem:[%s15281_s0 + $0x30c] sm:$0xff] }
  0x34   :  { %15759 = vst [vmem:[#allocation74_spill] sm:$0xff] %v10044_v60  ;;  %15760 = vst [vmem:[#allocation75_spill] sm:$0xff] %v10049_v3  ;;  %v10054_v53 = vld [vmem:[%s15281_s0 + $0x318] sm:$0xff]  ;;  %v10063_v59 = vld [vmem:[%s15281_s0 + $0x320] sm:$0xff] }
  0x35   :  { %15761 = vst [vmem:[#allocation76_spill] sm:$0xff] %v10054_v53  ;;  %15762 = vst [vmem:[#allocation77_spill] sm:$0xff] %v10063_v59  ;;  %v10068_v47 = vld [vmem:[%s15281_s0 + $0x328] sm:$0xff]  ;;  %v10073_v54 = vld [vmem:[%s15281_s0 + $0x330] sm:$0xff] }
  0x36   :  { %15763 = vst [vmem:[#allocation78_spill] sm:$0xff] %v10068_v47  ;;  %15764 = vst [vmem:[#allocation79_spill] sm:$0xff] %v10073_v54  ;;  %v10082_v58 = vld [vmem:[%s15281_s0 + $0x33c] sm:$0xff]  ;;  %v10087_v7 = vld [vmem:[%s15281_s0 + $0x344] sm:$0xff] }
  0x37   :  { %15765 = vst [vmem:[#allocation80_spill] sm:$0xff] %v10082_v58  ;;  %15766 = vst [vmem:[#allocation81_spill] sm:$0xff] %v10087_v7  ;;  %v10096_v38 = vld [vmem:[%s15281_s0 + $0x34c] sm:$0xff]  ;;  %v10101_v45 = vld [vmem:[%s15281_s0 + $0x354] sm:$0xff] }
  0x38   :  { %15767 = vst [vmem:[#allocation82_spill] sm:$0xff] %v10096_v38  ;;  %15768 = vst [vmem:[#allocation83_spill] sm:$0xff] %v10101_v45  ;;  %v10110_v39 = vld [vmem:[%s15281_s0 + $0x360] sm:$0xff]  ;;  %v10115_v61 = vld [vmem:[%s15281_s0 + $0x368] sm:$0xff] }
  0x39   :  { %15769 = vst [vmem:[#allocation84_spill] sm:$0xff] %v10110_v39  ;;  %15770 = vst [vmem:[#allocation85_spill] sm:$0xff] %v10115_v61  ;;  %v10124_v40 = vld [vmem:[%s15281_s0 + $0x370] sm:$0xff]  ;;  %v10129_v52 = vld [vmem:[%s15281_s0 + $0x378] sm:$0xff] }
  0x3a   :  { %15771 = vst [vmem:[#allocation86_spill] sm:$0xff] %v10124_v40  ;;  %15772 = vst [vmem:[#allocation87_spill] sm:$0xff] %v10129_v52  ;;  %v10138_v41 = vld [vmem:[%s15281_s0 + $0x384] sm:$0xff]  ;;  %v10143_v3 = vld [vmem:[%s15281_s0 + $0x38c] sm:$0xff] }
  0x3b   :  { %15773 = vst [vmem:[#allocation88_spill] sm:$0xff] %v10138_v41  ;;  %15774 = vst [vmem:[#allocation89_spill] sm:$0xff] %v10143_v3  ;;  %v10152_v48 = vld [vmem:[%s15281_s0 + $0x394] sm:$0xff]  ;;  %v10157_v59 = vld [vmem:[%s15281_s0 + $0x39c] sm:$0xff] }
  0x3c   :  { %15775 = vst [vmem:[#allocation90_spill] sm:$0xff] %v10152_v48  ;;  %15776 = vst [vmem:[#allocation91_spill] sm:$0xff] %v10157_v59  ;;  %v10166_v55 = vld [vmem:[%s15281_s0 + $0x3a8] sm:$0xff]  ;;  %v10171_v54 = vld [vmem:[%s15281_s0 + $0x3b0] sm:$0xff] }
  0x3d   :  { %15777 = vst [vmem:[#allocation92_spill] sm:$0xff] %v10166_v55  ;;  %15778 = vst [vmem:[#allocation93_spill] sm:$0xff] %v10171_v54  ;;  %v10180_v46 = vld [vmem:[%s15281_s0 + $0x3b8] sm:$0xff]  ;;  %v10185_v7 = vld [vmem:[%s15281_s0 + $0x3c0] sm:$0xff]  ;;  %v15801_v55 = vunpack.c.l.bf16 %v9458_v32 }
  0x3e   :  { %15779 = vst [vmem:[#allocation94_spill] sm:$0xff] %v10180_v46  ;;  %15780 = vst [vmem:[#allocation95_spill] sm:$0xff] %v10185_v7  ;;  %v10194_v1 = vld [vmem:[%s15281_s0 + $0x3cc] sm:$0xff]  ;;  %v10199_v45 = vld [vmem:[%s15281_s0 + $0x3d4] sm:$0xff] }
  0x3f   :  { %15781 = vst [vmem:[#allocation96_spill] sm:$0xff] %v10194_v1  ;;  %15782 = vst [vmem:[#allocation97_spill] sm:$0xff] %v10199_v45  ;;  %v10208_v60 = vld [vmem:[%s15281_s0 + $0x3dc] sm:$0xff]  ;;  %v10213_v61 = vld [vmem:[%s15281_s0 + $0x3e4] sm:$0xff]  ;;  %v15808_v1 = vunpack.c.h.bf16 %v9483_v37 }
  0x40   :  { %15783 = vst [vmem:[#allocation98_spill] sm:$0xff] %v10208_v60  ;;  %15784 = vst [vmem:[#allocation99_spill] sm:$0xff] %v10213_v61  ;;  %v10222_v53 = vld [vmem:[%s15281_s0 + $0x3f0] sm:$0xff]  ;;  %v10227_v52 = vld [vmem:[%s15281_s0 + $0x3f8] sm:$0xff]  ;;  %v15807_v60 = vunpack.c.h.bf16 %v9463_v33 }
  0x41   :  { %15785 = vst [vmem:[#allocation100_spill] sm:$0xff] %v10222_v53  ;;  %15786 = vst [vmem:[#allocation101_spill] sm:$0xff] %v10227_v52  ;;  %v10236_v47 = vld [vmem:[%s15281_s0 + $0x400] sm:$0xff]  ;;  %v10241_v3 = vld [vmem:[%s15281_s0 + $0x408] sm:$0xff]  ;;  %v15806_v53 = vunpack.c.l.bf16 %v9483_v37  ;;  %v15816_v37 = vunpack.c.h.bf16 %v9497_v43 }
  0x42   :  { %15787 = vst [vmem:[#allocation102_spill] sm:$0xff] %v10236_v47  ;;  %15788 = vst [vmem:[#allocation103_spill] sm:$0xff] %v10241_v3  ;;  %v10250_v58 = vld [vmem:[%s15281_s0 + $0x414] sm:$0xff]  ;;  %v10255_v59 = vld [vmem:[%s15281_s0 + $0x41c] sm:$0xff]  ;;  %v15802_v3 = vunpack.c.l.bf16 %v9478_v36  ;;  %v15803_v47 = vunpack.c.h.bf16 %v9458_v32  ;;  %v1291_v46 = vadd.f32 %v15808_v1, %v15807_v60  ;;  %v15812_v36 = vunpack.c.h.bf16 %v9492_v42 }
  0x43   :  { %15789 = vst [vmem:[#allocation104_spill] sm:$0xff] %v10250_v58  ;;  %15790 = vst [vmem:[#allocation105_spill] sm:$0xff] %v10255_v59  ;;  %v10264_v38 = vld [vmem:[%s15281_s0 + $0x424] sm:$0xff]  ;;  %v10269_v54 = vld [vmem:[%s15281_s0 + $0x42c] sm:$0xff]  ;;  %v15814_v32 = vunpack.c.l.bf16 %v9497_v43  ;;  %v15817_v1 = vunpack.c.l.bf16 %v9502_v44 }
  0x44   :  { %15791 = vst [vmem:[#allocation106_spill] sm:$0xff] %v10264_v38  ;;  %15792 = vst [vmem:[#allocation107_spill] sm:$0xff] %v10269_v54  ;;  %v10278_v39 = vld [vmem:[%s15281_s0 + $0x438] sm:$0xff]  ;;  %v10283_v7 = vld [vmem:[%s15281_s0 + $0x440] sm:$0xff]  ;;  %v1217_v0 = vadd.f32 %v15804_v9, %v15803_v47  ;;  %v15813_v9 = vunpack.c.l.bf16 %v9473_v35 }
  0x45   :  { %15793 = vst [vmem:[#allocation108_spill] sm:$0xff] %v10278_v39  ;;  %15794 = vst [vmem:[#allocation109_spill] sm:$0xff] %v10283_v7  ;;  %v10292_v40 = vld [vmem:[%s15281_s0 + $0x448] sm:$0xff]  ;;  %v10297_v45 = vld [vmem:[%s15281_s0 + $0x450] sm:$0xff] }
  0x46   :  { %15795 = vst [vmem:[#allocation110_spill] sm:$0xff] %v10292_v40  ;;  %15796 = vst [vmem:[#allocation111_spill] sm:$0xff] %v10297_v45  ;;  %v10306_v41 = vld [vmem:[%s15281_s0 + $0x45c] sm:$0xff]  ;;  %v10311_v61 = vld [vmem:[%s15281_s0 + $0x464] sm:$0xff]  ;;  %v1180_v45 = vadd.f32 %v15802_v3, %v15801_v55  ;;  %v15811_v3 = vunpack.c.h.bf16 %v9468_v34 }
  0x47   :  { %15797 = vst [vmem:[#allocation112_spill] sm:$0xff] %v10306_v41  ;;  %15798 = vst [vmem:[#allocation113_spill] sm:$0xff] %v10311_v61  ;;  %v10320_v48 = vld [vmem:[%s15281_s0 + $0x46c] sm:$0xff]  ;;  %v10325_v52 = vld [vmem:[%s15281_s0 + $0x474] sm:$0xff]  ;;  %v1254_v61 = vadd.f32 %v15806_v53, %v15805_v13  ;;  %v1402_v53 = vadd.f32 %v15814_v32, %v15813_v9  ;;  %v15815_v13 = vunpack.c.h.bf16 %v9473_v35  ;;  %v15821_v41 = vunpack.c.l.bf16 %v9516_v50 }
  0x48   :  { %15799 = vst [vmem:[#allocation114_spill] sm:$0xff] %v10320_v48  ;;  %15800 = vst [vmem:[#allocation115_spill] sm:$0xff] %v10325_v52  ;;  %v15809_v52 = vunpack.c.l.bf16 %v9468_v34  ;;  %v15810_v48 = vunpack.c.l.bf16 %v9492_v42  ;;  %v1365_v47 = vadd.f32 %v15812_v36, %v15811_v3  ;;  %v1181_v33 = vadd.f32 %v1180_v45, %v15817_v1 }
  0x49   :  { %v1439_v60 = vadd.f32 %v15816_v37, %v15815_v13  ;;  %v15819_v34 = vunpack.c.l.bf16 %v9511_v49  ;;  %v15820_v36 = vunpack.c.h.bf16 %v9511_v49  ;;  %v15822_v9 = vunpack.c.h.bf16 %v9516_v50 }
  0x4a   :  { %v1328_v55 = vadd.f32 %v15810_v48, %v15809_v52  ;;  %v15818_v48 = vunpack.c.h.bf16 %v9502_v44  ;;  %v15823_v37 = vunpack.c.l.bf16 %v9521_v51  ;;  %v15824_v45 = vunpack.c.h.bf16 %v9521_v51 }
  0x4b   :  { %v1255_v42 = vadd.f32 %v1254_v61, %v15819_v34  ;;  %v1292_v3 = vadd.f32 %v1291_v46, %v15820_v36  ;;  %v1366_v35 = vadd.f32 %v1365_v47, %v15822_v9  ;;  %v15826_v34 = vunpack.c.h.bf16 %v9530_v56 }
  0x4c   :  { %v1218_v52 = vadd.f32 %v1217_v0, %v15818_v48  ;;  %v1329_v32 = vadd.f32 %v1328_v55, %v15821_v41  ;;  %v1403_v13 = vadd.f32 %v1402_v53, %v15823_v37  ;;  %v1440_v1 = vadd.f32 %v1439_v60, %v15824_v45 }
  0x4d   :  { %v15825_v0 = vunpack.c.l.bf16 %v9530_v56  ;;  %v15827_v46 = vunpack.c.l.bf16 %v9535_v57  ;;  %v15828_v41 = vunpack.c.h.bf16 %v9535_v57  ;;  %v15829_v47 = vunpack.c.l.bf16 %v9544_v62 }
  0x4e   :  { %v1219_v61 = vadd.f32 %v1218_v52, %v15826_v34  ;;  %v15830_v53 = vunpack.c.h.bf16 %v9544_v62  ;;  %v15831_v60 = vunpack.c.l.bf16 %v9549_v63  ;;  %v15833_v52 = vunpack.c.l.bf16 %v9558_v4 }
  0x4f   :  { %v1182_v48 = vadd.f32 %v1181_v33, %v15825_v0  ;;  %v1256_v36 = vadd.f32 %v1255_v42, %v15827_v46  ;;  %v1293_v55 = vadd.f32 %v1292_v3, %v15828_v41  ;;  %v1330_v9 = vadd.f32 %v1329_v32, %v15829_v47 }
  0x50   :  { %v1367_v37 = vadd.f32 %v1366_v35, %v15830_v53  ;;  %v1404_v45 = vadd.f32 %v1403_v13, %v15831_v60  ;;  %v15832_v33 = vunpack.c.h.bf16 %v9549_v63  ;;  %v15834_v42 = vunpack.c.h.bf16 %v9558_v4 }
  0x51   :  { %v1183_v34 = vadd.f32 %v1182_v48, %v15833_v52  ;;  %v15835_v3 = vunpack.c.l.bf16 %v9563_v5  ;;  %v15836_v32 = vunpack.c.h.bf16 %v9563_v5  ;;  %v15837_v35 = vunpack.c.l.bf16 %v9572_v10 }
  0x52   :  { %v1441_v0 = vadd.f32 %v1440_v1, %v15832_v33  ;;  %v1220_v46 = vadd.f32 %v1219_v61, %v15834_v42  ;;  %v15838_v13 = vunpack.c.h.bf16 %v9572_v10  ;;  %v15839_v1 = vunpack.c.l.bf16 %v9577_v11 }
  0x53   :  { %v1257_v41 = vadd.f32 %v1256_v36, %v15835_v3  ;;  %v1294_v47 = vadd.f32 %v1293_v55, %v15836_v32  ;;  %v1331_v53 = vadd.f32 %v1330_v9, %v15837_v35  ;;  %v15840_v48 = vunpack.c.h.bf16 %v9577_v11 }
  0x54   :  { %v1368_v60 = vadd.f32 %v1367_v37, %v15838_v13  ;;  %v1405_v33 = vadd.f32 %v1404_v45, %v15839_v1  ;;  %v15841_v61 = vunpack.c.l.bf16 %v9586_v16  ;;  %v15842_v36 = vunpack.c.h.bf16 %v9586_v16 }
  0x55   :  { %v1442_v52 = vadd.f32 %v1441_v0, %v15840_v48  ;;  %v15843_v55 = vunpack.c.l.bf16 %v9591_v17  ;;  %v15844_v9 = vunpack.c.h.bf16 %v9591_v17  ;;  %v15845_v37 = vunpack.c.l.bf16 %v9600_v22 }
  0x56   :  { %v1184_v42 = vadd.f32 %v1183_v34, %v15841_v61  ;;  %v1221_v3 = vadd.f32 %v1220_v46, %v15842_v36  ;;  %v15846_v45 = vunpack.c.h.bf16 %v9600_v22  ;;  %v15847_v0 = vunpack.c.l.bf16 %v9605_v23 }
  0x57   :  { %v1258_v32 = vadd.f32 %v1257_v41, %v15843_v55  ;;  %v1295_v35 = vadd.f32 %v1294_v47, %v15844_v9  ;;  %v1332_v13 = vadd.f32 %v1331_v53, %v15845_v37  ;;  %v15848_v34 = vunpack.c.h.bf16 %v9605_v23 }
  0x58   :  { %v1369_v1 = vadd.f32 %v1368_v60, %v15846_v45  ;;  %v1406_v48 = vadd.f32 %v1405_v33, %v15847_v0  ;;  %v15849_v46 = vunpack.c.l.bf16 %v9614_v28  ;;  %v15850_v41 = vunpack.c.h.bf16 %v9614_v28 }
  0x59   :  { %v1443_v61 = vadd.f32 %v1442_v52, %v15848_v34  ;;  %v15851_v47 = vunpack.c.l.bf16 %v9619_v29  ;;  %v15852_v53 = vunpack.c.h.bf16 %v9619_v29  ;;  %v15853_v60 = vunpack.c.l.bf16 %v9628_v27 }
  0x5a   :  { %v1185_v36 = vadd.f32 %v1184_v42, %v15849_v46  ;;  %v1222_v55 = vadd.f32 %v1221_v3, %v15850_v41  ;;  %v15854_v33 = vunpack.c.h.bf16 %v9628_v27  ;;  %v15855_v52 = vunpack.c.l.bf16 %v9633_v24 }
  0x5b   :  { %v1259_v9 = vadd.f32 %v1258_v32, %v15851_v47  ;;  %v1296_v37 = vadd.f32 %v1295_v35, %v15852_v53  ;;  %v1333_v45 = vadd.f32 %v1332_v13, %v15853_v60  ;;  %v15856_v42 = vunpack.c.h.bf16 %v9633_v24 }
  0x5c   :  { %v1370_v0 = vadd.f32 %v1369_v1, %v15854_v33  ;;  %v1407_v34 = vadd.f32 %v1406_v48, %v15855_v52  ;;  %v15857_v3 = vunpack.c.l.bf16 %v9642_v26  ;;  %v15858_v32 = vunpack.c.h.bf16 %v9642_v26 }
  0x5d   :  { %v1444_v46 = vadd.f32 %v1443_v61, %v15856_v42  ;;  %v15859_v35 = vunpack.c.l.bf16 %v9647_v20  ;;  %v15860_v13 = vunpack.c.h.bf16 %v9647_v20  ;;  %v15861_v1 = vunpack.c.l.bf16 %v9656_v25 }
  0x5e   :  { %v1186_v41 = vadd.f32 %v1185_v36, %v15857_v3  ;;  %v1223_v47 = vadd.f32 %v1222_v55, %v15858_v32  ;;  %v15862_v48 = vunpack.c.h.bf16 %v9656_v25  ;;  %v15863_v61 = vunpack.c.l.bf16 %v9661_v18 }
  0x5f   :  { %v1260_v53 = vadd.f32 %v1259_v9, %v15859_v35  ;;  %v1297_v60 = vadd.f32 %v1296_v37, %v15860_v13  ;;  %v1334_v33 = vadd.f32 %v1333_v45, %v15861_v1  ;;  %v15864_v36 = vunpack.c.h.bf16 %v9661_v18 }
  0x60   :  { %v1371_v52 = vadd.f32 %v1370_v0, %v15862_v48  ;;  %v1408_v42 = vadd.f32 %v1407_v34, %v15863_v61  ;;  %v15865_v55 = vunpack.c.l.bf16 %v9670_v31  ;;  %v15866_v9 = vunpack.c.h.bf16 %v9670_v31 }
  0x61   :  { %v1445_v3 = vadd.f32 %v1444_v46, %v15864_v36  ;;  %v15867_v37 = vunpack.c.l.bf16 %v9675_v14  ;;  %v15868_v45 = vunpack.c.h.bf16 %v9675_v14  ;;  %v15869_v0 = vunpack.c.l.bf16 %v9684_v30 }
  0x62   :  { %v1187_v32 = vadd.f32 %v1186_v41, %v15865_v55  ;;  %v1224_v35 = vadd.f32 %v1223_v47, %v15866_v9  ;;  %v15870_v34 = vunpack.c.h.bf16 %v9684_v30  ;;  %v15871_v46 = vunpack.c.l.bf16 %v9689_v12 }
  0x63   :  { %v1261_v13 = vadd.f32 %v1260_v53, %v15867_v37  ;;  %v1298_v1 = vadd.f32 %v1297_v60, %v15868_v45  ;;  %v1335_v48 = vadd.f32 %v1334_v33, %v15869_v0  ;;  %v15872_v41 = vunpack.c.h.bf16 %v9689_v12 }
  0x64   :  { %v1372_v61 = vadd.f32 %v1371_v52, %v15870_v34  ;;  %v1409_v36 = vadd.f32 %v1408_v42, %v15871_v46  ;;  %v15873_v47 = vunpack.c.l.bf16 %v9698_v21  ;;  %v15874_v53 = vunpack.c.h.bf16 %v9698_v21 }
  0x65   :  { %v1446_v55 = vadd.f32 %v1445_v3, %v15872_v41  ;;  %v15875_v60 = vunpack.c.l.bf16 %v9703_v8  ;;  %v15876_v33 = vunpack.c.h.bf16 %v9703_v8  ;;  %v15877_v52 = vunpack.c.l.bf16 %v9712_v19 }
  0x66   :  { %v1188_v9 = vadd.f32 %v1187_v32, %v15873_v47  ;;  %v1225_v37 = vadd.f32 %v1224_v35, %v15874_v53  ;;  %v15878_v42 = vunpack.c.h.bf16 %v9712_v19  ;;  %v15879_v3 = vunpack.c.l.bf16 %v9717_v6  ;;  %v15885_v19 = vld [vmem:[#allocation30_spill] sm:$0xff] }
  0x67   :  { %v1262_v45 = vadd.f32 %v1261_v13, %v15875_v60  ;;  %v1299_v0 = vadd.f32 %v1298_v1, %v15876_v33  ;;  %v1336_v34 = vadd.f32 %v1335_v48, %v15877_v52  ;;  %v15880_v32 = vunpack.c.h.bf16 %v9717_v6  ;;  %v15888_v6 = vld [vmem:[#allocation31_spill] sm:$0xff] }
  0x68   :  { %v1373_v46 = vadd.f32 %v1372_v61, %v15878_v42  ;;  %v1410_v41 = vadd.f32 %v1409_v36, %v15879_v3  ;;  %v15881_v35 = vunpack.c.l.bf16 %v9726_v15  ;;  %v15882_v13 = vunpack.c.h.bf16 %v9726_v15  ;;  %v15891_v15 = vld [vmem:[#allocation32_spill] sm:$0xff] }
  0x69   :  { %v1447_v47 = vadd.f32 %v1446_v55, %v15880_v32  ;;  %v15883_v1 = vunpack.c.l.bf16 %v9731_v2  ;;  %v15884_v48 = vunpack.c.h.bf16 %v9731_v2  ;;  %v15886_v61 = vunpack.c.l.bf16 %v15885_v19  ;;  %v15894_v2 = vld [vmem:[#allocation33_spill] sm:$0xff] }
  0x6a   :  { %v1189_v53 = vadd.f32 %v1188_v9, %v15881_v35  ;;  %v1226_v60 = vadd.f32 %v1225_v37, %v15882_v13  ;;  %v15887_v36 = vunpack.c.h.bf16 %v15885_v19  ;;  %v15889_v55 = vunpack.c.l.bf16 %v15888_v6  ;;  %v15897_v19 = vld [vmem:[#allocation34_spill] sm:$0xff] }
  0x6b   :  { %v1263_v33 = vadd.f32 %v1262_v45, %v15883_v1  ;;  %v1300_v52 = vadd.f32 %v1299_v0, %v15884_v48  ;;  %v1337_v42 = vadd.f32 %v1336_v34, %v15886_v61  ;;  %v15890_v9 = vunpack.c.h.bf16 %v15888_v6  ;;  %v15900_v6 = vld [vmem:[#allocation35_spill] sm:$0xff] }
  0x6c   :  { %v1374_v3 = vadd.f32 %v1373_v46, %v15887_v36  ;;  %v1411_v32 = vadd.f32 %v1410_v41, %v15889_v55  ;;  %v15892_v37 = vunpack.c.l.bf16 %v15891_v15  ;;  %v15893_v45 = vunpack.c.h.bf16 %v15891_v15  ;;  %v15903_v15 = vld [vmem:[#allocation36_spill] sm:$0xff] }
  0x6d   :  { %v1448_v35 = vadd.f32 %v1447_v47, %v15890_v9  ;;  %v15895_v0 = vunpack.c.l.bf16 %v15894_v2  ;;  %v15896_v34 = vunpack.c.h.bf16 %v15894_v2  ;;  %v15898_v46 = vunpack.c.l.bf16 %v15897_v19  ;;  %v15906_v2 = vld [vmem:[#allocation37_spill] sm:$0xff] }
  0x6e   :  { %v1190_v13 = vadd.f32 %v1189_v53, %v15892_v37  ;;  %v1227_v1 = vadd.f32 %v1226_v60, %v15893_v45  ;;  %v15899_v41 = vunpack.c.h.bf16 %v15897_v19  ;;  %v15901_v47 = vunpack.c.l.bf16 %v15900_v6  ;;  %v15909_v19 = vld [vmem:[#allocation38_spill] sm:$0xff] }
  0x6f   :  { %v1264_v48 = vadd.f32 %v1263_v33, %v15895_v0  ;;  %v1301_v61 = vadd.f32 %v1300_v52, %v15896_v34  ;;  %v1338_v36 = vadd.f32 %v1337_v42, %v15898_v46  ;;  %v15902_v53 = vunpack.c.h.bf16 %v15900_v6  ;;  %v15912_v6 = vld [vmem:[#allocation39_spill] sm:$0xff] }
  0x70   :  { %v1375_v55 = vadd.f32 %v1374_v3, %v15899_v41  ;;  %v1412_v9 = vadd.f32 %v1411_v32, %v15901_v47  ;;  %v15904_v60 = vunpack.c.l.bf16 %v15903_v15  ;;  %v15905_v33 = vunpack.c.h.bf16 %v15903_v15  ;;  %v15915_v15 = vld [vmem:[#allocation40_spill] sm:$0xff] }
  0x71   :  { %v1449_v37 = vadd.f32 %v1448_v35, %v15902_v53  ;;  %v15907_v52 = vunpack.c.l.bf16 %v15906_v2  ;;  %v15908_v42 = vunpack.c.h.bf16 %v15906_v2  ;;  %v15910_v3 = vunpack.c.l.bf16 %v15909_v19  ;;  %v15918_v2 = vld [vmem:[#allocation41_spill] sm:$0xff] }
  0x72   :  { %v1191_v45 = vadd.f32 %v1190_v13, %v15904_v60  ;;  %v1228_v0 = vadd.f32 %v1227_v1, %v15905_v33  ;;  %v15911_v32 = vunpack.c.h.bf16 %v15909_v19  ;;  %v15913_v35 = vunpack.c.l.bf16 %v15912_v6  ;;  %v15921_v19 = vld [vmem:[#allocation42_spill] sm:$0xff] }
  0x73   :  { %v1265_v34 = vadd.f32 %v1264_v48, %v15907_v52  ;;  %v1302_v46 = vadd.f32 %v1301_v61, %v15908_v42  ;;  %v1339_v41 = vadd.f32 %v1338_v36, %v15910_v3  ;;  %v15914_v13 = vunpack.c.h.bf16 %v15912_v6  ;;  %v15924_v6 = vld [vmem:[#allocation43_spill] sm:$0xff] }
  0x74   :  { %v1376_v47 = vadd.f32 %v1375_v55, %v15911_v32  ;;  %v1413_v53 = vadd.f32 %v1412_v9, %v15913_v35  ;;  %v15916_v1 = vunpack.c.l.bf16 %v15915_v15  ;;  %v15917_v48 = vunpack.c.h.bf16 %v15915_v15  ;;  %v15927_v15 = vld [vmem:[#allocation44_spill] sm:$0xff] }
  0x75   :  { %v1450_v60 = vadd.f32 %v1449_v37, %v15914_v13  ;;  %v15919_v61 = vunpack.c.l.bf16 %v15918_v2  ;;  %v15920_v36 = vunpack.c.h.bf16 %v15918_v2  ;;  %v15922_v55 = vunpack.c.l.bf16 %v15921_v19  ;;  %v15930_v2 = vld [vmem:[#allocation45_spill] sm:$0xff] }
  0x76   :  { %v1192_v33 = vadd.f32 %v1191_v45, %v15916_v1  ;;  %v1229_v52 = vadd.f32 %v1228_v0, %v15917_v48  ;;  %v15923_v9 = vunpack.c.h.bf16 %v15921_v19  ;;  %v15925_v37 = vunpack.c.l.bf16 %v15924_v6  ;;  %v15933_v19 = vld [vmem:[#allocation46_spill] sm:$0xff] }
  0x77   :  { %v1266_v42 = vadd.f32 %v1265_v34, %v15919_v61  ;;  %v1303_v3 = vadd.f32 %v1302_v46, %v15920_v36  ;;  %v1340_v32 = vadd.f32 %v1339_v41, %v15922_v55  ;;  %v15926_v45 = vunpack.c.h.bf16 %v15924_v6  ;;  %v15936_v6 = vld [vmem:[#allocation47_spill] sm:$0xff] }
  0x78   :  { %v1377_v35 = vadd.f32 %v1376_v47, %v15923_v9  ;;  %v1414_v13 = vadd.f32 %v1413_v53, %v15925_v37  ;;  %v15928_v0 = vunpack.c.l.bf16 %v15927_v15  ;;  %v15929_v34 = vunpack.c.h.bf16 %v15927_v15  ;;  %v15939_v15 = vld [vmem:[#allocation48_spill] sm:$0xff] }
  0x79   :  { %v1451_v1 = vadd.f32 %v1450_v60, %v15926_v45  ;;  %v15931_v46 = vunpack.c.l.bf16 %v15930_v2  ;;  %v15932_v41 = vunpack.c.h.bf16 %v15930_v2  ;;  %v15934_v47 = vunpack.c.l.bf16 %v15933_v19  ;;  %v15942_v2 = vld [vmem:[#allocation49_spill] sm:$0xff] }
  0x7a   :  { %v1193_v48 = vadd.f32 %v1192_v33, %v15928_v0  ;;  %v1230_v61 = vadd.f32 %v1229_v52, %v15929_v34  ;;  %v15935_v53 = vunpack.c.h.bf16 %v15933_v19  ;;  %v15937_v60 = vunpack.c.l.bf16 %v15936_v6  ;;  %v15945_v19 = vld [vmem:[#allocation50_spill] sm:$0xff] }
  0x7b   :  { %v1267_v36 = vadd.f32 %v1266_v42, %v15931_v46  ;;  %v1304_v55 = vadd.f32 %v1303_v3, %v15932_v41  ;;  %v1341_v9 = vadd.f32 %v1340_v32, %v15934_v47  ;;  %v15938_v33 = vunpack.c.h.bf16 %v15936_v6  ;;  %v15948_v6 = vld [vmem:[#allocation51_spill] sm:$0xff] }
  0x7c   :  { %v1378_v37 = vadd.f32 %v1377_v35, %v15935_v53  ;;  %v1415_v45 = vadd.f32 %v1414_v13, %v15937_v60  ;;  %v15940_v52 = vunpack.c.l.bf16 %v15939_v15  ;;  %v15941_v42 = vunpack.c.h.bf16 %v15939_v15  ;;  %v15951_v15 = vld [vmem:[#allocation52_spill] sm:$0xff] }
  0x7d   :  { %v1452_v0 = vadd.f32 %v1451_v1, %v15938_v33  ;;  %v15943_v3 = vunpack.c.l.bf16 %v15942_v2  ;;  %v15944_v32 = vunpack.c.h.bf16 %v15942_v2  ;;  %v15946_v35 = vunpack.c.l.bf16 %v15945_v19  ;;  %v15954_v2 = vld [vmem:[#allocation53_spill] sm:$0xff] }
  0x7e   :  { %v1194_v34 = vadd.f32 %v1193_v48, %v15940_v52  ;;  %v1231_v46 = vadd.f32 %v1230_v61, %v15941_v42  ;;  %v15947_v13 = vunpack.c.h.bf16 %v15945_v19  ;;  %v15949_v1 = vunpack.c.l.bf16 %v15948_v6  ;;  %v15957_v19 = vld [vmem:[#allocation54_spill] sm:$0xff] }
  0x7f   :  { %v1268_v41 = vadd.f32 %v1267_v36, %v15943_v3  ;;  %v1305_v47 = vadd.f32 %v1304_v55, %v15944_v32  ;;  %v1342_v53 = vadd.f32 %v1341_v9, %v15946_v35  ;;  %v15950_v48 = vunpack.c.h.bf16 %v15948_v6  ;;  %v15960_v6 = vld [vmem:[#allocation55_spill] sm:$0xff] }
  0x80   :  { %v1379_v60 = vadd.f32 %v1378_v37, %v15947_v13  ;;  %v1416_v33 = vadd.f32 %v1415_v45, %v15949_v1  ;;  %v15952_v61 = vunpack.c.l.bf16 %v15951_v15  ;;  %v15953_v36 = vunpack.c.h.bf16 %v15951_v15  ;;  %v15963_v15 = vld [vmem:[#allocation56_spill] sm:$0xff] }
  0x81   :  { %v1453_v52 = vadd.f32 %v1452_v0, %v15950_v48  ;;  %v15955_v55 = vunpack.c.l.bf16 %v15954_v2  ;;  %v15956_v9 = vunpack.c.h.bf16 %v15954_v2  ;;  %v15958_v37 = vunpack.c.l.bf16 %v15957_v19  ;;  %v15966_v2 = vld [vmem:[#allocation57_spill] sm:$0xff] }
  0x82   :  { %v1195_v42 = vadd.f32 %v1194_v34, %v15952_v61  ;;  %v1232_v3 = vadd.f32 %v1231_v46, %v15953_v36  ;;  %v15959_v45 = vunpack.c.h.bf16 %v15957_v19  ;;  %v15961_v0 = vunpack.c.l.bf16 %v15960_v6  ;;  %v15969_v19 = vld [vmem:[#allocation58_spill] sm:$0xff] }
  0x83   :  { %v1269_v32 = vadd.f32 %v1268_v41, %v15955_v55  ;;  %v1306_v35 = vadd.f32 %v1305_v47, %v15956_v9  ;;  %v1343_v13 = vadd.f32 %v1342_v53, %v15958_v37  ;;  %v15962_v34 = vunpack.c.h.bf16 %v15960_v6  ;;  %v15972_v6 = vld [vmem:[#allocation59_spill] sm:$0xff] }
  0x84   :  { %v1380_v1 = vadd.f32 %v1379_v60, %v15959_v45  ;;  %v1417_v48 = vadd.f32 %v1416_v33, %v15961_v0  ;;  %v15964_v46 = vunpack.c.l.bf16 %v15963_v15  ;;  %v15965_v41 = vunpack.c.h.bf16 %v15963_v15  ;;  %v15975_v15 = vld [vmem:[#allocation60_spill] sm:$0xff] }
  0x85   :  { %v1454_v61 = vadd.f32 %v1453_v52, %v15962_v34  ;;  %v15967_v47 = vunpack.c.l.bf16 %v15966_v2  ;;  %v15968_v53 = vunpack.c.h.bf16 %v15966_v2  ;;  %v15970_v60 = vunpack.c.l.bf16 %v15969_v19  ;;  %v15978_v2 = vld [vmem:[#allocation61_spill] sm:$0xff] }
  0x86   :  { %v1196_v36 = vadd.f32 %v1195_v42, %v15964_v46  ;;  %v1233_v55 = vadd.f32 %v1232_v3, %v15965_v41  ;;  %v15971_v33 = vunpack.c.h.bf16 %v15969_v19  ;;  %v15973_v52 = vunpack.c.l.bf16 %v15972_v6  ;;  %v15981_v19 = vld [vmem:[#allocation62_spill] sm:$0xff] }
  0x87   :  { %v1270_v9 = vadd.f32 %v1269_v32, %v15967_v47  ;;  %v1307_v37 = vadd.f32 %v1306_v35, %v15968_v53  ;;  %v1344_v45 = vadd.f32 %v1343_v13, %v15970_v60  ;;  %v15974_v42 = vunpack.c.h.bf16 %v15972_v6  ;;  %v15984_v6 = vld [vmem:[#allocation63_spill] sm:$0xff] }
  0x88   :  { %v1381_v0 = vadd.f32 %v1380_v1, %v15971_v33  ;;  %v1418_v34 = vadd.f32 %v1417_v48, %v15973_v52  ;;  %v15976_v3 = vunpack.c.l.bf16 %v15975_v15  ;;  %v15977_v32 = vunpack.c.h.bf16 %v15975_v15  ;;  %v15987_v15 = vld [vmem:[#allocation64_spill] sm:$0xff] }
  0x89   :  { %v1455_v46 = vadd.f32 %v1454_v61, %v15974_v42  ;;  %v15979_v35 = vunpack.c.l.bf16 %v15978_v2  ;;  %v15980_v13 = vunpack.c.h.bf16 %v15978_v2  ;;  %v15982_v1 = vunpack.c.l.bf16 %v15981_v19  ;;  %v15990_v2 = vld [vmem:[#allocation65_spill] sm:$0xff] }
  0x8a   :  { %v1197_v41 = vadd.f32 %v1196_v36, %v15976_v3  ;;  %v1234_v47 = vadd.f32 %v1233_v55, %v15977_v32  ;;  %v15983_v48 = vunpack.c.h.bf16 %v15981_v19  ;;  %v15985_v61 = vunpack.c.l.bf16 %v15984_v6  ;;  %v15993_v19 = vld [vmem:[#allocation66_spill] sm:$0xff] }
  0x8b   :  { %v1271_v53 = vadd.f32 %v1270_v9, %v15979_v35  ;;  %v1308_v60 = vadd.f32 %v1307_v37, %v15980_v13  ;;  %v1345_v33 = vadd.f32 %v1344_v45, %v15982_v1  ;;  %v15986_v36 = vunpack.c.h.bf16 %v15984_v6  ;;  %v15996_v6 = vld [vmem:[#allocation67_spill] sm:$0xff] }
  0x8c   :  { %v1382_v52 = vadd.f32 %v1381_v0, %v15983_v48  ;;  %v1419_v42 = vadd.f32 %v1418_v34, %v15985_v61  ;;  %v15988_v55 = vunpack.c.l.bf16 %v15987_v15  ;;  %v15989_v9 = vunpack.c.h.bf16 %v15987_v15  ;;  %v15999_v15 = vld [vmem:[#allocation68_spill] sm:$0xff] }
  0x8d   :  { %v1456_v3 = vadd.f32 %v1455_v46, %v15986_v36  ;;  %v15991_v37 = vunpack.c.l.bf16 %v15990_v2  ;;  %v15992_v45 = vunpack.c.h.bf16 %v15990_v2  ;;  %v15994_v0 = vunpack.c.l.bf16 %v15993_v19  ;;  %v16002_v2 = vld [vmem:[#allocation69_spill] sm:$0xff] }
  0x8e   :  { %v1198_v32 = vadd.f32 %v1197_v41, %v15988_v55  ;;  %v1235_v35 = vadd.f32 %v1234_v47, %v15989_v9  ;;  %v15995_v34 = vunpack.c.h.bf16 %v15993_v19  ;;  %v15997_v46 = vunpack.c.l.bf16 %v15996_v6  ;;  %v16005_v19 = vld [vmem:[#allocation70_spill] sm:$0xff] }
  0x8f   :  { %v1272_v13 = vadd.f32 %v1271_v53, %v15991_v37  ;;  %v1309_v1 = vadd.f32 %v1308_v60, %v15992_v45  ;;  %v1346_v48 = vadd.f32 %v1345_v33, %v15994_v0  ;;  %v15998_v41 = vunpack.c.h.bf16 %v15996_v6  ;;  %v16008_v6 = vld [vmem:[#allocation71_spill] sm:$0xff] }
  0x90   :  { %v1383_v61 = vadd.f32 %v1382_v52, %v15995_v34  ;;  %v1420_v36 = vadd.f32 %v1419_v42, %v15997_v46  ;;  %v16000_v47 = vunpack.c.l.bf16 %v15999_v15  ;;  %v16001_v53 = vunpack.c.h.bf16 %v15999_v15  ;;  %v16011_v15 = vld [vmem:[#allocation72_spill] sm:$0xff] }
  0x91   :  { %v1457_v55 = vadd.f32 %v1456_v3, %v15998_v41  ;;  %v16003_v60 = vunpack.c.l.bf16 %v16002_v2  ;;  %v16004_v33 = vunpack.c.h.bf16 %v16002_v2  ;;  %v16006_v52 = vunpack.c.l.bf16 %v16005_v19  ;;  %v16014_v2 = vld [vmem:[#allocation73_spill] sm:$0xff] }
  0x92   :  { %v1199_v9 = vadd.f32 %v1198_v32, %v16000_v47  ;;  %v1236_v37 = vadd.f32 %v1235_v35, %v16001_v53  ;;  %v16007_v42 = vunpack.c.h.bf16 %v16005_v19  ;;  %v16009_v3 = vunpack.c.l.bf16 %v16008_v6  ;;  %v16017_v19 = vld [vmem:[#allocation74_spill] sm:$0xff] }
  0x93   :  { %v1273_v45 = vadd.f32 %v1272_v13, %v16003_v60  ;;  %v1310_v0 = vadd.f32 %v1309_v1, %v16004_v33  ;;  %v1347_v34 = vadd.f32 %v1346_v48, %v16006_v52  ;;  %v16010_v32 = vunpack.c.h.bf16 %v16008_v6  ;;  %v16020_v6 = vld [vmem:[#allocation75_spill] sm:$0xff] }
  0x94   :  { %v1384_v46 = vadd.f32 %v1383_v61, %v16007_v42  ;;  %v1421_v41 = vadd.f32 %v1420_v36, %v16009_v3  ;;  %v16012_v35 = vunpack.c.l.bf16 %v16011_v15  ;;  %v16013_v13 = vunpack.c.h.bf16 %v16011_v15  ;;  %v16023_v15 = vld [vmem:[#allocation76_spill] sm:$0xff] }
  0x95   :  { %v1458_v47 = vadd.f32 %v1457_v55, %v16010_v32  ;;  %v16015_v1 = vunpack.c.l.bf16 %v16014_v2  ;;  %v16016_v48 = vunpack.c.h.bf16 %v16014_v2  ;;  %v16018_v61 = vunpack.c.l.bf16 %v16017_v19  ;;  %v16026_v2 = vld [vmem:[#allocation77_spill] sm:$0xff] }
  0x96   :  { %v1200_v53 = vadd.f32 %v1199_v9, %v16012_v35  ;;  %v1237_v60 = vadd.f32 %v1236_v37, %v16013_v13  ;;  %v16019_v36 = vunpack.c.h.bf16 %v16017_v19  ;;  %v16021_v55 = vunpack.c.l.bf16 %v16020_v6  ;;  %v16029_v19 = vld [vmem:[#allocation78_spill] sm:$0xff] }
  0x97   :  { %v1274_v33 = vadd.f32 %v1273_v45, %v16015_v1  ;;  %v1311_v52 = vadd.f32 %v1310_v0, %v16016_v48  ;;  %v1348_v42 = vadd.f32 %v1347_v34, %v16018_v61  ;;  %v16022_v9 = vunpack.c.h.bf16 %v16020_v6  ;;  %v16032_v6 = vld [vmem:[#allocation79_spill] sm:$0xff] }
  0x98   :  { %v1385_v3 = vadd.f32 %v1384_v46, %v16019_v36  ;;  %v1422_v32 = vadd.f32 %v1421_v41, %v16021_v55  ;;  %v16024_v37 = vunpack.c.l.bf16 %v16023_v15  ;;  %v16025_v45 = vunpack.c.h.bf16 %v16023_v15  ;;  %v16035_v15 = vld [vmem:[#allocation80_spill] sm:$0xff] }
  0x99   :  { %v1459_v35 = vadd.f32 %v1458_v47, %v16022_v9  ;;  %v16027_v0 = vunpack.c.l.bf16 %v16026_v2  ;;  %v16028_v34 = vunpack.c.h.bf16 %v16026_v2  ;;  %v16030_v46 = vunpack.c.l.bf16 %v16029_v19  ;;  %v16038_v2 = vld [vmem:[#allocation81_spill] sm:$0xff] }
  0x9a   :  { %v1201_v13 = vadd.f32 %v1200_v53, %v16024_v37  ;;  %v1238_v1 = vadd.f32 %v1237_v60, %v16025_v45  ;;  %v16031_v41 = vunpack.c.h.bf16 %v16029_v19  ;;  %v16033_v47 = vunpack.c.l.bf16 %v16032_v6  ;;  %v16041_v19 = vld [vmem:[#allocation82_spill] sm:$0xff] }
  0x9b   :  { %v1275_v48 = vadd.f32 %v1274_v33, %v16027_v0  ;;  %v1312_v61 = vadd.f32 %v1311_v52, %v16028_v34  ;;  %v1349_v36 = vadd.f32 %v1348_v42, %v16030_v46  ;;  %v16034_v53 = vunpack.c.h.bf16 %v16032_v6  ;;  %v16044_v6 = vld [vmem:[#allocation83_spill] sm:$0xff] }
  0x9c   :  { %v1386_v55 = vadd.f32 %v1385_v3, %v16031_v41  ;;  %v1423_v9 = vadd.f32 %v1422_v32, %v16033_v47  ;;  %v16036_v60 = vunpack.c.l.bf16 %v16035_v15  ;;  %v16037_v33 = vunpack.c.h.bf16 %v16035_v15  ;;  %v16047_v15 = vld [vmem:[#allocation84_spill] sm:$0xff] }
  0x9d   :  { %v1460_v37 = vadd.f32 %v1459_v35, %v16034_v53  ;;  %v16039_v52 = vunpack.c.l.bf16 %v16038_v2  ;;  %v16040_v42 = vunpack.c.h.bf16 %v16038_v2  ;;  %v16042_v3 = vunpack.c.l.bf16 %v16041_v19  ;;  %v16050_v2 = vld [vmem:[#allocation85_spill] sm:$0xff] }
  0x9e   :  { %v1202_v45 = vadd.f32 %v1201_v13, %v16036_v60  ;;  %v1239_v0 = vadd.f32 %v1238_v1, %v16037_v33  ;;  %v16043_v32 = vunpack.c.h.bf16 %v16041_v19  ;;  %v16045_v35 = vunpack.c.l.bf16 %v16044_v6  ;;  %v16053_v19 = vld [vmem:[#allocation86_spill] sm:$0xff] }
  0x9f   :  { %v1276_v34 = vadd.f32 %v1275_v48, %v16039_v52  ;;  %v1313_v46 = vadd.f32 %v1312_v61, %v16040_v42  ;;  %v1350_v41 = vadd.f32 %v1349_v36, %v16042_v3  ;;  %v16046_v13 = vunpack.c.h.bf16 %v16044_v6  ;;  %v16056_v6 = vld [vmem:[#allocation87_spill] sm:$0xff] }
  0xa0   :  { %v1387_v47 = vadd.f32 %v1386_v55, %v16043_v32  ;;  %v1424_v53 = vadd.f32 %v1423_v9, %v16045_v35  ;;  %v16048_v1 = vunpack.c.l.bf16 %v16047_v15  ;;  %v16049_v48 = vunpack.c.h.bf16 %v16047_v15  ;;  %v16059_v15 = vld [vmem:[#allocation88_spill] sm:$0xff] }
  0xa1   :  { %v1461_v60 = vadd.f32 %v1460_v37, %v16046_v13  ;;  %v16051_v61 = vunpack.c.l.bf16 %v16050_v2  ;;  %v16052_v36 = vunpack.c.h.bf16 %v16050_v2  ;;  %v16054_v55 = vunpack.c.l.bf16 %v16053_v19  ;;  %v16062_v2 = vld [vmem:[#allocation89_spill] sm:$0xff] }
  0xa2   :  { %v1203_v33 = vadd.f32 %v1202_v45, %v16048_v1  ;;  %v1240_v52 = vadd.f32 %v1239_v0, %v16049_v48  ;;  %v16055_v9 = vunpack.c.h.bf16 %v16053_v19  ;;  %v16057_v37 = vunpack.c.l.bf16 %v16056_v6  ;;  %v16065_v19 = vld [vmem:[#allocation90_spill] sm:$0xff] }
  0xa3   :  { %v1277_v42 = vadd.f32 %v1276_v34, %v16051_v61  ;;  %v1314_v3 = vadd.f32 %v1313_v46, %v16052_v36  ;;  %v1351_v32 = vadd.f32 %v1350_v41, %v16054_v55  ;;  %v16058_v45 = vunpack.c.h.bf16 %v16056_v6  ;;  %v16068_v6 = vld [vmem:[#allocation91_spill] sm:$0xff] }
  0xa4   :  { %v1388_v35 = vadd.f32 %v1387_v47, %v16055_v9  ;;  %v1425_v13 = vadd.f32 %v1424_v53, %v16057_v37  ;;  %v16060_v0 = vunpack.c.l.bf16 %v16059_v15  ;;  %v16061_v34 = vunpack.c.h.bf16 %v16059_v15  ;;  %v16071_v15 = vld [vmem:[#allocation92_spill] sm:$0xff] }
  0xa5   :  { %v1462_v1 = vadd.f32 %v1461_v60, %v16058_v45  ;;  %v16063_v46 = vunpack.c.l.bf16 %v16062_v2  ;;  %v16064_v41 = vunpack.c.h.bf16 %v16062_v2  ;;  %v16066_v47 = vunpack.c.l.bf16 %v16065_v19  ;;  %v16074_v2 = vld [vmem:[#allocation93_spill] sm:$0xff] }
  0xa6   :  { %v1204_v48 = vadd.f32 %v1203_v33, %v16060_v0  ;;  %v1241_v61 = vadd.f32 %v1240_v52, %v16061_v34  ;;  %v16067_v53 = vunpack.c.h.bf16 %v16065_v19  ;;  %v16069_v60 = vunpack.c.l.bf16 %v16068_v6  ;;  %v16077_v19 = vld [vmem:[#allocation94_spill] sm:$0xff] }
  0xa7   :  { %v1278_v36 = vadd.f32 %v1277_v42, %v16063_v46  ;;  %v1315_v55 = vadd.f32 %v1314_v3, %v16064_v41  ;;  %v1352_v9 = vadd.f32 %v1351_v32, %v16066_v47  ;;  %v16070_v33 = vunpack.c.h.bf16 %v16068_v6  ;;  %v16080_v6 = vld [vmem:[#allocation95_spill] sm:$0xff] }
  0xa8   :  { %v1389_v37 = vadd.f32 %v1388_v35, %v16067_v53  ;;  %v1426_v45 = vadd.f32 %v1425_v13, %v16069_v60  ;;  %v16072_v52 = vunpack.c.l.bf16 %v16071_v15  ;;  %v16073_v42 = vunpack.c.h.bf16 %v16071_v15  ;;  %v16083_v15 = vld [vmem:[#allocation96_spill] sm:$0xff] }
  0xa9   :  { %v1463_v0 = vadd.f32 %v1462_v1, %v16070_v33  ;;  %v16075_v3 = vunpack.c.l.bf16 %v16074_v2  ;;  %v16076_v32 = vunpack.c.h.bf16 %v16074_v2  ;;  %v16078_v35 = vunpack.c.l.bf16 %v16077_v19  ;;  %v16086_v2 = vld [vmem:[#allocation97_spill] sm:$0xff] }
  0xaa   :  { %v1205_v34 = vadd.f32 %v1204_v48, %v16072_v52  ;;  %v1242_v46 = vadd.f32 %v1241_v61, %v16073_v42  ;;  %v16079_v13 = vunpack.c.h.bf16 %v16077_v19  ;;  %v16081_v1 = vunpack.c.l.bf16 %v16080_v6  ;;  %v16089_v19 = vld [vmem:[#allocation98_spill] sm:$0xff] }
  0xab   :  { %v1279_v41 = vadd.f32 %v1278_v36, %v16075_v3  ;;  %v1316_v47 = vadd.f32 %v1315_v55, %v16076_v32  ;;  %v1353_v53 = vadd.f32 %v1352_v9, %v16078_v35  ;;  %v16082_v48 = vunpack.c.h.bf16 %v16080_v6  ;;  %v16092_v6 = vld [vmem:[#allocation99_spill] sm:$0xff] }
  0xac   :  { %v1390_v60 = vadd.f32 %v1389_v37, %v16079_v13  ;;  %v1427_v33 = vadd.f32 %v1426_v45, %v16081_v1  ;;  %v16084_v61 = vunpack.c.l.bf16 %v16083_v15  ;;  %v16085_v36 = vunpack.c.h.bf16 %v16083_v15  ;;  %v16095_v15 = vld [vmem:[#allocation100_spill] sm:$0xff] }
  0xad   :  { %v1464_v52 = vadd.f32 %v1463_v0, %v16082_v48  ;;  %v16087_v55 = vunpack.c.l.bf16 %v16086_v2  ;;  %v16088_v9 = vunpack.c.h.bf16 %v16086_v2  ;;  %v16090_v37 = vunpack.c.l.bf16 %v16089_v19  ;;  %v16098_v2 = vld [vmem:[#allocation101_spill] sm:$0xff] }
  0xae   :  { %v1206_v42 = vadd.f32 %v1205_v34, %v16084_v61  ;;  %v1243_v3 = vadd.f32 %v1242_v46, %v16085_v36  ;;  %v16091_v45 = vunpack.c.h.bf16 %v16089_v19  ;;  %v16093_v0 = vunpack.c.l.bf16 %v16092_v6  ;;  %v16101_v19 = vld [vmem:[#allocation102_spill] sm:$0xff] }
  0xaf   :  { %v1280_v32 = vadd.f32 %v1279_v41, %v16087_v55  ;;  %v1317_v35 = vadd.f32 %v1316_v47, %v16088_v9  ;;  %v1354_v13 = vadd.f32 %v1353_v53, %v16090_v37  ;;  %v16094_v34 = vunpack.c.h.bf16 %v16092_v6  ;;  %v16104_v6 = vld [vmem:[#allocation103_spill] sm:$0xff] }
  0xb0   :  { %v1391_v1 = vadd.f32 %v1390_v60, %v16091_v45  ;;  %v1428_v48 = vadd.f32 %v1427_v33, %v16093_v0  ;;  %v16096_v46 = vunpack.c.l.bf16 %v16095_v15  ;;  %v16097_v41 = vunpack.c.h.bf16 %v16095_v15 }
  0xb1   :  { %v1465_v61 = vadd.f32 %v1464_v52, %v16094_v34  ;;  %v16099_v47 = vunpack.c.l.bf16 %v16098_v2  ;;  %v16100_v53 = vunpack.c.h.bf16 %v16098_v2  ;;  %v16102_v60 = vunpack.c.l.bf16 %v16101_v19 }
  0xb2   :  { %v1207_v36 = vadd.f32 %v1206_v42, %v16096_v46  ;;  %v1244_v55 = vadd.f32 %v1243_v3, %v16097_v41  ;;  %v16103_v33 = vunpack.c.h.bf16 %v16101_v19  ;;  %v16105_v52 = vunpack.c.l.bf16 %v16104_v6 }
  0xb3   :  { %v1281_v9 = vadd.f32 %v1280_v32, %v16099_v47  ;;  %v1318_v37 = vadd.f32 %v1317_v35, %v16100_v53  ;;  %v1355_v45 = vadd.f32 %v1354_v13, %v16102_v60  ;;  %v16106_v42 = vunpack.c.h.bf16 %v16104_v6 }
  0xb4   :  { %v1392_v0 = vadd.f32 %v1391_v1, %v16103_v33  ;;  %v1429_v34 = vadd.f32 %v1428_v48, %v16105_v52  ;;  %v16107_v3 = vunpack.c.l.bf16 %v10250_v58  ;;  %v16108_v32 = vunpack.c.h.bf16 %v10250_v58 }
  0xb5   :  { %v1466_v46 = vadd.f32 %v1465_v61, %v16106_v42  ;;  %v16109_v35 = vunpack.c.l.bf16 %v10255_v59  ;;  %v16110_v13 = vunpack.c.h.bf16 %v10255_v59  ;;  %v16111_v1 = vunpack.c.l.bf16 %v10264_v38 }
  0xb6   :  { %v1208_v41 = vadd.f32 %v1207_v36, %v16107_v3  ;;  %v1245_v47 = vadd.f32 %v1244_v55, %v16108_v32  ;;  %v16112_v48 = vunpack.c.h.bf16 %v10264_v38  ;;  %v16113_v61 = vunpack.c.l.bf16 %v10269_v54 }
  0xb7   :  { %v1282_v53 = vadd.f32 %v1281_v9, %v16109_v35  ;;  %v1319_v60 = vadd.f32 %v1318_v37, %v16110_v13  ;;  %v1356_v33 = vadd.f32 %v1355_v45, %v16111_v1  ;;  %v16114_v36 = vunpack.c.h.bf16 %v10269_v54  ;;  %v16121_v54 = vld [vmem:[#allocation111_spill] sm:$0xff] }
  0xb8   :  { %v1393_v52 = vadd.f32 %v1392_v0, %v16112_v48  ;;  %v1430_v42 = vadd.f32 %v1429_v34, %v16113_v61  ;;  %v16115_v55 = vunpack.c.l.bf16 %v10278_v39  ;;  %v16116_v9 = vunpack.c.h.bf16 %v10278_v39  ;;  %v16124_v39 = vld [vmem:[#allocation112_spill] sm:$0xff] }
  0xb9   :  { %v1467_v3 = vadd.f32 %v1466_v46, %v16114_v36  ;;  %v16117_v37 = vunpack.c.l.bf16 %v10283_v7  ;;  %v16118_v45 = vunpack.c.h.bf16 %v10283_v7  ;;  %v16119_v0 = vunpack.c.l.bf16 %v10292_v40  ;;  %v16127_v7 = vld [vmem:[#allocation113_spill] sm:$0xff] }
  0xba   :  { %v1209_v32 = vadd.f32 %v1208_v41, %v16115_v55  ;;  %v1246_v35 = vadd.f32 %v1245_v47, %v16116_v9  ;;  %v16120_v34 = vunpack.c.h.bf16 %v10292_v40  ;;  %v16122_v46 = vunpack.c.l.bf16 %v16121_v54  ;;  %v16130_v40 = vld [vmem:[#allocation114_spill] sm:$0xff] }
  0xbb   :  { %v1283_v13 = vadd.f32 %v1282_v53, %v16117_v37  ;;  %v1320_v1 = vadd.f32 %v1319_v60, %v16118_v45  ;;  %v1357_v48 = vadd.f32 %v1356_v33, %v16119_v0  ;;  %v16123_v41 = vunpack.c.h.bf16 %v16121_v54  ;;  %v16133_v54 = vld [vmem:[#allocation115_spill] sm:$0xff] }
  0xbc   :  { %v1394_v61 = vadd.f32 %v1393_v52, %v16120_v34  ;;  %v1431_v36 = vadd.f32 %v1430_v42, %v16122_v46  ;;  %v16125_v47 = vunpack.c.l.bf16 %v16124_v39  ;;  %v16126_v53 = vunpack.c.h.bf16 %v16124_v39 }
  0xbd   :  { %v1468_v55 = vadd.f32 %v1467_v3, %v16123_v41  ;;  %v16128_v60 = vunpack.c.l.bf16 %v16127_v7  ;;  %v16129_v33 = vunpack.c.h.bf16 %v16127_v7  ;;  %v16131_v52 = vunpack.c.l.bf16 %v16130_v40 }
  0xbe   :  { %v1210_v9 = vadd.f32 %v1209_v32, %v16125_v47  ;;  %v1247_v37 = vadd.f32 %v1246_v35, %v16126_v53  ;;  %v16132_v42 = vunpack.c.h.bf16 %v16130_v40  ;;  %v16134_v3 = vunpack.c.l.bf16 %v16133_v54 }
  0xbf   :  { %v1284_v45 = vadd.f32 %v1283_v13, %v16128_v60  ;;  %v1321_v0 = vadd.f32 %v1320_v1, %v16129_v33  ;;  %v1358_v34 = vadd.f32 %v1357_v48, %v16131_v52  ;;  %v16135_v32 = vunpack.c.h.bf16 %v16133_v54 }
  0xc0   :  { %v1395_v46 = vadd.f32 %v1394_v61, %v16132_v42  ;;  %v1432_v41 = vadd.f32 %v1431_v36, %v16134_v3  ;;  %v1211_v39 = vrot.slane %v1210_v9, 4  ;;  %v1248_v35 = vrot.slane %v1247_v37, 4 }
  0xc1   :  { %v1469_v47 = vadd.f32 %v1468_v55, %v16135_v32  ;;  %v1285_v53 = vrot.slane %v1284_v45, 4  ;;  %v1322_v38 = vrot.slane %v1321_v0, 4  ;;  %v1359_v13 = vrot.slane %v1358_v34, 4 }
  0xc2   :  { %v1396_v60 = vrot.slane %v1395_v46, 4  ;;  %v1433_v7 = vrot.slane %v1432_v41, 4  ;;  %v1212_v33 = vadd.f32 %v1211_v39, %v1210_v9  ;;  %v1249_v59 = vadd.f32 %v1248_v35, %v1247_v37 }
  0xc3   :  { %v1470_v1 = vrot.slane %v1469_v47, 4  ;;  %v1286_v48 = vadd.f32 %v1285_v53, %v1284_v45  ;;  %v1323_v52 = vadd.f32 %v1322_v38, %v1321_v0  ;;  %v1360_v40 = vadd.f32 %v1359_v13, %v1358_v34  ;;  %v16137_v53 = vld [vmem:[#allocation6_spill] sm:$0xff]  ;;  %v16142_v13 = vld [vmem:[#allocation5_spill] sm:$0xff] }
  0xc4   :  { %v1397_v61 = vadd.f32 %v1396_v60, %v1395_v46  ;;  %v1434_v42 = vadd.f32 %v1433_v7, %v1432_v41  ;;  %v1213_v36 = vrot.slane %v1212_v33, 2  ;;  %v1250_v3 = vrot.slane %v1249_v59, 2  ;;  %v8992_v60 = vld [vmem:[%s15280_s3 + $0x178] sm:$0xff]  }
  0xc5   :  { %v1471_v58 = vadd.f32 %v1470_v1, %v1469_v47  ;;  %v1287_v54 = vrot.slane %v1286_v48, 2  ;;  %v1324_v55 = vrot.slane %v1323_v52, 2  ;;  %v1361_v32 = vrot.slane %v1360_v40, 2  ;;  %8014 = vmatprep.subr.bf16.mxu0 %v8992_v60  ;;  %v16143_v1 = vld [vmem:[#allocation23_spill] sm:$0xff]  ;;  %v16161_v60 = vld [vmem:[#allocation41_spill] sm:$0xff] }
  0xc6   :  { %v1398_v6 = vrot.slane %v1397_v61, 2  ;;  %v1435_v19 = vrot.slane %v1434_v42, 2  ;;  %v1214_v15 = vadd.f32 %v1213_v36, %v1212_v33  ;;  %v1251_v8 = vadd.f32 %v1250_v3, %v1249_v59  ;;  %v16144_v33 = vld [vmem:[#allocation24_spill] sm:$0xff]  ;;  %v16149_v36 = vld [vmem:[#allocation29_spill] sm:$0xff]  ;;  %v16150_v3 = vld [vmem:[#allocation30_spill] sm:$0xff] }
  0xc7   :  { %v1472_v2 = vrot.slane %v1471_v58, 2  ;;  %v1288_v21 = vadd.f32 %v1287_v54, %v1286_v48  ;;  %v1325_v12 = vadd.f32 %v1324_v55, %v1323_v52  ;;  %v1362_v39 = vadd.f32 %v1361_v32, %v1360_v40  ;;  %v16145_v48 = vld [vmem:[#allocation25_spill] sm:$0xff]  ;;  %v16146_v52 = vld [vmem:[#allocation26_spill] sm:$0xff]  ;;  %v16151_v55 = vld [vmem:[#allocation31_spill] sm:$0xff] }
  0xc8   :  { %v1399_v9 = vadd.f32 %v1398_v6, %v1397_v61  ;;  %v10863_v37 = vadd.f32 %v1435_v19, %v1434_v42  ;;  %v1215_v7 = vrot.slane %v1214_v15, 1  ;;  %v1252_v45 = vrot.slane %v1251_v8, 1  ;;  %v16136_v19 = vld [vmem:[#allocation2_spill] sm:$0xff]  ;;  %v16147_v61 = vld [vmem:[#allocation27_spill] sm:$0xff]  ;;  %v16148_v42 = vld [vmem:[#allocation28_spill] sm:$0xff] }
  0xc9   :  { %v10865_v38 = vadd.f32 %v1472_v2, %v1471_v58  ;;  %v1289_v0 = vrot.slane %v1288_v21, 1  ;;  %v1326_v34 = vrot.slane %v1325_v12, 1  ;;  %v1363_v46 = vrot.slane %v1362_v39, 1  ;;  %v16152_v32 = vld [vmem:[#allocation32_spill] sm:$0xff]  ;;  %v16162_v54 = vld [vmem:[#allocation42_spill] sm:$0xff]  ;;  %v16163_v59 = vld [vmem:[#allocation43_spill] sm:$0xff] }
  0xca   :  { %v1400_v41 = vrot.slane %v1399_v9, 1  ;;  %v10867_v47 = vadd.f32 %v1215_v7, %v1214_v15  ;;  %v10869_v35 = vadd.f32 %v1252_v45, %v1251_v8  ;;  %9124 = vmul.bf16.f32.vacc0 %v16136_v19, %v16136_v19  ;;  %v16138_v8 = vld [vmem:[#allocation3_spill] sm:$0xff]  ;;  %v16156_v45 = vld [vmem:[#allocation36_spill] sm:$0xff] }
  0xcb   :  { %v10873_v40 = vadd.f32 %v1289_v0, %v1288_v21  ;;  %v10875_v6 = vadd.f32 %v1326_v34, %v1325_v12  ;;  %v10877_v58 = vadd.f32 %v1363_v46, %v1362_v39  ;;  %9125 = vmac.bf16.f32.vacc0 %v16137_v53, %v16137_v53  ;;  %v16139_v15 = vld [vmem:[#allocation7_spill] sm:$0xff]  ;;  %v16140_v21 = vld [vmem:[#allocation4_spill] sm:$0xff]  ;;  %v16153_v39 = vld [vmem:[#allocation33_spill] sm:$0xff] }
  0xcc   :  { %v10879_v2 = vadd.f32 %v1400_v41, %v1399_v9  ;;  %9172 = vmul.bf16.f32.vacc1 %v16138_v8, %v16138_v8  ;;  %9220 = vmul.bf16.f32.vacc2 %v16140_v21, %v16140_v21  ;;  %v16141_v12 = vld [vmem:[#allocation8_spill] sm:$0xff]  ;;  %9268 = vmul.bf16.f32.vacc3 %v16142_v13, %v16142_v13  ;;  %v16154_v9 = vld [vmem:[#allocation34_spill] sm:$0xff]  ;;  %v16155_v7 = vld [vmem:[#allocation35_spill] sm:$0xff] }
  0xcd   :  { %9173 = vmac.bf16.f32.vacc1 %v16139_v15, %v16139_v15  ;;  %9221 = vmac.bf16.f32.vacc2 %v16141_v12, %v16141_v12  ;;  %9269 = vmac.bf16.f32.vacc3 %v9497_v43, %v9497_v43  ;;  %9126 = vmac.bf16.f32.vacc0 %v9502_v44, %v9502_v44  ;;  %v16157_v0 = vld [vmem:[#allocation37_spill] sm:$0xff]  ;;  %v16158_v34 = vld [vmem:[#allocation38_spill] sm:$0xff]  ;;  %v16159_v46 = vld [vmem:[#allocation39_spill] sm:$0xff] }
  0xce   :  { %9174 = vmac.bf16.f32.vacc1 %v9511_v49, %v9511_v49  ;;  %9222 = vmac.bf16.f32.vacc2 %v9516_v50, %v9516_v50  ;;  %9270 = vmac.bf16.f32.vacc3 %v9521_v51, %v9521_v51  ;;  %9127 = vmac.bf16.f32.vacc0 %v9530_v56, %v9530_v56  ;;  %v16160_v41 = vld [vmem:[#allocation40_spill] sm:$0xff]  ;;  %v16197_v51 = vld [vmem:[#allocation77_spill] sm:$0xff] }
  0xcf   :  { %9175 = vmac.bf16.f32.vacc1 %v9535_v57, %v9535_v57  ;;  %9223 = vmac.bf16.f32.vacc2 %v9544_v62, %v9544_v62  ;;  %9271 = vmac.bf16.f32.vacc3 %v9549_v63, %v9549_v63  ;;  %9128 = vmac.bf16.f32.vacc0 %v9558_v4, %v9558_v4  ;;  %v16196_v63 = vld [vmem:[#allocation76_spill] sm:$0xff]  ;;  %v16201_v50 = vld [vmem:[#allocation81_spill] sm:$0xff] }
  0xd0   :  { %9176 = vmac.bf16.f32.vacc1 %v9563_v5, %v9563_v5  ;;  %9224 = vmac.bf16.f32.vacc2 %v9572_v10, %v9572_v10  ;;  %9272 = vmac.bf16.f32.vacc3 %v9577_v11, %v9577_v11  ;;  %9129 = vmac.bf16.f32.vacc0 %v9586_v16, %v9586_v16  ;;  %v16189_v11 = vld [vmem:[#allocation69_spill] sm:$0xff]  ;;  %v16200_v62 = vld [vmem:[#allocation80_spill] sm:$0xff] }
  0xd1   :  { %9177 = vmac.bf16.f32.vacc1 %v9591_v17, %v9591_v17  ;;  %9225 = vmac.bf16.f32.vacc2 %v9600_v22, %v9600_v22  ;;  %9273 = vmac.bf16.f32.vacc3 %v9605_v23, %v9605_v23  ;;  %9130 = vmac.bf16.f32.vacc0 %v9614_v28, %v9614_v28  ;;  %v16188_v23 = vld [vmem:[#allocation68_spill] sm:$0xff]  ;;  %v16193_v10 = vld [vmem:[#allocation73_spill] sm:$0xff] }
  0xd2   :  { %9178 = vmac.bf16.f32.vacc1 %v9619_v29, %v9619_v29  ;;  %9226 = vmac.bf16.f32.vacc2 %v9628_v27, %v9628_v27  ;;  %9274 = vmac.bf16.f32.vacc3 %v9633_v24, %v9633_v24  ;;  %9131 = vmac.bf16.f32.vacc0 %v9642_v26, %v9642_v26  ;;  %v16181_v24 = vld [vmem:[#allocation61_spill] sm:$0xff]  ;;  %v16192_v22 = vld [vmem:[#allocation72_spill] sm:$0xff] }
  0xd3   :  { %9179 = vmac.bf16.f32.vacc1 %v9647_v20, %v9647_v20  ;;  %9227 = vmac.bf16.f32.vacc2 %v9656_v25, %v9656_v25  ;;  %9275 = vmac.bf16.f32.vacc3 %v9661_v18, %v9661_v18  ;;  %9132 = vmac.bf16.f32.vacc0 %v9670_v31, %v9670_v31  ;;  %v16180_v18 = vld [vmem:[#allocation60_spill] sm:$0xff]  ;;  %v16185_v27 = vld [vmem:[#allocation65_spill] sm:$0xff] }
  0xd4   :  { %9180 = vmac.bf16.f32.vacc1 %v9675_v14, %v9675_v14  ;;  %9228 = vmac.bf16.f32.vacc2 %v9684_v30, %v9684_v30  ;;  %9276 = vmac.bf16.f32.vacc3 %v16143_v1, %v16143_v1  ;;  %9133 = vmac.bf16.f32.vacc0 %v16144_v33, %v16144_v33  ;;  %v16173_v1 = vld [vmem:[#allocation53_spill] sm:$0xff]  ;;  %v16184_v25 = vld [vmem:[#allocation64_spill] sm:$0xff] }
  0xd5   :  { %9181 = vmac.bf16.f32.vacc1 %v16145_v48, %v16145_v48  ;;  %9229 = vmac.bf16.f32.vacc2 %v16146_v52, %v16146_v52  ;;  %9277 = vmac.bf16.f32.vacc3 %v16147_v61, %v16147_v61  ;;  %9134 = vmac.bf16.f32.vacc0 %v16148_v42, %v16148_v42  ;;  %v16172_v61 = vld [vmem:[#allocation52_spill] sm:$0xff]  ;;  %v16177_v30 = vld [vmem:[#allocation57_spill] sm:$0xff] }
  0xd6   :  { %9182 = vmac.bf16.f32.vacc1 %v16149_v36, %v16149_v36  ;;  %9230 = vmac.bf16.f32.vacc2 %v16150_v3, %v16150_v3  ;;  %9278 = vmac.bf16.f32.vacc3 %v16151_v55, %v16151_v55  ;;  %9135 = vmac.bf16.f32.vacc0 %v16152_v32, %v16152_v32  ;;  %v16165_v55 = vld [vmem:[#allocation45_spill] sm:$0xff]  ;;  %v16176_v52 = vld [vmem:[#allocation56_spill] sm:$0xff] }
  0xd7   :  { %9183 = vmac.bf16.f32.vacc1 %v16153_v39, %v16153_v39  ;;  %9231 = vmac.bf16.f32.vacc2 %v16154_v9, %v16154_v9  ;;  %9279 = vmac.bf16.f32.vacc3 %v16155_v7, %v16155_v7  ;;  %9136 = vmac.bf16.f32.vacc0 %v16156_v45, %v16156_v45  ;;  %v16164_v7 = vld [vmem:[#allocation44_spill] sm:$0xff]  ;;  %v16169_v3 = vld [vmem:[#allocation49_spill] sm:$0xff] }
  0xd8   :  { %9184 = vmac.bf16.f32.vacc1 %v16157_v0, %v16157_v0  ;;  %9232 = vmac.bf16.f32.vacc2 %v16158_v34, %v16158_v34  ;;  %9280 = vmac.bf16.f32.vacc3 %v16159_v46, %v16159_v46  ;;  %9137 = vmac.bf16.f32.vacc0 %v16160_v41, %v16160_v41  ;;  %v16166_v34 = vld [vmem:[#allocation46_spill] sm:$0xff]  ;;  %v16167_v46 = vld [vmem:[#allocation47_spill] sm:$0xff]  ;;  %v16168_v9 = vld [vmem:[#allocation48_spill] sm:$0xff] }
  0xd9   :  { %9185 = vmac.bf16.f32.vacc1 %v16161_v60, %v16161_v60  ;;  %9233 = vmac.bf16.f32.vacc2 %v16162_v54, %v16162_v54  ;;  %9281 = vmac.bf16.f32.vacc3 %v16163_v59, %v16163_v59  ;;  %9138 = vmac.bf16.f32.vacc0 %v16164_v7, %v16164_v7  ;;  %v16170_v54 = vld [vmem:[#allocation50_spill] sm:$0xff]  ;;  %v16171_v59 = vld [vmem:[#allocation51_spill] sm:$0xff]  ;;  %v16204_v43 = vld [vmem:[#allocation84_spill] sm:$0xff] }
  0xda   :  { %9186 = vmac.bf16.f32.vacc1 %v16165_v55, %v16165_v55  ;;  %9234 = vmac.bf16.f32.vacc2 %v16166_v34, %v16166_v34  ;;  %9282 = vmac.bf16.f32.vacc3 %v16167_v46, %v16167_v46  ;;  %9139 = vmac.bf16.f32.vacc0 %v16168_v9, %v16168_v9  ;;  %v16174_v34 = vld [vmem:[#allocation54_spill] sm:$0xff]  ;;  %v16175_v46 = vld [vmem:[#allocation55_spill] sm:$0xff]  ;;  %v16205_v13 = vld [vmem:[#allocation85_spill] sm:$0xff] }
  0xdb   :  { %9187 = vmac.bf16.f32.vacc1 %v16169_v3, %v16169_v3  ;;  %9235 = vmac.bf16.f32.vacc2 %v16170_v54, %v16170_v54  ;;  %9283 = vmac.bf16.f32.vacc3 %v16171_v59, %v16171_v59  ;;  %9140 = vmac.bf16.f32.vacc0 %v16172_v61, %v16172_v61  ;;  %v16178_v54 = vld [vmem:[#allocation58_spill] sm:$0xff]  ;;  %v16179_v59 = vld [vmem:[#allocation59_spill] sm:$0xff]  ;;  %v16208_v12 = vld [vmem:[#allocation88_spill] sm:$0xff] }
  0xdc   :  { %9188 = vmac.bf16.f32.vacc1 %v16173_v1, %v16173_v1  ;;  %9236 = vmac.bf16.f32.vacc2 %v16174_v34, %v16174_v34  ;;  %9284 = vmac.bf16.f32.vacc3 %v16175_v46, %v16175_v46  ;;  %9141 = vmac.bf16.f32.vacc0 %v16176_v52, %v16176_v52  ;;  %v16182_v34 = vld [vmem:[#allocation62_spill] sm:$0xff]  ;;  %v16183_v46 = vld [vmem:[#allocation63_spill] sm:$0xff]  ;;  %v16209_v21 = vld [vmem:[#allocation89_spill] sm:$0xff] }
  0xdd   :  { %9189 = vmac.bf16.f32.vacc1 %v16177_v30, %v16177_v30  ;;  %9237 = vmac.bf16.f32.vacc2 %v16178_v54, %v16178_v54  ;;  %9285 = vmac.bf16.f32.vacc3 %v16179_v59, %v16179_v59  ;;  %9142 = vmac.bf16.f32.vacc0 %v16180_v18, %v16180_v18  ;;  %v16186_v54 = vld [vmem:[#allocation66_spill] sm:$0xff]  ;;  %v16187_v59 = vld [vmem:[#allocation67_spill] sm:$0xff] }
  0xde   :  { %9190 = vmac.bf16.f32.vacc1 %v16181_v24, %v16181_v24  ;;  %9238 = vmac.bf16.f32.vacc2 %v16182_v34, %v16182_v34  ;;  %9286 = vmac.bf16.f32.vacc3 %v16183_v46, %v16183_v46  ;;  %9143 = vmac.bf16.f32.vacc0 %v16184_v25, %v16184_v25  ;;  %v16190_v34 = vld [vmem:[#allocation70_spill] sm:$0xff]  ;;  %v16191_v46 = vld [vmem:[#allocation71_spill] sm:$0xff] }
  0xdf   :  { %9191 = vmac.bf16.f32.vacc1 %v16185_v27, %v16185_v27  ;;  %9239 = vmac.bf16.f32.vacc2 %v16186_v54, %v16186_v54  ;;  %9287 = vmac.bf16.f32.vacc3 %v16187_v59, %v16187_v59  ;;  %9144 = vmac.bf16.f32.vacc0 %v16188_v23, %v16188_v23  ;;  %v16194_v54 = vld [vmem:[#allocation74_spill] sm:$0xff]  ;;  %v16195_v59 = vld [vmem:[#allocation75_spill] sm:$0xff] }
  0xe0   :  { %9192 = vmac.bf16.f32.vacc1 %v16189_v11, %v16189_v11  ;;  %9240 = vmac.bf16.f32.vacc2 %v16190_v34, %v16190_v34  ;;  %9288 = vmac.bf16.f32.vacc3 %v16191_v46, %v16191_v46  ;;  %9145 = vmac.bf16.f32.vacc0 %v16192_v22, %v16192_v22  ;;  %v16198_v34 = vld [vmem:[#allocation78_spill] sm:$0xff]  ;;  %v16199_v46 = vld [vmem:[#allocation79_spill] sm:$0xff]  ;;  %v16234_v22 = vld [vmem:[#allocation113_spill] sm:$0xff] }
  0xe1   :  { %9193 = vmac.bf16.f32.vacc1 %v16193_v10, %v16193_v10  ;;  %9241 = vmac.bf16.f32.vacc2 %v16194_v54, %v16194_v54  ;;  %9289 = vmac.bf16.f32.vacc3 %v16195_v59, %v16195_v59  ;;  %9146 = vmac.bf16.f32.vacc0 %v16196_v63, %v16196_v63  ;;  %v16202_v54 = vld [vmem:[#allocation82_spill] sm:$0xff]  ;;  %v16203_v59 = vld [vmem:[#allocation83_spill] sm:$0xff] }
  0xe2   :  { %9194 = vmac.bf16.f32.vacc1 %v16197_v51, %v16197_v51  ;;  %9242 = vmac.bf16.f32.vacc2 %v16198_v34, %v16198_v34  ;;  %9290 = vmac.bf16.f32.vacc3 %v16199_v46, %v16199_v46  ;;  %9147 = vmac.bf16.f32.vacc0 %v16200_v62, %v16200_v62  ;;  %v16206_v34 = vld [vmem:[#allocation86_spill] sm:$0xff]  ;;  %v16207_v46 = vld [vmem:[#allocation87_spill] sm:$0xff] }
  0xe3   :  { %9195 = vmac.bf16.f32.vacc1 %v16201_v50, %v16201_v50  ;;  %9243 = vmac.bf16.f32.vacc2 %v16202_v54, %v16202_v54  ;;  %9291 = vmac.bf16.f32.vacc3 %v16203_v59, %v16203_v59  ;;  %9148 = vmac.bf16.f32.vacc0 %v16204_v43, %v16204_v43  ;;  %v16210_v54 = vld [vmem:[#allocation90_spill] sm:$0xff]  ;;  %v16211_v59 = vld [vmem:[#allocation91_spill] sm:$0xff]  ;;  %v16212_v43 = vld [vmem:[#allocation92_spill] sm:$0xff] }
  0xe4   :  { %9196 = vmac.bf16.f32.vacc1 %v16205_v13, %v16205_v13  ;;  %9244 = vmac.bf16.f32.vacc2 %v16206_v34, %v16206_v34  ;;  %9292 = vmac.bf16.f32.vacc3 %v16207_v46, %v16207_v46  ;;  %9149 = vmac.bf16.f32.vacc0 %v16208_v12, %v16208_v12  ;;  %v16213_v13 = vld [vmem:[#allocation93_spill] sm:$0xff]  ;;  %v16214_v34 = vld [vmem:[#allocation94_spill] sm:$0xff]  ;;  %v16215_v46 = vld [vmem:[#allocation95_spill] sm:$0xff] }
  0xe5   :  { %9197 = vmac.bf16.f32.vacc1 %v16209_v21, %v16209_v21  ;;  %9245 = vmac.bf16.f32.vacc2 %v16210_v54, %v16210_v54  ;;  %9293 = vmac.bf16.f32.vacc3 %v16211_v59, %v16211_v59  ;;  %9150 = vmac.bf16.f32.vacc0 %v16212_v43, %v16212_v43  ;;  %v16216_v12 = vld [vmem:[#allocation96_spill] sm:$0xff]  ;;  %v16217_v21 = vld [vmem:[#allocation97_spill] sm:$0xff]  ;;  %v16218_v54 = vld [vmem:[#allocation98_spill] sm:$0xff] }
  0xe6   :  { %9198 = vmac.bf16.f32.vacc1 %v16213_v13, %v16213_v13  ;;  %9246 = vmac.bf16.f32.vacc2 %v16214_v34, %v16214_v34  ;;  %9294 = vmac.bf16.f32.vacc3 %v16215_v46, %v16215_v46  ;;  %9151 = vmac.bf16.f32.vacc0 %v16216_v12, %v16216_v12  ;;  %v16219_v59 = vld [vmem:[#allocation99_spill] sm:$0xff]  ;;  %v16220_v43 = vld [vmem:[#allocation100_spill] sm:$0xff]  ;;  %v16221_v13 = vld [vmem:[#allocation101_spill] sm:$0xff] }
  0xe7   :  { %9199 = vmac.bf16.f32.vacc1 %v16217_v21, %v16217_v21  ;;  %9247 = vmac.bf16.f32.vacc2 %v16218_v54, %v16218_v54  ;;  %9295 = vmac.bf16.f32.vacc3 %v16219_v59, %v16219_v59  ;;  %9152 = vmac.bf16.f32.vacc0 %v16220_v43, %v16220_v43  ;;  %v16222_v34 = vld [vmem:[#allocation102_spill] sm:$0xff]  ;;  %v16223_v46 = vld [vmem:[#allocation103_spill] sm:$0xff]  ;;  %v16224_v12 = vld [vmem:[#allocation104_spill] sm:$0xff] }
  0xe8   :  { %9200 = vmac.bf16.f32.vacc1 %v16221_v13, %v16221_v13  ;;  %9248 = vmac.bf16.f32.vacc2 %v16222_v34, %v16222_v34  ;;  %9296 = vmac.bf16.f32.vacc3 %v16223_v46, %v16223_v46  ;;  %9153 = vmac.bf16.f32.vacc0 %v16224_v12, %v16224_v12  ;;  %v16225_v21 = vld [vmem:[#allocation105_spill] sm:$0xff]  ;;  %v16226_v54 = vld [vmem:[#allocation106_spill] sm:$0xff]  ;;  %v16227_v59 = vld [vmem:[#allocation107_spill] sm:$0xff] }
  0xe9   :  { %9201 = vmac.bf16.f32.vacc1 %v16225_v21, %v16225_v21  ;;  %9249 = vmac.bf16.f32.vacc2 %v16226_v54, %v16226_v54  ;;  %9297 = vmac.bf16.f32.vacc3 %v16227_v59, %v16227_v59  ;;  %v16228_v43 = vld [vmem:[#allocation108_spill] sm:$0xff]  ;;  %v16229_v13 = vld [vmem:[#allocation109_spill] sm:$0xff]  ;;  %v16230_v34 = vld [vmem:[#allocation110_spill] sm:$0xff]  ;;  %v9316_v51 = vmov 1935823168  }
  0xea   :  { %9154 = vmac.bf16.f32.vacc0 %v16228_v43, %v16228_v43  ;;  %9202 = vmac.bf16.f32.vacc1 %v16229_v13, %v16229_v13  ;;  %9250 = vmac.bf16.f32.vacc2 %v16230_v34, %v16230_v34  ;;  %v16231_v46 = vld [vmem:[#allocation111_spill] sm:$0xff]  ;;  %v9001_v21 = vld [vmem:[%s15280_s3 + $0x1f8] sm:$0xff]   ;;  %v16232_v54 = vld [vmem:[#allocation112_spill] sm:$0xff]  ;;  %v9160_v62 = vunpack.c.l.s4 %v9316_v51 }
  0xeb   :  { %9298 = vmac.bf16.f32.vacc3 %v16231_v46, %v16231_v46  ;;  %9155 = vmac.bf16.f32.vacc0 %v16232_v54, %v16232_v54  ;;  %v9162_v63 = vlaneseq  ;;  %9203 = vmac.bf16.f32.vacc1 %v16234_v22, %v16234_v22  ;;  %8126 = vmatprep.subr.bf16.mxu1 %v9001_v21 }
  0xec   :  { %v9161_v13 = vunpack.c.0.s8 %v9160_v62 }
  0xed   :  { %v9156_v59 = vmovacc.add.low.vacc0  ;;  %v11137_v10 = vshrl.u32 %v9162_v63, 7  ;;  %v9204_v23 = vmovacc.add.low.vacc1 }
  0xee   :  { %v9157_v12 = vmovacc.add.high.vacc0  ;;  %v9205_v27 = vmovacc.add.high.vacc1 }
  0xef   :  { %16233 = vst [vmem:[#allocation2_spill] sm:$0xff] %v11137_v10  ;;  %v9164_v34 = vsub.s32 %v9161_v13, %v11137_v10 }
  0xf0   :  { %v9158_v50 = vcombine.low %v9156_v59, %v9157_v12  ;;  %v9159_v43 = vcombine.high %v9156_v59, %v9157_v12  ;;  %v9206_v54 = vcombine.low %v9204_v23, %v9205_v27  ;;  %v9207_v24 = vcombine.high %v9204_v23, %v9205_v27  ;;  %v16235_v59 = vld [vmem:[#allocation114_spill] sm:$0xff] }
  0xf1   :  { %9251 = vmac.bf16.f32.vacc2 %v16235_v59, %v16235_v59 }
  0xf2   :  { %v9165_v46 = vrot.slane %v9158_v50, %v9164_v34  ;;  %v9171_v11 = vrot.slane %v9159_v43, %v9164_v34  ;;  %v9213_v25 = vrot.slane %v9206_v54, %v9164_v34  ;;  %v9219_v18 = vrot.slane %v9207_v24, %v9164_v34  ;;  %v16236_v50 = vld [vmem:[#allocation115_spill] sm:$0xff] }
  0xf3   :  { %v9252_v51 = vmovacc.add.low.vacc2  ;;  %9299 = vmac.bf16.f32.vacc3 %v16236_v50, %v16236_v50 }
  0xf4   :  { %v9253_v62 = vmovacc.add.high.vacc2  ;;  %v1832_v24 = vrot.slane %v9165_v46, 4  ;;  %v1869_v27 = vrot.slane %v9171_v11, 4  ;;  %v1906_v54 = vrot.slane %v9213_v25, 4 }
  0xf5   :  { %v9300_v43 = vmovacc.add.low.vacc3  ;;  %v1943_v59 = vrot.slane %v9219_v18, 4 }
  0xf6   :  { %v9254_v63 = vcombine.low %v9252_v51, %v9253_v62  ;;  %v9255_v12 = vcombine.high %v9252_v51, %v9253_v62  ;;  %v9301_v22 = vmovacc.add.high.vacc3  ;;  %v1833_v62 = vadd.f32 %v9165_v46, %v1832_v24 }
  0xf7   :  { %v1944_v7 = vadd.f32 %v9219_v18, %v1943_v59  ;;  %v16237_v24 = vrot.slane %v10863_v37, 1 }
  0xf8   :  { %v9261_v30 = vrot.slane %v9254_v63, %v9164_v34  ;;  %v9267_v13 = vrot.slane %v9255_v12, %v9164_v34  ;;  %v9302_v1 = vcombine.low %v9300_v43, %v9301_v22  ;;  %v9303_v52 = vcombine.high %v9300_v43, %v9301_v22 }
  0xf9   :  { %v1870_v63 = vadd.f32 %v9171_v11, %v1869_v27  ;;  %v1907_v12 = vadd.f32 %v9213_v25, %v1906_v54  ;;  %v1834_v22 = vrot.slane %v1833_v62, 2  ;;  %v1945_v21 = vrot.slane %v1944_v7, 2 }
  0xfa   :  { %v9309_v61 = vrot.slane %v9302_v1, %v9164_v34  ;;  %v9315_v23 = vrot.slane %v9303_v52, %v9164_v34  ;;  %v1980_v3 = vrot.slane %v9261_v30, 4  ;;  %v2017_v55 = vrot.slane %v9267_v13, 4 }
  0xfb   :  { %v1871_v1 = vrot.slane %v1870_v63, 2  ;;  %v1908_v52 = vrot.slane %v1907_v12, 2  ;;  %v1835_v36 = vadd.f32 %v1834_v22, %v1833_v62  ;;  %v1946_v48 = vadd.f32 %v1945_v21, %v1944_v7 }
  0xfc   :  { %v2054_v9 = vrot.slane %v9309_v61, 4  ;;  %v2091_v51 = vrot.slane %v9315_v23, 4  ;;  %v1981_v50 = vadd.f32 %v9261_v30, %v1980_v3  ;;  %v2018_v60 = vadd.f32 %v9267_v13, %v2017_v55 }
  0xfd   :  { %v1872_v32 = vadd.f32 %v1871_v1, %v1870_v63  ;;  %v1909_v42 = vadd.f32 %v1908_v52, %v1907_v12  ;;  %v1836_v30 = vrot.slane %v1835_v36, 1  ;;  %v1947_v55 = vrot.slane %v1946_v48, 1 }
  0xfe   :  { %v2055_v0 = vadd.f32 %v9309_v61, %v2054_v9  ;;  %v2092_v41 = vadd.f32 %v9315_v23, %v2091_v51  ;;  %v1982_v34 = vrot.slane %v1981_v50, 2  ;;  %v2019_v43 = vrot.slane %v2018_v60, 2 }
  0xff   :  { %v1873_v3 = vrot.slane %v1872_v32, 1  ;;  %v1910_v61 = vrot.slane %v1909_v42, 1  ;;  %v1438_v27 = vadd.f32 %v16237_v24, %v10863_v37  ;;  %v16238_v54 = vrot.slane %v10865_v38, 1 }
 0x100   :  { %v2056_v45 = vrot.slane %v2055_v0, 2  ;;  %v2093_v39 = vrot.slane %v2092_v41, 2  ;;  %v1983_v46 = vadd.f32 %v1982_v34, %v1981_v50  ;;  %v2020_v11 = vadd.f32 %v2019_v43, %v2018_v60 }
 0x101   :  { %v1475_v7 = vadd.f32 %v16238_v54, %v10865_v38  ;;  %v1837_v50 = vadd.f32 %v1836_v30, %v1835_v36  ;;  %v1874_v60 = vadd.f32 %v1873_v3, %v1872_v32  ;;  %v11153_v62 = vmul.f32 0.0051020407, %v10867_v47 }
 0x102   :  { %v2057_v25 = vadd.f32 %v2056_v45, %v2055_v0  ;;  %v2094_v18 = vadd.f32 %v2093_v39, %v2092_v41  ;;  %v1984_v9 = vrot.slane %v1983_v46, 1  ;;  %v2021_v59 = vrot.slane %v2020_v11, 1 }
 0x103   :  { %v1911_v45 = vadd.f32 %v1910_v61, %v1909_v42  ;;  %v1948_v39 = vadd.f32 %v1947_v55, %v1946_v48  ;;  %v11156_v63 = vmul.f32 0.0051020407, %v10869_v35  ;;  %v11159_v12 = vmul.f32 0.0051020407, %v10873_v40 }
 0x104   :  { %v2058_v13 = vrot.slane %v2057_v25, 1  ;;  %v2095_v23 = vrot.slane %v2094_v18, 1  ;;  %v1985_v0 = vadd.f32 %v1984_v9, %v1983_v46  ;;  %v2022_v41 = vadd.f32 %v2021_v59, %v2020_v11 }
 0x105   :  { %v11162_v22 = vmul.f32 0.0051020407, %v10875_v6  ;;  %v11165_v38 = vmul.f32 0.0051020407, %v10877_v58  ;;  %v11168_v48 = vmul.f32 0.0051020407, %v10879_v2  ;;  %v2152_v35 = vmul.f32 %v11153_v62, %v11153_v62 }
 0x106   :  { %v2059_v51 = vadd.f32 %v2058_v13, %v2057_v25  ;;  %v2096_v37 = vadd.f32 %v2095_v23, %v2094_v18  ;;  %v11170_v42 = vmul.f32 0.0051020407, %v1438_v27  ;;  %v11172_v47 = vmul.f32 0.0051020407, %v1475_v7 }
 0x107   :  { %v2143_v36 = vmul.f32 0.0051020407, %v1837_v50  ;;  %v2144_v40 = vmul.f32 0.0051020407, %v1874_v60  ;;  %v2145_v32 = vmul.f32 0.0051020407, %v1911_v45  ;;  %v2153_v6 = vmul.f32 %v11156_v63, %v11156_v63 }
 0x108   :  { %v2146_v1 = vmul.f32 0.0051020407, %v1948_v39  ;;  %v2147_v52 = vmul.f32 0.0051020407, %v1985_v0  ;;  %v2148_v58 = vmul.f32 0.0051020407, %v2022_v41  ;;  %v2154_v2 = vmul.f32 %v11159_v12, %v11159_v12 }
 0x109   :  { %v2149_v21 = vmul.f32 0.0051020407, %v2059_v51  ;;  %v2150_v34 = vmul.f32 0.0051020407, %v2096_v37  ;;  %v2155_v43 = vmul.f32 %v11162_v22, %v11162_v22  ;;  %v2156_v46 = vmul.f32 %v11165_v38, %v11165_v38  ;;  %v2188_v41 = vld [vmem:[%s15282_s1] sm:$0xff] }
 0x10a   :  { %v2157_v11 = vmul.f32 %v11168_v48, %v11168_v48  ;;  %v2158_v25 = vmul.f32 %v11170_v42, %v11170_v42  ;;  %v2159_v18 = vmul.f32 %v11172_v47, %v11172_v47  ;;  %v2161_v30 = vsub.f32 %v2143_v36, %v2152_v35 }
 0x10b   :  { %v2162_v3 = vsub.f32 %v2144_v40, %v2153_v6  ;;  %v2163_v61 = vsub.f32 %v2145_v32, %v2154_v2  ;;  %v2164_v55 = vsub.f32 %v2146_v1, %v2155_v43  ;;  %v2165_v9 = vsub.f32 %v2147_v52, %v2156_v46 }
 0x10c   :  { %v2166_v59 = vsub.f32 %v2148_v58, %v2157_v11  ;;  %v2167_v13 = vsub.f32 %v2149_v21, %v2158_v25  ;;  %v2170_v23 = vadd.f32 1e-05, %v2161_v30  ;;  %v2168_v27 = vsub.f32 %v2150_v34, %v2159_v18 }
 0x10d   :  { %v2171_v24 = vadd.f32 1e-05, %v2162_v3  ;;  %v2172_v54 = vadd.f32 1e-05, %v2163_v61  ;;  %v2173_v7 = vadd.f32 1e-05, %v2164_v55 }
 0x10e   :  { %v2174_v50 = vadd.f32 1e-05, %v2165_v9  ;;  %9104 = vrsqrt.f32 %v2170_v23  ;;  %v2175_v60 = vadd.f32 1e-05, %v2166_v59  ;;  %v2176_v45 = vadd.f32 1e-05, %v2167_v13 }
 0x10f   :  { %9106 = vrsqrt.f32 %v2171_v24  ;;  %v2177_v39 = vadd.f32 1e-05, %v2168_v27  ;;  %v11191_v0 = vsub.s32 0, %v11137_v10  ;;  %v2198_v51 = vsub.s32 1, %v11137_v10 }
 0x110   :  { %9108 = vrsqrt.f32 %v2172_v54  ;;  %v2202_v37 = vsub.s32 2, %v11137_v10  ;;  %v2206_v36 = vsub.s32 3, %v11137_v10  ;;  %v9317_v35 = vmov 1966171168  }
 0x111   :  { %9110 = vrsqrt.f32 %v2173_v7  ;;  %16239 = vst [vmem:[#allocation6_spill] sm:$0xff] %v11191_v0  ;;  %v2271_v40 = vunpack.c.l.s4 %v9317_v35  ;;  %v2195_v32 = vrot.slane %v2188_v41, %v11191_v0  ;;  %v2210_v1 = vsub.s32 4, %v11137_v10 }
 0x112   :  { %9112 = vrsqrt.f32 %v2174_v50  ;;  %v2199_v6 = vrot.slane %v2188_v41, %v2198_v51  ;;  %v2214_v52 = vsub.s32 5, %v11137_v10  ;;  %v2203_v58 = vrot.slane %v2188_v41, %v2202_v37 }
 0x113   :  { %9114 = vrsqrt.f32 %v2175_v60  ;;  %v2218_v21 = vsub.s32 6, %v11137_v10  ;;  %v2207_v34 = vrot.slane %v2188_v41, %v2206_v36  ;;  %v2222_v43 = vsub.s32 7, %v11137_v10 }
 0x114   :  { %9116 = vrsqrt.f32 %v2176_v45  ;;  %v2272_v46 = vunpack.c.0.s8 %v2271_v40  ;;  %v2211_v25 = vrot.slane %v2188_v41, %v2210_v1  ;;  %v2215_v3 = vrot.slane %v2188_v41, %v2214_v52 }
 0x115   :  { %9118 = vrsqrt.f32 %v2177_v39  ;;  %v2219_v9 = vrot.slane %v2188_v41, %v2218_v21  ;;  %v2223_v24 = vrot.slane %v2188_v41, %v2222_v43 }
 0x116   :  { %v11221_v7 = vsub.s32 %v2272_v46, %v11137_v10 }
 0x118   :  { %16240 = vst [vmem:[#allocation3_spill] sm:$0xff] %v11221_v7 }
 0x11b   :  { %v9105_v2 = vpop.eup %9104 }
 0x11c   :  { %v9107_v11 = vpop.eup %9106  ;;  %v2237_v18 = vmul.f32 %v9105_v2, %v2195_v32 }
 0x11d   :  { %v9109_v30 = vpop.eup %9108  ;;  %v2238_v61 = vmul.f32 %v9107_v11, %v2199_v6 }
 0x11e   :  { %v9111_v55 = vpop.eup %9110  ;;  %v2239_v59 = vmul.f32 %v9109_v30, %v2203_v58  ;;  %v2248_v13 = vmul.f32 %v2237_v18, %v11153_v62 }
 0x11f   :  { %v9113_v23 = vpop.eup %9112  ;;  %v2240_v27 = vmul.f32 %v9111_v55, %v2207_v34  ;;  %v2249_v54 = vmul.f32 %v2238_v61, %v11156_v63 }
 0x120   :  { %v9115_v50 = vpop.eup %9114  ;;  %v11223_v60 = vmul.f32 %v9113_v23, %v2211_v25  ;;  %v2250_v45 = vmul.f32 %v2239_v59, %v11159_v12  ;;  %v11247_v25 = vrot.slane %v2238_v61, %v11191_v0  ;;  %v16243_v23 = vunpack.c.h.bf16 %v16137_v53 }
 0x121   :  { %v9117_v39 = vpop.eup %9116  ;;  %v11226_v35 = vmul.f32 %v9115_v50, %v2215_v3  ;;  %v2251_v62 = vmul.f32 %v2240_v27, %v11162_v22  ;;  %v2266_v40 = vcombine.low %v2248_v13, %v2249_v54  ;;  %v11241_v22 = vrot.slane %v2237_v18, %v11191_v0 }
 0x122   :  { %v9119_v32 = vpop.eup %9118  ;;  %v11229_v6 = vmul.f32 %v9117_v39, %v2219_v9  ;;  %v2252_v63 = vmul.f32 %v11223_v60, %v11165_v38  ;;  %v16242_v13 = vunpack.c.l.bf16 %v16136_v19 }
 0x123   :  { %v11233_v41 = vmul.f32 %v9119_v32, %v2223_v24  ;;  %v2253_v58 = vmul.f32 %v11226_v35, %v11168_v48  ;;  %v2267_v2 = vcombine.low %v2250_v45, %v2251_v62  ;;  %v2276_v12 = vrot.slane %v2266_v40, %v11221_v7 }
 0x124   :  { %v2254_v34 = vmul.f32 %v11229_v6, %v11170_v42  ;;  %v11250_v48 = vrot.slane %v2240_v27, %v11191_v0  ;;  %v11254_v42 = vrot.slane %v2239_v59, %v11191_v0  ;;  %v2369_v61 = vmul.f32 %v11241_v22, %v16242_v13 }
 0x125   :  { %v2255_v46 = vmul.f32 %v11233_v41, %v11172_v47  ;;  %v2268_v11 = vcombine.low %v2252_v63, %v2253_v58  ;;  %v2283_v38 = vrot.slane %v2267_v2, %v11221_v7  ;;  %v16241_v47 = vunpack.c.h.bf16 %v16136_v19 }
 0x126   :  { %v2379_v24 = vmul.f32 %v11247_v25, %v16243_v23  ;;  %v16244_v27 = vunpack.c.h.bf16 %v16138_v8  ;;  %v16245_v59 = vunpack.c.h.bf16 %v16139_v15  ;;  %v16246_v45 = vunpack.c.l.bf16 %v16137_v53  ;;  %v2246_v23 = vld [vmem:[%s15283_s2] sm:$0xff] }
 0x127   :  { %v2269_v30 = vcombine.low %v2254_v34, %v2255_v46  ;;  %v2290_v3 = vrot.slane %v2268_v11, %v11221_v7  ;;  %v2298_v55 = vcombine.low %v2276_v12, %v2283_v38  ;;  %v2370_v9 = vmul.f32 %v11247_v25, %v16241_v47 }
 0x128   :  { %v2372_v54 = vmul.f32 %v11250_v48, %v16244_v27  ;;  %v2381_v50 = vmul.f32 %v11250_v48, %v16245_v59  ;;  %v2378_v39 = vmul.f32 %v11241_v22, %v16246_v45  ;;  %v16247_v40 = vunpack.c.l.bf16 %v16138_v8 }
 0x129   :  { %v2297_v18 = vrot.slane %v2269_v30, %v11221_v7  ;;  %v2306_v19 = vrot.slane %v2298_v55, %v11221_v7  ;;  %v16248_v63 = vunpack.c.l.bf16 %v16139_v15  ;;  %v16249_v2 = vunpack.c.h.bf16 %v9502_v44 }
 0x12a   :  { %v2371_v32 = vmul.f32 %v11254_v42, %v16247_v40  ;;  %v16250_v34 = vunpack.c.h.bf16 %v9530_v56  ;;  %v16251_v46 = vunpack.c.h.bf16 %v9511_v49  ;;  %v16252_v8 = vunpack.c.h.bf16 %v9535_v57 }
 0x12b   :  { %v2299_v62 = vcombine.low %v2290_v3, %v2297_v18  ;;  %v2380_v58 = vmul.f32 %v11254_v42, %v16248_v63  ;;  %v2388_v12 = vmul.f32 %v11247_v25, %v16249_v2  ;;  %v16253_v30 = vunpack.c.l.bf16 %v9502_v44 }
 0x12c   :  { %v2397_v53 = vmul.f32 %v11247_v25, %v16250_v34  ;;  %v2390_v11 = vmul.f32 %v11250_v48, %v16251_v46  ;;  %v2399_v38 = vmul.f32 %v11250_v48, %v16252_v8  ;;  %v16254_v55 = vunpack.c.l.bf16 %v9530_v56 }
 0x12d   :  { %v2313_v15 = vrot.slane %v2299_v62, %v11221_v7  ;;  %v11298_v3 = vmul.f32 %v11241_v22, %v16253_v30  ;;  %v16255_v47 = vunpack.c.l.bf16 %v9511_v49  ;;  %v16256_v27 = vunpack.c.l.bf16 %v9535_v57 }
 0x12e   :  { %v11303_v18 = vmul.f32 %v11241_v22, %v16254_v55  ;;  %v16257_v59 = vunpack.c.h.bf16 %v9558_v4  ;;  %v16258_v45 = vunpack.c.h.bf16 %v9586_v16  ;;  %v16259_v62 = vunpack.c.h.bf16 %v9563_v5 }
 0x12f   :  { %v11308_v13 = vmul.f32 %v11254_v42, %v16255_v47  ;;  %v11316_v44 = vmul.f32 %v11254_v42, %v16256_v27  ;;  %v2314_v63 = vcombine.low %v2306_v19, %v2313_v15  ;;  %v16260_v57 = vunpack.c.h.bf16 %v9591_v17 }
 0x130   :  { %v11321_v56 = vmul.f32 %v11247_v25, %v16257_v59  ;;  %v11326_v49 = vmul.f32 %v11247_v25, %v16258_v45  ;;  %v11331_v40 = vmul.f32 %v11250_v48, %v16259_v62  ;;  %v16261_v34 = vunpack.c.l.bf16 %v9558_v4 }
 0x131   :  { %v11336_v2 = vmul.f32 %v11250_v48, %v16260_v57  ;;  %v16262_v8 = vunpack.c.l.bf16 %v9586_v16  ;;  %v16263_v55 = vunpack.c.l.bf16 %v9563_v5  ;;  %v16264_v19 = vunpack.c.l.bf16 %v9591_v17 }
 0x132   :  { %v11341_v46 = vmul.f32 %v11241_v22, %v16261_v34  ;;  %v16265_v4 = vunpack.c.h.bf16 %v9614_v28  ;;  %v16266_v16 = vunpack.c.h.bf16 %v9642_v26  ;;  %v2331_v45 = vsub.f32 %v2246_v23, %v2314_v63 }
 0x133   :  { %v11346_v30 = vmul.f32 %v11241_v22, %v16262_v8  ;;  %v11351_v47 = vmul.f32 %v11254_v42, %v16263_v55  ;;  %v11356_v15 = vmul.f32 %v11254_v42, %v16264_v19  ;;  %v16267_v5 = vunpack.c.h.bf16 %v9619_v29 }
 0x134   :  { %v11361_v27 = vmul.f32 %v11247_v25, %v16265_v4  ;;  %v11366_v59 = vmul.f32 %v11247_v25, %v16266_v16  ;;  %v16268_v17 = vunpack.c.h.bf16 %v9647_v20  ;;  %v16269_v34 = vunpack.c.l.bf16 %v9614_v28 }
 0x135   :  { %v11371_v62 = vmul.f32 %v11250_v48, %v16267_v5  ;;  %v16270_v55 = vunpack.c.l.bf16 %v9642_v26  ;;  %v16271_v23 = vunpack.c.l.bf16 %v9619_v29  ;;  %v16272_v4 = vunpack.c.l.bf16 %v9647_v20 }
 0x136   :  { %v11376_v57 = vmul.f32 %v11250_v48, %v16268_v17  ;;  %v11381_v8 = vmul.f32 %v11241_v22, %v16269_v34  ;;  %v16273_v28 = vunpack.c.h.bf16 %v9670_v31  ;;  %v11404_v26 = vrot.slane %v2331_v45, %v11191_v0 }
 0x137   :  { %v11386_v19 = vmul.f32 %v11241_v22, %v16270_v55  ;;  %v11391_v63 = vmul.f32 %v11254_v42, %v16271_v23  ;;  %v11396_v16 = vmul.f32 %v11254_v42, %v16272_v4  ;;  %v11408_v17 = vrot.slane %v2331_v45, %v2198_v51 }
 0x138   :  { %v11401_v5 = vmul.f32 %v11247_v25, %v16273_v28  ;;  %v11412_v29 = vrot.slane %v2331_v45, %v2202_v37  ;;  %v11416_v20 = vrot.slane %v2331_v45, %v2206_v36  ;;  %v11420_v34 = vrot.slane %v2331_v45, %v2210_v1 }
 0x139   :  { %v11424_v55 = vrot.slane %v2331_v45, %v2214_v52  ;;  %v11428_v51 = vrot.slane %v2331_v45, %v2218_v21  ;;  %v11432_v37 = vrot.slane %v2331_v45, %v2222_v43  ;;  %v2705_v23 = vadd.f32 %v11408_v17, %v2370_v9 }
 0x13a   :  { %16274 = vst [vmem:[#allocation7_spill] sm:$0xff] %v11420_v34  ;;  %v2714_v36 = vadd.f32 %v11408_v17, %v2379_v24  ;;  %v2707_v4 = vadd.f32 %v11416_v20, %v2372_v54  ;;  %v2716_v1 = vadd.f32 %v11416_v20, %v2381_v50  ;;  %v2704_v28 = vadd.f32 %v11404_v26, %v2369_v61  ;;  %v8993_v61 = vld [vmem:[%s15280_s3 + $0x138] sm:$0xff]  }
 0x13b   :  { %16275 = vst [vmem:[#allocation24_spill] sm:$0xff] %v11424_v55  ;;  %16276 = vst [vmem:[#allocation116_spill] sm:$0xff] %v11428_v51  ;;  %v2713_v52 = vadd.f32 %v11404_v26, %v2378_v39  ;;  %v2706_v7 = vadd.f32 %v11412_v29, %v2371_v32  ;;  %v2715_v21 = vadd.f32 %v11412_v29, %v2380_v58  ;;  %v2993_v51 = vmax.f32 %v2705_v23, 0.0  ;;  %v9003_v32 = vld [vmem:[%s15280_s3 + $0x1b8] sm:$0xff]  }
 0x13c   :  { %16277 = vst [vmem:[#allocation117_spill] sm:$0xff] %v11432_v37  ;;  %v3002_v10 = vmax.f32 %v2714_v36, 0.0  ;;  %v2995_v43 = vmax.f32 %v2707_v4, 0.0  ;;  %v3004_v45 = vmax.f32 %v2716_v1, 0.0  ;;  %v2992_v37 = vmax.f32 %v2704_v28, 0.0 }
 0x13d   :  { %v3001_v9 = vmax.f32 %v2713_v52, 0.0  ;;  %v2994_v34 = vmax.f32 %v2706_v7, 0.0  ;;  %v3003_v24 = vmax.f32 %v2715_v21, 0.0  ;;  %v2723_v50 = vadd.f32 %v11408_v17, %v2388_v12  ;;  %v9005_v12 = vld [vmem:[%s15280_s3 + $0x1f0] sm:$0xff]  }
 0x13e   :  { %v3281_v55 = vpack.c.bf16 %v3002_v10, %v2993_v51  ;;  %v3283_v54 = vpack.c.bf16 %v3004_v45, %v2995_v43  ;;  %v2732_v39 = vadd.f32 %v11408_v17, %v2397_v53  ;;  %v2725_v36 = vadd.f32 %v11416_v20, %v2390_v11  ;;  %v8994_v10 = vld [vmem:[%s15280_s3 + $0x170] sm:$0xff]  }
 0x13f   :  { %v3280_v58 = vpack.c.bf16 %v3001_v9, %v2992_v37  ;;  %v3282_v23 = vpack.c.bf16 %v3003_v24, %v2994_v34  ;;  %v2734_v7 = vadd.f32 %v11416_v20, %v2399_v38  ;;  %v3011_v53 = vmax.f32 %v2723_v50, 0.0  ;;  %v9007_v21 = vld [vmem:[%s15280_s3 + $0x1b0] sm:$0xff]   ;;  %v9009_v9 = vld [vmem:[%s15280_s3 + $0x1e8] sm:$0xff]  }
 0x140   :  { %4032 = vmatprep.mubr.bf16.mxu0 %v3281_v55  ;;  %4193 = vmatprep.mubr.bf16.mxu1 %v3283_v54  ;;  %v3020_v51 = vmax.f32 %v2732_v39, 0.0  ;;  %v2722_v37 = vadd.f32 %v11404_v26, %v11298_v3  ;;  %v2731_v11 = vadd.f32 %v11404_v26, %v11303_v18  ;;  %v3013_v38 = vmax.f32 %v2725_v36, 0.0  ;;  %v8995_v18 = vld [vmem:[%s15280_s3 + $0x130] sm:$0xff]  }
 0x141   :  { %4033 = vmatmul.mubr.bf16.vlgmr.msra.gmra.mxu0 %v3280_v58  ;;  %4194 = vmatmul.mubr.bf16.vlgmr.msra.gmra.mxu1 %v3282_v23  ;;  %v3022_v34 = vmax.f32 %v2734_v7, 0.0  ;;  %v2724_v4 = vadd.f32 %v11412_v29, %v11308_v13  ;;  %v2733_v1 = vadd.f32 %v11412_v29, %v11316_v44  ;;  %v2741_v3 = vadd.f32 %v11408_v17, %v11321_v56  ;;  %v8996_v56 = vld [vmem:[%s15280_s3 + $0x168] sm:$0xff]  }
 0x142   :  { %8015 = vmatpush3.bf16.msra.mxu0 %v8993_v61  ;;  %v3290_v55 = vpack.c.bf16 %v3020_v51, %v3011_v53  ;;  %v3010_v28 = vmax.f32 %v2722_v37, 0.0  ;;  %v3019_v52 = vmax.f32 %v2731_v11, 0.0  ;;  %8127 = vmatpush3.bf16.msra.mxu1 %v9003_v32  ;;  %v2750_v44 = vadd.f32 %v11408_v17, %v11326_v49  ;;  %v9012_v11 = vld [vmem:[%s15280_s3 + $0x1e0] sm:$0xff]  }
 0x143   :  { %v3292_v13 = vpack.c.bf16 %v3022_v34, %v3013_v38  ;;  %v3012_v43 = vmax.f32 %v2724_v4, 0.0  ;;  %v3021_v45 = vmax.f32 %v2733_v1, 0.0  ;;  %8016 = vmatprep.subr.bf16.mxu0 %v8994_v10  ;;  %8128 = vmatprep.subr.bf16.mxu1 %v9005_v12  ;;  %v3029_v54 = vmax.f32 %v2741_v3, 0.0  ;;  %v16280_v3 = vld [vmem:[#allocation25_spill] sm:$0xff] }
 0x144   :  { %4040 = vmatprep.mubr.bf16.mxu0 %v3290_v55  ;;  %v3289_v24 = vpack.c.bf16 %v3019_v52, %v3010_v28  ;;  %v2743_v61 = vadd.f32 %v11416_v20, %v11331_v40  ;;  %v2752_v50 = vadd.f32 %v11416_v20, %v11336_v2  ;;  %v3038_v39 = vmax.f32 %v2750_v44, 0.0  ;;  %v8999_v44 = vld [vmem:[%s15280_s3 + $0x120] sm:$0xff]  }
 0x145   :  { %4201 = vmatprep.mubr.bf16.mxu1 %v3292_v13  ;;  %v3291_v49 = vpack.c.bf16 %v3021_v45, %v3012_v43  ;;  %v2740_v32 = vadd.f32 %v11404_v26, %v11341_v46  ;;  %v2749_v58 = vadd.f32 %v11404_v26, %v11346_v30  ;;  %v2742_v7 = vadd.f32 %v11412_v29, %v11351_v47  ;;  %v8997_v46 = vld [vmem:[%s15280_s3 + $0x128] sm:$0xff]  }
 0x146   :  { %v3031_v23 = vmax.f32 %v2743_v61, 0.0  ;;  %v3040_v36 = vmax.f32 %v2752_v50, 0.0  ;;  %v2751_v40 = vadd.f32 %v11412_v29, %v11356_v15  ;;  %8017 = vmatpush3.bf16.msra.mxu0 %v8995_v18  ;;  %8129 = vmatpush3.bf16.msra.mxu1 %v9007_v21  ;;  %v3299_v2 = vpack.c.bf16 %v3038_v39, %v3029_v54  ;;  %v9011_v30 = vld [vmem:[%s15280_s3 + $0x1a8] sm:$0xff]   ;;  %v9016_v61 = vld [vmem:[%s15280_s3 + $0x1d8] sm:$0xff]  }
 0x147   :  { %v3028_v10 = vmax.f32 %v2740_v32, 0.0  ;;  %v3037_v12 = vmax.f32 %v2749_v58, 0.0  ;;  %v2759_v53 = vadd.f32 %v11408_v17, %v11361_v27  ;;  %8018 = vmatprep.subr.bf16.mxu0 %v8996_v56  ;;  %8130 = vmatprep.subr.bf16.mxu1 %v9009_v9  ;;  %v3030_v15 = vmax.f32 %v2742_v7, 0.0  ;;  %v8998_v27 = vld [vmem:[%s15280_s3 + $0x160] sm:$0xff]  }
 0x148   :  { %v3301_v47 = vpack.c.bf16 %v3040_v36, %v3031_v23  ;;  %v3039_v51 = vmax.f32 %v2751_v40, 0.0  ;;  %v2768_v37 = vadd.f32 %v11408_v17, %v11366_v59  ;;  %v2761_v38 = vadd.f32 %v11416_v20, %v11371_v62  ;;  %v9014_v56 = vld [vmem:[%s15280_s3 + $0x1a0] sm:$0xff]  }
 0x149   :  { %4041 = vmatmul.mubr.bf16.gmra.mxu0 %v3289_v24  ;;  %4202 = vmatmul.mubr.bf16.gmra.mxu1 %v3291_v49  ;;  %v2770_v34 = vadd.f32 %v11416_v20, %v11376_v57  ;;  %v16278_v4 = vunpack.c.h.bf16 %v16144_v33  ;;  %v3047_v1 = vmax.f32 %v2759_v53, 0.0  ;;  %v16279_v28 = vunpack.c.h.bf16 %v9675_v14  ;;  %v16286_v53 = vld [vmem:[#allocation28_spill] sm:$0xff] }
 0x14a   :  { %4048 = vmatprep.mubr.bf16.mxu0 %v3299_v2  ;;  %4209 = vmatprep.mubr.bf16.mxu1 %v3301_v47  ;;  %v3056_v55 = vmax.f32 %v2768_v37, 0.0  ;;  %v16281_v18 = vunpack.c.h.bf16 %v16280_v3  ;;  %v3298_v62 = vpack.c.bf16 %v3037_v12, %v3028_v10  ;;  %v3049_v13 = vmax.f32 %v2761_v38, 0.0  ;;  %v9002_v2 = vld [vmem:[%s15280_s3 + $0x118] sm:$0xff]   ;;  %v9018_v37 = vld [vmem:[%s15280_s3 + $0x1d0] sm:$0xff]  }
 0x14b   :  { %v2451_v59 = vmul.f32 %v11247_v25, %v16278_v4  ;;  %v2444_v52 = vmul.f32 %v11250_v48, %v16279_v28  ;;  %v3058_v43 = vmax.f32 %v2770_v34, 0.0  ;;  %v16282_v57 = vunpack.c.l.bf16 %v9670_v31  ;;  %8019 = vmatpush3.bf16.msra.mxu0 %v8997_v46  ;;  %8131 = vmatpush3.bf16.msra.mxu1 %v9011_v30  ;;  %v9000_v31 = vld [vmem:[%s15280_s3 + $0x158] sm:$0xff]   ;;  %v16288_v30 = vld [vmem:[#allocation32_spill] sm:$0xff] }
 0x14c   :  { %v2453_v21 = vmul.f32 %v11250_v48, %v16281_v18  ;;  %v3300_v9 = vpack.c.bf16 %v3039_v51, %v3030_v15  ;;  %v2758_v24 = vadd.f32 %v11404_v26, %v11381_v8  ;;  %v2767_v54 = vadd.f32 %v11404_v26, %v11386_v19  ;;  %8020 = vmatprep.subr.bf16.mxu0 %v8998_v27  ;;  %v9004_v51 = vld [vmem:[%s15280_s3 + $0x150] sm:$0xff]  }
 0x14d   :  { %v2441_v45 = vmul.f32 %v11241_v22, %v16282_v57  ;;  %8132 = vmatprep.subr.bf16.mxu1 %v9012_v11  ;;  %v2760_v50 = vadd.f32 %v11412_v29, %v11391_v63  ;;  %v2769_v49 = vadd.f32 %v11412_v29, %v11396_v16  ;;  %v2777_v8 = vadd.f32 %v11408_v17, %v11401_v5 }
 0x14e   :  { %v2786_v19 = vadd.f32 %v11408_v17, %v2451_v59  ;;  %v3308_v39 = vpack.c.bf16 %v3056_v55, %v3047_v1  ;;  %v3310_v32 = vpack.c.bf16 %v3058_v43, %v3049_v13  ;;  %v2779_v58 = vadd.f32 %v11416_v20, %v2444_v52  ;;  %v16290_v1 = vld [vmem:[#allocation29_spill] sm:$0xff]  ;;  %v9006_v43 = vld [vmem:[%s15280_s3 + $0x110] sm:$0xff]  }
 0x14f   :  { %v2788_v23 = vadd.f32 %v11416_v20, %v2453_v21  ;;  %v16283_v36 = vunpack.c.l.bf16 %v16144_v33  ;;  %v16284_v63 = vunpack.c.l.bf16 %v9675_v14  ;;  %v16285_v16 = vunpack.c.l.bf16 %v16280_v3  ;;  %8021 = vmatpush3.bf16.msra.mxu0 %v8999_v44  ;;  %8133 = vmatpush3.bf16.msra.mxu1 %v9014_v56  ;;  %v9017_v33 = vld [vmem:[%s15280_s3 + $0x198] sm:$0xff]  }
 0x150   :  { %v3046_v10 = vmax.f32 %v2758_v24, 0.0  ;;  %v3055_v12 = vmax.f32 %v2767_v54, 0.0  ;;  %v16287_v14 = vunpack.c.h.bf16 %v16286_v53  ;;  %v16289_v47 = vunpack.c.h.bf16 %v16288_v30  ;;  %8022 = vmatprep.subr.bf16.mxu0 %v9000_v31  ;;  %8134 = vmatprep.subr.bf16.mxu1 %v9016_v61  ;;  %v16292_v52 = vld [vmem:[#allocation33_spill] sm:$0xff] }
 0x151   :  { %v2450_v7 = vmul.f32 %v11241_v22, %v16283_v36  ;;  %v2443_v40 = vmul.f32 %v11254_v42, %v16284_v63  ;;  %v2452_v5 = vmul.f32 %v11254_v42, %v16285_v16  ;;  %4049 = vmatmul.mubr.bf16.gmra.mxu0 %v3298_v62  ;;  %4210 = vmatmul.mubr.bf16.gmra.mxu1 %v3300_v9  ;;  %v3048_v27 = vmax.f32 %v2760_v50, 0.0  ;;  %v9010_v63 = vld [vmem:[%s15280_s3 + $0x108] sm:$0xff]  }
 0x152   :  { %v2460_v46 = vmul.f32 %v11247_v25, %v16287_v14  ;;  %v2469_v15 = vmul.f32 %v11247_v25, %v16289_v47  ;;  %v3057_v11 = vmax.f32 %v2769_v49, 0.0  ;;  %v3065_v38 = vmax.f32 %v2777_v8, 0.0  ;;  %4056 = vmatprep.mubr.bf16.mxu0 %v3308_v39  ;;  %4217 = vmatprep.mubr.bf16.mxu1 %v3310_v32 }
 0x153   :  { %v3074_v34 = vmax.f32 %v2786_v19, 0.0  ;;  %v3067_v4 = vmax.f32 %v2779_v58, 0.0  ;;  %v3076_v59 = vmax.f32 %v2788_v23, 0.0  ;;  %v16291_v55 = vunpack.c.h.bf16 %v16290_v1  ;;  %8023 = vmatpush3.bf16.msra.mxu0 %v9002_v2  ;;  %8135 = vmatpush3.bf16.msra.mxu1 %v9017_v33  ;;  %v16298_v2 = vld [vmem:[#allocation36_spill] sm:$0xff] }
 0x154   :  { %v16293_v3 = vunpack.c.h.bf16 %v16292_v52  ;;  %v2776_v21 = vadd.f32 %v11404_v26, %v2441_v45  ;;  %v16294_v62 = vunpack.c.l.bf16 %v16286_v53  ;;  %v3307_v57 = vpack.c.bf16 %v3055_v12, %v3046_v10  ;;  %8024 = vmatprep.subr.bf16.mxu0 %v9004_v51  ;;  %v9008_v45 = vld [vmem:[%s15280_s3 + $0x148] sm:$0xff]   ;;  %8136 = vmatprep.subr.bf16.mxu1 %v9018_v37  ;;  %v16300_v12 = vld [vmem:[#allocation40_spill] sm:$0xff]  ;;  %v16302_v51 = vld [vmem:[#allocation37_spill] sm:$0xff] }
 0x155   :  { %v2462_v28 = vmul.f32 %v11250_v48, %v16291_v55  ;;  %v2785_v44 = vadd.f32 %v11404_v26, %v2450_v7  ;;  %v2778_v56 = vadd.f32 %v11412_v29, %v2443_v40  ;;  %v3309_v9 = vpack.c.bf16 %v3057_v11, %v3048_v27  ;;  %v9019_v40 = vld [vmem:[%s15280_s3 + $0x190] sm:$0xff]   ;;  %v16304_v11 = vld [vmem:[#allocation41_spill] sm:$0xff] }
 0x156   :  { %v2471_v18 = vmul.f32 %v11250_v48, %v16293_v3  ;;  %v2459_v13 = vmul.f32 %v11241_v22, %v16294_v62  ;;  %v3317_v24 = vpack.c.bf16 %v3074_v34, %v3065_v38  ;;  %v2787_v54 = vadd.f32 %v11412_v29, %v2452_v5 }
 0x157   :  { %v2795_v31 = vadd.f32 %v11408_v17, %v2460_v46  ;;  %v3319_v61 = vpack.c.bf16 %v3076_v59, %v3067_v4  ;;  %v2804_v50 = vadd.f32 %v11408_v17, %v2469_v15  ;;  %v2797_v49 = vadd.f32 %v11416_v20, %v2462_v28  ;;  %8025 = vmatpush3.bf16.msra.mxu0 %v9006_v43  ;;  %v9013_v46 = vld [vmem:[%s15280_s3 + $0x140] sm:$0xff]  }
 0x158   :  { %v2806_v8 = vadd.f32 %v11416_v20, %v2471_v18  ;;  %v3064_v19 = vmax.f32 %v2776_v21, 0.0  ;;  %v16295_v39 = vunpack.c.l.bf16 %v16288_v30  ;;  %v16296_v58 = vunpack.c.l.bf16 %v16290_v1  ;;  %8026 = vmatprep.subr.bf16.mxu0 %v9008_v45  ;;  %v9020_v30 = vld [vmem:[%s15280_s3 + $0x1c8] sm:$0xff]   ;;  %v9015_v18 = vld [vmem:[%s15280_s3 + $0x100] sm:$0xff]   ;;  %8137 = vmatpush3.bf16.msra.mxu1 %v9019_v40 }
 0x159   :  { %v16297_v36 = vunpack.c.l.bf16 %v16292_v52  ;;  %v3073_v16 = vmax.f32 %v2785_v44, 0.0  ;;  %v3066_v5 = vmax.f32 %v2778_v56, 0.0  ;;  %v16299_v33 = vunpack.c.h.bf16 %v16298_v2  ;;  %4057 = vmatmul.mubr.bf16.gmra.mxu0 %v3307_v57  ;;  %4218 = vmatmul.mubr.bf16.gmra.mxu1 %v3309_v9  ;;  %v9021_v21 = vld [vmem:[%s15280_s3 + $0x188] sm:$0xff]   ;;  %v9022_v43 = vld [vmem:[%s15280_s3 + $0x1c0] sm:$0xff]   ;;  %v11652_v57 = vld [vmem:[%s15280_s3 + $0x238] sm:$0xff]  }
 0x15a   :  { %v2468_v32 = vmul.f32 %v11241_v22, %v16295_v39  ;;  %v2461_v23 = vmul.f32 %v11254_v42, %v16296_v58  ;;  %v16301_v53 = vunpack.c.h.bf16 %v16300_v12  ;;  %v3075_v47 = vmax.f32 %v2787_v54, 0.0  ;;  %4064 = vmatprep.mubr.bf16.mxu0 %v3317_v24  ;;  %4225 = vmatprep.mubr.bf16.mxu1 %v3319_v61 }
 0x15b   :  { %v2470_v7 = vmul.f32 %v11254_v42, %v16297_v36  ;;  %v2478_v10 = vmul.f32 %v11247_v25, %v16299_v33  ;;  %v3083_v15 = vmax.f32 %v2795_v31, 0.0  ;;  %v16303_v37 = vunpack.c.h.bf16 %v16302_v51  ;;  %8027 = vmatpush3.bf16.msra.mxu0 %v9010_v63  ;;  %8138 = vmatprep.subr.bf16.mxu1 %v9020_v30  ;;  %v16310_v33 = vld [vmem:[#allocation44_spill] sm:$0xff]  ;;  %v16314_v30 = vld [vmem:[#allocation45_spill] sm:$0xff] }
 0x15c   :  { %v2487_v14 = vmul.f32 %v11247_v25, %v16301_v53  ;;  %v16305_v38 = vunpack.c.h.bf16 %v16304_v11  ;;  %v3092_v4 = vmax.f32 %v2804_v50, 0.0  ;;  %v3085_v59 = vmax.f32 %v2797_v49, 0.0  ;;  %8028 = vmatprep.subr.bf16.mxu0 %v9013_v46  ;;  %8139 = vmatpush3.bf16.msra.mxu1 %v9021_v21  ;;  %v16312_v53 = vld [vmem:[#allocation48_spill] sm:$0xff] }
 0x15d   :  { %v2480_v27 = vmul.f32 %v11250_v48, %v16303_v37  ;;  %v3094_v1 = vmax.f32 %v2806_v8, 0.0  ;;  %v2794_v55 = vadd.f32 %v11404_v26, %v2459_v13  ;;  %v2803_v28 = vadd.f32 %v11404_v26, %v2468_v32  ;;  %8140 = vmatprep.subr.bf16.mxu1 %v9022_v43 }
 0x15e   :  { %v2489_v34 = vmul.f32 %v11250_v48, %v16305_v38  ;;  %v2796_v52 = vadd.f32 %v11412_v29, %v2461_v23  ;;  %v2805_v3 = vadd.f32 %v11412_v29, %v2470_v7  ;;  %v2813_v62 = vadd.f32 %v11408_v17, %v2478_v10 }
 0x15f   :  { %v2822_v13 = vadd.f32 %v11408_v17, %v2487_v14  ;;  %v3316_v44 = vpack.c.bf16 %v3073_v16, %v3064_v19  ;;  %v3318_v56 = vpack.c.bf16 %v3075_v47, %v3066_v5  ;;  %v2815_v45 = vadd.f32 %v11416_v20, %v2480_v27  ;;  %8029 = vmatpush3.bf16.msra.mxu0 %v9015_v18  ;;  %v9023_v19 = vld [vmem:[%s15280_s3 + $0x180] sm:$0xff]  }
 0x160   :  { %v2824_v9 = vadd.f32 %v11416_v20, %v2489_v34  ;;  %v3326_v24 = vpack.c.bf16 %v3092_v4, %v3083_v15  ;;  %v3328_v54 = vpack.c.bf16 %v3094_v1, %v3085_v59  ;;  %v3082_v31 = vmax.f32 %v2794_v55, 0.0  ;;  %8478 = vmatprep.subr.bf16.mxu0 %v11652_v57  ;;  %8141 = vmatpush3.bf16.msra.mxu1 %v9023_v19 }
 0x161   :  { %v3091_v61 = vmax.f32 %v2803_v28, 0.0  ;;  %v3084_v50 = vmax.f32 %v2796_v52, 0.0  ;;  %v3093_v49 = vmax.f32 %v2805_v3, 0.0  ;;  %v16306_v8 = vunpack.c.l.bf16 %v16298_v2  ;;  %4065 = vmatmul.mubr.bf16.gmra.mxu0 %v3316_v44  ;;  %4226 = vmatmul.mubr.bf16.gmra.mxu1 %v3318_v56 }
 0x162   :  { %v3101_v32 = vmax.f32 %v2813_v62, 0.0  ;;  %v3110_v58 = vmax.f32 %v2822_v13, 0.0  ;;  %v16307_v23 = vunpack.c.l.bf16 %v16300_v12  ;;  %v16308_v7 = vunpack.c.l.bf16 %v16302_v51  ;;  %4072 = vmatprep.mubr.bf16.mxu0 %v3326_v24  ;;  %4233 = vmatprep.mubr.bf16.mxu1 %v3328_v54  ;;  %v16316_v51 = vld [vmem:[#allocation49_spill] sm:$0xff] }
 0x163   :  { %v2477_v39 = vmul.f32 %v11241_v22, %v16306_v8  ;;  %v3103_v40 = vmax.f32 %v2815_v45, 0.0  ;;  %v3112_v16 = vmax.f32 %v2824_v9, 0.0  ;;  %v16309_v5 = vunpack.c.l.bf16 %v16304_v11 }
 0x164   :  { %v2486_v36 = vmul.f32 %v11241_v22, %v16307_v23  ;;  %v2479_v63 = vmul.f32 %v11254_v42, %v16308_v7  ;;  %v16311_v10 = vunpack.c.h.bf16 %v16310_v33  ;;  %v16313_v14 = vunpack.c.h.bf16 %v16312_v53 }
 0x165   :  { %v2488_v2 = vmul.f32 %v11254_v42, %v16309_v5  ;;  %v16315_v47 = vunpack.c.h.bf16 %v16314_v30  ;;  %v16317_v37 = vunpack.c.h.bf16 %v16316_v51  ;;  %v2812_v11 = vadd.f32 %v11404_v26, %v2477_v39  ;;  %v16324_v39 = vld [vmem:[#allocation56_spill] sm:$0xff] }
 0x166   :  { %v2496_v12 = vmul.f32 %v11247_v25, %v16311_v10  ;;  %v2505_v46 = vmul.f32 %v11247_v25, %v16313_v14  ;;  %v3325_v38 = vpack.c.bf16 %v3091_v61, %v3082_v31  ;;  %v3327_v34 = vpack.c.bf16 %v3093_v49, %v3084_v50  ;;  %v16322_v50 = vld [vmem:[#allocation52_spill] sm:$0xff] }
 0x167   :  { %v2498_v15 = vmul.f32 %v11250_v48, %v16315_v47  ;;  %v2507_v27 = vmul.f32 %v11250_v48, %v16317_v37  ;;  %v2821_v4 = vadd.f32 %v11404_v26, %v2486_v36  ;;  %v2814_v59 = vadd.f32 %v11412_v29, %v2479_v63  ;;  %v16326_v36 = vld [vmem:[#allocation53_spill] sm:$0xff] }
 0x168   :  { %v3335_v1 = vpack.c.bf16 %v3110_v58, %v3101_v32  ;;  %v3337_v55 = vpack.c.bf16 %v3112_v16, %v3103_v40  ;;  %v2823_v28 = vadd.f32 %v11412_v29, %v2488_v2  ;;  %v2831_v52 = vadd.f32 %v11408_v17, %v2496_v12  ;;  %v16328_v40 = vld [vmem:[#allocation57_spill] sm:$0xff] }
 0x169   :  { %v2840_v3 = vadd.f32 %v11408_v17, %v2505_v46  ;;  %v2833_v18 = vadd.f32 %v11416_v20, %v2498_v15  ;;  %v2842_v21 = vadd.f32 %v11416_v20, %v2507_v27  ;;  %v16318_v62 = vunpack.c.l.bf16 %v16310_v33  ;;  %4073 = vmatmul.mubr.bf16.gmra.mxu0 %v3325_v38  ;;  %4234 = vmatmul.mubr.bf16.gmra.mxu1 %v3327_v34 }
 0x16a   :  { %v3100_v43 = vmax.f32 %v2812_v11, 0.0  ;;  %v16319_v44 = vunpack.c.l.bf16 %v16312_v53  ;;  %v16320_v45 = vunpack.c.l.bf16 %v16314_v30  ;;  %v16321_v24 = vunpack.c.l.bf16 %v16316_v51  ;;  %4080 = vmatprep.mubr.bf16.mxu0 %v3335_v1  ;;  %4241 = vmatprep.mubr.bf16.mxu1 %v3337_v55 }
 0x16b   :  { %v2495_v13 = vmul.f32 %v11241_v22, %v16318_v62  ;;  %v3109_v31 = vmax.f32 %v2821_v4, 0.0  ;;  %v3102_v61 = vmax.f32 %v2814_v59, 0.0  ;;  %v16323_v49 = vunpack.c.h.bf16 %v16322_v50 }
 0x16c   :  { %v2504_v56 = vmul.f32 %v11241_v22, %v16319_v44  ;;  %v2497_v9 = vmul.f32 %v11254_v42, %v16320_v45  ;;  %v2506_v54 = vmul.f32 %v11254_v42, %v16321_v24  ;;  %v16325_v19 = vunpack.c.h.bf16 %v16324_v39 }
 0x16d   :  { %v2514_v8 = vmul.f32 %v11247_v25, %v16323_v49  ;;  %v3111_v58 = vmax.f32 %v2823_v28, 0.0  ;;  %v3119_v23 = vmax.f32 %v2831_v52, 0.0  ;;  %v16327_v7 = vunpack.c.h.bf16 %v16326_v36  ;;  %v16338_v49 = vld [vmem:[#allocation61_spill] sm:$0xff] }
 0x16e   :  { %v2523_v32 = vmul.f32 %v11247_v25, %v16325_v19  ;;  %v16329_v16 = vunpack.c.h.bf16 %v16328_v40  ;;  %v3128_v2 = vmax.f32 %v2840_v3, 0.0  ;;  %v3121_v33 = vmax.f32 %v2833_v18, 0.0  ;;  %v16340_v19 = vld [vmem:[#allocation65_spill] sm:$0xff] }
 0x16f   :  { %v2516_v63 = vmul.f32 %v11250_v48, %v16327_v7  ;;  %v3130_v10 = vmax.f32 %v2842_v21, 0.0  ;;  %v2830_v12 = vadd.f32 %v11404_v26, %v2495_v13  ;;  %v2839_v53 = vadd.f32 %v11404_v26, %v2504_v56 }
 0x170   :  { %v2525_v5 = vmul.f32 %v11250_v48, %v16329_v16  ;;  %v2832_v14 = vadd.f32 %v11412_v29, %v2497_v9  ;;  %v2841_v46 = vadd.f32 %v11412_v29, %v2506_v54  ;;  %v2849_v30 = vadd.f32 %v11408_v17, %v2514_v8  ;;  %v16334_v9 = vld [vmem:[#allocation60_spill] sm:$0xff] }
 0x171   :  { %v2858_v47 = vadd.f32 %v11408_v17, %v2523_v32  ;;  %v3334_v15 = vpack.c.bf16 %v3109_v31, %v3100_v43  ;;  %v3336_v51 = vpack.c.bf16 %v3111_v58, %v3102_v61  ;;  %v2851_v37 = vadd.f32 %v11416_v20, %v2516_v63  ;;  %v16336_v31 = vld [vmem:[#allocation64_spill] sm:$0xff] }
 0x172   :  { %v2860_v27 = vadd.f32 %v11416_v20, %v2525_v5  ;;  %v3344_v11 = vpack.c.bf16 %v3128_v2, %v3119_v23  ;;  %v3346_v38 = vpack.c.bf16 %v3130_v10, %v3121_v33  ;;  %v3118_v34 = vmax.f32 %v2830_v12, 0.0 }
 0x173   :  { %v3127_v4 = vmax.f32 %v2839_v53, 0.0  ;;  %v3120_v59 = vmax.f32 %v2832_v14, 0.0  ;;  %v3129_v1 = vmax.f32 %v2841_v46, 0.0  ;;  %v16330_v55 = vunpack.c.l.bf16 %v16322_v50  ;;  %4081 = vmatmul.mubr.bf16.gmra.mxu0 %v3334_v15  ;;  %4242 = vmatmul.mubr.bf16.gmra.mxu1 %v3336_v51 }
 0x174   :  { %v3137_v52 = vmax.f32 %v2849_v30, 0.0  ;;  %v3146_v3 = vmax.f32 %v2858_v47, 0.0  ;;  %v16331_v18 = vunpack.c.l.bf16 %v16324_v39  ;;  %v16332_v62 = vunpack.c.l.bf16 %v16326_v36  ;;  %4088 = vmatprep.mubr.bf16.mxu0 %v3344_v11  ;;  %4249 = vmatprep.mubr.bf16.mxu1 %v3346_v38 }
 0x175   :  { %v2513_v28 = vmul.f32 %v11241_v22, %v16330_v55  ;;  %v3139_v43 = vmax.f32 %v2851_v37, 0.0  ;;  %v3148_v44 = vmax.f32 %v2860_v27, 0.0  ;;  %v16333_v56 = vunpack.c.l.bf16 %v16328_v40  ;;  %v16348_v55 = vld [vmem:[#allocation72_spill] sm:$0xff] }
 0x176   :  { %v2522_v21 = vmul.f32 %v11241_v22, %v16331_v18  ;;  %v2515_v13 = vmul.f32 %v11254_v42, %v16332_v62  ;;  %v16335_v24 = vunpack.c.h.bf16 %v16334_v9  ;;  %v16337_v61 = vunpack.c.h.bf16 %v16336_v31 }
 0x177   :  { %v2524_v45 = vmul.f32 %v11254_v42, %v16333_v56  ;;  %v16339_v8 = vunpack.c.h.bf16 %v16338_v49  ;;  %v16341_v32 = vunpack.c.h.bf16 %v16340_v19  ;;  %v2848_v23 = vadd.f32 %v11404_v26, %v2513_v28 }
 0x178   :  { %v2532_v54 = vmul.f32 %v11247_v25, %v16335_v24  ;;  %v2541_v50 = vmul.f32 %v11247_v25, %v16337_v61  ;;  %v3343_v36 = vpack.c.bf16 %v3127_v4, %v3118_v34  ;;  %v3345_v7 = vpack.c.bf16 %v3129_v1, %v3120_v59  ;;  %v16346_v4 = vld [vmem:[#allocation68_spill] sm:$0xff] }
 0x179   :  { %v2534_v39 = vmul.f32 %v11250_v48, %v16339_v8  ;;  %v2543_v58 = vmul.f32 %v11250_v48, %v16341_v32  ;;  %v2857_v63 = vadd.f32 %v11404_v26, %v2522_v21  ;;  %v2850_v40 = vadd.f32 %v11412_v29, %v2515_v13  ;;  %v16350_v21 = vld [vmem:[#allocation69_spill] sm:$0xff] }
 0x17a   :  { %v3353_v16 = vpack.c.bf16 %v3146_v3, %v3137_v52  ;;  %v3355_v5 = vpack.c.bf16 %v3148_v44, %v3139_v43  ;;  %v2859_v2 = vadd.f32 %v11412_v29, %v2524_v45  ;;  %v2867_v33 = vadd.f32 %v11408_v17, %v2532_v54  ;;  %v16352_v43 = vld [vmem:[#allocation73_spill] sm:$0xff] }
 0x17b   :  { %v2876_v10 = vadd.f32 %v11408_v17, %v2541_v50  ;;  %v2869_v12 = vadd.f32 %v11416_v20, %v2534_v39  ;;  %v2878_v53 = vadd.f32 %v11416_v20, %v2543_v58  ;;  %v16342_v14 = vunpack.c.l.bf16 %v16334_v9  ;;  %4089 = vmatmul.mubr.bf16.gmra.mxu0 %v3343_v36  ;;  %4250 = vmatmul.mubr.bf16.gmra.mxu1 %v3345_v7 }
 0x17c   :  { %v3136_v30 = vmax.f32 %v2848_v23, 0.0  ;;  %v16343_v47 = vunpack.c.l.bf16 %v16336_v31  ;;  %v16344_v51 = vunpack.c.l.bf16 %v16338_v49  ;;  %v16345_v27 = vunpack.c.l.bf16 %v16340_v19  ;;  %4096 = vmatprep.mubr.bf16.mxu0 %v3353_v16  ;;  %4257 = vmatprep.mubr.bf16.mxu1 %v3355_v5 }
 0x17d   :  { %v2531_v46 = vmul.f32 %v11241_v22, %v16342_v14  ;;  %v3145_v38 = vmax.f32 %v2857_v63, 0.0  ;;  %v3138_v34 = vmax.f32 %v2850_v40, 0.0  ;;  %v16347_v59 = vunpack.c.h.bf16 %v16346_v4 }
 0x17e   :  { %v2540_v15 = vmul.f32 %v11241_v22, %v16343_v47  ;;  %v2533_v37 = vmul.f32 %v11254_v42, %v16344_v51  ;;  %v2542_v11 = vmul.f32 %v11254_v42, %v16345_v27  ;;  %v16349_v28 = vunpack.c.h.bf16 %v16348_v55 }
 0x17f   :  { %v2550_v1 = vmul.f32 %v11247_v25, %v16347_v59  ;;  %v3147_v3 = vmax.f32 %v2859_v2, 0.0  ;;  %v3155_v18 = vmax.f32 %v2867_v33, 0.0  ;;  %v16351_v62 = vunpack.c.h.bf16 %v16350_v21  ;;  %v16362_v59 = vld [vmem:[#allocation77_spill] sm:$0xff] }
 0x180   :  { %v2559_v52 = vmul.f32 %v11247_v25, %v16349_v28  ;;  %v16353_v44 = vunpack.c.h.bf16 %v16352_v43  ;;  %v3164_v45 = vmax.f32 %v2876_v10, 0.0  ;;  %v3157_v9 = vmax.f32 %v2869_v12, 0.0  ;;  %v16364_v28 = vld [vmem:[#allocation81_spill] sm:$0xff] }
 0x181   :  { %v2552_v13 = vmul.f32 %v11250_v48, %v16351_v62  ;;  %v3166_v24 = vmax.f32 %v2878_v53, 0.0  ;;  %v2866_v54 = vadd.f32 %v11404_v26, %v2531_v46  ;;  %v2875_v31 = vadd.f32 %v11404_v26, %v2540_v15 }
 0x182   :  { %v2561_v56 = vmul.f32 %v11250_v48, %v16353_v44  ;;  %v2868_v61 = vadd.f32 %v11412_v29, %v2533_v37  ;;  %v2877_v50 = vadd.f32 %v11412_v29, %v2542_v11  ;;  %v2885_v49 = vadd.f32 %v11408_v17, %v2550_v1  ;;  %v16358_v37 = vld [vmem:[#allocation76_spill] sm:$0xff] }
 0x183   :  { %v2894_v8 = vadd.f32 %v11408_v17, %v2559_v52  ;;  %v3352_v39 = vpack.c.bf16 %v3145_v38, %v3136_v30  ;;  %v3354_v19 = vpack.c.bf16 %v3147_v3, %v3138_v34  ;;  %v2887_v32 = vadd.f32 %v11416_v20, %v2552_v13  ;;  %v16360_v38 = vld [vmem:[#allocation80_spill] sm:$0xff] }
 0x184   :  { %v2896_v58 = vadd.f32 %v11416_v20, %v2561_v56  ;;  %v3362_v23 = vpack.c.bf16 %v3164_v45, %v3155_v18  ;;  %v3364_v36 = vpack.c.bf16 %v3166_v24, %v3157_v9  ;;  %v3154_v7 = vmax.f32 %v2866_v54, 0.0 }
 0x185   :  { %v3163_v63 = vmax.f32 %v2875_v31, 0.0  ;;  %v3156_v40 = vmax.f32 %v2868_v61, 0.0  ;;  %v3165_v16 = vmax.f32 %v2877_v50, 0.0  ;;  %v16354_v5 = vunpack.c.l.bf16 %v16346_v4  ;;  %4097 = vmatmul.mubr.bf16.gmra.mxu0 %v3352_v39  ;;  %4258 = vmatmul.mubr.bf16.gmra.mxu1 %v3354_v19 }
 0x186   :  { %v3173_v33 = vmax.f32 %v2885_v49, 0.0  ;;  %v3182_v10 = vmax.f32 %v2894_v8, 0.0  ;;  %v16355_v12 = vunpack.c.l.bf16 %v16348_v55  ;;  %v16356_v14 = vunpack.c.l.bf16 %v16350_v21  ;;  %4104 = vmatprep.mubr.bf16.mxu0 %v3362_v23  ;;  %4265 = vmatprep.mubr.bf16.mxu1 %v3364_v36 }
 0x187   :  { %v2549_v2 = vmul.f32 %v11241_v22, %v16354_v5  ;;  %v3175_v30 = vmax.f32 %v2887_v32, 0.0  ;;  %v3184_v47 = vmax.f32 %v2896_v58, 0.0  ;;  %v16357_v15 = vunpack.c.l.bf16 %v16352_v43  ;;  %v16372_v5 = vld [vmem:[#allocation88_spill] sm:$0xff] }
 0x188   :  { %v2558_v53 = vmul.f32 %v11241_v22, %v16355_v12  ;;  %v2551_v46 = vmul.f32 %v11254_v42, %v16356_v14  ;;  %v16359_v27 = vunpack.c.h.bf16 %v16358_v37  ;;  %v16361_v34 = vunpack.c.h.bf16 %v16360_v38 }
 0x189   :  { %v2560_v51 = vmul.f32 %v11254_v42, %v16357_v15  ;;  %v16363_v1 = vunpack.c.h.bf16 %v16362_v59  ;;  %v16365_v52 = vunpack.c.h.bf16 %v16364_v28  ;;  %v2884_v18 = vadd.f32 %v11404_v26, %v2549_v2 }
 0x18a   :  { %v2568_v11 = vmul.f32 %v11247_v25, %v16359_v27  ;;  %v2577_v4 = vmul.f32 %v11247_v25, %v16361_v34  ;;  %v3361_v21 = vpack.c.bf16 %v3163_v63, %v3154_v7  ;;  %v3363_v62 = vpack.c.bf16 %v3165_v16, %v3156_v40  ;;  %v16370_v63 = vld [vmem:[#allocation84_spill] sm:$0xff] }
 0x18b   :  { %v2570_v55 = vmul.f32 %v11250_v48, %v16363_v1  ;;  %v2579_v3 = vmul.f32 %v11250_v48, %v16365_v52  ;;  %v2893_v13 = vadd.f32 %v11404_v26, %v2558_v53  ;;  %v2886_v43 = vadd.f32 %v11412_v29, %v2551_v46  ;;  %v16374_v53 = vld [vmem:[#allocation85_spill] sm:$0xff] }
 0x18c   :  { %v3371_v44 = vpack.c.bf16 %v3182_v10, %v3173_v33  ;;  %v3373_v56 = vpack.c.bf16 %v3184_v47, %v3175_v30  ;;  %v2895_v45 = vadd.f32 %v11412_v29, %v2560_v51  ;;  %v2903_v9 = vadd.f32 %v11408_v17, %v2568_v11  ;;  %v16376_v30 = vld [vmem:[#allocation89_spill] sm:$0xff] }
 0x18d   :  { %v2912_v24 = vadd.f32 %v11408_v17, %v2577_v4  ;;  %v2905_v54 = vadd.f32 %v11416_v20, %v2570_v55  ;;  %v2914_v31 = vadd.f32 %v11416_v20, %v2579_v3  ;;  %v16366_v61 = vunpack.c.l.bf16 %v16358_v37  ;;  %4105 = vmatmul.mubr.bf16.gmra.mxu0 %v3361_v21  ;;  %4266 = vmatmul.mubr.bf16.gmra.mxu1 %v3363_v62 }
 0x18e   :  { %v3172_v49 = vmax.f32 %v2884_v18, 0.0  ;;  %v16367_v8 = vunpack.c.l.bf16 %v16360_v38  ;;  %v16368_v19 = vunpack.c.l.bf16 %v16362_v59  ;;  %v16369_v58 = vunpack.c.l.bf16 %v16364_v28  ;;  %4112 = vmatprep.mubr.bf16.mxu0 %v3371_v44  ;;  %4273 = vmatprep.mubr.bf16.mxu1 %v3373_v56 }
 0x18f   :  { %v2567_v50 = vmul.f32 %v11241_v22, %v16366_v61  ;;  %v3181_v36 = vmax.f32 %v2893_v13, 0.0  ;;  %v3174_v7 = vmax.f32 %v2886_v43, 0.0  ;;  %v16371_v40 = vunpack.c.h.bf16 %v16370_v63 }
 0x190   :  { %v2576_v39 = vmul.f32 %v11241_v22, %v16367_v8  ;;  %v2569_v32 = vmul.f32 %v11254_v42, %v16368_v19  ;;  %v2578_v23 = vmul.f32 %v11254_v42, %v16369_v58  ;;  %v16373_v2 = vunpack.c.h.bf16 %v16372_v5 }
 0x191   :  { %v2586_v16 = vmul.f32 %v11247_v25, %v16371_v40  ;;  %v3183_v10 = vmax.f32 %v2895_v45, 0.0  ;;  %v3191_v12 = vmax.f32 %v2903_v9, 0.0  ;;  %v16375_v14 = vunpack.c.h.bf16 %v16374_v53  ;;  %v16386_v40 = vld [vmem:[#allocation93_spill] sm:$0xff] }
 0x192   :  { %v2595_v33 = vmul.f32 %v11247_v25, %v16373_v2  ;;  %v16377_v47 = vunpack.c.h.bf16 %v16376_v30  ;;  %v3200_v51 = vmax.f32 %v2912_v24, 0.0  ;;  %v3193_v37 = vmax.f32 %v2905_v54, 0.0  ;;  %v16388_v2 = vld [vmem:[#allocation97_spill] sm:$0xff] }
 0x193   :  { %v2588_v46 = vmul.f32 %v11250_v48, %v16375_v14  ;;  %v3202_v27 = vmax.f32 %v2914_v31, 0.0  ;;  %v2902_v11 = vadd.f32 %v11404_v26, %v2567_v50  ;;  %v2911_v38 = vadd.f32 %v11404_v26, %v2576_v39 }
 0x194   :  { %v2597_v15 = vmul.f32 %v11250_v48, %v16377_v47  ;;  %v2904_v34 = vadd.f32 %v11412_v29, %v2569_v32  ;;  %v2913_v4 = vadd.f32 %v11412_v29, %v2578_v23  ;;  %v2921_v59 = vadd.f32 %v11408_v17, %v2586_v16  ;;  %v16382_v32 = vld [vmem:[#allocation92_spill] sm:$0xff] }
 0x195   :  { %v2930_v1 = vadd.f32 %v11408_v17, %v2595_v33  ;;  %v3370_v55 = vpack.c.bf16 %v3181_v36, %v3172_v49  ;;  %v3372_v28 = vpack.c.bf16 %v3183_v10, %v3174_v7  ;;  %v2923_v52 = vadd.f32 %v11416_v20, %v2588_v46  ;;  %v16384_v36 = vld [vmem:[#allocation96_spill] sm:$0xff] }
 0x196   :  { %v2932_v3 = vadd.f32 %v11416_v20, %v2597_v15  ;;  %v3380_v18 = vpack.c.bf16 %v3200_v51, %v3191_v12  ;;  %v3382_v21 = vpack.c.bf16 %v3202_v27, %v3193_v37  ;;  %v3190_v62 = vmax.f32 %v2902_v11, 0.0 }
 0x197   :  { %v3199_v13 = vmax.f32 %v2911_v38, 0.0  ;;  %v3192_v43 = vmax.f32 %v2904_v34, 0.0  ;;  %v3201_v44 = vmax.f32 %v2913_v4, 0.0  ;;  %v16378_v56 = vunpack.c.l.bf16 %v16370_v63  ;;  %4113 = vmatmul.mubr.bf16.gmra.mxu0 %v3370_v55  ;;  %4274 = vmatmul.mubr.bf16.gmra.mxu1 %v3372_v28 }
 0x198   :  { %v3209_v9 = vmax.f32 %v2921_v59, 0.0  ;;  %v3218_v24 = vmax.f32 %v2930_v1, 0.0  ;;  %v16379_v54 = vunpack.c.l.bf16 %v16372_v5  ;;  %v16380_v61 = vunpack.c.l.bf16 %v16374_v53  ;;  %4120 = vmatprep.mubr.bf16.mxu0 %v3380_v18  ;;  %4281 = vmatprep.mubr.bf16.mxu1 %v3382_v21 }
 0x199   :  { %v2585_v45 = vmul.f32 %v11241_v22, %v16378_v56  ;;  %v3211_v49 = vmax.f32 %v2923_v52, 0.0  ;;  %v3220_v8 = vmax.f32 %v2932_v3, 0.0  ;;  %v16381_v39 = vunpack.c.l.bf16 %v16376_v30 }
 0x19a   :  { %v2594_v31 = vmul.f32 %v11241_v22, %v16379_v54  ;;  %v2587_v50 = vmul.f32 %v11254_v42, %v16380_v61  ;;  %v16383_v58 = vunpack.c.h.bf16 %v16382_v32  ;;  %v16385_v7 = vunpack.c.h.bf16 %v16384_v36 }
 0x19b   :  { %v2596_v19 = vmul.f32 %v11254_v42, %v16381_v39  ;;  %v16387_v16 = vunpack.c.h.bf16 %v16386_v40  ;;  %v16389_v33 = vunpack.c.h.bf16 %v16388_v2  ;;  %v11878_v12 = vrot.slane %v11223_v60, %v11191_v0 }
 0x19c   :  { %v2604_v23 = vmul.f32 %v11247_v25, %v16383_v58  ;;  %v2613_v63 = vmul.f32 %v11247_v25, %v16385_v7  ;;  %v11882_v53 = vrot.slane %v11226_v35, %v11191_v0  ;;  %v2920_v14 = vadd.f32 %v11404_v26, %v2585_v45 }
 0x19d   :  { %v2606_v5 = vmul.f32 %v11250_v48, %v16387_v16  ;;  %v2615_v10 = vmul.f32 %v11250_v48, %v16389_v33  ;;  %v3379_v46 = vpack.c.bf16 %v3199_v13, %v3190_v62  ;;  %v3381_v30 = vpack.c.bf16 %v3201_v44, %v3192_v43  ;;  %v16394_v62 = vld [vmem:[#allocation100_spill] sm:$0xff] }
 0x19e   :  { %v3389_v47 = vpack.c.bf16 %v3218_v24, %v3209_v9  ;;  %v2929_v15 = vadd.f32 %v11404_v26, %v2594_v31  ;;  %v3391_v51 = vpack.c.bf16 %v3220_v8, %v3211_v49  ;;  %v2922_v37 = vadd.f32 %v11412_v29, %v2587_v50  ;;  %v16396_v44 = vld [vmem:[#allocation104_spill] sm:$0xff]  ;;  %v16398_v9 = vld [vmem:[#allocation101_spill] sm:$0xff] }
 0x19f   :  { %v2931_v27 = vadd.f32 %v11412_v29, %v2596_v19  ;;  %v2939_v11 = vadd.f32 %v11408_v17, %v2604_v23  ;;  %v2948_v60 = vadd.f32 %v11408_v17, %v2613_v63  ;;  %v2941_v38 = vadd.f32 %v11416_v20, %v2606_v5  ;;  %4121 = vmatmul.mubr.bf16.gmra.mxu0 %v3379_v46  ;;  %v16400_v49 = vld [vmem:[#allocation105_spill] sm:$0xff] }
 0x1a0   :  { %v2950_v35 = vadd.f32 %v11416_v20, %v2615_v10  ;;  %v16390_v34 = vunpack.c.l.bf16 %v16382_v32  ;;  %v3208_v59 = vmax.f32 %v2920_v14, 0.0  ;;  %v16391_v1 = vunpack.c.l.bf16 %v16384_v36  ;;  %4282 = vmatmul.mubr.bf16.gmra.mxu1 %v3381_v30  ;;  %4128 = vmatprep.mubr.bf16.mxu0 %v3389_v47 }
 0x1a1   :  { %v16392_v28 = vunpack.c.l.bf16 %v16386_v40  ;;  %v16393_v3 = vunpack.c.l.bf16 %v16388_v2  ;;  %v3217_v21 = vmax.f32 %v2929_v15, 0.0  ;;  %v16395_v13 = vunpack.c.h.bf16 %v16394_v62  ;;  %4289 = vmatprep.mubr.bf16.mxu1 %v3391_v51 }
 0x1a2   :  { %v2603_v4 = vmul.f32 %v11241_v22, %v16390_v34  ;;  %v2612_v55 = vmul.f32 %v11241_v22, %v16391_v1  ;;  %v16397_v56 = vunpack.c.h.bf16 %v16396_v44  ;;  %v16399_v24 = vunpack.c.h.bf16 %v16398_v9 }
 0x1a3   :  { %v2605_v52 = vmul.f32 %v11254_v42, %v16392_v28  ;;  %v2614_v18 = vmul.f32 %v11254_v42, %v16393_v3  ;;  %v2622_v43 = vmul.f32 %v11247_v25, %v16395_v13  ;;  %v3210_v31 = vmax.f32 %v2922_v37, 0.0  ;;  %v16408_v13 = vld [vmem:[#allocation112_spill] sm:$0xff] }
 0x1a4   :  { %v2631_v45 = vmul.f32 %v11247_v25, %v16397_v56  ;;  %v2624_v54 = vmul.f32 %v11250_v48, %v16399_v24  ;;  %v3219_v61 = vmax.f32 %v2931_v27, 0.0  ;;  %v3227_v50 = vmax.f32 %v2939_v11, 0.0  ;;  %v16410_v56 = vld [vmem:[#allocation109_spill] sm:$0xff] }
 0x1a5   :  { %v16401_v8 = vunpack.c.h.bf16 %v16400_v49  ;;  %v3236_v19 = vmax.f32 %v2948_v60, 0.0  ;;  %v3229_v32 = vmax.f32 %v2941_v38, 0.0  ;;  %v3238_v58 = vmax.f32 %v2950_v35, 0.0  ;;  %v16412_v24 = vld [vmem:[#allocation113_spill] sm:$0xff] }
 0x1a6   :  { %v2938_v23 = vadd.f32 %v11404_v26, %v2603_v4  ;;  %v11919_v36 = vrot.slane %v11229_v6, %v11191_v0  ;;  %v2947_v7 = vadd.f32 %v11404_v26, %v2612_v55  ;;  %v2940_v63 = vadd.f32 %v11412_v29, %v2605_v52 }
 0x1a7   :  { %v2633_v39 = vmul.f32 %v11250_v48, %v16401_v8  ;;  %v2949_v40 = vadd.f32 %v11412_v29, %v2614_v18  ;;  %v2957_v16 = vadd.f32 %v11408_v17, %v2622_v43  ;;  %v2966_v5 = vadd.f32 %v11408_v17, %v2631_v45  ;;  %v16406_v18 = vld [vmem:[#allocation108_spill] sm:$0xff] }
 0x1a8   :  { %v2959_v2 = vadd.f32 %v11416_v20, %v2624_v54  ;;  %v16402_v33 = vunpack.c.l.bf16 %v16394_v62  ;;  %v3388_v14 = vpack.c.bf16 %v3217_v21, %v3208_v59  ;;  %v3390_v46 = vpack.c.bf16 %v3219_v61, %v3210_v31 }
 0x1a9   :  { %v2968_v6 = vadd.f32 %v11416_v20, %v2633_v39  ;;  %v16403_v30 = vunpack.c.l.bf16 %v16396_v44  ;;  %v11936_v15 = vrot.slane %v11233_v41, %v11191_v0  ;;  %v3398_v51 = vpack.c.bf16 %v3236_v19, %v3227_v50 }
 0x1aa   :  { %v2621_v10 = vmul.f32 %v11241_v22, %v16402_v33  ;;  %v3400_v37 = vpack.c.bf16 %v3238_v58, %v3229_v32  ;;  %v3226_v27 = vmax.f32 %v2938_v23, 0.0  ;;  %v3235_v11 = vmax.f32 %v2947_v7, 0.0  ;;  %4129 = vmatmul.mubr.bf16.gmra.mxu0 %v3388_v14  ;;  %4290 = vmatmul.mubr.bf16.gmra.mxu1 %v3390_v46 }
 0x1ab   :  { %v2630_v47 = vmul.f32 %v11241_v22, %v16403_v30  ;;  %v3228_v60 = vmax.f32 %v2940_v63, 0.0  ;;  %v3237_v38 = vmax.f32 %v2949_v40, 0.0  ;;  %v16404_v35 = vunpack.c.l.bf16 %v16398_v9  ;;  %4136 = vmatprep.mubr.bf16.mxu0 %v3398_v51 }
 0x1ac   :  { %v3245_v4 = vmax.f32 %v2957_v16, 0.0  ;;  %v3254_v59 = vmax.f32 %v2966_v5, 0.0  ;;  %v3247_v1 = vmax.f32 %v2959_v2, 0.0  ;;  %v2956_v55 = vadd.f32 %v11404_v26, %v2621_v10  ;;  %4297 = vmatprep.mubr.bf16.mxu1 %v3400_v37 }
 0x1ad   :  { %v2623_v34 = vmul.f32 %v11254_v42, %v16404_v35  ;;  %v3256_v28 = vmax.f32 %v2968_v6, 0.0  ;;  %v2965_v41 = vadd.f32 %v11404_v26, %v2630_v47  ;;  %v16405_v52 = vunpack.c.l.bf16 %v16400_v49  ;;  %v16418_v6 = vld [vmem:[#allocation4_spill] sm:$0xff] }
 0x1ae   :  { %v16407_v21 = vunpack.c.h.bf16 %v16406_v18  ;;  %v16409_v43 = vunpack.c.h.bf16 %v16408_v13  ;;  %v16411_v45 = vunpack.c.h.bf16 %v16410_v56  ;;  %v16413_v54 = vunpack.c.h.bf16 %v16412_v24  ;;  %v16420_v47 = vld [vmem:[#allocation8_spill] sm:$0xff] }
 0x1af   :  { %v2632_v3 = vmul.f32 %v11254_v42, %v16405_v52  ;;  %v3397_v61 = vpack.c.bf16 %v3235_v11, %v3226_v27  ;;  %v3399_v50 = vpack.c.bf16 %v3237_v38, %v3228_v60  ;;  %v2958_v49 = vadd.f32 %v11412_v29, %v2623_v34 }
 0x1b0   :  { %v2640_v62 = vmul.f32 %v11247_v25, %v16407_v21  ;;  %v2649_v44 = vmul.f32 %v11247_v25, %v16409_v43  ;;  %v2642_v9 = vmul.f32 %v11250_v48, %v16411_v45  ;;  %v2651_v31 = vmul.f32 %v11250_v48, %v16413_v54 }
 0x1b1   :  { %v16414_v8 = vunpack.c.l.bf16 %v16406_v18  ;;  %v3407_v19 = vpack.c.bf16 %v3254_v59, %v3245_v4  ;;  %v16415_v32 = vunpack.c.l.bf16 %v16408_v13  ;;  %v16416_v58 = vunpack.c.l.bf16 %v16410_v56  ;;  %v16424_v4 = vld [vmem:[#allocation5_spill] sm:$0xff] }
 0x1b2   :  { %v16417_v7 = vunpack.c.l.bf16 %v16412_v24  ;;  %v3409_v63 = vpack.c.bf16 %v3256_v28, %v3247_v1  ;;  %v3244_v40 = vmax.f32 %v2956_v55, 0.0  ;;  %v3253_v16 = vmax.f32 %v2965_v41, 0.0  ;;  %4137 = vmatmul.mubr.bf16.gmra.mxu0 %v3397_v61  ;;  %4298 = vmatmul.mubr.bf16.gmra.mxu1 %v3399_v50  ;;  %v16430_v61 = vld [vmem:[#allocation117_spill] sm:$0xff] }
 0x1b3   :  { %v2639_v39 = vmul.f32 %v11241_v22, %v16414_v8  ;;  %v2648_v25 = vmul.f32 %v11241_v22, %v16415_v32  ;;  %v2641_v23 = vmul.f32 %v11254_v42, %v16416_v58  ;;  %v2967_v5 = vadd.f32 %v11412_v29, %v2632_v3  ;;  %4144 = vmatprep.mubr.bf16.mxu0 %v3407_v19 }
 0x1b4   :  { %v2650_v48 = vmul.f32 %v11254_v42, %v16417_v7  ;;  %v2975_v2 = vadd.f32 %v11408_v17, %v2640_v62  ;;  %v2984_v33 = vadd.f32 %v11408_v17, %v2649_v44  ;;  %v2977_v10 = vadd.f32 %v11416_v20, %v2642_v9  ;;  %4305 = vmatprep.mubr.bf16.mxu1 %v3409_v63  ;;  %v16428_v62 = vld [vmem:[#allocation24_spill] sm:$0xff]  ;;  %v16429_v9 = vld [vmem:[#allocation7_spill] sm:$0xff] }
 0x1b5   :  { %v2986_v22 = vadd.f32 %v11416_v20, %v2651_v31  ;;  %v3246_v14 = vmax.f32 %v2958_v49, 0.0  ;;  %v2974_v46 = vadd.f32 %v11404_v26, %v2639_v39  ;;  %v16419_v30 = vunpack.c.h.bf16 %v16418_v6 }
 0x1b6   :  { %v16421_v51 = vunpack.c.h.bf16 %v16420_v47  ;;  %v2983_v27 = vadd.f32 %v11404_v26, %v2648_v25  ;;  %v2976_v11 = vadd.f32 %v11412_v29, %v2641_v23  ;;  %v2985_v17 = vadd.f32 %v11412_v29, %v2650_v48  ;;  %v16426_v26 = vld [vmem:[#allocation9_spill] sm:$0xff] }
 0x1b7   :  { %v2374_v42 = vmul.f32 %v11882_v53, %v16419_v30  ;;  %v16422_v60 = vunpack.c.l.bf16 %v16418_v6  ;;  %v3255_v38 = vmax.f32 %v2967_v5, 0.0  ;;  %v16423_v35 = vunpack.c.l.bf16 %v16420_v47  ;;  %v16437_v30 = vld [vmem:[#allocation11_spill] sm:$0xff] }
 0x1b8   :  { %v2383_v37 = vmul.f32 %v11882_v53, %v16421_v51  ;;  %v16425_v59 = vunpack.c.h.bf16 %v16424_v4  ;;  %v16427_v55 = vunpack.c.h.bf16 %v16426_v26  ;;  %v3263_v29 = vmax.f32 %v2975_v2, 0.0  ;;  %v16439_v51 = vld [vmem:[#allocation13_spill] sm:$0xff] }
 0x1b9   :  { %v2373_v20 = vmul.f32 %v11878_v12, %v16422_v60  ;;  %v2382_v34 = vmul.f32 %v11878_v12, %v16423_v35  ;;  %v3272_v41 = vmax.f32 %v2984_v33, 0.0  ;;  %v3265_v52 = vmax.f32 %v2977_v10, 0.0  ;;  %v16433_v33 = vld [vmem:[#allocation10_spill] sm:$0xff] }
 0x1ba   :  { %v2376_v1 = vmul.f32 %v11936_v15, %v16425_v59  ;;  %v2385_v28 = vmul.f32 %v11936_v15, %v16427_v55  ;;  %v3274_v3 = vmax.f32 %v2986_v22, 0.0  ;;  %v3406_v18 = vpack.c.bf16 %v3253_v16, %v3244_v40 }
 0x1bb   :  { %v3262_v21 = vmax.f32 %v2974_v46, 0.0  ;;  %v2709_v13 = vadd.f32 %v16428_v62, %v2374_v42  ;;  %v2718_v43 = vadd.f32 %v16428_v62, %v2383_v37  ;;  %v3271_v44 = vmax.f32 %v2983_v27, 0.0 }
 0x1bc   :  { %v3264_v56 = vmax.f32 %v2976_v11, 0.0  ;;  %v3273_v45 = vmax.f32 %v2985_v17, 0.0  ;;  %v2708_v24 = vadd.f32 %v16429_v9, %v2373_v20  ;;  %v3408_v54 = vpack.c.bf16 %v3255_v38, %v3246_v14  ;;  %4145 = vmatmul.mubr.bf16.gmra.mxu0 %v3406_v18  ;;  %v16435_v14 = vld [vmem:[#allocation12_spill] sm:$0xff] }
 0x1bd   :  { %v2717_v31 = vadd.f32 %v16429_v9, %v2382_v34  ;;  %v2711_v50 = vadd.f32 %v16430_v61, %v2376_v1  ;;  %v2720_v49 = vadd.f32 %v16430_v61, %v2385_v28  ;;  %v3416_v8 = vpack.c.bf16 %v3272_v41, %v3263_v29  ;;  %v16441_v17 = vld [vmem:[#allocation116_spill] sm:$0xff]  ;;  %v16446_v28 = vld [vmem:[#allocation14_spill] sm:$0xff] }
 0x1be   :  { %v3418_v39 = vpack.c.bf16 %v3274_v3, %v3265_v52  ;;  %v2997_v19 = vmax.f32 %v2709_v13, 0.0  ;;  %v3006_v32 = vmax.f32 %v2718_v43, 0.0  ;;  %v16431_v25 = vunpack.c.l.bf16 %v16424_v4  ;;  %4306 = vmatmul.mubr.bf16.gmra.mxu1 %v3408_v54 }
 0x1bf   :  { %v16432_v23 = vunpack.c.l.bf16 %v16426_v26  ;;  %v3415_v48 = vpack.c.bf16 %v3271_v44, %v3262_v21  ;;  %v3417_v63 = vpack.c.bf16 %v3273_v45, %v3264_v56  ;;  %v2996_v40 = vmax.f32 %v2708_v24, 0.0  ;;  %4152 = vmatprep.mubr.bf16.mxu0 %v3416_v8  ;;  %v16448_v21 = vld [vmem:[#allocation16_spill] sm:$0xff] }
 0x1c0   :  { %v2375_v58 = vmul.f32 %v11919_v36, %v16431_v25  ;;  %v3005_v16 = vmax.f32 %v2717_v31, 0.0  ;;  %v2999_v5 = vmax.f32 %v2711_v50, 0.0  ;;  %v3008_v2 = vmax.f32 %v2720_v49, 0.0  ;;  %4313 = vmatprep.mubr.bf16.mxu1 %v3418_v39 }
 0x1c1   :  { %v2384_v7 = vmul.f32 %v11919_v36, %v16432_v23  ;;  %v16434_v10 = vunpack.c.h.bf16 %v16433_v33  ;;  %v16436_v46 = vunpack.c.h.bf16 %v16435_v14  ;;  %v16438_v42 = vunpack.c.h.bf16 %v16437_v30 }
 0x1c2   :  { %v16440_v37 = vunpack.c.h.bf16 %v16439_v51  ;;  %v3285_v11 = vpack.c.bf16 %v3006_v32, %v2997_v19  ;;  %v2710_v60 = vadd.f32 %v16441_v17, %v2375_v58  ;;  %v16442_v38 = vunpack.c.l.bf16 %v16433_v33 }
 0x1c3   :  { %v2392_v22 = vmul.f32 %v11882_v53, %v16434_v10  ;;  %v2401_v6 = vmul.f32 %v11882_v53, %v16436_v46  ;;  %v2394_v47 = vmul.f32 %v11936_v15, %v16438_v42  ;;  %v2719_v20 = vadd.f32 %v16441_v17, %v2384_v7 }
 0x1c4   :  { %v2403_v27 = vmul.f32 %v11936_v15, %v16440_v37  ;;  %v2391_v35 = vmul.f32 %v11878_v12, %v16442_v38  ;;  %v16443_v34 = vunpack.c.l.bf16 %v16435_v14  ;;  %v16444_v59 = vunpack.c.l.bf16 %v16437_v30  ;;  %4153 = vmatmul.mubr.bf16.gmra.mxu0 %v3415_v48 }
 0x1c5   :  { %v16445_v26 = vunpack.c.l.bf16 %v16439_v51  ;;  %v16447_v29 = vunpack.c.h.bf16 %v16446_v28  ;;  %v3284_v52 = vpack.c.bf16 %v3005_v16, %v2996_v40  ;;  %v3287_v3 = vpack.c.bf16 %v3008_v2, %v2999_v5  ;;  %v16452_v40 = vld [vmem:[#allocation15_spill] sm:$0xff]  ;;  %v16454_v2 = vld [vmem:[#allocation17_spill] sm:$0xff]  ;;  %4354 = vmatprep.mubr.bf16.mxu0 %v3285_v11 }
 0x1c6   :  { %v2400_v4 = vmul.f32 %v11878_v12, %v16443_v34  ;;  %v2393_v1 = vmul.f32 %v11919_v36, %v16444_v59  ;;  %v2727_v18 = vadd.f32 %v16428_v62, %v2392_v22  ;;  %v16449_v13 = vunpack.c.h.bf16 %v16448_v21  ;;  %4314 = vmatmul.mubr.bf16.gmra.mxu1 %v3417_v63 }
 0x1c7   :  { %v2402_v55 = vmul.f32 %v11919_v36, %v16445_v26  ;;  %v2410_v41 = vmul.f32 %v11882_v53, %v16447_v29  ;;  %v2736_v44 = vadd.f32 %v16428_v62, %v2401_v6  ;;  %v2729_v56 = vadd.f32 %v16430_v61, %v2394_v47  ;;  %4515 = vmatprep.mubr.bf16.mxu1 %v3287_v3  ;;  %v16458_v26 = vld [vmem:[#allocation18_spill] sm:$0xff]  ;;  %v9025_v29 = vld [vmem:[%s15280_s3 + $0x230] sm:$0xff]  }
 0x1c8   :  { %v2419_v43 = vmul.f32 %v11882_v53, %v16449_v13  ;;  %v2738_v45 = vadd.f32 %v16430_v61, %v2403_v27  ;;  %v16450_v24 = vunpack.c.l.bf16 %v16446_v28  ;;  %v2998_v31 = vmax.f32 %v2710_v60, 0.0 }
 0x1c9   :  { %v3007_v50 = vmax.f32 %v2719_v20, 0.0  ;;  %v2726_v49 = vadd.f32 %v16429_v9, %v2391_v35  ;;  %v16451_v8 = vunpack.c.l.bf16 %v16448_v21  ;;  %v2735_v19 = vadd.f32 %v16429_v9, %v2400_v4  ;;  %v16460_v21 = vld [vmem:[#allocation20_spill] sm:$0xff] }
 0x1ca   :  { %v2409_v54 = vmul.f32 %v11878_v12, %v16450_v24  ;;  %v2728_v32 = vadd.f32 %v16441_v17, %v2393_v1  ;;  %v2737_v25 = vadd.f32 %v16441_v17, %v2402_v55  ;;  %v2745_v58 = vadd.f32 %v16428_v62, %v2410_v41 }
 0x1cb   :  { %v2418_v39 = vmul.f32 %v11878_v12, %v16451_v8  ;;  %v3015_v23 = vmax.f32 %v2727_v18, 0.0  ;;  %v2754_v7 = vadd.f32 %v16428_v62, %v2419_v43  ;;  %v16453_v16 = vunpack.c.h.bf16 %v16452_v40 }
 0x1cc   :  { %v16455_v33 = vunpack.c.h.bf16 %v16454_v2  ;;  %v3024_v22 = vmax.f32 %v2736_v44, 0.0  ;;  %v3017_v14 = vmax.f32 %v2729_v56, 0.0  ;;  %v3026_v46 = vmax.f32 %v2738_v45, 0.0  ;;  %v16462_v56 = vld [vmem:[#allocation19_spill] sm:$0xff]  ;;  %4355 = vmatmul.mubr.bf16.vlgmr.msra.gmra.mxu0 %v3284_v52 }
 0x1cd   :  { %v2412_v5 = vmul.f32 %v11936_v15, %v16453_v16  ;;  %v2744_v6 = vadd.f32 %v16429_v9, %v2409_v54  ;;  %v3286_v48 = vpack.c.bf16 %v3007_v50, %v2998_v31  ;;  %v2753_v63 = vadd.f32 %v16429_v9, %v2418_v39  ;;  %v16464_v54 = vld [vmem:[#allocation21_spill] sm:$0xff]  ;;  %8479 = vmatpush3.bf16.msra.mxu0 %v11652_v57  ;;  %v9026_v57 = vld [vmem:[%s15280_s3 + $0x228] sm:$0xff]  }
 0x1ce   :  { %v2421_v10 = vmul.f32 %v11936_v15, %v16455_v33  ;;  %v16456_v30 = vunpack.c.l.bf16 %v16452_v40  ;;  %v16457_v47 = vunpack.c.l.bf16 %v16454_v2  ;;  %v3014_v37 = vmax.f32 %v2726_v49, 0.0  ;;  %8480 = vmatprep.subr.bf16.mxu0 %v9025_v29 }
 0x1cf   :  { %v3023_v27 = vmax.f32 %v2735_v19, 0.0  ;;  %v3016_v11 = vmax.f32 %v2728_v32, 0.0  ;;  %v3025_v60 = vmax.f32 %v2737_v25, 0.0  ;;  %v3033_v20 = vmax.f32 %v2745_v58, 0.0  ;;  %4516 = vmatmul.mubr.bf16.vlgmr.msra.gmra.mxu1 %v3286_v48  ;;  %v16470_v48 = vld [vmem:[#allocation22_spill] sm:$0xff] }
 0x1d0   :  { %v2411_v42 = vmul.f32 %v11919_v36, %v16456_v30  ;;  %v2420_v51 = vmul.f32 %v11919_v36, %v16457_v47  ;;  %v3042_v38 = vmax.f32 %v2754_v7, 0.0  ;;  %v2747_v35 = vadd.f32 %v16430_v61, %v2412_v5 }
 0x1d1   :  { %v2756_v34 = vadd.f32 %v16430_v61, %v2421_v10  ;;  %v3294_v4 = vpack.c.bf16 %v3024_v22, %v3015_v23  ;;  %v3296_v59 = vpack.c.bf16 %v3026_v46, %v3017_v14  ;;  %v3032_v1 = vmax.f32 %v2744_v6, 0.0  ;;  %8481 = vmatpush3.bf16.msra.mxu0 %v9025_v29 }
 0x1d2   :  { %v16459_v55 = vunpack.c.h.bf16 %v16458_v26  ;;  %v3041_v41 = vmax.f32 %v2753_v63, 0.0  ;;  %v2746_v3 = vadd.f32 %v16441_v17, %v2411_v42  ;;  %v2755_v18 = vadd.f32 %v16441_v17, %v2420_v51  ;;  %v16472_v42 = vld [vmem:[#allocation26_spill] sm:$0xff]  ;;  %8482 = vmatprep.subr.bf16.mxu0 %v9026_v57 }
 0x1d3   :  { %v16461_v13 = vunpack.c.h.bf16 %v16460_v21  ;;  %v3293_v44 = vpack.c.bf16 %v3023_v27, %v3014_v37  ;;  %v16463_v45 = vunpack.c.h.bf16 %v16462_v56  ;;  %v16465_v31 = vunpack.c.h.bf16 %v16464_v54  ;;  %4362 = vmatprep.mubr.bf16.mxu0 %v3294_v4  ;;  %4523 = vmatprep.mubr.bf16.mxu1 %v3296_v59  ;;  %v16476_v59 = vld [vmem:[#allocation23_spill] sm:$0xff] }
 0x1d4   :  { %v2428_v28 = vmul.f32 %v11882_v53, %v16459_v55  ;;  %v3295_v49 = vpack.c.bf16 %v3025_v60, %v3016_v11  ;;  %v3303_v8 = vpack.c.bf16 %v3042_v38, %v3033_v20  ;;  %v3035_v39 = vmax.f32 %v2747_v35, 0.0  ;;  %v16478_v55 = vld [vmem:[#allocation27_spill] sm:$0xff] }
 0x1d5   :  { %v2437_v43 = vmul.f32 %v11882_v53, %v16461_v13  ;;  %v2430_v24 = vmul.f32 %v11936_v15, %v16463_v45  ;;  %v2439_v50 = vmul.f32 %v11936_v15, %v16465_v31  ;;  %v3044_v19 = vmax.f32 %v2756_v34, 0.0  ;;  %v9027_v13 = vld [vmem:[%s15280_s3 + $0x220] sm:$0xff]   ;;  %4363 = vmatmul.mubr.bf16.gmra.mxu0 %v3293_v44 }
 0x1d6   :  { %v2763_v32 = vadd.f32 %v16428_v62, %v2428_v28  ;;  %v16466_v25 = vunpack.c.l.bf16 %v16458_v26  ;;  %v16467_v23 = vunpack.c.l.bf16 %v16460_v21  ;;  %v12099_v52 = vpack.c.bf16 %v3041_v41, %v3032_v1  ;;  %4370 = vmatprep.mubr.bf16.mxu0 %v3303_v8  ;;  %8483 = vmatpush3.bf16.msra.mxu0 %v9026_v57  ;;  %v9028_v57 = vld [vmem:[%s15280_s3 + $0x218] sm:$0xff]  }
 0x1d7   :  { %v3034_v40 = vmax.f32 %v2746_v3, 0.0  ;;  %v3043_v16 = vmax.f32 %v2755_v18, 0.0  ;;  %v2772_v5 = vadd.f32 %v16428_v62, %v2437_v43  ;;  %v2765_v2 = vadd.f32 %v16430_v61, %v2430_v24  ;;  %4524 = vmatmul.mubr.bf16.gmra.mxu1 %v3295_v49  ;;  %8484 = vmatprep.subr.bf16.mxu0 %v9027_v13 }
 0x1d8   :  { %v2427_v58 = vmul.f32 %v11878_v12, %v16466_v25  ;;  %v2436_v7 = vmul.f32 %v11878_v12, %v16467_v23  ;;  %v2774_v33 = vadd.f32 %v16430_v61, %v2439_v50  ;;  %v16468_v10 = vunpack.c.l.bf16 %v16462_v56 }
 0x1d9   :  { %v16469_v14 = vunpack.c.l.bf16 %v16464_v54  ;;  %v3305_v6 = vpack.c.bf16 %v3044_v19, %v3035_v39  ;;  %v16471_v63 = vunpack.c.h.bf16 %v16470_v48  ;;  %v16473_v47 = vunpack.c.h.bf16 %v16472_v42 }
 0x1da   :  { %v2429_v22 = vmul.f32 %v11919_v36, %v16468_v10  ;;  %v16474_v37 = vunpack.c.l.bf16 %v16470_v48  ;;  %v3051_v11 = vmax.f32 %v2763_v32, 0.0  ;;  %v2762_v60 = vadd.f32 %v16429_v9, %v2427_v58  ;;  %v16482_v32 = vld [vmem:[#allocation30_spill] sm:$0xff]  ;;  %8485 = vmatpush3.bf16.msra.mxu0 %v9027_v13 }
 0x1db   :  { %v2438_v46 = vmul.f32 %v11919_v36, %v16469_v14  ;;  %v2446_v30 = vmul.f32 %v11882_v53, %v16471_v63  ;;  %v2455_v51 = vmul.f32 %v11882_v53, %v16473_v47  ;;  %v2771_v20 = vadd.f32 %v16429_v9, %v2436_v7  ;;  %4531 = vmatprep.mubr.bf16.mxu1 %v3305_v6  ;;  %v16484_v58 = vld [vmem:[#allocation34_spill] sm:$0xff] }
 0x1dc   :  { %v2445_v27 = vmul.f32 %v11878_v12, %v16474_v37  ;;  %v16475_v38 = vunpack.c.l.bf16 %v16472_v42  ;;  %v3304_v34 = vpack.c.bf16 %v3043_v16, %v3034_v40  ;;  %v3060_v4 = vmax.f32 %v2772_v5, 0.0  ;;  %8486 = vmatprep.subr.bf16.mxu0 %v9028_v57 }
 0x1dd   :  { %v16477_v1 = vunpack.c.h.bf16 %v16476_v59  ;;  %v16479_v28 = vunpack.c.h.bf16 %v16478_v55  ;;  %v3053_v41 = vmax.f32 %v2765_v2, 0.0  ;;  %v3062_v3 = vmax.f32 %v2774_v33, 0.0  ;;  %4371 = vmatmul.mubr.bf16.gmra.mxu0 %v12099_v52 }
 0x1de   :  { %v2454_v35 = vmul.f32 %v11878_v12, %v16475_v38  ;;  %v2764_v18 = vadd.f32 %v16441_v17, %v2429_v22  ;;  %v2773_v21 = vadd.f32 %v16441_v17, %v2438_v46  ;;  %v2781_v43 = vadd.f32 %v16428_v62, %v2446_v30  ;;  %v16489_v38 = vld [vmem:[#allocation35_spill] sm:$0xff]  ;;  %8487 = vmatpush3.bf16.msra.mxu0 %v9028_v57 }
 0x1df   :  { %v2448_v26 = vmul.f32 %v11936_v15, %v16477_v1  ;;  %v2457_v29 = vmul.f32 %v11936_v15, %v16479_v28  ;;  %v2790_v56 = vadd.f32 %v16428_v62, %v2455_v51  ;;  %v2780_v45 = vadd.f32 %v16429_v9, %v2445_v27  ;;  %4532 = vmatmul.mubr.bf16.gmra.mxu1 %v3304_v34 }
 0x1e0   :  { %v3050_v24 = vmax.f32 %v2762_v60, 0.0  ;;  %v2789_v54 = vadd.f32 %v16429_v9, %v2454_v35  ;;  %v16480_v31 = vunpack.c.l.bf16 %v16476_v59  ;;  %v16481_v39 = vunpack.c.l.bf16 %v16478_v55  ;;  %v9029_v59 = vld [vmem:[%s15280_s3 + $0x210] sm:$0xff]  }
 0x1e1   :  { %v2783_v49 = vadd.f32 %v16430_v61, %v2448_v26  ;;  %v2792_v19 = vadd.f32 %v16430_v61, %v2457_v29  ;;  %v16483_v25 = vunpack.c.h.bf16 %v16482_v32  ;;  %v16485_v23 = vunpack.c.h.bf16 %v16484_v58  ;;  %8488 = vmatprep.subr.bf16.mxu0 %v9029_v59 }
 0x1e2   :  { %v2447_v50 = vmul.f32 %v11919_v36, %v16480_v31  ;;  %v2456_v44 = vmul.f32 %v11919_v36, %v16481_v39  ;;  %v3312_v40 = vpack.c.bf16 %v3060_v4, %v3051_v11  ;;  %v3059_v16 = vmax.f32 %v2771_v20, 0.0  ;;  %v16487_v11 = vld [vmem:[#allocation31_spill] sm:$0xff]  ;;  %v16494_v31 = vld [vmem:[#allocation38_spill] sm:$0xff]  ;;  %8489 = vmatpush3.bf16.msra.mxu0 %v9029_v59 }
 0x1e3   :  { %v2464_v8 = vmul.f32 %v11882_v53, %v16483_v25  ;;  %v2473_v7 = vmul.f32 %v11882_v53, %v16485_v23  ;;  %v3314_v5 = vpack.c.bf16 %v3062_v3, %v3053_v41  ;;  %v3052_v2 = vmax.f32 %v2764_v18, 0.0 }
 0x1e4   :  { %v3061_v33 = vmax.f32 %v2773_v21, 0.0  ;;  %v3069_v10 = vmax.f32 %v2781_v43, 0.0  ;;  %v3078_v22 = vmax.f32 %v2790_v56, 0.0  ;;  %v3068_v14 = vmax.f32 %v2780_v45, 0.0  ;;  %4378 = vmatprep.mubr.bf16.mxu0 %v3312_v40 }
 0x1e5   :  { %v3077_v46 = vmax.f32 %v2789_v54, 0.0  ;;  %v2782_v6 = vadd.f32 %v16441_v17, %v2447_v50  ;;  %v2791_v48 = vadd.f32 %v16441_v17, %v2456_v44  ;;  %v16486_v63 = vunpack.c.l.bf16 %v16482_v32  ;;  %4539 = vmatprep.mubr.bf16.mxu1 %v3314_v5  ;;  %v9030_v44 = vld [vmem:[%s15280_s3 + $0x208] sm:$0xff]  }
 0x1e6   :  { %v3071_v42 = vmax.f32 %v2783_v49, 0.0  ;;  %v3080_v47 = vmax.f32 %v2792_v19, 0.0  ;;  %v2799_v51 = vadd.f32 %v16428_v62, %v2464_v8  ;;  %v2808_v37 = vadd.f32 %v16428_v62, %v2473_v7  ;;  %v16496_v19 = vld [vmem:[#allocation42_spill] sm:$0xff]  ;;  %8490 = vmatprep.subr.bf16.mxu0 %v9030_v44 }
 0x1e7   :  { %v2463_v30 = vmul.f32 %v11878_v12, %v16486_v63  ;;  %v3311_v27 = vpack.c.bf16 %v3059_v16, %v3050_v24  ;;  %v16488_v60 = vunpack.c.h.bf16 %v16487_v11  ;;  %v16490_v35 = vunpack.c.h.bf16 %v16489_v38  ;;  %8491 = vmatpush3.bf16.msra.mxu0 %v9030_v44 }
 0x1e8   :  { %v3313_v1 = vpack.c.bf16 %v3061_v33, %v3052_v2  ;;  %v3321_v26 = vpack.c.bf16 %v3078_v22, %v3069_v10  ;;  %v16491_v55 = vunpack.c.l.bf16 %v16484_v58  ;;  %v3070_v29 = vmax.f32 %v2782_v6, 0.0  ;;  %v16500_v2 = vld [vmem:[#allocation39_spill] sm:$0xff] }
 0x1e9   :  { %v2466_v20 = vmul.f32 %v11936_v15, %v16488_v60  ;;  %v2475_v4 = vmul.f32 %v11936_v15, %v16490_v35  ;;  %v3079_v41 = vmax.f32 %v2791_v48, 0.0  ;;  %v12180_v3 = vadd.f32 %v16429_v9, %v2463_v30  ;;  %v16502_v22 = vld [vmem:[#allocation43_spill] sm:$0xff]  ;;  %4379 = vmatmul.mubr.bf16.gmra.mxu0 %v3311_v27 }
 0x1ea   :  { %v2472_v28 = vmul.f32 %v11878_v12, %v16491_v55  ;;  %v16492_v18 = vunpack.c.l.bf16 %v16487_v11  ;;  %v12185_v13 = vpack.c.bf16 %v3077_v46, %v3068_v14  ;;  %v3323_v52 = vpack.c.bf16 %v3080_v47, %v3071_v42  ;;  %v9031_v11 = vld [vmem:[%s15280_s3 + $0x200] sm:$0xff]   ;;  %4540 = vmatmul.mubr.bf16.gmra.mxu1 %v3313_v1  ;;  %4386 = vmatprep.mubr.bf16.mxu0 %v3321_v26 }
 0x1eb   :  { %v3087_v34 = vmax.f32 %v2799_v51, 0.0  ;;  %v3096_v43 = vmax.f32 %v2808_v37, 0.0  ;;  %v2801_v56 = vadd.f32 %v16430_v61, %v2466_v20  ;;  %v2810_v45 = vadd.f32 %v16430_v61, %v2475_v4  ;;  %v16506_v55 = vld [vmem:[#allocation46_spill] sm:$0xff]  ;;  %8492 = vmatprep.subr.bf16.mxu0 %v9031_v11 }
 0x1ec   :  { %v2465_v21 = vmul.f32 %v11919_v36, %v16492_v18  ;;  %v16493_v24 = vunpack.c.l.bf16 %v16489_v38  ;;  %v16495_v50 = vunpack.c.h.bf16 %v16494_v31  ;;  %v2807_v49 = vadd.f32 %v16429_v9, %v2472_v28  ;;  %4547 = vmatprep.mubr.bf16.mxu1 %v3323_v52  ;;  %8493 = vmatpush3.bf16.msra.mxu0 %v9031_v11 }
 0x1ed   :  { %v16497_v32 = vunpack.c.h.bf16 %v16496_v19  ;;  %v16498_v8 = vunpack.c.l.bf16 %v16494_v31  ;;  %v16499_v23 = vunpack.c.l.bf16 %v16496_v19  ;;  %v3322_v40 = vpack.c.bf16 %v3079_v41, %v3070_v29  ;;  %v16508_v41 = vld [vmem:[#allocation50_spill] sm:$0xff]  ;;  %v16514_v31 = vld [vmem:[#allocation51_spill] sm:$0xff] }
 0x1ee   :  { %v2474_v54 = vmul.f32 %v11919_v36, %v16493_v24  ;;  %v2482_v39 = vmul.f32 %v11882_v53, %v16495_v50  ;;  %v3086_v16 = vmax.f32 %v12180_v3, 0.0  ;;  %v2800_v5 = vadd.f32 %v16441_v17, %v2465_v21 }
 0x1ef   :  { %v2491_v25 = vmul.f32 %v11882_v53, %v16497_v32  ;;  %v2481_v58 = vmul.f32 %v11878_v12, %v16498_v8  ;;  %v2490_v7 = vmul.f32 %v11878_v12, %v16499_v23  ;;  %v16501_v57 = vunpack.c.h.bf16 %v16500_v2 }
 0x1f0   :  { %v3330_v10 = vpack.c.bf16 %v3096_v43, %v3087_v34  ;;  %v16503_v14 = vunpack.c.h.bf16 %v16502_v22  ;;  %v16504_v6 = vunpack.c.l.bf16 %v16500_v2  ;;  %v16505_v63 = vunpack.c.l.bf16 %v16502_v22 }
 0x1f1   :  { %v2484_v33 = vmul.f32 %v11936_v15, %v16501_v57  ;;  %v3089_v42 = vmax.f32 %v2801_v56, 0.0  ;;  %v3098_v47 = vmax.f32 %v2810_v45, 0.0  ;;  %v2809_v51 = vadd.f32 %v16441_v17, %v2474_v54  ;;  %v16512_v45 = vld [vmem:[#allocation47_spill] sm:$0xff]  ;;  %4387 = vmatmul.mubr.bf16.gmra.mxu0 %v12185_v13 }
 0x1f2   :  { %v2493_v46 = vmul.f32 %v11936_v15, %v16503_v14  ;;  %v2483_v48 = vmul.f32 %v11919_v36, %v16504_v6  ;;  %v2492_v30 = vmul.f32 %v11919_v36, %v16505_v63  ;;  %v2817_v37 = vadd.f32 %v16428_v62, %v2482_v39  ;;  %4548 = vmatmul.mubr.bf16.gmra.mxu1 %v3322_v40 }
 0x1f3   :  { %v3095_v60 = vmax.f32 %v2807_v49, 0.0  ;;  %v2826_v20 = vadd.f32 %v16428_v62, %v2491_v25  ;;  %v2816_v38 = vadd.f32 %v16429_v9, %v2481_v58  ;;  %v2825_v35 = vadd.f32 %v16429_v9, %v2490_v7  ;;  %4394 = vmatprep.mubr.bf16.mxu0 %v3330_v10 }
 0x1f4   :  { %v3088_v4 = vmax.f32 %v2800_v5, 0.0  ;;  %v2819_v59 = vadd.f32 %v16430_v61, %v2484_v33  ;;  %v16507_v28 = vunpack.c.h.bf16 %v16506_v55  ;;  %v16509_v3 = vunpack.c.h.bf16 %v16508_v41 }
 0x1f5   :  { %v2828_v1 = vadd.f32 %v16430_v61, %v2493_v46  ;;  %v2818_v18 = vadd.f32 %v16441_v17, %v2483_v48  ;;  %v2827_v21 = vadd.f32 %v16441_v17, %v2492_v30  ;;  %v16510_v26 = vunpack.c.l.bf16 %v16506_v55 }
 0x1f6   :  { %v2500_v29 = vmul.f32 %v11882_v53, %v16507_v28  ;;  %v2509_v27 = vmul.f32 %v11882_v53, %v16509_v3  ;;  %v3332_v34 = vpack.c.bf16 %v3098_v47, %v3089_v42  ;;  %v16511_v43 = vunpack.c.l.bf16 %v16508_v41 }
 0x1f7   :  { %v2499_v52 = vmul.f32 %v11878_v12, %v16510_v26  ;;  %v16513_v24 = vunpack.c.h.bf16 %v16512_v45  ;;  %v16515_v50 = vunpack.c.h.bf16 %v16514_v31  ;;  %v3097_v49 = vmax.f32 %v2809_v51, 0.0 }
 0x1f8   :  { %v2508_v56 = vmul.f32 %v11878_v12, %v16511_v43  ;;  %v3105_v19 = vmax.f32 %v2817_v37, 0.0  ;;  %v3114_v32 = vmax.f32 %v2826_v20, 0.0  ;;  %v3104_v25 = vmax.f32 %v2816_v38, 0.0  ;;  %4555 = vmatprep.mubr.bf16.mxu1 %v3332_v34  ;;  %v16518_v37 = vld [vmem:[#allocation54_spill] sm:$0xff] }
 0x1f9   :  { %v2502_v54 = vmul.f32 %v11936_v15, %v16513_v24  ;;  %v2511_v39 = vmul.f32 %v11936_v15, %v16515_v50  ;;  %v3113_v8 = vmax.f32 %v2825_v35, 0.0  ;;  %v3107_v44 = vmax.f32 %v2819_v59, 0.0  ;;  %v16520_v59 = vld [vmem:[#allocation58_spill] sm:$0xff] }
 0x1fa   :  { %v2835_v58 = vadd.f32 %v16428_v62, %v2500_v29  ;;  %v2844_v23 = vadd.f32 %v16428_v62, %v2509_v27  ;;  %v3116_v7 = vmax.f32 %v2828_v1, 0.0  ;;  %v3106_v5 = vmax.f32 %v2818_v18, 0.0  ;;  %v16524_v18 = vld [vmem:[#allocation55_spill] sm:$0xff] }
 0x1fb   :  { %v3115_v2 = vmax.f32 %v2827_v21, 0.0  ;;  %v12255_v57 = vadd.f32 %v16429_v9, %v2499_v52  ;;  %v3329_v33 = vpack.c.bf16 %v3095_v60, %v3086_v16  ;;  %v12258_v22 = vadd.f32 %v16429_v9, %v2508_v56  ;;  %v16526_v56 = vld [vmem:[#allocation59_spill] sm:$0xff] }
 0x1fc   :  { %v2837_v14 = vadd.f32 %v16430_v61, %v2502_v54  ;;  %v2846_v46 = vadd.f32 %v16430_v61, %v2511_v39  ;;  %v3331_v6 = vpack.c.bf16 %v3097_v49, %v3088_v4  ;;  %v3339_v48 = vpack.c.bf16 %v3114_v32, %v3105_v19  ;;  %v16530_v49 = vld [vmem:[#allocation62_spill] sm:$0xff] }
 0x1fd   :  { %v16516_v63 = vunpack.c.l.bf16 %v16512_v45  ;;  %v3123_v42 = vmax.f32 %v2835_v58, 0.0  ;;  %v3132_v16 = vmax.f32 %v2844_v23, 0.0  ;;  %v16517_v47 = vunpack.c.l.bf16 %v16514_v31  ;;  %4395 = vmatmul.mubr.bf16.gmra.mxu0 %v3329_v33 }
 0x1fe   :  { %v16519_v11 = vunpack.c.h.bf16 %v16518_v37  ;;  %v3338_v13 = vpack.c.bf16 %v3113_v8, %v3104_v25  ;;  %v3341_v40 = vpack.c.bf16 %v3116_v7, %v3107_v44  ;;  %v3340_v20 = vpack.c.bf16 %v3115_v2, %v3106_v5  ;;  %v16532_v25 = vld [vmem:[#allocation66_spill] sm:$0xff]  ;;  %4556 = vmatmul.mubr.bf16.gmra.mxu1 %v3331_v6  ;;  %4402 = vmatprep.mubr.bf16.mxu0 %v3339_v48 }
 0x1ff   :  { %v2501_v30 = vmul.f32 %v11919_v36, %v16516_v63  ;;  %v2510_v51 = vmul.f32 %v11919_v36, %v16517_v47  ;;  %v3122_v38 = vmax.f32 %v12255_v57, 0.0  ;;  %v3131_v35 = vmax.f32 %v12258_v22, 0.0 }
 0x200   :  { %v2518_v60 = vmul.f32 %v11882_v53, %v16519_v11  ;;  %v3125_v4 = vmax.f32 %v2837_v14, 0.0  ;;  %v3134_v10 = vmax.f32 %v2846_v46, 0.0  ;;  %v16521_v55 = vunpack.c.h.bf16 %v16520_v59  ;;  %4563 = vmatprep.mubr.bf16.mxu1 %v3341_v40 }
 0x201   :  { %v2836_v29 = vadd.f32 %v16441_v17, %v2501_v30  ;;  %v16522_v41 = vunpack.c.l.bf16 %v16518_v37  ;;  %v16523_v27 = vunpack.c.l.bf16 %v16520_v59  ;;  %v16525_v21 = vunpack.c.h.bf16 %v16524_v18  ;;  %v16538_v37 = vld [vmem:[#allocation67_spill] sm:$0xff] }
 0x202   :  { %v2527_v28 = vmul.f32 %v11882_v53, %v16521_v55  ;;  %v3348_v52 = vpack.c.bf16 %v3132_v16, %v3123_v42  ;;  %v2845_v34 = vadd.f32 %v16441_v17, %v2510_v51  ;;  %v2853_v43 = vadd.f32 %v16428_v62, %v2518_v60  ;;  %v16536_v16 = vld [vmem:[#allocation63_spill] sm:$0xff] }
 0x203   :  { %v2517_v3 = vmul.f32 %v11878_v12, %v16522_v41  ;;  %v2526_v1 = vmul.f32 %v11878_v12, %v16523_v27  ;;  %v2520_v26 = vmul.f32 %v11936_v15, %v16525_v21  ;;  %v16527_v45 = vunpack.c.h.bf16 %v16526_v56 }
 0x204   :  { %v16528_v54 = vunpack.c.l.bf16 %v16524_v18  ;;  %v16529_v50 = vunpack.c.l.bf16 %v16526_v56  ;;  %v16531_v19 = vunpack.c.h.bf16 %v16530_v49  ;;  %v16533_v8 = vunpack.c.h.bf16 %v16532_v25 }
 0x205   :  { %v2529_v24 = vmul.f32 %v11936_v15, %v16527_v45  ;;  %v3350_v58 = vpack.c.bf16 %v3134_v10, %v3125_v4  ;;  %v2862_v23 = vadd.f32 %v16428_v62, %v2527_v28  ;;  %v16534_v7 = vunpack.c.l.bf16 %v16530_v49  ;;  %4403 = vmatmul.mubr.bf16.gmra.mxu0 %v3338_v13 }
 0x206   :  { %v2519_v31 = vmul.f32 %v11919_v36, %v16528_v54  ;;  %v2528_v39 = vmul.f32 %v11919_v36, %v16529_v50  ;;  %v2536_v32 = vmul.f32 %v11882_v53, %v16531_v19  ;;  %v2545_v44 = vmul.f32 %v11882_v53, %v16533_v8  ;;  %4564 = vmatmul.mubr.bf16.gmra.mxu1 %v3340_v20 }
 0x207   :  { %v2535_v5 = vmul.f32 %v11878_v12, %v16534_v7  ;;  %v16535_v2 = vunpack.c.l.bf16 %v16532_v25  ;;  %v3124_v22 = vmax.f32 %v2836_v29, 0.0  ;;  %v2852_v14 = vadd.f32 %v16429_v9, %v2517_v3  ;;  %4410 = vmatprep.mubr.bf16.mxu0 %v3348_v52  ;;  %4571 = vmatprep.mubr.bf16.mxu1 %v3350_v58 }
 0x208   :  { %v2861_v46 = vadd.f32 %v16429_v9, %v2526_v1  ;;  %v2855_v63 = vadd.f32 %v16430_v61, %v2520_v26  ;;  %v3133_v30 = vmax.f32 %v2845_v34, 0.0  ;;  %v2864_v42 = vadd.f32 %v16430_v61, %v2529_v24 }
 0x209   :  { %v2544_v57 = vmul.f32 %v11878_v12, %v16535_v2  ;;  %v16537_v47 = vunpack.c.h.bf16 %v16536_v16  ;;  %v16539_v11 = vunpack.c.h.bf16 %v16538_v37  ;;  %v2854_v6 = vadd.f32 %v16441_v17, %v2519_v31 }
 0x20a   :  { %v2863_v60 = vadd.f32 %v16441_v17, %v2528_v39  ;;  %v2871_v4 = vadd.f32 %v16428_v62, %v2536_v32  ;;  %v2880_v48 = vadd.f32 %v16428_v62, %v2545_v44  ;;  %v3141_v40 = vmax.f32 %v2853_v43, 0.0  ;;  %v16542_v32 = vld [vmem:[#allocation70_spill] sm:$0xff] }
 0x20b   :  { %v2538_v51 = vmul.f32 %v11936_v15, %v16537_v47  ;;  %v2547_v33 = vmul.f32 %v11936_v15, %v16539_v11  ;;  %v2870_v10 = vadd.f32 %v16429_v9, %v2535_v5  ;;  %v2879_v59 = vadd.f32 %v16429_v9, %v2544_v57 }
 0x20c   :  { %v16540_v55 = vunpack.c.l.bf16 %v16536_v16  ;;  %v3150_v29 = vmax.f32 %v2862_v23, 0.0  ;;  %v3140_v41 = vmax.f32 %v2852_v14, 0.0  ;;  %v3149_v3 = vmax.f32 %v2861_v46, 0.0 }
 0x20d   :  { %v3143_v27 = vmax.f32 %v2855_v63, 0.0  ;;  %v3152_v1 = vmax.f32 %v2864_v42, 0.0  ;;  %v2873_v18 = vadd.f32 %v16430_v61, %v2538_v51  ;;  %v2882_v21 = vadd.f32 %v16430_v61, %v2547_v33  ;;  %v16548_v42 = vld [vmem:[#allocation71_spill] sm:$0xff] }
 0x20e   :  { %v2537_v28 = vmul.f32 %v11919_v36, %v16540_v55  ;;  %v16541_v26 = vunpack.c.l.bf16 %v16538_v37  ;;  %v3142_v43 = vmax.f32 %v2854_v6, 0.0  ;;  %v3151_v56 = vmax.f32 %v2863_v60, 0.0  ;;  %v16550_v51 = vld [vmem:[#allocation75_spill] sm:$0xff] }
 0x20f   :  { %v3159_v45 = vmax.f32 %v2871_v4, 0.0  ;;  %v3168_v24 = vmax.f32 %v2880_v48, 0.0  ;;  %v3347_v54 = vpack.c.bf16 %v3131_v35, %v3122_v38  ;;  %v3158_v31 = vmax.f32 %v2870_v10, 0.0  ;;  %v16544_v38 = vld [vmem:[#allocation74_spill] sm:$0xff] }
 0x210   :  { %v2546_v34 = vmul.f32 %v11919_v36, %v16541_v26  ;;  %v3167_v50 = vmax.f32 %v2879_v59, 0.0  ;;  %v12336_v39 = vadd.f32 %v16441_v17, %v2537_v28  ;;  %v3349_v49 = vpack.c.bf16 %v3133_v30, %v3124_v22  ;;  %v16554_v59 = vld [vmem:[#allocation78_spill] sm:$0xff] }
 0x211   :  { %v3357_v19 = vpack.c.bf16 %v3150_v29, %v3141_v40  ;;  %v16543_v25 = vunpack.c.h.bf16 %v16542_v32  ;;  %v3161_v44 = vmax.f32 %v2873_v18, 0.0  ;;  %v3170_v23 = vmax.f32 %v2882_v21, 0.0  ;;  %v16556_v29 = vld [vmem:[#allocation82_spill] sm:$0xff]  ;;  %4411 = vmatmul.mubr.bf16.gmra.mxu0 %v3347_v54 }
 0x212   :  { %v2881_v7 = vadd.f32 %v16441_v17, %v2546_v34  ;;  %v16545_v35 = vunpack.c.h.bf16 %v16544_v38  ;;  %v3356_v2 = vpack.c.bf16 %v3149_v3, %v3140_v41  ;;  %v3359_v57 = vpack.c.bf16 %v3152_v1, %v3143_v27  ;;  %4572 = vmatmul.mubr.bf16.gmra.mxu1 %v3349_v49 }
 0x213   :  { %v2554_v8 = vmul.f32 %v11882_v53, %v16543_v25  ;;  %v3358_v13 = vpack.c.bf16 %v3151_v56, %v3142_v43  ;;  %v12345_v20 = vpack.c.bf16 %v3168_v24, %v3159_v45  ;;  %v12347_v22 = vpack.c.bf16 %v3167_v50, %v3158_v31  ;;  %v16560_v43 = vld [vmem:[#allocation79_spill] sm:$0xff]  ;;  %4418 = vmatprep.mubr.bf16.mxu0 %v3357_v19 }
 0x214   :  { %v2563_v5 = vmul.f32 %v11882_v53, %v16545_v35  ;;  %v3160_v14 = vmax.f32 %v12336_v39, 0.0  ;;  %v16546_v52 = vunpack.c.l.bf16 %v16542_v32  ;;  %v16547_v46 = vunpack.c.l.bf16 %v16544_v38  ;;  %v16562_v24 = vld [vmem:[#allocation83_spill] sm:$0xff]  ;;  %4579 = vmatprep.mubr.bf16.mxu1 %v3359_v57 }
 0x215   :  { %v2889_v30 = vadd.f32 %v16428_v62, %v2554_v8  ;;  %v16549_v16 = vunpack.c.h.bf16 %v16548_v42  ;;  %v16551_v37 = vunpack.c.h.bf16 %v16550_v51  ;;  %v16552_v33 = vunpack.c.l.bf16 %v16548_v42 }
 0x216   :  { %v2553_v58 = vmul.f32 %v11878_v12, %v16546_v52  ;;  %v2562_v63 = vmul.f32 %v11878_v12, %v16547_v46  ;;  %v3368_v60 = vpack.c.bf16 %v3170_v23, %v3161_v44  ;;  %v3169_v4 = vmax.f32 %v2881_v7, 0.0 }
 0x217   :  { %v2556_v47 = vmul.f32 %v11936_v15, %v16549_v16  ;;  %v2565_v11 = vmul.f32 %v11936_v15, %v16551_v37  ;;  %v2555_v6 = vmul.f32 %v11919_v36, %v16552_v33  ;;  %v2898_v48 = vadd.f32 %v16428_v62, %v2563_v5 }
 0x218   :  { %v16553_v40 = vunpack.c.l.bf16 %v16550_v51  ;;  %v16555_v55 = vunpack.c.h.bf16 %v16554_v59  ;;  %v16557_v41 = vunpack.c.h.bf16 %v16556_v29  ;;  %v16558_v27 = vunpack.c.l.bf16 %v16554_v59 }
 0x219   :  { %v16559_v18 = vunpack.c.l.bf16 %v16556_v29  ;;  %v2888_v26 = vadd.f32 %v16429_v9, %v2553_v58  ;;  %v2897_v34 = vadd.f32 %v16429_v9, %v2562_v63  ;;  %v16561_v56 = vunpack.c.h.bf16 %v16560_v43  ;;  %4419 = vmatmul.mubr.bf16.gmra.mxu0 %v3356_v2 }
 0x21a   :  { %v2564_v10 = vmul.f32 %v11919_v36, %v16553_v40  ;;  %v2572_v28 = vmul.f32 %v11882_v53, %v16555_v55  ;;  %v2581_v3 = vmul.f32 %v11882_v53, %v16557_v41  ;;  %v2571_v1 = vmul.f32 %v11878_v12, %v16558_v27  ;;  %4580 = vmatmul.mubr.bf16.gmra.mxu1 %v3358_v13 }
 0x21b   :  { %v2580_v21 = vmul.f32 %v11878_v12, %v16559_v18  ;;  %v2574_v45 = vmul.f32 %v11936_v15, %v16561_v56  ;;  %v16563_v31 = vunpack.c.h.bf16 %v16562_v24  ;;  %v3177_v39 = vmax.f32 %v2889_v30, 0.0  ;;  %v7806_v18 = vpop.f32.mrf.mxu0  ;;  %4426 = vmatprep.mubr.bf16.mxu0 %v12345_v20  ;;  %4587 = vmatprep.mubr.bf16.mxu1 %v3368_v60  ;;  %v16572_v20 = vld [vmem:[#allocation87_spill] sm:$0xff] }
 0x21c   :  { %v2891_v32 = vadd.f32 %v16430_v61, %v2556_v47  ;;  %v2900_v25 = vadd.f32 %v16430_v61, %v2565_v11  ;;  %v2890_v8 = vadd.f32 %v16441_v17, %v2555_v6  ;;  %v3186_v44 = vmax.f32 %v2898_v48, 0.0  ;;  %v16566_v47 = vld [vmem:[#allocation86_spill] sm:$0xff] }
 0x21d   :  { %v2583_v50 = vmul.f32 %v11936_v15, %v16563_v31  ;;  %v2899_v23 = vadd.f32 %v16441_v17, %v2564_v10  ;;  %v16564_v7 = vunpack.c.l.bf16 %v16560_v43  ;;  %v16565_v35 = vunpack.c.l.bf16 %v16562_v24  ;;  %v16568_v48 = vld [vmem:[#allocation90_spill] sm:$0xff]  ;;  %v7807_v13 = vpop.f32.mrf.mxu0 }
 0x21e   :  { %v2907_v49 = vadd.f32 %v16428_v62, %v2572_v28  ;;  %v2916_v5 = vadd.f32 %v16428_v62, %v2581_v3  ;;  %v2906_v52 = vadd.f32 %v16429_v9, %v2571_v1  ;;  %v2915_v19 = vadd.f32 %v16429_v9, %v2580_v21  ;;  %v7918_v21 = vpop.f32.mrf.mxu1 }
 0x21f   :  { %v2573_v38 = vmul.f32 %v11919_v36, %v16564_v7  ;;  %v2582_v54 = vmul.f32 %v11919_v36, %v16565_v35  ;;  %v3176_v57 = vmax.f32 %v2888_v26, 0.0  ;;  %v3185_v58 = vmax.f32 %v2897_v34, 0.0 }
 0x220   :  { %v2909_v46 = vadd.f32 %v16430_v61, %v2574_v45  ;;  %v2918_v63 = vadd.f32 %v16430_v61, %v2583_v50  ;;  %v3179_v30 = vmax.f32 %v2891_v32, 0.0  ;;  %v3188_v42 = vmax.f32 %v2900_v25, 0.0  ;;  %v7919_v31 = vpop.f32.mrf.mxu1 }
 0x221   :  { %v3178_v16 = vmax.f32 %v2890_v8, 0.0  ;;  %v16567_v51 = vunpack.c.h.bf16 %v16566_v47  ;;  %v3187_v11 = vmax.f32 %v2899_v23, 0.0  ;;  %v2908_v33 = vadd.f32 %v16441_v17, %v2573_v38  ;;  %v7809_v38 = vpop.f32.mrf.mxu0  ;;  %4427 = vmatmul.mubr.bf16.gmra.mxu0 %v12347_v22 }
 0x222   :  { %v2917_v6 = vadd.f32 %v16441_v17, %v2582_v54  ;;  %v16569_v40 = vunpack.c.h.bf16 %v16568_v48  ;;  %v3195_v59 = vmax.f32 %v2907_v49, 0.0  ;;  %v3204_v55 = vmax.f32 %v2916_v5, 0.0  ;;  %v7921_v35 = vpop.f32.mrf.mxu1 }
 0x223   :  { %v2590_v37 = vmul.f32 %v11882_v53, %v16567_v51  ;;  %v3194_v28 = vmax.f32 %v2906_v52, 0.0  ;;  %v3203_v29 = vmax.f32 %v2915_v19, 0.0  ;;  %v3367_v41 = vpack.c.bf16 %v3169_v4, %v3160_v14  ;;  %v16574_v52 = vld [vmem:[#allocation91_spill] sm:$0xff] }
 0x224   :  { %v2599_v10 = vmul.f32 %v11882_v53, %v16569_v40  ;;  %v3375_v3 = vpack.c.bf16 %v3186_v44, %v3177_v39  ;;  %v3197_v27 = vmax.f32 %v2909_v46, 0.0  ;;  %v3206_v1 = vmax.f32 %v2918_v63, 0.0 }
 0x225   :  { %v2925_v26 = vadd.f32 %v16428_v62, %v2590_v37  ;;  %v16570_v34 = vunpack.c.l.bf16 %v16566_v47  ;;  %v16571_v56 = vunpack.c.l.bf16 %v16568_v48  ;;  %v12422_v14 = vpack.c.bf16 %v3185_v58, %v3176_v57  ;;  %v7922_v47 = vpop.f32.mrf.mxu1  ;;  %v16580_v48 = vld [vmem:[#allocation98_spill] sm:$0xff]  ;;  %4588 = vmatmul.mubr.bf16.gmra.mxu1 %v3367_v41 }
 0x226   :  { %v3196_v4 = vmax.f32 %v2908_v33, 0.0  ;;  %v3205_v24 = vmax.f32 %v2917_v6, 0.0  ;;  %v2934_v2 = vadd.f32 %v16428_v62, %v2599_v10  ;;  %v3377_v50 = vpack.c.bf16 %v3188_v42, %v3179_v30  ;;  %4434 = vmatprep.mubr.bf16.mxu0 %v3375_v3 }
 0x227   :  { %v2589_v43 = vmul.f32 %v11878_v12, %v16570_v34  ;;  %v2598_v45 = vmul.f32 %v11878_v12, %v16571_v56  ;;  %v12425_v39 = vpack.c.bf16 %v3187_v11, %v3178_v16  ;;  %v12427_v32 = vpack.c.bf16 %v3204_v55, %v3195_v59  ;;  %v7810_v16 = vpop.f32.mrf.mxu0  ;;  %v16578_v11 = vld [vmem:[#allocation94_spill] sm:$0xff] }
 0x228   :  { %v12429_v25 = vpack.c.bf16 %v3203_v29, %v3194_v28  ;;  %v7808_v8 = vadd.f32 %v7807_v13, %v7806_v18  ;;  %v7920_v44 = vadd.f32 %v7919_v31, %v7918_v21  ;;  %v12431_v23 = vpack.c.bf16 %v3206_v1, %v3197_v27  ;;  %4595 = vmatprep.mubr.bf16.mxu1 %v3377_v50  ;;  %v16586_v31 = vld [vmem:[#allocation99_spill] sm:$0xff] }
 0x229   :  { %v16573_v60 = vunpack.c.h.bf16 %v16572_v20  ;;  %v3213_v54 = vmax.f32 %v2925_v26, 0.0  ;;  %v2924_v49 = vadd.f32 %v16429_v9, %v2589_v43  ;;  %v2933_v5 = vadd.f32 %v16429_v9, %v2598_v45  ;;  %v7812_v21 = vpop.f32.mrf.mxu0  ;;  %v7924_v26 = vpop.f32.mrf.mxu1  ;;  %v16584_v45 = vld [vmem:[#allocation95_spill] sm:$0xff]  ;;  %4435 = vmatmul.mubr.bf16.gmra.mxu0 %v12422_v14 }
 0x22a   :  { %v16575_v19 = vunpack.c.h.bf16 %v16574_v52  ;;  %v12441_v58 = vadd.f32 %v7920_v44, %v7808_v8  ;;  %v12443_v46 = vpack.c.bf16 %v3205_v24, %v3196_v4  ;;  %v3222_v63 = vmax.f32 %v2934_v2, 0.0  ;;  %4442 = vmatprep.mubr.bf16.mxu0 %v12427_v32 }
 0x22b   :  { %v2592_v7 = vmul.f32 %v11936_v15, %v16573_v60  ;;  %v16576_v30 = vunpack.c.l.bf16 %v16572_v20  ;;  %v16577_v51 = vunpack.c.l.bf16 %v16574_v52  ;;  %v16579_v33 = vunpack.c.h.bf16 %v16578_v11  ;;  %v7813_v22 = vpop.f32.mrf.mxu0  ;;  %v7925_v41 = vpop.f32.mrf.mxu1 }
 0x22c   :  { %v2601_v57 = vmul.f32 %v11936_v15, %v16575_v19  ;;  %v16581_v40 = vunpack.c.h.bf16 %v16580_v48  ;;  %v16582_v59 = vunpack.c.l.bf16 %v16578_v11  ;;  %v7811_v28 = vadd.f32 %v7810_v16, %v7809_v38 }
 0x22d   :  { %v2591_v42 = vmul.f32 %v11919_v36, %v16576_v30  ;;  %v2600_v37 = vmul.f32 %v11919_v36, %v16577_v51  ;;  %v2608_v6 = vmul.f32 %v11882_v53, %v16579_v33  ;;  %v7923_v29 = vadd.f32 %v7922_v47, %v7921_v35  ;;  %v7927_v52 = vpop.f32.mrf.mxu1  ;;  %4596 = vmatmul.mubr.bf16.gmra.mxu1 %v12425_v39 }
 0x22e   :  { %v2617_v10 = vmul.f32 %v11882_v53, %v16581_v40  ;;  %v2607_v55 = vmul.f32 %v11878_v12, %v16582_v59  ;;  %v2927_v27 = vadd.f32 %v16430_v61, %v2592_v7  ;;  %v16583_v1 = vunpack.c.l.bf16 %v16580_v48  ;;  %4603 = vmatprep.mubr.bf16.mxu1 %v12431_v23 }
 0x22f   :  { %v3212_v34 = vmax.f32 %v2924_v49, 0.0  ;;  %v3221_v43 = vmax.f32 %v2933_v5, 0.0  ;;  %v2936_v56 = vadd.f32 %v16430_v61, %v2601_v57  ;;  %v16585_v4 = vunpack.c.h.bf16 %v16584_v45  ;;  %v7815_v5 = vpop.f32.mrf.mxu0  ;;  %v7928_v11 = vpop.f32.mrf.mxu1 }
 0x230   :  { %v2616_v18 = vmul.f32 %v11878_v12, %v16583_v1  ;;  %v12469_v2 = vadd.f32 %v7923_v29, %v7811_v28  ;;  %v2926_v13 = vadd.f32 %v16441_v17, %v2591_v42  ;;  %v16587_v8 = vunpack.c.h.bf16 %v16586_v31 }
 0x231   :  { %v2610_v24 = vmul.f32 %v11936_v15, %v16585_v4  ;;  %v2935_v20 = vadd.f32 %v16441_v17, %v2600_v37  ;;  %v2943_v60 = vadd.f32 %v16428_v62, %v2608_v6  ;;  %v2952_v7 = vadd.f32 %v16428_v62, %v2617_v10  ;;  %v7930_v1 = vpop.f32.mrf.mxu1  ;;  %4443 = vmatmul.mubr.bf16.gmra.mxu0 %v12429_v25  ;;  %v756_v25 = vld [vmem:[%s15281_s0 + $0xb0] ss:$36 sps:$4 sm:$0xff]  }
 0x232   :  { %v2619_v44 = vmul.f32 %v11936_v15, %v16587_v8  ;;  %v2942_v38 = vadd.f32 %v16429_v9, %v2607_v55  ;;  %v7814_v35 = vadd.f32 %v7813_v22, %v7812_v21  ;;  %v7926_v49 = vadd.f32 %v7925_v41, %v7924_v26  ;;  %v16590_v26 = vld [vmem:[#allocation102_spill] sm:$0xff] }
 0x233   :  { %v12479_v3 = vpack.c.bf16 %v3222_v63, %v3213_v54  ;;  %v2951_v50 = vadd.f32 %v16429_v9, %v2616_v18  ;;  %v12482_v19 = vpack.c.bf16 %v3221_v43, %v3212_v34  ;;  %v3215_v57 = vmax.f32 %v2927_v27, 0.0  ;;  %v7816_v63 = vpop.f32.mrf.mxu0  ;;  %v7931_v22 = vpop.f32.mrf.mxu1 }
 0x234   :  { %v2945_v30 = vadd.f32 %v16430_v61, %v2610_v24  ;;  %v16588_v42 = vunpack.c.l.bf16 %v16584_v45  ;;  %v12488_v47 = vadd.f32 %v7926_v49, %v7814_v35  ;;  %v3224_v51 = vmax.f32 %v2936_v56, 0.0  ;;  %v16592_v56 = vld [vmem:[#allocation106_spill] sm:$0xff] }
 0x235   :  { %v3214_v37 = vmax.f32 %v2926_v13, 0.0  ;;  %v2954_v54 = vadd.f32 %v16430_v61, %v2619_v44  ;;  %v3223_v33 = vmax.f32 %v2935_v20, 0.0  ;;  %v3231_v6 = vmax.f32 %v2943_v60, 0.0  ;;  %v7818_v27 = vpop.f32.mrf.mxu0  ;;  %4604 = vmatmul.mubr.bf16.gmra.mxu1 %v12443_v46  ;;  %4450 = vmatprep.mubr.bf16.mxu0 %v12479_v3 }
 0x236   :  { %v2609_v16 = vmul.f32 %v11919_v36, %v16588_v42  ;;  %v3240_v48 = vmax.f32 %v2952_v7, 0.0  ;;  %v3230_v40 = vmax.f32 %v2942_v38, 0.0  ;;  %v7817_v10 = vadd.f32 %v7816_v63, %v7815_v5  ;;  %v16596_v7 = vld [vmem:[#allocation103_spill] sm:$0xff]  ;;  %v7933_v42 = vpop.f32.mrf.mxu1 }
 0x237   :  { %v7929_v59 = vadd.f32 %v7928_v11, %v7927_v52  ;;  %v3239_v55 = vmax.f32 %v2951_v50, 0.0  ;;  %v16589_v28 = vunpack.c.l.bf16 %v16586_v31  ;;  %v3233_v18 = vmax.f32 %v2945_v30, 0.0  ;;  %v7819_v44 = vpop.f32.mrf.mxu0  ;;  %v16598_v50 = vld [vmem:[#allocation107_spill] sm:$0xff] }
 0x238   :  { %v12497_v21 = vadd.f32 %v16441_v17, %v2609_v16  ;;  %v16591_v34 = vunpack.c.h.bf16 %v16590_v26  ;;  %v16593_v45 = vunpack.c.h.bf16 %v16592_v56  ;;  %v3242_v14 = vmax.f32 %v2954_v54, 0.0 }
 0x239   :  { %v2618_v29 = vmul.f32 %v11919_v36, %v16589_v28  ;;  %v12505_v24 = vadd.f32 %v7929_v59, %v7817_v10  ;;  %v16594_v39 = vunpack.c.l.bf16 %v16590_v26  ;;  %v16595_v31 = vunpack.c.l.bf16 %v16592_v56  ;;  %v7821_v30 = vpop.f32.mrf.mxu0  ;;  %v7934_v10 = vpop.f32.mrf.mxu1  ;;  %4451 = vmatmul.mubr.bf16.gmra.mxu0 %v12482_v19 }
 0x23a   :  { %v2626_v43 = vmul.f32 %v11882_v53, %v16591_v34  ;;  %v2635_v4 = vmul.f32 %v11882_v53, %v16593_v45  ;;  %v3395_v41 = vpack.c.bf16 %v3224_v51, %v3215_v57  ;;  %v12515_v20 = vpack.c.bf16 %v3223_v33, %v3214_v37  ;;  %v736_v57 = vld [vmem:[%s15281_s0 + $0x20] ss:$36 sps:$4 sm:$0xff]  }
 0x23b   :  { %v2625_v13 = vmul.f32 %v11878_v12, %v16594_v39  ;;  %v2634_v8 = vmul.f32 %v11878_v12, %v16595_v31  ;;  %v12517_v60 = vpack.c.bf16 %v3240_v48, %v3231_v6  ;;  %v16597_v32 = vunpack.c.h.bf16 %v16596_v7  ;;  %v746_v48 = vld [vmem:[%s15281_s0 + $0x68] ss:$36 sps:$4 sm:$0xff]   ;;  %v7936_v56 = vpop.f32.mrf.mxu1 }
 0x23c   :  { %v7820_v38 = vadd.f32 %v7819_v44, %v7818_v27  ;;  %v7932_v35 = vadd.f32 %v7931_v22, %v7930_v1  ;;  %v12522_v49 = vpack.c.bf16 %v3239_v55, %v3230_v40  ;;  %v16599_v5 = vunpack.c.h.bf16 %v16598_v50  ;;  %v7822_v40 = vpop.f32.mrf.mxu0  ;;  %4611 = vmatprep.mubr.bf16.mxu1 %v3395_v41  ;;  %v16602_v44 = vld [vmem:[#allocation110_spill] sm:$0xff] }
 0x23d   :  { %v2628_v23 = vmul.f32 %v11936_v15, %v16597_v32  ;;  %v2953_v16 = vadd.f32 %v16441_v17, %v2618_v29  ;;  %v3232_v51 = vmax.f32 %v12497_v21, 0.0  ;;  %v2961_v37 = vadd.f32 %v16428_v62, %v2626_v43  ;;  %v7937_v32 = vpop.f32.mrf.mxu1  ;;  %4612 = vmatmul.mubr.bf16.gmra.mxu1 %v12515_v20  ;;  %4458 = vmatprep.mubr.bf16.mxu0 %v12517_v60  ;;  %v16608_v20 = vld [vmem:[#allocation111_spill] sm:$0xff] }
 0x23e   :  { %v2637_v52 = vmul.f32 %v11936_v15, %v16599_v5  ;;  %v2970_v54 = vadd.f32 %v16428_v62, %v2635_v4  ;;  %v12534_v63 = vadd.f32 %v7932_v35, %v7820_v38  ;;  %v12536_v11 = vpack.c.bf16 %v3242_v14, %v3233_v18  ;;  %v7824_v43 = vpop.f32.mrf.mxu0 }
 0x23f   :  { %v2960_v33 = vadd.f32 %v16429_v9, %v2625_v13  ;;  %v2969_v6 = vadd.f32 %v16429_v9, %v2634_v8  ;;  %v2963_v59 = vadd.f32 %v16430_v61, %v2628_v23  ;;  %v16600_v55 = vunpack.c.l.bf16 %v16596_v7 }
 0x240   :  { %v12547_v29 = vunpack.c.l.bf16 %v736_v57  ;;  %v12549_v27 = vunpack.c.h.bf16 %v736_v57  ;;  %v7823_v1 = vadd.f32 %v7822_v40, %v7821_v30  ;;  %v7935_v18 = vadd.f32 %v7934_v10, %v7933_v42  ;;  %v7825_v46 = vpop.f32.mrf.mxu0  ;;  %v7939_v30 = vpop.f32.mrf.mxu1  ;;  %4619 = vmatprep.mubr.bf16.mxu1 %v12536_v11 }
 0x241   :  { %v2627_v28 = vmul.f32 %v11919_v36, %v16600_v55  ;;  %v2972_v21 = vadd.f32 %v16430_v61, %v2637_v52  ;;  %v16601_v26 = vunpack.c.l.bf16 %v16598_v50  ;;  %v3241_v45 = vmax.f32 %v2953_v16, 0.0  ;;  %v16604_v16 = vld [vmem:[#allocation114_spill] sm:$0xff]  ;;  %4459 = vmatmul.mubr.bf16.gmra.mxu0 %v12522_v49  ;;  %v796_v49 = vld [vmem:[%s15281_s0 + $0x1d0] ss:$36 sps:$4 sm:$0xff]  }
 0x242   :  { %v3249_v4 = vmax.f32 %v2961_v37, 0.0  ;;  %v3258_v14 = vmax.f32 %v2970_v54, 0.0  ;;  %v12557_v39 = vunpack.c.l.bf16 %v746_v48  ;;  %v12559_v13 = vadd.f32 %v7935_v18, %v7823_v1  ;;  %v7827_v57 = vpop.f32.mrf.mxu0 }
 0x243   :  { %v2636_v34 = vmul.f32 %v11919_v36, %v16601_v26  ;;  %v3248_v31 = vmax.f32 %v2960_v33, 0.0  ;;  %v3257_v8 = vmax.f32 %v2969_v6, 0.0  ;;  %v16603_v22 = vunpack.c.h.bf16 %v16602_v44 }
 0x244   :  { %v3251_v23 = vmax.f32 %v2963_v59, 0.0  ;;  %v2962_v38 = vadd.f32 %v16441_v17, %v2627_v28  ;;  %v12569_v35 = vunpack.c.h.bf16 %v746_v48  ;;  %v1476_v3 = vadd.f32 %v12549_v27, %v12547_v29  ;;  %v7828_v55 = vpop.f32.mrf.mxu0  ;;  %v7940_v28 = vpop.f32.mrf.mxu1 }
 0x245   :  { %v2644_v7 = vmul.f32 %v11882_v53, %v16603_v22  ;;  %v7826_v41 = vadd.f32 %v7825_v46, %v7824_v43  ;;  %v7938_v50 = vadd.f32 %v7937_v32, %v7936_v56  ;;  %v3260_v5 = vmax.f32 %v2972_v21, 0.0  ;;  %v16610_v32 = vld [vmem:[#allocation115_spill] sm:$0xff] }
 0x246   :  { %v2971_v52 = vadd.f32 %v16441_v17, %v2636_v34  ;;  %v12574_v42 = vpack.c.bf16 %v3241_v45, %v3232_v51  ;;  %v16605_v37 = vunpack.c.h.bf16 %v16604_v16  ;;  %v12579_v33 = vunpack.c.l.bf16 %v756_v25  ;;  %v766_v51 = vld [vmem:[%s15281_s0 + $0xf8] ss:$36 sps:$4 sm:$0xff]  }
 0x247   :  { %v1477_v6 = vadd.f32 %v1476_v3, %v12557_v39  ;;  %v12582_v48 = vadd.f32 %v7938_v50, %v7826_v41  ;;  %v12584_v40 = vpack.c.bf16 %v3258_v14, %v3249_v4  ;;  %v12586_v10 = vpack.c.bf16 %v3257_v8, %v3248_v31  ;;  %v7830_v4 = vpop.f32.mrf.mxu0  ;;  %v7942_v14 = vpop.f32.mrf.mxu1 }
 0x248   :  { %v2653_v54 = vmul.f32 %v11882_v53, %v16605_v37  ;;  %v12589_v59 = vadd.f32 %v16428_v62, %v2644_v7  ;;  %v3250_v53 = vmax.f32 %v2962_v38, 0.0  ;;  %v16606_v1 = vunpack.c.l.bf16 %v16602_v44  ;;  %v776_v38 = vld [vmem:[%s15281_s0 + $0x140] ss:$36 sps:$4 sm:$0xff]   ;;  %4620 = vmatmul.mubr.bf16.gmra.mxu1 %v12574_v42 }
 0x249   :  { %v12597_v21 = vunpack.c.h.bf16 %v756_v25  ;;  %v1478_v26 = vadd.f32 %v1477_v6, %v12569_v35  ;;  %v7829_v34 = vadd.f32 %v7828_v55, %v7827_v57  ;;  %v7941_v43 = vadd.f32 %v7940_v28, %v7939_v30  ;;  %v7831_v3 = vpop.f32.mrf.mxu0  ;;  %v7943_v41 = vpop.f32.mrf.mxu1  ;;  %4466 = vmatprep.mubr.bf16.mxu0 %v12584_v40 }
 0x24a   :  { %v2643_v18 = vmul.f32 %v11878_v12, %v16606_v1  ;;  %v3413_v56 = vpack.c.bf16 %v3260_v5, %v3251_v23  ;;  %v3259_v45 = vmax.f32 %v2971_v52, 0.0  ;;  %v12603_v31 = vadd.f32 %v16428_v62, %v2653_v54  ;;  %4467 = vmatmul.mubr.bf16.gmra.mxu0 %v12586_v10 }
 0x24b   :  { %v16607_v8 = vunpack.c.l.bf16 %v16604_v16  ;;  %v12608_v22 = vunpack.c.l.bf16 %v766_v51  ;;  %v1479_v7 = vadd.f32 %v1478_v26, %v12579_v33  ;;  %v12611_v25 = vadd.f32 %v7941_v43, %v7829_v34  ;;  %v7833_v16 = vpop.f32.mrf.mxu0  ;;  %v7945_v37 = vpop.f32.mrf.mxu1  ;;  %v786_v26 = vld [vmem:[%s15281_s0 + $0x188] ss:$36 sps:$4 sm:$0xff]  }
 0x24c   :  { %v3267_v19 = vmax.f32 %v12589_v59, 0.0  ;;  %v16609_v46 = vunpack.c.h.bf16 %v16608_v20  ;;  %v16611_v23 = vunpack.c.h.bf16 %v16610_v32  ;;  %v12625_v50 = vunpack.c.h.bf16 %v766_v51  ;;  %4627 = vmatprep.mubr.bf16.mxu1 %v3413_v56 }
 0x24d   :  { %v2652_v44 = vmul.f32 %v11878_v12, %v16607_v8  ;;  %v1480_v60 = vadd.f32 %v1479_v7, %v12597_v21  ;;  %v1521_v11 = vmul.f32 %v12547_v29, %v12547_v29  ;;  %v1530_v5 = vmul.f32 %v12549_v27, %v12549_v27  ;;  %v7834_v34 = vpop.f32.mrf.mxu0  ;;  %v7946_v43 = vpop.f32.mrf.mxu1 }
 0x24e   :  { %v2646_v62 = vmul.f32 %v11936_v15, %v16609_v46  ;;  %v2655_v12 = vmul.f32 %v11936_v15, %v16611_v23  ;;  %v7832_v52 = vadd.f32 %v7831_v3, %v7830_v4  ;;  %v7944_v57 = vadd.f32 %v7943_v41, %v7942_v14 }
 0x24f   :  { %v12632_v30 = vpack.c.bf16 %v3259_v45, %v3250_v53  ;;  %v12635_v15 = vadd.f32 %v16429_v9, %v2643_v18  ;;  %v3276_v54 = vmax.f32 %v12603_v31, 0.0  ;;  %v12638_v6 = vunpack.c.l.bf16 %v776_v38  ;;  %v7948_v23 = vpop.f32.mrf.mxu1 }
 0x250   :  { %v1481_v51 = vadd.f32 %v1480_v60, %v12608_v22  ;;  %v1539_v55 = vmul.f32 %v12557_v39, %v12557_v39  ;;  %v12643_v28 = vadd.f32 %v7944_v57, %v7832_v52  ;;  %v12646_v1 = vadd.f32 %v16429_v9, %v2652_v44 }
 0x251   :  { %v2981_v53 = vadd.f32 %v16430_v61, %v2646_v62  ;;  %v2990_v18 = vadd.f32 %v16430_v61, %v2655_v12  ;;  %v12653_v45 = vunpack.c.h.bf16 %v776_v38  ;;  %v1548_v14 = vmul.f32 %v12569_v35, %v12569_v35  ;;  %v7836_v62 = vpop.f32.mrf.mxu0  ;;  %4628 = vmatmul.mubr.bf16.gmra.mxu1 %v12632_v30 }
 0x252   :  { %v1482_v4 = vadd.f32 %v1481_v51, %v12625_v50  ;;  %v2097_v31 = vadd.f32 %v1530_v5, %v1521_v11  ;;  %v7835_v9 = vadd.f32 %v7834_v34, %v7833_v16  ;;  %v7947_v8 = vadd.f32 %v7946_v43, %v7945_v37  ;;  %v7949_v11 = vpop.f32.mrf.mxu1 }
 0x253   :  { %v16612_v44 = vunpack.c.l.bf16 %v16608_v20  ;;  %v16613_v7 = vunpack.c.l.bf16 %v16610_v32  ;;  %v12666_v12 = vunpack.c.l.bf16 %v786_v26  ;;  %v1557_v3 = vmul.f32 %v12579_v33, %v12579_v33  ;;  %v7837_v42 = vpop.f32.mrf.mxu0 }
 0x254   :  { %v1483_v38 = vadd.f32 %v1482_v4, %v12638_v6  ;;  %v2098_v20 = vadd.f32 %v2097_v31, %v1539_v55  ;;  %v12671_v41 = vadd.f32 %v7947_v8, %v7835_v9  ;;  %v3269_v32 = vmax.f32 %v2981_v53, 0.0  ;;  %v7951_v55 = vpop.f32.mrf.mxu1 }
 0x255   :  { %v2645_v61 = vmul.f32 %v11919_v36, %v16612_v44  ;;  %v2654_v46 = vmul.f32 %v11919_v36, %v16613_v7  ;;  %v3266_v36 = vmax.f32 %v12635_v15, 0.0  ;;  %v3278_v60 = vmax.f32 %v2990_v18, 0.0  ;;  %v7839_v51 = vpop.f32.mrf.mxu0 }
 0x256   :  { %v12678_v5 = vunpack.c.h.bf16 %v786_v26  ;;  %v1484_v52 = vadd.f32 %v1483_v38, %v12653_v45  ;;  %v1566_v57 = vmul.f32 %v12597_v21, %v12597_v21  ;;  %v2099_v16 = vadd.f32 %v2098_v20, %v1548_v14  ;;  %v7952_v8 = vpop.f32.mrf.mxu1 }
 0x257   :  { %v7838_v40 = vadd.f32 %v7837_v42, %v7836_v62  ;;  %v7950_v56 = vadd.f32 %v7949_v11, %v7948_v23  ;;  %v2980_v15 = vadd.f32 %v16441_v17, %v2645_v61  ;;  %v2989_v37 = vadd.f32 %v16441_v17, %v2654_v46  ;;  %v806_v17 = vld [vmem:[%s15281_s0 + $0x218] ss:$36 sps:$4 sm:$0xff]   ;;  %v7840_v9 = vpop.f32.mrf.mxu0 }
 0x258   :  { %v12685_v53 = vunpack.c.l.bf16 %v796_v49  ;;  %v1485_v18 = vadd.f32 %v1484_v52, %v12666_v12  ;;  %v1575_v26 = vmul.f32 %v12608_v22, %v12608_v22  ;;  %v2100_v34 = vadd.f32 %v2099_v16, %v1557_v3  ;;  %v7954_v23 = vpop.f32.mrf.mxu1 }
 0x259   :  { %v12690_v43 = vadd.f32 %v7950_v56, %v7838_v40  ;;  %v3420_v4 = vpack.c.bf16 %v3276_v54, %v3267_v19  ;;  %v3275_v14 = vmax.f32 %v12646_v1, 0.0  ;;  %v3422_v31 = vpack.c.bf16 %v3278_v60, %v3269_v32  ;;  %v7842_v1 = vpop.f32.mrf.mxu0 }
 0x25a   :  { %v12698_v44 = vunpack.c.h.bf16 %v796_v49  ;;  %v1486_v61 = vadd.f32 %v1485_v18, %v12678_v5  ;;  %v1584_v7 = vmul.f32 %v12625_v50, %v12625_v50  ;;  %v2101_v46 = vadd.f32 %v2100_v34, %v1566_v57  ;;  %v816_v49 = vld [vmem:[%s15281_s0 + $0x260] ss:$36 sps:$4 sm:$0xff]   ;;  %v7955_v10 = vpop.f32.mrf.mxu1 }
 0x25b   :  { %v7841_v62 = vadd.f32 %v7840_v9, %v7839_v51  ;;  %v7953_v59 = vadd.f32 %v7952_v8, %v7951_v55  ;;  %v3268_v19 = vmax.f32 %v2980_v15, 0.0  ;;  %v3277_v54 = vmax.f32 %v2989_v37, 0.0  ;;  %4474 = vmatprep.mubr.bf16.mxu0 %v3420_v4  ;;  %4635 = vmatprep.mubr.bf16.mxu1 %v3422_v31  ;;  %v7843_v42 = vpop.f32.mrf.mxu0  ;;  %v826_v31 = vld [vmem:[%s15281_s0 + $0x2a8] ss:$36 sps:$4 sm:$0xff]  }
 0x25c   :  { %v12705_v38 = vunpack.c.l.bf16 %v806_v17  ;;  %v1487_v3 = vadd.f32 %v1486_v61, %v12685_v53  ;;  %v1593_v20 = vmul.f32 %v12638_v6, %v12638_v6  ;;  %v2102_v32 = vadd.f32 %v2101_v46, %v1575_v26  ;;  %v7957_v51 = vpop.f32.mrf.mxu1 }
 0x25d   :  { %v12710_v60 = vadd.f32 %v7953_v59, %v7841_v62  ;;  %v12715_v11 = vunpack.c.h.bf16 %v806_v17  ;;  %v1602_v52 = vmul.f32 %v12653_v45, %v12653_v45  ;;  %v7844_v16 = vadd.f32 %v7843_v42, %v7842_v1  ;;  %v7845_v37 = vpop.f32.mrf.mxu0 }
 0x25e   :  { %v1488_v30 = vadd.f32 %v1487_v3, %v12698_v44  ;;  %v2103_v57 = vadd.f32 %v2102_v32, %v1584_v7  ;;  %v7956_v40 = vadd.f32 %v7955_v10, %v7954_v23  ;;  %v3419_v56 = vpack.c.bf16 %v3275_v14, %v3266_v36  ;;  %v7958_v9 = vpop.f32.mrf.mxu1 }
 0x25f   :  { %16614 = vst [vmem:[#allocation25_spill] sm:$0xff] %v12710_v60  ;;  %v3421_v15 = vpack.c.bf16 %v3277_v54, %v3268_v19  ;;  %v12720_v55 = vunpack.c.l.bf16 %v816_v49  ;;  %v1611_v26 = vmul.f32 %v12666_v12, %v12666_v12  ;;  %v7846_v17 = vpop.f32.mrf.mxu0  ;;  %v12730_v36 = vunpack.c.h.bf16 %v816_v49 }
 0x260   :  { %v1489_v18 = vadd.f32 %v1488_v30, %v12705_v38  ;;  %v2104_v34 = vadd.f32 %v2103_v57, %v1593_v20  ;;  %v12725_v4 = vadd.f32 %v7956_v40, %v7844_v16  ;;  %v1620_v8 = vmul.f32 %v12678_v5, %v12678_v5  ;;  %v7960_v59 = vpop.f32.mrf.mxu1  ;;  %4475 = vmatmul.mubr.bf16.gmra.mxu0 %v3419_v56  ;;  %v836_v20 = vld [vmem:[%s15281_s0 + $0x2f0] ss:$36 sps:$4 sm:$0xff]  }
 0x261   :  { %v7847_v7 = vadd.f32 %v7846_v17, %v7845_v37  ;;  %v7959_v46 = vadd.f32 %v7958_v9, %v7957_v51  ;;  %v7848_v62 = vpop.f32.mrf.mxu0  ;;  %4636 = vmatmul.mubr.bf16.gmra.mxu1 %v3421_v15  ;;  %v12735_v19 = vunpack.c.l.bf16 %v826_v31  ;;  %v1629_v1 = vmul.f32 %v12685_v53, %v12685_v53 }
 0x262   :  { %16615 = vst [vmem:[#allocation28_spill] sm:$0xff] %v12725_v4  ;;  %v1490_v14 = vadd.f32 %v1489_v18, %v12715_v11  ;;  %v2105_v61 = vadd.f32 %v2104_v34, %v1602_v52  ;;  %v7961_v49 = vpop.f32.mrf.mxu1  ;;  %v12745_v42 = vunpack.c.h.bf16 %v826_v31  ;;  %v1638_v30 = vmul.f32 %v12698_v44, %v12698_v44  ;;  %v846_v34 = vld [vmem:[%s15281_s0 + $0x338] ss:$36 sps:$4 sm:$0xff]  }
 0x263   :  { %v12740_v3 = vadd.f32 %v7959_v46, %v7847_v7  ;;  %v7849_v32 = vpop.f32.mrf.mxu0  ;;  %v7962_v16 = vadd.f32 %v7961_v49, %v7960_v59  ;;  %v12750_v15 = vunpack.c.l.bf16 %v836_v20  ;;  %v1647_v51 = vmul.f32 %v12705_v38, %v12705_v38  ;;  %v856_v49 = vld [vmem:[%s15281_s0 + $0x380] ss:$36 sps:$4 sm:$0xff]  }
 0x264   :  { %v1491_v54 = vadd.f32 %v1490_v14, %v12720_v55  ;;  %v2106_v23 = vadd.f32 %v2105_v61, %v1611_v26  ;;  %v7850_v57 = vadd.f32 %v7849_v32, %v7848_v62  ;;  %v7963_v56 = vpop.f32.mrf.mxu1  ;;  %v12760_v9 = vunpack.c.h.bf16 %v836_v20 }
 0x265   :  { %16616 = vst [vmem:[#allocation32_spill] sm:$0xff] %v12740_v3  ;;  %v7851_v40 = vpop.f32.mrf.mxu0  ;;  %v12765_v62 = vunpack.c.l.bf16 %v846_v34 }
 0x266   :  { %v1492_v10 = vadd.f32 %v1491_v54, %v12730_v36  ;;  %v2107_v52 = vadd.f32 %v2106_v23, %v1620_v8  ;;  %v12755_v26 = vadd.f32 %v7962_v16, %v7850_v57  ;;  %v7964_v17 = vpop.f32.mrf.mxu1  ;;  %v1656_v8 = vmul.f32 %v12715_v11, %v12715_v11 }
 0x267   :  { %v7852_v31 = vpop.f32.mrf.mxu0  ;;  %v7965_v46 = vadd.f32 %v7964_v17, %v7963_v56  ;;  %v1665_v54 = vmul.f32 %v12720_v55, %v12720_v55 }
 0x268   :  { %v1493_v37 = vadd.f32 %v1492_v10, %v12735_v19  ;;  %v2108_v18 = vadd.f32 %v2107_v52, %v1629_v1  ;;  %16617 = vst [vmem:[#allocation29_spill] sm:$0xff] %v12755_v26  ;;  %v7853_v7 = vadd.f32 %v7852_v31, %v7851_v40  ;;  %v7966_v32 = vpop.f32.mrf.mxu1  ;;  %v12775_v10 = vunpack.c.h.bf16 %v846_v34 }
 0x269   :  { %v7854_v23 = vpop.f32.mrf.mxu0  ;;  %v1674_v52 = vmul.f32 %v12730_v36, %v12730_v36  ;;  %v1683_v31 = vmul.f32 %v12735_v19, %v12735_v19 }
 0x26a   :  { %v1494_v14 = vadd.f32 %v1493_v37, %v12745_v42  ;;  %v2109_v61 = vadd.f32 %v2108_v18, %v1638_v30  ;;  %v12770_v20 = vadd.f32 %v7965_v46, %v7853_v7  ;;  %v7967_v40 = vpop.f32.mrf.mxu1 }
 0x26b   :  { %v7855_v16 = vpop.f32.mrf.mxu0  ;;  %v7968_v37 = vadd.f32 %v7967_v40, %v7966_v32  ;;  %v1701_v40 = vmul.f32 %v12750_v15, %v12750_v15 }
 0x26c   :  { %v1495_v59 = vadd.f32 %v1494_v14, %v12750_v15  ;;  %v2110_v1 = vadd.f32 %v2109_v61, %v1647_v51  ;;  %16618 = vst [vmem:[#allocation33_spill] sm:$0xff] %v12770_v20  ;;  %v7856_v56 = vadd.f32 %v7855_v16, %v7854_v23  ;;  %v12780_v51 = vunpack.c.l.bf16 %v856_v49  ;;  %v7969_v14 = vpop.f32.mrf.mxu1  ;;  %v866_v61 = vld [vmem:[%s15281_s0 + $0x3c8] ss:$36 sps:$4 sm:$0xff]  }
 0x26d   :  { %v7857_v34 = vpop.f32.mrf.mxu0 }
 0x26e   :  { %v1496_v30 = vadd.f32 %v1495_v59, %v12760_v9  ;;  %v2111_v57 = vadd.f32 %v2110_v1, %v1656_v8  ;;  %v12788_v7 = vadd.f32 %v7968_v37, %v7856_v56  ;;  %v12790_v8 = vunpack.c.h.bf16 %v856_v49  ;;  %v7970_v32 = vpop.f32.mrf.mxu1 }
 0x26f   :  { %v1692_v59 = vmul.f32 %v12745_v42, %v12745_v42  ;;  %v7858_v23 = vpop.f32.mrf.mxu0 }
 0x270   :  { %v1497_v18 = vadd.f32 %v1496_v30, %v12765_v62  ;;  %v2112_v17 = vadd.f32 %v2111_v57, %v1665_v54  ;;  %16619 = vst [vmem:[#allocation36_spill] sm:$0xff] %v12788_v7  ;;  %16620 = vst [vmem:[#allocation40_spill] sm:$0xff] %v12790_v8  ;;  %v7859_v30 = vadd.f32 %v7858_v23, %v7857_v34  ;;  %v12795_v57 = vunpack.c.l.bf16 %v866_v61  ;;  %v7972_v37 = vpop.f32.mrf.mxu1 }
 0x271   :  { %v7971_v54 = vadd.f32 %v7970_v32, %v7969_v14  ;;  %v7860_v49 = vpop.f32.mrf.mxu0  ;;  %v1710_v34 = vmul.f32 %v12760_v9, %v12760_v9 }
 0x272   :  { %v1498_v46 = vadd.f32 %v1497_v18, %v12775_v10  ;;  %v2113_v1 = vadd.f32 %v2112_v17, %v1674_v52  ;;  %16621 = vst [vmem:[#allocation37_spill] sm:$0xff] %v12795_v57  ;;  %v876_v18 = vld [vmem:[%s15281_s0 + $0x410] ss:$36 sps:$4 sm:$0xff]   ;;  %v12805_v52 = vunpack.c.h.bf16 %v866_v61  ;;  %v7973_v23 = vpop.f32.mrf.mxu1 }
 0x273   :  { %v12803_v7 = vadd.f32 %v7971_v54, %v7859_v30  ;;  %v1719_v30 = vmul.f32 %v12765_v62, %v12765_v62 }
 0x274   :  { %v1499_v16 = vadd.f32 %v1498_v46, %v12780_v51  ;;  %v2114_v56 = vadd.f32 %v2113_v1, %v1683_v31  ;;  %16623 = vst [vmem:[#allocation44_spill] sm:$0xff] %v12805_v52  ;;  %v7861_v46 = vpop.f32.mrf.mxu0  ;;  %v7974_v31 = vadd.f32 %v7973_v23, %v7972_v37  ;;  %v12810_v1 = vunpack.c.l.bf16 %v876_v18 }
 0x275   :  { %16622 = vst [vmem:[#allocation41_spill] sm:$0xff] %v12803_v7  ;;  %v7862_v32 = vadd.f32 %v7861_v46, %v7860_v49  ;;  %v7975_v7 = vpop.f32.mrf.mxu1  ;;  %v1728_v49 = vmul.f32 %v12775_v10, %v12775_v10 }
 0x276   :  { %v1500_v17 = vadd.f32 %v1499_v16, %v12790_v8  ;;  %v2115_v14 = vadd.f32 %v2114_v56, %v1692_v59  ;;  %v7863_v61 = vpop.f32.mrf.mxu0  ;;  %v886_v16 = vld [vmem:[%s15281_s0 + $0x458] ss:$36 sps:$4 sm:$0xff]   ;;  %v12820_v59 = vunpack.c.h.bf16 %v876_v18 }
 0x277   :  { %v12818_v26 = vadd.f32 %v7974_v31, %v7862_v32  ;;  %v7976_v46 = vpop.f32.mrf.mxu1  ;;  %v1737_v32 = vmul.f32 %v12780_v51, %v12780_v51 }
 0x278   :  { %v1501_v20 = vadd.f32 %v1500_v17, %v12795_v57  ;;  %v2116_v54 = vadd.f32 %v2115_v14, %v1701_v40  ;;  %16625 = vst [vmem:[#allocation45_spill] sm:$0xff] %v12820_v59  ;;  %v7864_v17 = vpop.f32.mrf.mxu0  ;;  %v7977_v40 = vadd.f32 %v7976_v46, %v7975_v7  ;;  %v12825_v14 = vunpack.c.l.bf16 %v886_v16 }
 0x279   :  { %16624 = vst [vmem:[#allocation48_spill] sm:$0xff] %v12818_v26  ;;  %v7865_v23 = vadd.f32 %v7864_v17, %v7863_v61  ;;  %v7978_v26 = vpop.f32.mrf.mxu1 }
 0x27a   :  { %v1502_v56 = vadd.f32 %v1501_v20, %v12805_v52  ;;  %v2117_v37 = vadd.f32 %v2116_v54, %v1710_v34  ;;  %16626 = vst [vmem:[#allocation49_spill] sm:$0xff] %v12825_v14  ;;  %v7866_v18 = vpop.f32.mrf.mxu0  ;;  %v12832_v20 = vunpack.c.h.bf16 %v886_v16  ;;  %v1746_v54 = vmul.f32 %v12790_v8, %v12790_v8 }
 0x27b   :  { %v12830_v4 = vadd.f32 %v7977_v40, %v7865_v23  ;;  %v7979_v17 = vpop.f32.mrf.mxu1 }
 0x27c   :  { %v1503_v3 = vadd.f32 %v1502_v56, %v12810_v1  ;;  %v2118_v31 = vadd.f32 %v2117_v37, %v1719_v30  ;;  %16628 = vst [vmem:[#allocation56_spill] sm:$0xff] %v12832_v20  ;;  %v7867_v61 = vpop.f32.mrf.mxu0  ;;  %v7980_v56 = vadd.f32 %v7979_v17, %v7978_v26  ;;  %v1755_v30 = vmul.f32 %v12795_v57, %v12795_v57 }
 0x27d   :  { %16627 = vst [vmem:[#allocation52_spill] sm:$0xff] %v12830_v4  ;;  %v7868_v46 = vadd.f32 %v7867_v61, %v7866_v18  ;;  %v7981_v40 = vpop.f32.mrf.mxu1  ;;  %v1764_v4 = vmul.f32 %v12805_v52, %v12805_v52 }
 0x27e   :  { %v1504_v34 = vadd.f32 %v1503_v3, %v12820_v59  ;;  %v2119_v7 = vadd.f32 %v2118_v31, %v1728_v49  ;;  %v7869_v23 = vpop.f32.mrf.mxu0 }
 0x27f   :  { %v12840_v16 = vadd.f32 %v7980_v56, %v7868_v46  ;;  %v7982_v8 = vpop.f32.mrf.mxu1 }
 0x280   :  { %v1505_v60 = vadd.f32 %v1504_v34, %v12825_v14  ;;  %v2120_v37 = vadd.f32 %v2119_v7, %v1737_v32  ;;  %v7870_v31 = vpop.f32.mrf.mxu0  ;;  %v7983_v26 = vadd.f32 %v7982_v8, %v7981_v40  ;;  %v1773_v34 = vmul.f32 %v12810_v1, %v12810_v1 }
 0x281   :  { %16629 = vst [vmem:[#allocation53_spill] sm:$0xff] %v12840_v16  ;;  %v7871_v18 = vadd.f32 %v7870_v31, %v7869_v23  ;;  %v7984_v7 = vpop.f32.mrf.mxu1  ;;  %v1791_v8 = vmul.f32 %v12825_v14, %v12825_v14 }
 0x282   :  { %v1506_v3 = vadd.f32 %v1505_v60, %v12832_v20  ;;  %v2121_v49 = vadd.f32 %v2120_v37, %v1746_v54  ;;  %v7872_v32 = vpop.f32.mrf.mxu0  ;;  %v1782_v60 = vmul.f32 %v12820_v59, %v12820_v59 }
 0x283   :  { %v12847_v57 = vadd.f32 %v7983_v26, %v7871_v18  ;;  %v7985_v54 = vpop.f32.mrf.mxu1 }
 0x284   :  { %v1507_v61 = vrot.slane %v1506_v3, 4  ;;  %v2122_v17 = vadd.f32 %v2121_v49, %v1755_v30  ;;  %v7873_v16 = vpop.f32.mrf.mxu0  ;;  %v7986_v52 = vadd.f32 %v7985_v54, %v7984_v7 }
 0x285   :  { %16630 = vst [vmem:[#allocation57_spill] sm:$0xff] %v12847_v57  ;;  %v7874_v37 = vadd.f32 %v7873_v16, %v7872_v32  ;;  %v7987_v30 = vpop.f32.mrf.mxu1 }
 0x286   :  { %v1508_v46 = vadd.f32 %v1507_v61, %v1506_v3  ;;  %v2123_v56 = vadd.f32 %v2122_v17, %v1764_v4  ;;  %v7875_v31 = vpop.f32.mrf.mxu0  ;;  %v1800_v3 = vmul.f32 %v12832_v20, %v12832_v20 }
 0x287   :  { %v12853_v49 = vadd.f32 %v7986_v52, %v7874_v37  ;;  %v7988_v4 = vpop.f32.mrf.mxu1 }
 0x288   :  { %v1509_v23 = vrot.slane %v1508_v46, 2  ;;  %v2124_v40 = vadd.f32 %v2123_v56, %v1773_v34  ;;  %v7876_v61 = vpop.f32.mrf.mxu0  ;;  %v7989_v57 = vadd.f32 %v7988_v4, %v7987_v30 }
 0x289   :  { %16631 = vst [vmem:[#allocation60_spill] sm:$0xff] %v12853_v49  ;;  %v7877_v17 = vadd.f32 %v7876_v61, %v7875_v31  ;;  %v7990_v7 = vpop.f32.mrf.mxu1 }
 0x28a   :  { %v1510_v18 = vadd.f32 %v1509_v23, %v1508_v46  ;;  %v2125_v26 = vadd.f32 %v2124_v40, %v1782_v60  ;;  %v7878_v32 = vpop.f32.mrf.mxu0 }
 0x28b   :  { %v12857_v54 = vadd.f32 %v7989_v57, %v7877_v17  ;;  %v7991_v59 = vpop.f32.mrf.mxu1 }
 0x28c   :  { %v2126_v16 = vadd.f32 %v2125_v26, %v1791_v8  ;;  %v1511_v14 = vrot.slane %v1510_v18, 1  ;;  %v7879_v56 = vpop.f32.mrf.mxu0  ;;  %v7992_v37 = vadd.f32 %v7991_v59, %v7990_v7 }
 0x28d   :  { %16632 = vst [vmem:[#allocation64_spill] sm:$0xff] %v12857_v54  ;;  %v7880_v52 = vadd.f32 %v7879_v56, %v7878_v32  ;;  %v7993_v49 = vpop.f32.mrf.mxu1 }
 0x28e   :  { %v2127_v34 = vadd.f32 %v2126_v16, %v1800_v3  ;;  %v7881_v23 = vpop.f32.mrf.mxu0  ;;  %v1512_v60 = vadd.f32 %v1511_v14, %v1510_v18 }
 0x28f   :  { %v12859_v20 = vadd.f32 %v7992_v37, %v7880_v52  ;;  %v7994_v30 = vpop.f32.mrf.mxu1 }
 0x290   :  { %v2128_v46 = vrot.slane %v2127_v34, 4  ;;  %v7882_v31 = vpop.f32.mrf.mxu0  ;;  %v7995_v26 = vadd.f32 %v7994_v30, %v7993_v49  ;;  %v2142_v16 = vmul.f32 0.0051020407, %v1512_v60 }
 0x291   :  { %v7883_v8 = vadd.f32 %v7882_v31, %v7881_v23  ;;  %v7996_v4 = vpop.f32.mrf.mxu1 }
 0x292   :  { %v2129_v40 = vadd.f32 %v2128_v46, %v2127_v34  ;;  %v7884_v57 = vpop.f32.mrf.mxu0  ;;  %v2160_v34 = vmul.f32 %v2142_v16, %v2142_v16 }
 0x293   :  { %v12861_v17 = vadd.f32 %v7995_v26, %v7883_v8  ;;  %v7997_v59 = vpop.f32.mrf.mxu1 }
 0x294   :  { %v2130_v61 = vrot.slane %v2129_v40, 2  ;;  %v7885_v32 = vpop.f32.mrf.mxu0  ;;  %v7998_v56 = vadd.f32 %v7997_v59, %v7996_v4 }
 0x295   :  { %16633 = vst [vmem:[#allocation61_spill] sm:$0xff] %v12861_v17  ;;  %v7886_v7 = vadd.f32 %v7885_v32, %v7884_v57  ;;  %v7999_v37 = vpop.f32.mrf.mxu1 }
 0x296   :  { %v2131_v3 = vadd.f32 %v2130_v61, %v2129_v40  ;;  %v7887_v52 = vpop.f32.mrf.mxu0 }
 0x297   :  { %v12863_v14 = vadd.f32 %v7998_v56, %v7886_v7  ;;  %v8000_v49 = vpop.f32.mrf.mxu1 }
 0x298   :  { %v2132_v54 = vrot.slane %v2131_v3, 1  ;;  %v7888_v46 = vpop.f32.mrf.mxu0  ;;  %v8001_v31 = vadd.f32 %v8000_v49, %v7999_v37 }
 0x299   :  { %v7889_v23 = vadd.f32 %v7888_v46, %v7887_v52  ;;  %v8002_v26 = vpop.f32.mrf.mxu1 }
 0x29a   :  { %v2133_v18 = vadd.f32 %v2132_v54, %v2131_v3  ;;  %v7890_v8 = vpop.f32.mrf.mxu0 }
 0x29b   :  { %v12865_v40 = vadd.f32 %v8001_v31, %v7889_v23  ;;  %v8003_v57 = vpop.f32.mrf.mxu1 }
 0x29c   :  { %v2151_v30 = vmul.f32 0.0051020407, %v2133_v18  ;;  %v7891_v61 = vpop.f32.mrf.mxu0  ;;  %v8004_v32 = vadd.f32 %v8003_v57, %v8002_v26 }
 0x29d   :  { %v7892_v4 = vadd.f32 %v7891_v61, %v7890_v8  ;;  %v8005_v7 = vpop.f32.mrf.mxu1 }
 0x29e   :  { %v2169_v60 = vsub.f32 %v2151_v30, %v2160_v34  ;;  %v7893_v17 = vpop.f32.mrf.mxu0 }
 0x29f   :  { %v12867_v56 = vadd.f32 %v8004_v32, %v7892_v4  ;;  %v8006_v3 = vpop.f32.mrf.mxu1 }
 0x2a0   :  { %v2178_v59 = vadd.f32 1e-05, %v2169_v60  ;;  %v7894_v54 = vpop.f32.mrf.mxu0  ;;  %v8007_v37 = vadd.f32 %v8006_v3, %v8005_v7 }
 0x2a1   :  { %16634 = vst [vmem:[#allocation65_spill] sm:$0xff] %v12867_v56  ;;  %v7895_v52 = vadd.f32 %v7894_v54, %v7893_v17  ;;  %v8008_v46 = vpop.f32.mrf.mxu1  ;;  %v7645_v17 = vld [vmem:[%s15282_s1 + $0x8] ss:$0 sm:$0xff] }
 0x2a2   :  { %9120 = vrsqrt.f32 %v2178_v59  ;;  %v7896_v18 = vpop.f32.mrf.mxu0 }
 0x2a3   :  { %v12869_v49 = vadd.f32 %v8007_v37, %v7895_v52  ;;  %v8009_v34 = vpop.f32.mrf.mxu1 }
 0x2a4   :  { %v7897_v23 = vpop.f32.mrf.mxu0  ;;  %v8010_v30 = vadd.f32 %v8009_v34, %v8008_v46 }
 0x2a5   :  { %v7898_v31 = vadd.f32 %v7897_v23, %v7896_v18  ;;  %v8011_v26 = vpop.f32.mrf.mxu1 }
 0x2a6   :  { %v7899_v8 = vpop.f32.mrf.mxu0 }
 0x2a7   :  { %v12871_v60 = vadd.f32 %v8010_v30, %v7898_v31  ;;  %v8012_v57 = vpop.f32.mrf.mxu1 }
 0x2a8   :  { %v7900_v61 = vpop.f32.mrf.mxu0  ;;  %v8013_v32 = vadd.f32 %v8012_v57, %v8011_v26 }
 0x2a9   :  { %16635 = vst [vmem:[#allocation68_spill] sm:$0xff] %v12871_v60  ;;  %v7901_v4 = vadd.f32 %v7900_v61, %v7899_v8  ;;  %v8142_v56 = vpop.f32.mrf.mxu1  ;;  %v16638_v61 = vld [vmem:[#allocation3_spill] sm:$0xff] }
 0x2aa   :  { %v8030_v59 = vpop.f32.mrf.mxu0 }
 0x2ab   :  { %v12876_v7 = vadd.f32 %v8013_v32, %v7901_v4  ;;  %v8143_v3 = vpop.f32.mrf.mxu1 }
 0x2ac   :  { %v8031_v54 = vpop.f32.mrf.mxu0  ;;  %v8144_v18 = vadd.f32 %v8143_v3, %v8142_v56  ;;  %v2247_v56 = vld [vmem:[%s15283_s2 + $0x8] sm:$0x1] }
 0x2ad   :  { %16636 = vst [vmem:[#allocation72_spill] sm:$0xff] %v12876_v7  ;;  %v8032_v37 = vadd.f32 %v8031_v54, %v8030_v59 }
 0x2ae   :  { %v12878_v23 = vpop.f32.mrf.mxu0 }
 0x2af   :  { %v9121_v52 = vpop.eup %9120  ;;  %v4357_v34 = vadd.f32 %v8032_v37, %v12441_v58 }
 0x2b0   :  { %v2245_v46 = vmul.f32 %v9121_v52, %v7645_v17  ;;  %v12881_v30 = vpop.f32.mrf.mxu0 }
 0x2b1   :  { %v12886_v26 = vadd.f32 %v8144_v18, %v4357_v34 }
 0x2b2   :  { %v2256_v31 = vmul.f32 %v2245_v46, %v2142_v16  ;;  %v12884_v8 = vrot.slane %v2245_v46, %v11191_v0  ;;  %v12889_v4 = vpop.f32.mrf.mxu0 }
 0x2b3   :  { %16637 = vst [vmem:[#allocation69_spill] sm:$0xff] %v12886_v26 }
 0x2b4   :  { %v2321_v57 = vrot.slane %v2256_v31, %v16638_v61  ;;  %v12895_v59 = vpop.f32.mrf.mxu0  ;;  %v2377_v58 = vmul.f32 %v12884_v8, %v12547_v29  ;;  %v2386_v17 = vmul.f32 %v12884_v8, %v12549_v27  ;;  %v2395_v54 = vmul.f32 %v12884_v8, %v12557_v39 }
 0x2b5   :  { %v2404_v3 = vmul.f32 %v12884_v8, %v12569_v35  ;;  %v2413_v37 = vmul.f32 %v12884_v8, %v12579_v33  ;;  %v2422_v18 = vmul.f32 %v12884_v8, %v12597_v21  ;;  %v2431_v27 = vmul.f32 %v12884_v8, %v12608_v22 }
 0x2b6   :  { %v2328_v32 = vrot.slane %v2321_v57, %v16638_v61  ;;  %v12905_v52 = vpop.f32.mrf.mxu0  ;;  %v2440_v39 = vmul.f32 %v12884_v8, %v12625_v50  ;;  %v2449_v35 = vmul.f32 %v12884_v8, %v12638_v6  ;;  %v2458_v33 = vmul.f32 %v12884_v8, %v12653_v45 }
 0x2b8   :  { %v2332_v16 = vsub.f32 %v2247_v56, %v2328_v32  ;;  %v12914_v46 = vpop.f32.mrf.mxu0 }
 0x2ba   :  { %v12912_v29 = vrot.slane %v2332_v16, %v11191_v0  ;;  %v12928_v57 = vpop.f32.mrf.mxu0 }
 0x2bc   :  { %v2712_v34 = vadd.f32 %v12912_v29, %v2377_v58  ;;  %v2721_v21 = vadd.f32 %v12912_v29, %v2386_v17  ;;  %v2730_v31 = vadd.f32 %v12912_v29, %v2395_v54  ;;  %v2739_v61 = vadd.f32 %v12912_v29, %v2404_v3  ;;  %v12932_v0 = vpop.f32.mrf.mxu0 }
 0x2bd   :  { %v2748_v22 = vadd.f32 %v12912_v29, %v2413_v37  ;;  %v2757_v50 = vadd.f32 %v12912_v29, %v2422_v18  ;;  %v2766_v17 = vadd.f32 %v12912_v29, %v2431_v27  ;;  %v2775_v54 = vadd.f32 %v12912_v29, %v2440_v39 }
 0x2be   :  { %v3000_v56 = vmax.f32 %v2712_v34, 0.0  ;;  %v3009_v32 = vmax.f32 %v2721_v21, 0.0  ;;  %v3018_v6 = vmax.f32 %v2730_v31, 0.0  ;;  %v3027_v16 = vmax.f32 %v2739_v61, 0.0  ;;  %v8045_v60 = vpop.f32.mrf.mxu0 }
 0x2bf   :  { %v3036_v45 = vmax.f32 %v2748_v22, 0.0  ;;  %v3045_v58 = vmax.f32 %v2757_v50, 0.0  ;;  %v2784_v7 = vadd.f32 %v12912_v29, %v2449_v35  ;;  %v2793_v37 = vadd.f32 %v12912_v29, %v2458_v33 }
 0x2c0   :  { %v3288_v26 = vpack.c.bf16 %v3009_v32, %v3000_v56  ;;  %v3297_v3 = vpack.c.bf16 %v3027_v16, %v3018_v6  ;;  %v8046_v34 = vpop.f32.mrf.mxu0  ;;  %v3054_v21 = vmax.f32 %v2766_v17, 0.0  ;;  %v3063_v31 = vmax.f32 %v2775_v54, 0.0 }
 0x2c1   :  { %v3306_v18 = vpack.c.bf16 %v3045_v58, %v3036_v45  ;;  %v2467_v61 = vmul.f32 %v12884_v8, %v12666_v12  ;;  %v2476_v27 = vmul.f32 %v12884_v8, %v12678_v5  ;;  %v3072_v39 = vmax.f32 %v2784_v7, 0.0 }
 0x2c2   :  { %8494 = vmatprep.mubr.bf16.mxu0 %v3288_v26  ;;  %v3081_v22 = vmax.f32 %v2793_v37, 0.0  ;;  %v2485_v35 = vmul.f32 %v12884_v8, %v12685_v53  ;;  %v2494_v33 = vmul.f32 %v12884_v8, %v12698_v44  ;;  %v12946_v26 = vpop.f32.mrf.mxu1  ;;  %v8048_v50 = vpop.f32.mrf.mxu0  ;;  %v3315_v32 = vpack.c.bf16 %v3063_v31, %v3054_v21 }
 0x2c3   :  { %8495 = vmatmul.mubr.bf16.vlgmr.msra.gmra.mxu0 %v3297_v3  ;;  %v2802_v6 = vadd.f32 %v12912_v29, %v2467_v61  ;;  %v2811_v12 = vadd.f32 %v12912_v29, %v2476_v27  ;;  %v8035_v44 = vadd.f32 %v12881_v30, %v12878_v23  ;;  %v2503_v3 = vmul.f32 %v12884_v8, %v12705_v38 }
 0x2c4   :  { %8498 = vmatprep.mubr.bf16.mxu0 %v3306_v18  ;;  %v8049_v56 = vpop.f32.mrf.mxu0  ;;  %v3324_v16 = vpack.c.bf16 %v3081_v22, %v3072_v39  ;;  %v2820_v5 = vadd.f32 %v12912_v29, %v2485_v35  ;;  %v2829_v7 = vadd.f32 %v12912_v29, %v2494_v33  ;;  %v12952_v45 = vpop.f32.mrf.mxu1  ;;  %v2512_v37 = vmul.f32 %v12884_v8, %v12715_v11 }
 0x2c5   :  { %v3090_v17 = vmax.f32 %v2802_v6, 0.0  ;;  %v3099_v54 = vmax.f32 %v2811_v12, 0.0  ;;  %v2521_v31 = vmul.f32 %v12884_v8, %v12720_v55  ;;  %v2530_v61 = vmul.f32 %v12884_v8, %v12730_v36 }
 0x2c6   :  { %v8051_v53 = vpop.f32.mrf.mxu0  ;;  %v3108_v18 = vmax.f32 %v2820_v5, 0.0  ;;  %v3117_v21 = vmax.f32 %v2829_v7, 0.0  ;;  %v12964_v23 = vpop.f32.mrf.mxu1  ;;  %v12967_v27 = vadd.f32 %v8035_v44, %v12469_v2  ;;  %v2838_v22 = vadd.f32 %v12912_v29, %v2503_v3 }
 0x2c7   :  { %v3333_v38 = vpack.c.bf16 %v3099_v54, %v3090_v17  ;;  %v2847_v11 = vadd.f32 %v12912_v29, %v2512_v37  ;;  %v8038_v35 = vadd.f32 %v12895_v59, %v12889_v4  ;;  %v2856_v55 = vadd.f32 %v12912_v29, %v2521_v31 }
 0x2c8   :  { %v8052_v58 = vpop.f32.mrf.mxu0  ;;  %v3342_v33 = vpack.c.bf16 %v3117_v21, %v3108_v18  ;;  %v2865_v36 = vadd.f32 %v12912_v29, %v2530_v61  ;;  %v8041_v2 = vadd.f32 %v12914_v46, %v12905_v52  ;;  %v2539_v12 = vmul.f32 %v12884_v8, %v12735_v19 }
 0x2c9   :  { %v12984_v5 = vadd.f32 %v8038_v35, %v12488_v47  ;;  %v2557_v4 = vmul.f32 %v12884_v8, %v12750_v15  ;;  %v2566_v59 = vmul.f32 %v12884_v8, %v12760_v9  ;;  %v8044_v52 = vadd.f32 %v12932_v0, %v12928_v57 }
 0x2ca   :  { %v8054_v30 = vpop.f32.mrf.mxu0  ;;  %v12991_v7 = vadd.f32 %v8041_v2, %v12505_v24  ;;  %v3126_v19 = vmax.f32 %v2838_v22, 0.0  ;;  %v3135_v44 = vmax.f32 %v2847_v11, 0.0  ;;  %v8050_v17 = vadd.f32 %v8049_v56, %v8048_v50 }
 0x2cb   :  { %8499 = vmatmul.mubr.bf16.gmra.mxu0 %v3315_v32  ;;  %v12975_v32 = vpop.f32.mrf.mxu1  ;;  %v3144_v47 = vmax.f32 %v2856_v55, 0.0  ;;  %v3153_v54 = vmax.f32 %v2865_v36, 0.0  ;;  %v12998_v15 = vadd.f32 %v8044_v52, %v12534_v63  ;;  %v8053_v9 = vadd.f32 %v8052_v58, %v8051_v53  ;;  %v16639_v36 = vld [vmem:[#allocation40_spill] sm:$0xff] }
 0x2cc   :  { %8502 = vmatprep.mubr.bf16.mxu0 %v3324_v16  ;;  %v8055_v39 = vpop.f32.mrf.mxu0  ;;  %v2548_v16 = vmul.f32 %v12884_v8, %v12745_v42  ;;  %v8047_v42 = vadd.f32 %v8046_v34, %v8045_v60  ;;  %v13004_v0 = vadd.f32 %v8050_v17, %v12582_v48  ;;  %v2874_v60 = vadd.f32 %v12912_v29, %v2539_v12  ;;  %v16641_v17 = vld [vmem:[#allocation28_spill] sm:$0xff] }
 0x2cd   :  { %v12995_v3 = vpop.f32.mrf.mxu1  ;;  %v8056_v57 = vadd.f32 %v8055_v39, %v8054_v30  ;;  %v13008_v34 = vadd.f32 %v8053_v9, %v12611_v25  ;;  %v3351_v18 = vpack.c.bf16 %v3135_v44, %v3126_v19  ;;  %v2892_v21 = vadd.f32 %v12912_v29, %v2557_v4 }
 0x2ce   :  { %v8057_v6 = vpop.f32.mrf.mxu0  ;;  %v13001_v37 = vadd.f32 %v8047_v42, %v12559_v13  ;;  %v2883_v63 = vadd.f32 %v12912_v29, %v2548_v16  ;;  %v3360_v13 = vpack.c.bf16 %v3153_v54, %v3144_v47  ;;  %v2901_v48 = vadd.f32 %v12912_v29, %v2566_v59  ;;  %v16642_v54 = vld [vmem:[#allocation37_spill] sm:$0xff] }
 0x2cf   :  { %v13012_v53 = vadd.f32 %v8056_v57, %v12643_v28  ;;  %v13016_v31 = vpop.f32.mrf.mxu1  ;;  %v2575_v39 = vmul.f32 %v12884_v8, %v12765_v62  ;;  %v2584_v11 = vmul.f32 %v12884_v8, %v12775_v10  ;;  %v2611_v9 = vmul.f32 %v12884_v8, %v16642_v54 }
 0x2d0   :  { %v8058_v46 = vpop.f32.mrf.mxu0  ;;  %v3171_v22 = vmax.f32 %v2883_v63, 0.0  ;;  %v3189_v55 = vmax.f32 %v2901_v48, 0.0 }
 0x2d1   :  { %v8059_v50 = vadd.f32 %v8058_v46, %v8057_v6  ;;  %v13032_v2 = vpop.f32.mrf.mxu1  ;;  %v16640_v6 = vld [vmem:[#allocation25_spill] sm:$0xff]  ;;  %v2910_v10 = vadd.f32 %v12912_v29, %v2575_v39  ;;  %v2919_v59 = vadd.f32 %v12912_v29, %v2584_v11 }
 0x2d2   :  { %v8060_v24 = vpop.f32.mrf.mxu0 }
 0x2d3   :  { %8503 = vmatmul.mubr.bf16.gmra.mxu0 %v3333_v38  ;;  %v13019_v61 = vadd.f32 %v8059_v50, %v12671_v41  ;;  %v3162_v38 = vmax.f32 %v2874_v60, 0.0  ;;  %v2593_v41 = vmul.f32 %v12884_v8, %v12780_v51  ;;  %v13041_v44 = vpop.f32.mrf.mxu1  ;;  %v3198_v57 = vmax.f32 %v2910_v10, 0.0  ;;  %v16643_v50 = vld [vmem:[#allocation44_spill] sm:$0xff] }
 0x2d4   :  { %8506 = vmatprep.mubr.bf16.mxu0 %v3342_v33  ;;  %v8061_v56 = vpop.f32.mrf.mxu0  ;;  %v3180_v33 = vmax.f32 %v2892_v21, 0.0  ;;  %v3207_v60 = vmax.f32 %v2919_v59, 0.0  ;;  %v16644_v21 = vld [vmem:[#allocation45_spill] sm:$0xff] }
 0x2d5   :  { %v8062_v58 = vadd.f32 %v8061_v56, %v8060_v24  ;;  %v3369_v4 = vpack.c.bf16 %v3171_v22, %v3162_v38  ;;  %v2928_v19 = vadd.f32 %v12912_v29, %v2593_v41  ;;  %v2620_v56 = vmul.f32 %v12884_v8, %v16643_v50 }
 0x2d6   :  { %v8063_v25 = vpop.f32.mrf.mxu0  ;;  %v3378_v46 = vpack.c.bf16 %v3189_v55, %v3180_v33  ;;  %v2638_v48 = vmul.f32 %v12884_v8, %v16644_v21  ;;  %v2946_v22 = vadd.f32 %v12912_v29, %v2611_v9 }
 0x2d7   :  { %v13022_v30 = vadd.f32 %v8062_v58, %v12690_v43  ;;  %v2602_v43 = vmul.f32 %v12884_v8, %v16639_v36  ;;  %v3216_v63 = vmax.f32 %v2928_v19, 0.0  ;;  %v2955_v33 = vadd.f32 %v12912_v29, %v2620_v56  ;;  %v16648_v19 = vld [vmem:[#allocation56_spill] sm:$0xff] }
 0x2d8   :  { %v8064_v28 = vpop.f32.mrf.mxu0 }
 0x2d9   :  { %v8065_v35 = vadd.f32 %v8064_v28, %v8063_v25  ;;  %v2937_v51 = vadd.f32 %v12912_v29, %v2602_v43  ;;  %v13054_v25 = vpop.f32.mrf.mxu1  ;;  %v16645_v28 = vld [vmem:[#allocation32_spill] sm:$0xff]  ;;  %v3243_v59 = vmax.f32 %v2955_v33, 0.0 }
 0x2da   :  { %v8066_v62 = vpop.f32.mrf.mxu0 }
 0x2db   :  { %8507 = vmatmul.mubr.bf16.gmra.mxu0 %v3351_v18  ;;  %v13035_v12 = vadd.f32 %v8065_v35, %v16640_v6  ;;  %v3225_v58 = vmax.f32 %v2937_v51, 0.0  ;;  %v3387_v35 = vpack.c.bf16 %v3207_v60, %v3198_v57  ;;  %v13063_v43 = vpop.f32.mrf.mxu1  ;;  %v16646_v6 = vld [vmem:[#allocation29_spill] sm:$0xff]  ;;  %v2656_v51 = vmul.f32 %v12884_v8, %v16648_v19 }
 0x2dc   :  { %8510 = vmatprep.mubr.bf16.mxu0 %v3360_v13  ;;  %v8067_v16 = vpop.f32.mrf.mxu0  ;;  %v2629_v13 = vmul.f32 %v12884_v8, %v12810_v1  ;;  %v2973_v1 = vadd.f32 %v12912_v29, %v2638_v48  ;;  %v16649_v57 = vld [vmem:[#allocation33_spill] sm:$0xff]  ;;  %v16650_v48 = vld [vmem:[#allocation36_spill] sm:$0xff] }
 0x2dd   :  { %v8068_v52 = vadd.f32 %v8067_v16, %v8066_v62  ;;  %v3396_v41 = vpack.c.bf16 %v3225_v58, %v3216_v63  ;;  %v13072_v9 = vpop.f32.mrf.mxu1  ;;  %v2991_v63 = vadd.f32 %v12912_v29, %v2656_v51 }
 0x2de   :  { %v8069_v42 = vpop.f32.mrf.mxu0  ;;  %v2964_v36 = vadd.f32 %v12912_v29, %v2629_v13  ;;  %v3261_v54 = vmax.f32 %v2973_v1, 0.0 }
 0x2df   :  { %v13044_v47 = vadd.f32 %v8068_v52, %v16641_v17  ;;  %v16647_v52 = vld [vmem:[#allocation49_spill] sm:$0xff]  ;;  %v13079_v21 = vpop.f32.mrf.mxu1 }
 0x2e0   :  { %v8070_v24 = vpop.f32.mrf.mxu0  ;;  %v3252_v17 = vmax.f32 %v2964_v36, 0.0 }
 0x2e1   :  { %v8071_v18 = vadd.f32 %v8070_v24, %v8069_v42  ;;  %v13084_v33 = vpop.f32.mrf.mxu1 }
 0x2e2   :  { %v8072_v39 = vpop.f32.mrf.mxu0  ;;  %v3414_v13 = vpack.c.bf16 %v3261_v54, %v3252_v17 }
 0x2e3   :  { %8511 = vmatmul.mubr.bf16.gmra.mxu0 %v3369_v4  ;;  %v13057_v38 = vadd.f32 %v8071_v18, %v16645_v28  ;;  %v3234_v4 = vmax.f32 %v2946_v22, 0.0 }
 0x2e4   :  { %8514 = vmatprep.mubr.bf16.mxu0 %v3378_v46  ;;  %v8073_v11 = vpop.f32.mrf.mxu0  ;;  %v2647_v46 = vmul.f32 %v12884_v8, %v16647_v52 }
 0x2e5   :  { %v8074_v55 = vadd.f32 %v8073_v11, %v8072_v39  ;;  %v3405_v56 = vpack.c.bf16 %v3243_v59, %v3234_v4  ;;  %v3279_v11 = vmax.f32 %v2991_v63, 0.0 }
 0x2e6   :  { %v8075_v62 = vpop.f32.mrf.mxu0  ;;  %v2982_v18 = vadd.f32 %v12912_v29, %v2647_v46 }
 0x2e7   :  { %v13066_v16 = vadd.f32 %v8074_v55, %v16646_v6  ;;  %v13089_v6 = vpop.f32.mrf.mxu1 }
 0x2e8   :  { %v8076_v10 = vpop.f32.mrf.mxu0  ;;  %v3270_v22 = vmax.f32 %v2982_v18, 0.0 }
 0x2e9   :  { %v8077_v42 = vadd.f32 %v8076_v10, %v8075_v62  ;;  %v16653_v10 = vld [vmem:[#allocation48_spill] sm:$0xff]  ;;  %v13094_v19 = vpop.f32.mrf.mxu1 }
 0x2ea   :  { %v8078_v24 = vpop.f32.mrf.mxu0  ;;  %v3423_v1 = vpack.c.bf16 %v3279_v11, %v3270_v22 }
 0x2eb   :  { %8515 = vmatmul.mubr.bf16.gmra.mxu0 %v3387_v35  ;;  %v13075_v60 = vadd.f32 %v8077_v42, %v16649_v57  ;;  %v16655_v42 = vld [vmem:[#allocation52_spill] sm:$0xff]  ;;  %v13099_v57 = vpop.f32.mrf.mxu1 }
 0x2ec   :  { %8518 = vmatprep.mubr.bf16.mxu0 %v3396_v41  ;;  %v8079_v50 = vpop.f32.mrf.mxu0  ;;  %v16651_v41 = vld [vmem:[#allocation41_spill] sm:$0xff] }
 0x2ed   :  { %v8080_v58 = vadd.f32 %v8079_v50, %v8078_v24 }
 0x2ee   :  { %v8081_v8 = vpop.f32.mrf.mxu0 }
 0x2ef   :  { %v13082_v39 = vadd.f32 %v8080_v58, %v16650_v48  ;;  %v16659_v48 = vld [vmem:[#allocation57_spill] sm:$0xff] }
 0x2f0   :  { %v8082_v28 = vpop.f32.mrf.mxu0 }
 0x2f1   :  { %v8083_v35 = vadd.f32 %v8082_v28, %v8081_v8 }
 0x2f2   :  { %v8084_v55 = vpop.f32.mrf.mxu0 }
 0x2f3   :  { %8519 = vmatmul.mubr.bf16.gmra.mxu0 %v3405_v56  ;;  %v13087_v36 = vadd.f32 %v8083_v35, %v16651_v41  ;;  %v16657_v56 = vld [vmem:[#allocation53_spill] sm:$0xff]  ;;  %v16661_v41 = vld [vmem:[#allocation60_spill] sm:$0xff] }
 0x2f4   :  { %8522 = vmatprep.mubr.bf16.mxu0 %v3414_v13  ;;  %v8085_v29 = vpop.f32.mrf.mxu0  ;;  %v13104_v13 = vpop.f32.mrf.mxu1 }
 0x2f5   :  { %16652 = vst [vmem:[#allocation73_spill] sm:$0xff] %v13087_v36  ;;  %v8086_v62 = vadd.f32 %v8085_v29, %v8084_v55 }
 0x2f6   :  { %v8087_v4 = vpop.f32.mrf.mxu0  ;;  %v13109_v35 = vpop.f32.mrf.mxu1 }
 0x2f7   :  { %v13092_v59 = vadd.f32 %v8086_v62, %v16653_v10 }
 0x2f8   :  { %v8088_v52 = vpop.f32.mrf.mxu0 }
 0x2f9   :  { %16654 = vst [vmem:[#allocation76_spill] sm:$0xff] %v13092_v59  ;;  %v8089_v46 = vadd.f32 %v8088_v52, %v8087_v4  ;;  %v13114_v4 = vpop.f32.mrf.mxu1  ;;  %v16663_v52 = vld [vmem:[#allocation64_spill] sm:$0xff] }
 0x2fa   :  { %v8090_v51 = vpop.f32.mrf.mxu0 }
 0x2fb   :  { %8523 = vmatmul.mubr.bf16.gmra.mxu0 %v3423_v1  ;;  %v13097_v17 = vadd.f32 %v8089_v46, %v16655_v42 }
 0x2fc   :  { %v8091_v54 = vpop.f32.mrf.mxu0 }
 0x2fd   :  { %16656 = vst [vmem:[#allocation80_spill] sm:$0xff] %v13097_v17  ;;  %v8092_v24 = vadd.f32 %v8091_v54, %v8090_v51  ;;  %v13119_v54 = vpop.f32.mrf.mxu1  ;;  %v16684_v17 = vld [vmem:[#allocation2_spill] sm:$0xff] }
 0x2fe   :  { %v8093_v50 = vpop.f32.mrf.mxu0  ;;  %v30_v59 = vadd.s32 16, %v16684_v17 }
 0x2ff   :  { %v13102_v18 = vadd.f32 %v8092_v24, %v16657_v56 }
 0x300   :  { %v8094_v63 = vpop.f32.mrf.mxu0 }
 0x301   :  { %16658 = vst [vmem:[#allocation77_spill] sm:$0xff] %v13102_v18  ;;  %v8095_v58 = vadd.f32 %v8094_v63, %v8093_v50 }
 0x302   :  { %v8096_v8 = vpop.f32.mrf.mxu0 }
 0x303   :  { %v13107_v28 = vadd.f32 %v8095_v58, %v16659_v48  ;;  %v13124_v58 = vpop.f32.mrf.mxu1  ;;  %v16666_v48 = vld [vmem:[#allocation61_spill] sm:$0xff] }
 0x304   :  { %v8097_v22 = vpop.f32.mrf.mxu0 }
 0x305   :  { %16660 = vst [vmem:[#allocation81_spill] sm:$0xff] %v13107_v28  ;;  %v8098_v11 = vadd.f32 %v8097_v22, %v8096_v8  ;;  %v16675_v28 = vld [vmem:[#allocation72_spill] sm:$0xff] }
 0x306   :  { %v8099_v55 = vpop.f32.mrf.mxu0 }
 0x307   :  { %v13112_v29 = vadd.f32 %v8098_v11, %v16661_v41  ;;  %v13129_v41 = vpop.f32.mrf.mxu1 }
 0x308   :  { %v8100_v1 = vpop.f32.mrf.mxu0 }
 0x309   :  { %16662 = vst [vmem:[#allocation84_spill] sm:$0xff] %v13112_v29  ;;  %v8101_v62 = vadd.f32 %v8100_v1, %v8099_v55 }
 0x30a   :  { %v8102_v10 = vpop.f32.mrf.mxu0 }
 0x30b   :  { %v13117_v46 = vadd.f32 %v8101_v62, %v16663_v52 }
 0x30c   :  { %v8103_v51 = vpop.f32.mrf.mxu0 }
 0x30d   :  { %16664 = vst [vmem:[#allocation88_spill] sm:$0xff] %v13117_v46  ;;  %v8104_v42 = vadd.f32 %v8103_v51, %v8102_v10 }
 0x30e   :  { %v8105_v24 = vpop.f32.mrf.mxu0 }
 0x30f   :  { %v13122_v50 = vadd.f32 %v8104_v42, %v12859_v20  ;;  %v13134_v20 = vpop.f32.mrf.mxu1 }
 0x310   :  { %v8106_v56 = vpop.f32.mrf.mxu0 }
 0x311   :  { %16665 = vst [vmem:[#allocation85_spill] sm:$0xff] %v13122_v50  ;;  %v8107_v63 = vadd.f32 %v8106_v56, %v8105_v24 }
 0x312   :  { %v8108_v8 = vpop.f32.mrf.mxu0 }
 0x313   :  { %v13127_v22 = vadd.f32 %v8107_v63, %v16666_v48  ;;  %v8179_v63 = vpop.f32.mrf.mxu1 }
 0x314   :  { %v8109_v11 = vpop.f32.mrf.mxu0 }
 0x315   :  { %16667 = vst [vmem:[#allocation89_spill] sm:$0xff] %v13127_v22  ;;  %v8110_v55 = vadd.f32 %v8109_v11, %v8108_v8  ;;  %v16670_v22 = vld [vmem:[#allocation65_spill] sm:$0xff]  ;;  %v8181_v46 = vpop.f32.mrf.mxu1 }
 0x316   :  { %v8111_v1 = vpop.f32.mrf.mxu0 }
 0x317   :  { %v13132_v62 = vadd.f32 %v8110_v55, %v12863_v14 }
 0x318   :  { %v8112_v10 = vpop.f32.mrf.mxu0 }
 0x319   :  { %16668 = vst [vmem:[#allocation92_spill] sm:$0xff] %v13132_v62  ;;  %v8113_v52 = vadd.f32 %v8112_v10, %v8111_v1  ;;  %v8182_v62 = vpop.f32.mrf.mxu1 }
 0x31a   :  { %v8114_v51 = vpop.f32.mrf.mxu0 }
 0x31b   :  { %v13137_v42 = vadd.f32 %v8113_v52, %v12865_v40  ;;  %v16673_v40 = vld [vmem:[#allocation68_spill] sm:$0xff] }
 0x31c   :  { %v8115_v24 = vpop.f32.mrf.mxu0 }
 0x31d   :  { %16669 = vst [vmem:[#allocation96_spill] sm:$0xff] %v13137_v42  ;;  %v8116_v56 = vadd.f32 %v8115_v24, %v8114_v51  ;;  %v8184_v42 = vpop.f32.mrf.mxu1 }
 0x31e   :  { %v8117_v48 = vpop.f32.mrf.mxu0 }
 0x31f   :  { %v13140_v8 = vadd.f32 %v8116_v56, %v16670_v22  ;;  %v8185_v56 = vpop.f32.mrf.mxu1 }
 0x320   :  { %v8118_v11 = vpop.f32.mrf.mxu0 }
 0x321   :  { %16671 = vst [vmem:[#allocation93_spill] sm:$0xff] %v13140_v8  ;;  %v8119_v50 = vadd.f32 %v8118_v11, %v8117_v48  ;;  %v8187_v48 = vpop.f32.mrf.mxu1 }
 0x322   :  { %v8120_v14 = vpop.f32.mrf.mxu0 }
 0x323   :  { %v13143_v55 = vadd.f32 %v8119_v50, %v12869_v49  ;;  %v8188_v11 = vpop.f32.mrf.mxu1 }
 0x324   :  { %v8121_v1 = vpop.f32.mrf.mxu0 }
 0x325   :  { %16672 = vst [vmem:[#allocation97_spill] sm:$0xff] %v13143_v55  ;;  %v8122_v10 = vadd.f32 %v8121_v1, %v8120_v14  ;;  %v13151_v8 = vpop.f32.mrf.mxu1 }
 0x326   :  { %v8123_v29 = vpop.f32.mrf.mxu0 }
 0x327   :  { %v13146_v52 = vadd.f32 %v8122_v10, %v16673_v40  ;;  %v13153_v49 = vpop.f32.mrf.mxu1 }
 0x328   :  { %v8124_v51 = vpop.f32.mrf.mxu0 }
 0x329   :  { %16674 = vst [vmem:[#allocation100_spill] sm:$0xff] %v13146_v52  ;;  %v8125_v24 = vadd.f32 %v8124_v51, %v8123_v29  ;;  %v13155_v50 = vpop.f32.mrf.mxu1 }
 0x32b   :  { %v13149_v22 = vadd.f32 %v8125_v24, %v16675_v28  ;;  %v13157_v14 = vpop.f32.mrf.mxu1 }
 0x32d   :  { %16676 = vst [vmem:[#allocation104_spill] sm:$0xff] %v13149_v22  ;;  %v13159_v1 = vpop.f32.mrf.mxu1 }
 0x32f   :  { %v13161_v10 = vpop.f32.mrf.mxu1 }
 0x331   :  { %v13163_v29 = vpop.f32.mrf.mxu1 }
 0x332   :  { %16677 = vst [vmem:[#allocation101_spill] sm:$0xff] %v13163_v29  ;;  %v78_v29 = vand.u32 15, %v30_v59  ;;  %v8156_v59 = vadd.f32 %v13041_v44, %v13032_v2 }
 0x333   :  { %v13165_v40 = vpop.f32.mrf.mxu1 }
 0x334   :  { %16678 = vst [vmem:[#allocation105_spill] sm:$0xff] %v13165_v40  ;;  %vm446_vm0 = vcmp.ge.s32.totalorder %v78_v29, 1 }
 0x335   :  { %v13167_v28 = vpop.f32.mrf.mxu1 }
 0x337   :  { %v13169_v51 = vpop.f32.mrf.mxu1 }
 0x338   :  { %16679 = vst [vmem:[#allocation108_spill] sm:$0xff] %v13169_v51  ;;  %v8150_v51 = vadd.f32 %v12975_v32, %v12964_v23  ;;  %v8159_v23 = vadd.f32 %v13063_v43, %v13054_v25  ;;  %v8165_v32 = vadd.f32 %v13089_v6, %v13084_v33  ;;  %v8177_v25 = vadd.f32 %v13129_v41, %v13124_v58 }
 0x339   :  { %v13171_v24 = vpop.f32.mrf.mxu1  ;;  %v32_v6 = vadd.s32 32, %v16684_v17  ;;  %v8189_v58 = vadd.f32 %v8188_v11, %v8187_v48 }
 0x33a   :  { %v4526_v2 = vadd.f32 %v8150_v51, %v12984_v5 }
 0x33b   :  { %v13173_v55 = vpop.f32.mrf.mxu1 }
 0x33c   :  { %16680 = vst [vmem:[#allocation112_spill] sm:$0xff] %v13173_v55  ;;  %v8153_v55 = vadd.f32 %v13016_v31, %v12995_v3  ;;  %v8171_v3 = vadd.f32 %v13109_v35, %v13104_v13  ;;  %v8174_v31 = vadd.f32 %v13119_v54, %v13114_v4  ;;  %v8186_v13 = vadd.f32 %v8185_v56, %v8184_v42 }
 0x33d   :  { %v13175_v22 = vpop.f32.mrf.mxu1  ;;  %v4534_v35 = vadd.f32 %v8156_v59, %v12998_v15  ;;  %v13226_v4 = vadd.f32 %v8165_v32, %v13008_v34  ;;  %v33_v54 = vadd.s32 40, %v16684_v17  ;;  %v16686_v15 = vld [vmem:[#allocation69_spill] sm:$0xff]  ;;  %v92_v34 = vand.u32 15, %v32_v6 }
 0x33e   :  { %16681 = vst [vmem:[#allocation109_spill] sm:$0xff] %v13175_v22  ;;  %v8147_v22 = vadd.f32 %v12952_v45, %v12946_v26  ;;  %v8168_v26 = vadd.f32 %v13099_v57, %v13094_v19  ;;  %v31_v45 = vadd.s32 24, %v16684_v17  ;;  %v8180_v19 = vadd.f32 %v8179_v63, %v13134_v20 }
 0x33f   :  { %v13177_v52 = vpop.f32.mrf.mxu1  ;;  %v8183_v57 = vadd.f32 %v8182_v62, %v8181_v46  ;;  %v13235_v46 = vadd.f32 %v8171_v3, %v13019_v61  ;;  %v13243_v42 = vadd.f32 %v8174_v31, %v13022_v30  ;;  %v99_v48 = vand.u32 15, %v33_v54 }
 0x340   :  { %16682 = vst [vmem:[#allocation113_spill] sm:$0xff] %v13177_v52  ;;  %v13232_v41 = vadd.f32 %v8168_v26, %v13012_v53  ;;  %v13250_v53 = vadd.f32 %v8186_v13, %v13066_v16  ;;  %v13253_v61 = vadd.f32 %v8180_v19, %v13044_v47  ;;  %v36_v16 = vadd.s32 64, %v16684_v17 }
 0x341   :  { %v13179_v18 = vpop.f32.mrf.mxu1  ;;  %v13266_v59 = vadd.f32 %v8189_v58, %v13075_v60  ;;  %vm448_vm2 = vcmp.ge.s32.totalorder %v92_v34, 1  ;;  %v8195_v26 = vadd.f32 %v13157_v14, %v13155_v50  ;;  %v37_v60 = vadd.s32 72, %v16684_v17 }
 0x342   :  { %16683 = vst [vmem:[#allocation4_spill] sm:$0xff] %v13179_v18  ;;  %v8162_v18 = vadd.f32 %v13079_v21, %v13072_v9  ;;  %v4529_v9 = vadd.f32 %v8153_v55, %v12991_v7  ;;  %v4521_v21 = vadd.f32 %v8147_v22, %v12967_v27  ;;  %v85_v7 = vand.u32 15, %v31_v45 }
 0x343   :  { %v13182_v36 = vpop.f32.mrf.mxu1  ;;  %v4537_v27 = vadd.f32 %v8159_v23, %v13001_v37  ;;  %v13246_v37 = vadd.f32 %v8177_v25, %v13035_v12  ;;  %v35_v55 = vadd.s32 56, %v16684_v17  ;;  %v13256_v22 = vadd.f32 %v8183_v57, %v13057_v38 }
 0x344   :  { %16685 = vst [vmem:[#allocation8_spill] sm:$0xff] %v13182_v36  ;;  %v9318_v36 = vmov 0.0   ;;  %v13220_v33 = vadd.f32 %v8162_v18, %v13004_v0  ;;  %v34_v18 = vadd.s32 48, %v16684_v17  ;;  %vm479_vm1 = vcmp.le.s32.totalorder %v85_v7, 14 }
 0x345   :  { %v13184_v40 = vpop.f32.mrf.mxu1  ;;  %v13199_v29 = vsel %vm446_vm0, 1.0, %v9318_v36  ;;  %v8192_v12 = vadd.f32 %v13153_v49, %v13151_v8  ;;  %v13277_v8 = vsel %vm479_vm1, 1.0, %v9318_v36  ;;  %v113_v45 = vand.u32 15, %v35_v55 }
 0x346   :  { %v106_v11 = vand.u32 15, %v34_v18  ;;  %16687 = vst [vmem:[#allocation5_spill] sm:$0xff] %v13277_v8  ;;  %vm481_vm3 = vcmp.le.s32.totalorder %v99_v48, 14  ;;  %v38_v50 = vadd.s32 80, %v16684_v17  ;;  %v120_v14 = vand.u32 15, %v36_v16  ;;  %v16697_v16 = vld [vmem:[#allocation105_spill] sm:$0xff] }
 0x347   :  { %v13194_v52 = vpop.f32.mrf.mxu1  ;;  %v13289_v25 = vadd.f32 %v8192_v12, %v13082_v39  ;;  %vm13297_vm5 = vcmp.le.s32.totalorder %v113_v45, 14  ;;  %v39_v39 = vadd.s32 88, %v16684_v17  ;;  %v127_v7 = vand.u32 15, %v37_v60 }
 0x348   :  { %vm450_vm4 = vcmp.ge.s32.totalorder %v106_v11, 1  ;;  %v134_v18 = vand.u32 15, %v38_v50  ;;  %vm13315_vm6 = vcmp.ge.s32.totalorder %v120_v14, 1  ;;  %v40_v11 = vadd.s32 96, %v16684_v17 }
 0x349   :  { %v13216_v43 = vpop.f32.mrf.mxu1  ;;  %v41_v45 = vadd.s32 104, %v16684_v17  ;;  %vm485_vm7 = vcmp.le.s32.totalorder %v127_v7, 14  ;;  %v13348_v50 = vsel %vm13315_vm6, 1.0, %v9318_v36  ;;  %v43_v34 = vadd.s32 120, %v16684_v17 }
 0x34a   :  { %16700 = vst [vmem:[#allocation10_spill] sm:$0xff] %v13348_v50  ;;  %vm454_vm8 = vcmp.ge.s32.totalorder %v134_v18, 1  ;;  %v148_v7 = vand.u32 15, %v40_v11 }
 0x34b   :  { %v13237_v62 = vpop.f32.mrf.mxu1  ;;  %v13375_v11 = vsel %vm454_vm8, 1.0, %v9318_v36 }
 0x34c   :  { %16705 = vst [vmem:[#allocation11_spill] sm:$0xff] %v13375_v11  ;;  %vm456_vm10 = vcmp.ge.s32.totalorder %v148_v7, 1 }
 0x34d   :  { %v13268_v47 = vpop.f32.mrf.mxu1  ;;  %v13402_v7 = vsel %vm456_vm10, 1.0, %v9318_v36 }
 0x34e   :  { %16710 = vst [vmem:[#allocation14_spill] sm:$0xff] %v13402_v7 }
 0x34f   :  { %v13293_v6 = vpop.f32.mrf.mxu1 }
 0x383   :  { %v8496_v44 = vpop.f32.mrf.mxu0 }
 0x384   :  { %v13258_v56 = vadd.f32 %v8496_v44, %v4526_v2  ;;  %v13285_v44 = vsel %vm448_vm2, 1.0, %v9318_v36 }
 0x385   :  { %v4678_v5 = vpop.f32.mrf.mxu0  ;;  %16688 = vst [vmem:[#allocation9_spill] sm:$0xff] %v13285_v44 }
 0x386   :  { %v13240_v20 = vadd.f32 %v4678_v5, %v16686_v15  ;;  %v4807_v3 = vmul.f32 %v13199_v29, %v13258_v56  ;;  %v13302_v5 = vsel %vm481_vm3, 1.0, %v9318_v36 }
 0x387   :  { %v8497_v0 = vpop.f32.mrf.mxu0  ;;  %16691 = vst [vmem:[#allocation24_spill] sm:$0xff] %v13302_v5 }
 0x388   :  { %v4805_v38 = vmul.f32 0.0, %v13240_v20  ;;  %v13271_v23 = vadd.f32 %v8497_v0, %v4529_v9  ;;  %v13313_v0 = vsel %vm450_vm4, 1.0, %v9318_v36 }
 0x389   :  { %v4681_v63 = vpop.f32.mrf.mxu0  ;;  %16692 = vst [vmem:[#allocation7_spill] sm:$0xff] %v13313_v0 }
 0x38a   :  { %v13260_v30 = vadd.f32 %v4681_v63, %v4521_v21  ;;  %v8198_v21 = vadd.f32 %v13161_v10, %v13159_v1  ;;  %v4808_v19 = vmul.f32 %v13277_v8, %v13271_v23  ;;  %v16695_v63 = vld [vmem:[#allocation73_spill] sm:$0xff] }
 0x38b   :  { %v8500_v51 = vpop.f32.mrf.mxu0  ;;  %v13320_v55 = vadd.f32 %v8195_v26, %v16695_v63 }
 0x38c   :  { %v4806_v32 = vmul.f32 0.0, %v13260_v30  ;;  %v13306_v1 = vadd.f32 %v8500_v51, %v13220_v33  ;;  %v13322_v33 = vpop.f32.mrf.mxu1  ;;  %v16696_v51 = vld [vmem:[#allocation101_spill] sm:$0xff] }
 0x38d   :  { %v4694_v49 = vpop.f32.mrf.mxu0 }
 0x38e   :  { %v4837_v31 = vadd.f32 %v4806_v32, %v4805_v38  ;;  %v13282_v2 = vadd.f32 %v4694_v49, %v4534_v35  ;;  %v8201_v38 = vadd.f32 %v16697_v16, %v16696_v51  ;;  %v13335_v32 = vsel %vm13297_vm5, 1.0, %v9318_v36 }
 0x38f   :  { %v8501_v9 = vpop.f32.mrf.mxu0  ;;  %16698 = vst [vmem:[#allocation117_spill] sm:$0xff] %v13335_v32  ;;  %v141_v49 = vand.u32 15, %v39_v39 }
 0x390   :  { %v4838_v57 = vadd.f32 %v4837_v31, %v4807_v3  ;;  %v4809_v10 = vmul.f32 %v13285_v44, %v13282_v2  ;;  %v13325_v12 = vadd.f32 %v8501_v9, %v13226_v4  ;;  %v4811_v4 = vmul.f32 %v13313_v0, %v13306_v1  ;;  %v16699_v31 = vld [vmem:[#allocation108_spill] sm:$0xff] }
 0x391   :  { %v4697_v35 = vpop.f32.mrf.mxu0  ;;  %v8204_v9 = vadd.f32 %v16699_v31, %v13167_v28  ;;  %vm13358_vm9 = vcmp.le.s32.totalorder %v141_v49, 14  ;;  %v16706_v49 = vld [vmem:[#allocation80_spill] sm:$0xff]  ;;  %v46_v28 = vadd.s32 144, %v16684_v17 }
 0x392   :  { %v4839_v54 = vadd.f32 %v4838_v57, %v4808_v19  ;;  %v13310_v58 = vadd.f32 %v4697_v35, %v4537_v27  ;;  %v42_v19 = vadd.s32 112, %v16684_v17  ;;  %v16701_v57 = vld [vmem:[#allocation76_spill] sm:$0xff]  ;;  %v13354_v35 = vpop.f32.mrf.mxu1 }
 0x393   :  { %v8504_v15 = vpop.f32.mrf.mxu0  ;;  %v13352_v13 = vadd.f32 %v8198_v21, %v16701_v57  ;;  %v155_v21 = vand.u32 15, %v41_v45  ;;  %v169_v57 = vand.u32 15, %v43_v34  ;;  %v16712_v34 = vld [vmem:[#allocation109_spill] sm:$0xff] }
 0x394   :  { %v4840_v48 = vadd.f32 %v4839_v54, %v4809_v10  ;;  %v4810_v27 = vmul.f32 %v13302_v5, %v13310_v58  ;;  %v13363_v10 = vsel %vm485_vm7, 1.0, %v9318_v36  ;;  %v13367_v63 = vadd.f32 %v8504_v15, %v13243_v42  ;;  %v13381_v45 = vpop.f32.mrf.mxu1 }
 0x395   :  { %v4710_v26 = vpop.f32.mrf.mxu0  ;;  %16704 = vst [vmem:[#allocation12_spill] sm:$0xff] %v13363_v10  ;;  %v162_v51 = vand.u32 15, %v42_v19  ;;  %v13393_v19 = vsel %vm13358_vm9, 1.0, %v9318_v36  ;;  %vm489_vm11 = vcmp.le.s32.totalorder %v155_v21, 14  ;;  %vm13414_vm13 = vcmp.le.s32.totalorder %v169_v57, 14 }
 0x396   :  { %v4841_v60 = vadd.f32 %v4840_v48, %v4810_v27  ;;  %v13341_v3 = vadd.f32 %v4710_v26, %v13232_v41  ;;  %v4812_v41 = vmul.f32 %v13335_v32, %v13325_v12  ;;  %v44_v26 = vadd.s32 128, %v16684_v17  ;;  %16708 = vst [vmem:[#allocation13_spill] sm:$0xff] %v13393_v19 }
 0x397   :  { %v8505_v14 = vpop.f32.mrf.mxu0  ;;  %vm458_vm12 = vcmp.ge.s32.totalorder %v162_v51, 1 }
 0x398   :  { %v4842_v39 = vadd.f32 %v4841_v60, %v4811_v4  ;;  %v4813_v48 = vmul.f32 %v13348_v50, %v13341_v3  ;;  %v13379_v4 = vadd.f32 %v8201_v38, %v16706_v49  ;;  %v13384_v15 = vadd.f32 %v8505_v14, %v13246_v37  ;;  %v16707_v60 = vld [vmem:[#allocation112_spill] sm:$0xff]  ;;  %v16713_v49 = vld [vmem:[#allocation113_spill] sm:$0xff] }
 0x399   :  { %v4713_v54 = vpop.f32.mrf.mxu0  ;;  %v8207_v31 = vadd.f32 %v16707_v60, %v13171_v24  ;;  %v4815_v37 = vmul.f32 %v13375_v11, %v13367_v63  ;;  %v8210_v60 = vadd.f32 %v16713_v49, %v16712_v34  ;;  %v13431_v57 = vsel %vm458_vm12, 1.0, %v9318_v36 }
 0x39a   :  { %v4843_v27 = vadd.f32 %v4842_v39, %v4812_v41  ;;  %v13372_v18 = vadd.f32 %v4713_v54, %v13235_v46  ;;  %v45_v41 = vadd.s32 136, %v16684_v17  ;;  %v176_v54 = vand.u32 15, %v44_v26  ;;  %16718 = vst [vmem:[#allocation17_spill] sm:$0xff] %v13431_v57 }
 0x39b   :  { %v8508_v16 = vpop.f32.mrf.mxu0 }
 0x39c   :  { %v4844_v42 = vadd.f32 %v4843_v27, %v4813_v48  ;;  %v4814_v46 = vmul.f32 %v13363_v10, %v13372_v18  ;;  %v16711_v48 = vld [vmem:[#allocation77_spill] sm:$0xff]  ;;  %v13410_v10 = vpop.f32.mrf.mxu1  ;;  %vm13433_vm14 = vcmp.ge.s32.totalorder %v176_v54, 1 }
 0x39d   :  { %v4726_v38 = vpop.f32.mrf.mxu0  ;;  %v13406_v27 = vadd.f32 %v8204_v9, %v16711_v48  ;;  %v47_v9 = vadd.s32 152, %v16684_v17  ;;  %v13423_v48 = vadd.f32 %v8508_v16, %v13250_v53  ;;  %v13466_v21 = vsel %vm13433_vm14, 1.0, %v9318_v36 }
 0x39e   :  { %v4845_v14 = vadd.f32 %v4844_v42, %v4814_v46  ;;  %v13399_v39 = vadd.f32 %v4726_v38, %v13253_v61  ;;  %v4816_v61 = vmul.f32 %v13393_v19, %v13384_v15  ;;  %v13419_v46 = vsel %vm489_vm11, 1.0, %v9318_v36  ;;  %v13440_v53 = vpop.f32.mrf.mxu1  ;;  %16726 = vst [vmem:[#allocation19_spill] sm:$0xff] %v13466_v21 }
 0x39f   :  { %v8509_v24 = vpop.f32.mrf.mxu0  ;;  %16716 = vst [vmem:[#allocation16_spill] sm:$0xff] %v13419_v46  ;;  %v183_v38 = vand.u32 15, %v45_v41  ;;  %v16721_v41 = vld [vmem:[#allocation81_spill] sm:$0xff] }
 0x3a0   :  { %16709 = vst [vmem:[#allocation116_spill] sm:$0xff] %v13399_v39  ;;  %v4846_v42 = vadd.f32 %v4845_v14, %v4815_v37  ;;  %v4817_v34 = vmul.f32 %v13402_v7, %v13399_v39  ;;  %v190_v37 = vand.u32 15, %v46_v28  ;;  %v13438_v11 = vadd.f32 %v8207_v31, %v16721_v41  ;;  %v16723_v28 = vld [vmem:[#allocation4_spill] sm:$0xff]  ;;  %v13470_v39 = vpop.f32.mrf.mxu1 }
 0x3a1   :  { %v4729_v26 = vpop.f32.mrf.mxu0  ;;  %v13453_v7 = vsel %vm13414_vm13, 1.0, %v9318_v36  ;;  %v197_v41 = vand.u32 15, %v47_v9  ;;  %vm493_vm15 = vcmp.le.s32.totalorder %v183_v38, 14  ;;  %v50_v9 = vadd.s32 176, %v16684_v17 }
 0x3a2   :  { %v4847_v49 = vadd.f32 %v4846_v42, %v4816_v61  ;;  %v13428_v51 = vadd.f32 %v4729_v26, %v13256_v22  ;;  %v13443_v61 = vadd.f32 %v8509_v24, %v13266_v59  ;;  %v48_v42 = vadd.s32 160, %v16684_v17  ;;  %v16724_v26 = vld [vmem:[#allocation8_spill] sm:$0xff]  ;;  %16725 = vst [vmem:[#allocation20_spill] sm:$0xff] %v13453_v7 }
 0x3a3   :  { %v8512_v14 = vpop.f32.mrf.mxu0  ;;  %v8213_v54 = vadd.f32 %v16724_v26, %v16723_v28  ;;  %v4819_v59 = vmul.f32 %v13431_v57, %v13423_v48  ;;  %v8216_v28 = vadd.f32 %v13194_v52, %v13184_v40  ;;  %vm462_vm0 = vcmp.ge.s32.totalorder %v190_v37, 1 }
 0x3a4   :  { %16717 = vst [vmem:[#allocation15_spill] sm:$0xff] %v13428_v51  ;;  %v4848_v16 = vadd.f32 %v4847_v49, %v4817_v34  ;;  %16722 = vst [vmem:[#allocation18_spill] sm:$0xff] %v13443_v61  ;;  %v4818_v22 = vmul.f32 %v13419_v46, %v13428_v51  ;;  %v49_v34 = vadd.s32 168, %v16684_v17  ;;  %v16727_v46 = vld [vmem:[#allocation84_spill] sm:$0xff]  ;;  %v204_v38 = vand.u32 15, %v48_v42 }
 0x3a5   :  { %v4742_v31 = vpop.f32.mrf.mxu0  ;;  %v4606_v51 = vadd.f32 %v8210_v60, %v16727_v46  ;;  %vm13474_vm1 = vcmp.le.s32.totalorder %v197_v41, 14  ;;  %v13479_v40 = vsel %vm493_vm15, 1.0, %v9318_v36  ;;  %v13483_v60 = vadd.f32 %v8512_v14, %v13352_v13 }
 0x3a6   :  { %v4849_v24 = vadd.f32 %v4848_v16, %v4818_v22  ;;  %v13459_v49 = vadd.f32 %v4742_v31, %v13289_v25  ;;  %v4820_v25 = vmul.f32 %v13453_v7, %v13443_v61  ;;  %16730 = vst [vmem:[#allocation21_spill] sm:$0xff] %v13479_v40  ;;  %v51_v22 = vadd.s32 184, %v16684_v17  ;;  %v16732_v7 = vld [vmem:[#allocation88_spill] sm:$0xff] }
 0x3a7   :  { %v8513_v26 = vpop.f32.mrf.mxu0  ;;  %v211_v31 = vand.u32 15, %v49_v34  ;;  %v13491_v42 = vsel %vm462_vm0, 1.0, %v9318_v36  ;;  %v218_v41 = vand.u32 15, %v50_v9  ;;  %v4609_v57 = vadd.f32 %v8213_v54, %v16732_v7  ;;  %v13495_v34 = vpop.f32.mrf.mxu1 }
 0x3a8   :  { %v4850_v16 = vadd.f32 %v4849_v24, %v4819_v59  ;;  %v4821_v46 = vmul.f32 %v13466_v21, %v13459_v49  ;;  %16731 = vst [vmem:[#allocation22_spill] sm:$0xff] %v13491_v42  ;;  %v52_v61 = vadd.s32 192, %v16684_v17  ;;  %v13498_v14 = vadd.f32 %v8513_v26, %v13379_v4 }
 0x3a9   :  { %v4745_v19 = vpop.f32.mrf.mxu0  ;;  %vm464_vm2 = vcmp.ge.s32.totalorder %v204_v38, 1  ;;  %v13507_v9 = vsel %vm13474_vm1, 1.0, %v9318_v36  ;;  %v225_v54 = vand.u32 15, %v51_v22  ;;  %v4823_v4 = vmul.f32 %v13491_v42, %v13483_v60 }
 0x3aa   :  { %v4851_v59 = vadd.f32 %v4850_v16, %v4820_v25  ;;  %v13488_v37 = vadd.f32 %v4745_v19, %v13320_v55  ;;  %v8219_v55 = vadd.f32 %v13237_v62, %v13216_v43  ;;  %16733 = vst [vmem:[#allocation26_spill] sm:$0xff] %v13507_v9  ;;  %v53_v16 = vadd.s32 200, %v16684_v17 }
 0x3ab   :  { %v8516_v24 = vpop.f32.mrf.mxu0  ;;  %vm497_vm3 = vcmp.le.s32.totalorder %v211_v31, 14  ;;  %v13516_v38 = vsel %vm464_vm2, 1.0, %v9318_v36  ;;  %v54_v62 = vadd.s32 208, %v16684_v17  ;;  %v232_v52 = vand.u32 15, %v52_v61 }
 0x3ac   :  { %v4852_v13 = vadd.f32 %v4851_v59, %v4821_v46  ;;  %v4822_v25 = vmul.f32 %v13479_v40, %v13488_v37  ;;  %16734 = vst [vmem:[#allocation23_spill] sm:$0xff] %v13516_v38  ;;  %v16735_v46 = vld [vmem:[#allocation85_spill] sm:$0xff]  ;;  %v8222_v22 = vadd.f32 %v13293_v6, %v13268_v47  ;;  %v8233_v40 = vpop.f32.mrf.mxu1  ;;  %vm466_vm4 = vcmp.ge.s32.totalorder %v218_v41, 1 }
 0x3ad   :  { %v4758_v7 = vpop.f32.mrf.mxu0  ;;  %v4614_v59 = vadd.f32 %v8216_v28, %v16735_v46  ;;  %vm13524_vm5 = vcmp.le.s32.totalorder %v225_v54, 14  ;;  %v13529_v31 = vsel %vm497_vm3, 1.0, %v9318_v36  ;;  %v55_v61 = vadd.s32 216, %v16684_v17 }
 0x3ae   :  { %v4853_v26 = vadd.f32 %v4852_v13, %v4822_v25  ;;  %v13513_v19 = vadd.f32 %v4758_v7, %v13406_v27  ;;  %v4824_v13 = vmul.f32 %v13507_v9, %v13498_v14  ;;  %16738 = vst [vmem:[#allocation27_spill] sm:$0xff] %v13529_v31  ;;  %v239_v28 = vand.u32 15, %v53_v16 }
 0x3af   :  { %v8517_v43 = vpop.f32.mrf.mxu0  ;;  %v13532_v46 = vadd.f32 %v8516_v24, %v4606_v51  ;;  %v8225_v41 = vadd.f32 %v13354_v35, %v13322_v33  ;;  %v13542_v54 = vsel %vm466_vm4, 1.0, %v9318_v36  ;;  %vm13544_vm6 = vcmp.ge.s32.totalorder %v232_v52, 1  ;;  %v8235_v51 = vpop.f32.mrf.mxu1  ;;  %v16743_v52 = vld [vmem:[#allocation89_spill] sm:$0xff] }
 0x3b0   :  { %v4854_v25 = vadd.f32 %v4853_v26, %v4823_v4  ;;  %v4825_v47 = vmul.f32 %v13516_v38, %v13513_v19  ;;  %16739 = vst [vmem:[#allocation30_spill] sm:$0xff] %v13542_v54  ;;  %v246_v26 = vand.u32 15, %v54_v62  ;;  %v13548_v16 = vadd.f32 %v8517_v43, %v4609_v57 }
 0x3b1   :  { %v4761_v7 = vpop.f32.mrf.mxu0  ;;  %v13556_v33 = vsel %vm13524_vm5, 1.0, %v9318_v36  ;;  %v253_v62 = vand.u32 15, %v55_v61  ;;  %v4827_v57 = vmul.f32 %v13542_v54, %v13532_v46  ;;  %vm501_vm7 = vcmp.le.s32.totalorder %v239_v28, 14  ;;  %v8236_v38 = vpop.f32.mrf.mxu1 }
 0x3b2   :  { %v4855_v6 = vadd.f32 %v4854_v25, %v4824_v13  ;;  %v13537_v4 = vadd.f32 %v4761_v7, %v13438_v11  ;;  %v56_v13 = vadd.s32 224, %v16684_v17  ;;  %16742 = vst [vmem:[#allocation34_spill] sm:$0xff] %v13556_v33  ;;  %v4617_v25 = vadd.f32 %v8219_v55, %v16743_v52  ;;  %v16746_v55 = vld [vmem:[#allocation96_spill] sm:$0xff] }
 0x3b3   :  { %v8520_v9 = vpop.f32.mrf.mxu0  ;;  %v57_v7 = vadd.s32 232, %v16684_v17  ;;  %v13570_v61 = vsel %vm13544_vm6, 1.0, %v9318_v36  ;;  %v4625_v52 = vadd.f32 %v8225_v41, %v16746_v55  ;;  %vm470_vm8 = vcmp.ge.s32.totalorder %v246_v26, 1 }
 0x3b4   :  { %v4856_v24 = vadd.f32 %v4855_v6, %v4825_v47  ;;  %v4826_v11 = vmul.f32 %v13529_v31, %v13537_v4  ;;  %v8228_v6 = vadd.f32 %v13410_v10, %v13381_v45  ;;  %v16744_v31 = vld [vmem:[#allocation92_spill] sm:$0xff]  ;;  %16745 = vst [vmem:[#allocation31_spill] sm:$0xff] %v13570_v61  ;;  %v260_v28 = vand.u32 15, %v56_v13  ;;  %v16757_v45 = vld [vmem:[#allocation97_spill] sm:$0xff] }
 0x3b5   :  { %v4774_v35 = vpop.f32.mrf.mxu0  ;;  %v4622_v27 = vadd.f32 %v8222_v22, %v16744_v31  ;;  %v8231_v10 = vadd.f32 %v13470_v39, %v13440_v53  ;;  %vm13577_vm9 = vcmp.le.s32.totalorder %v253_v62, 14  ;;  %v13582_v42 = vsel %vm501_vm7, 1.0, %v9318_v36 }
 0x3b6   :  { %v4857_v43 = vadd.f32 %v4856_v24, %v4826_v11  ;;  %v13562_v47 = vadd.f32 %v4774_v35, %v4614_v59  ;;  %v4828_v24 = vmul.f32 %v13556_v33, %v13548_v16  ;;  %16749 = vst [vmem:[#allocation35_spill] sm:$0xff] %v13582_v42  ;;  %v267_v31 = vand.u32 15, %v57_v7  ;;  %v16754_v7 = vld [vmem:[#allocation100_spill] sm:$0xff] }
 0x3b7   :  { %v8521_v17 = vpop.f32.mrf.mxu0  ;;  %v13584_v41 = vadd.f32 %v8520_v9, %v4622_v27  ;;  %v8234_v13 = vadd.f32 %v8233_v40, %v13495_v34  ;;  %v8237_v39 = vadd.f32 %v8236_v38, %v8235_v51  ;;  %v13592_v53 = vsel %vm470_vm8, 1.0, %v9318_v36  ;;  %v16756_v27 = vld [vmem:[#allocation104_spill] sm:$0xff] }
 0x3b8   :  { %v4858_v59 = vadd.f32 %v4857_v43, %v4827_v57  ;;  %v4829_v11 = vmul.f32 %v13570_v61, %v13562_v47  ;;  %16750 = vst [vmem:[#allocation38_spill] sm:$0xff] %v13592_v53  ;;  %v16751_v57 = vld [vmem:[#allocation93_spill] sm:$0xff]  ;;  %v13595_v33 = vadd.f32 %v8521_v17, %v4625_v52  ;;  %vm472_vm10 = vcmp.ge.s32.totalorder %v260_v28, 1 }
 0x3b9   :  { %v4777_v22 = vpop.f32.mrf.mxu0  ;;  %v4630_v43 = vadd.f32 %v8228_v6, %v16751_v57  ;;  %v4831_v34 = vmul.f32 %v13592_v53, %v13584_v41  ;;  %vm505_vm11 = vcmp.le.s32.totalorder %v267_v31, 14  ;;  %v4638_v17 = vadd.f32 %v8234_v13, %v16754_v7 }
 0x3ba   :  { %v4859_v35 = vadd.f32 %v4858_v59, %v4828_v24  ;;  %v13588_v26 = vadd.f32 %v4777_v22, %v4617_v25  ;;  %v13602_v25 = vsel %vm13577_vm9, 1.0, %v9318_v36  ;;  %v13610_v6 = vsel %vm472_vm10, 1.0, %v9318_v36 }
 0x3bb   :  { %v8524_v62 = vpop.f32.mrf.mxu0  ;;  %16752 = vst [vmem:[#allocation42_spill] sm:$0xff] %v13602_v25  ;;  %16755 = vst [vmem:[#allocation43_spill] sm:$0xff] %v13610_v6  ;;  %v4641_v52 = vadd.f32 %v8237_v39, %v16756_v27  ;;  %v4832_v59 = vmul.f32 %v13602_v25, %v13595_v33  ;;  %v4633_v22 = vadd.f32 %v8231_v10, %v16757_v45  ;;  %v13621_v31 = vsel %vm505_vm11, 1.0, %v9318_v36  ;;  %v9032_v27 = vld [vmem:[%s15284_s6 + $0x78] sm:$0xff]  }
 0x3bc   :  { %v4860_v55 = vadd.f32 %v4859_v35, %v4829_v11  ;;  %v4830_v9 = vmul.f32 %v13582_v42, %v13588_v26  ;;  %v13616_v11 = vadd.f32 %v8524_v62, %v4638_v17  ;;  %8526 = vmatprep.subr.bf16.mxu1 %v9032_v27 }
 0x3bd   :  { %v4790_v40 = vpop.f32.mrf.mxu0  ;;  %8527 = vmatpush3.bf16.msra.mxu1 %v9032_v27  ;;  %v9038_v27 = vld [vmem:[%s15284_s6 + $0x48] sm:$0xff]  }
 0x3be   :  { %v4861_v38 = vadd.f32 %v4860_v55, %v4830_v9  ;;  %v13606_v51 = vadd.f32 %v4790_v40, %v4630_v43  ;;  %v4835_v10 = vmul.f32 0.0, %v13616_v11 }
 0x3bf   :  { %v8525_v24 = vpop.f32.mrf.mxu0 }
 0x3c0   :  { %16753 = vst [vmem:[#allocation39_spill] sm:$0xff] %v13606_v51  ;;  %v4862_v28 = vadd.f32 %v4861_v38, %v4831_v34  ;;  %v13618_v35 = vadd.f32 %v8525_v24, %v4641_v52  ;;  %v4833_v57 = vmul.f32 %v13610_v6, %v13606_v51 }
 0x3c1   :  { %v4793_v13 = vpop.f32.mrf.mxu0 }
 0x3c2   :  { %v4863_v43 = vadd.f32 %v4862_v28, %v4832_v59  ;;  %v13625_v39 = vadd.f32 %v4793_v13, %v4633_v22  ;;  %v4836_v62 = vmul.f32 0.0, %v13618_v35  ;;  %v9039_v59 = vld [vmem:[%s15284_s6 + $0x38] sm:$0xff]   ;;  %v9033_v28 = vld [vmem:[%s15284_s6 + $0x70] sm:$0xff]  }
 0x3c3   :  { %8574 = vmatprep.subr.bf16.mxu0 %v9039_v59  ;;  %8528 = vmatprep.subr.bf16.mxu1 %v9033_v28  ;;  %v9040_v13 = vld [vmem:[%s15284_s6 + $0x30] sm:$0xff]  }
 0x3c4   :  { %v4864_v55 = vadd.f32 %v4863_v43, %v4833_v57  ;;  %v4834_v9 = vmul.f32 %v13621_v31, %v13625_v39  ;;  %8575 = vmatpush3.bf16.msra.mxu0 %v9039_v59  ;;  %8529 = vmatpush3.bf16.msra.mxu1 %v9033_v28  ;;  %v9034_v57 = vld [vmem:[%s15284_s6 + $0x68] sm:$0xff]   ;;  %v9042_v28 = vld [vmem:[%s15284_s6 + $0x40] sm:$0xff]  }
 0x3c5   :  { %8576 = vmatprep.subr.bf16.mxu0 %v9040_v13  ;;  %8530 = vmatprep.subr.bf16.mxu1 %v9034_v57  ;;  %v9041_v43 = vld [vmem:[%s15284_s6 + $0x28] sm:$0xff]  }
 0x3c6   :  { %v4865_v40 = vadd.f32 %v4864_v55, %v4834_v9  ;;  %v9035_v55 = vld [vmem:[%s15284_s6 + $0x60] sm:$0xff]   ;;  %v9046_v59 = vld [vmem:[%s15284_s6 + $0x8] sm:$0xff]  }
 0x3c7   :  { %v9043_v9 = vld [vmem:[%s15284_s6 + $0x20] sm:$0xff]  }
 0x3c8   :  { %v4866_v34 = vadd.f32 %v4865_v40, %v4835_v10  ;;  %8531 = vmatpush3.bf16.msra.mxu1 %v9034_v57  ;;  %8577 = vmatpush3.bf16.msra.mxu0 %v9040_v13  ;;  %v9036_v10 = vld [vmem:[%s15284_s6 + $0x58] sm:$0xff]  }
 0x3c9   :  { %8578 = vmatprep.subr.bf16.mxu0 %v9041_v43  ;;  %8532 = vmatprep.subr.bf16.mxu1 %v9035_v55 }
 0x3ca   :  { %v4867_v38 = vadd.f32 %v4866_v34, %v4836_v62  ;;  %v9044_v62 = vld [vmem:[%s15284_s6 + $0x18] sm:$0xff]  }
 0x3cc   :  { %v4868_v36 = vrot.slane %v4867_v38, 4  ;;  %8533 = vmatpush3.bf16.msra.mxu1 %v9035_v55  ;;  %8579 = vmatpush3.bf16.msra.mxu0 %v9041_v43 }
 0x3cd   :  { %8580 = vmatprep.subr.bf16.mxu0 %v9043_v9  ;;  %8534 = vmatprep.subr.bf16.mxu1 %v9036_v10 }
 0x3ce   :  { %v4869_v7 = vadd.f32 %v4868_v36, %v4867_v38  ;;  %v9037_v38 = vld [vmem:[%s15284_s6 + $0x50] sm:$0xff]  }
 0x3cf   :  { %v9045_v36 = vld [vmem:[%s15284_s6 + $0x10] sm:$0xff]  }
 0x3d0   :  { %v4870_v17 = vrot.slane %v4869_v7, 2  ;;  %8535 = vmatpush3.bf16.msra.mxu1 %v9036_v10  ;;  %8581 = vmatpush3.bf16.msra.mxu0 %v9043_v9  ;;  %v9047_v10 = vld [vmem:[%s15284_s6] sm:$0xff]  }
 0x3d1   :  { %8582 = vmatprep.subr.bf16.mxu0 %v9044_v62  ;;  %8536 = vmatprep.subr.bf16.mxu1 %v9037_v38 }
 0x3d2   :  { %v4871_v52 = vadd.f32 %v4870_v17, %v4869_v7 }
 0x3d4   :  { %v4872_v24 = vrot.slane %v4871_v52, 1  ;;  %8537 = vmatpush3.bf16.msra.mxu1 %v9037_v38  ;;  %8583 = vmatpush3.bf16.msra.mxu0 %v9044_v62 }
 0x3d5   :  { %8584 = vmatprep.subr.bf16.mxu0 %v9045_v36  ;;  %8538 = vmatprep.subr.bf16.mxu1 %v9038_v27 }
 0x3d6   :  { %v4873_v45 = vadd.f32 %v4872_v24, %v4871_v52 }
 0x3d8   :  { %v13640_v22 = vmul.f32 0.0051020407, %v4873_v45  ;;  %8539 = vmatpush3.bf16.msra.mxu1 %v9038_v27  ;;  %8585 = vmatpush3.bf16.msra.mxu0 %v9045_v36  ;;  %v13701_v36 = vld [vmem:[%s15284_s6 + $0xb8] sm:$0xff]  }
 0x3d9   :  { %8586 = vmatprep.subr.bf16.mxu0 %v9046_v59  ;;  %8540 = vmatprep.subr.bf16.mxu1 %v9042_v28  ;;  %16758 = vst [vmem:[#allocation46_spill] sm:$0xff] %v13701_v36 }
 0x3da   :  { %v4875_v40 = vsub.f32 %v13240_v20, %v13640_v22  ;;  %v4876_v34 = vsub.f32 %v13260_v30, %v13640_v22  ;;  %v4877_v52 = vsub.f32 %v13258_v56, %v13640_v22  ;;  %v4878_v24 = vsub.f32 %v13271_v23, %v13640_v22 }
 0x3db   :  { %v4879_v45 = vsub.f32 %v13282_v2, %v13640_v22  ;;  %v4880_v55 = vsub.f32 %v13310_v58, %v13640_v22  ;;  %v4881_v62 = vsub.f32 %v13306_v1, %v13640_v22 }
 0x3dc   :  { %v4907_v7 = vmul.f32 0.0, %v4875_v40  ;;  %v4908_v17 = vmul.f32 0.0, %v4876_v34  ;;  %v4909_v13 = vmul.f32 %v13199_v29, %v4877_v52  ;;  %v4910_v9 = vmul.f32 %v13277_v8, %v4878_v24  ;;  %8541 = vmatpush3.bf16.msra.mxu1 %v9042_v28  ;;  %8587 = vmatpush3.bf16.msra.mxu0 %v9046_v59 }
 0x3dd   :  { %v4911_v40 = vmul.f32 %v13285_v44, %v4879_v45  ;;  %8588 = vmatprep.subr.bf16.mxu0 %v9047_v10  ;;  %8622 = vmatprep.subr.bf16.mxu1 %v13701_v36  ;;  %v4883_v24 = vsub.f32 %v13341_v3, %v13640_v22  ;;  %v4913_v59 = vmul.f32 %v13313_v0, %v4881_v62  ;;  %v16759_v62 = vld [vmem:[#allocation12_spill] sm:$0xff] }
 0x3de   :  { %v4939_v57 = vmul.f32 %v4907_v7, %v4907_v7  ;;  %v4940_v43 = vmul.f32 %v4908_v17, %v4908_v17  ;;  %v4941_v34 = vmul.f32 %v4909_v13, %v4909_v13  ;;  %v4882_v7 = vsub.f32 %v13325_v12, %v13640_v22  ;;  %v16760_v36 = vld [vmem:[#allocation116_spill] sm:$0xff] }
 0x3df   :  { %v4912_v17 = vmul.f32 %v13302_v5, %v4880_v55  ;;  %v4942_v27 = vmul.f32 %v4910_v9, %v4910_v9  ;;  %v4943_v28 = vmul.f32 %v4911_v40, %v4911_v40  ;;  %v4884_v13 = vsub.f32 %v13372_v18, %v13640_v22 }
 0x3e0   :  { %v4971_v38 = vadd.f32 %v4940_v43, %v4939_v57  ;;  %8589 = vmatpush3.bf16.msra.mxu0 %v9047_v10  ;;  %v4914_v57 = vmul.f32 %v13335_v32, %v4882_v7  ;;  %v4885_v55 = vsub.f32 %v13367_v63, %v13640_v22  ;;  %v4915_v9 = vmul.f32 %v13348_v50, %v4883_v24  ;;  %v16761_v7 = vld [vmem:[#allocation11_spill] sm:$0xff]  ;;  %v16763_v24 = vld [vmem:[#allocation13_spill] sm:$0xff] }
 0x3e1   :  { %v4944_v43 = vmul.f32 %v4912_v17, %v4912_v17  ;;  %v4945_v10 = vmul.f32 %v4913_v59, %v4913_v59  ;;  %v4916_v40 = vmul.f32 %v16759_v62, %v4884_v13  ;;  %v4887_v0 = vsub.f32 %v16760_v36, %v13640_v22  ;;  %v16762_v32 = vld [vmem:[#allocation15_spill] sm:$0xff]  ;;  %v16764_v13 = vld [vmem:[#allocation14_spill] sm:$0xff] }
 0x3e2   :  { %v4972_v52 = vadd.f32 %v4971_v38, %v4941_v34  ;;  %v4886_v38 = vsub.f32 %v13384_v15, %v13640_v22  ;;  %v4917_v17 = vmul.f32 %v16761_v7, %v4885_v55  ;;  %v4888_v5 = vsub.f32 %v16762_v32, %v13640_v22  ;;  %v16765_v62 = vld [vmem:[#allocation18_spill] sm:$0xff]  ;;  %v16766_v55 = vld [vmem:[#allocation16_spill] sm:$0xff] }
 0x3e3   :  { %v4889_v50 = vsub.f32 %v13423_v48, %v13640_v22  ;;  %v4890_v8 = vsub.f32 %v16765_v62, %v13640_v22  ;;  %v4891_v7 = vsub.f32 %v13459_v49, %v13640_v22 }
 0x3e4   :  { %v4973_v45 = vadd.f32 %v4972_v52, %v4942_v27  ;;  %v4946_v27 = vmul.f32 %v4914_v57, %v4914_v57  ;;  %v4918_v59 = vmul.f32 %v16763_v24, %v4886_v38  ;;  %v4919_v57 = vmul.f32 %v16764_v13, %v4887_v0  ;;  %v16767_v38 = vld [vmem:[#allocation17_spill] sm:$0xff]  ;;  %v16768_v0 = vld [vmem:[#allocation20_spill] sm:$0xff] }
 0x3e5   :  { %v4892_v24 = vsub.f32 %v13488_v37, %v13640_v22  ;;  %v4893_v13 = vsub.f32 %v13483_v60, %v13640_v22 }
 0x3e6   :  { %v4974_v44 = vadd.f32 %v4973_v45, %v4943_v28  ;;  %v4947_v28 = vmul.f32 %v4915_v9, %v4915_v9  ;;  %v4920_v9 = vmul.f32 %v16766_v55, %v4888_v5  ;;  %v4923_v5 = vmul.f32 %v13466_v21, %v4891_v7  ;;  %v16771_v7 = vld [vmem:[#allocation26_spill] sm:$0xff] }
 0x3e7   :  { %v4897_v21 = vsub.f32 %v13532_v46, %v13640_v22 }
 0x3e8   :  { %v4975_v34 = vadd.f32 %v4974_v44, %v4944_v43  ;;  %v4948_v44 = vmul.f32 %v4916_v40, %v4916_v40  ;;  %v4921_v40 = vmul.f32 %v16767_v38, %v4889_v50  ;;  %v16769_v50 = vld [vmem:[#allocation21_spill] sm:$0xff]  ;;  %v4895_v38 = vsub.f32 %v13513_v19, %v13640_v22 }
 0x3ea   :  { %v4976_v52 = vadd.f32 %v4975_v34, %v4945_v10  ;;  %v4949_v10 = vmul.f32 %v4917_v17, %v4917_v17  ;;  %v4922_v17 = vmul.f32 %v16768_v0, %v4890_v8  ;;  %v16770_v8 = vld [vmem:[#allocation22_spill] sm:$0xff]  ;;  %v4896_v0 = vsub.f32 %v13537_v4, %v13640_v22 }
 0x3ec   :  { %v4977_v45 = vadd.f32 %v4976_v52, %v4946_v27  ;;  %v4950_v27 = vmul.f32 %v4918_v59, %v4918_v59  ;;  %v4953_v59 = vmul.f32 %v4921_v40, %v4921_v40 }
 0x3ee   :  { %v4978_v43 = vadd.f32 %v4977_v45, %v4947_v28  ;;  %v4951_v28 = vmul.f32 %v4919_v57, %v4919_v57  ;;  %v4924_v57 = vmul.f32 %v16769_v50, %v4892_v24  ;;  %v16772_v24 = vld [vmem:[#allocation23_spill] sm:$0xff]  ;;  %v4898_v50 = vsub.f32 %v13548_v16, %v13640_v22 }
 0x3f0   :  { %v4979_v34 = vadd.f32 %v4978_v43, %v4948_v44  ;;  %v4952_v44 = vmul.f32 %v4920_v9, %v4920_v9  ;;  %v4925_v9 = vmul.f32 %v16770_v8, %v4893_v13  ;;  %v16773_v13 = vld [vmem:[#allocation27_spill] sm:$0xff]  ;;  %v4899_v8 = vsub.f32 %v13562_v47, %v13640_v22 }
 0x3f2   :  { %v4980_v52 = vadd.f32 %v4979_v34, %v4949_v10  ;;  %v4894_v34 = vsub.f32 %v13498_v14, %v13640_v22 }
 0x3f4   :  { %v4981_v45 = vadd.f32 %v4980_v52, %v4950_v27  ;;  %v4954_v27 = vmul.f32 %v4922_v17, %v4922_v17  ;;  %v4926_v40 = vmul.f32 %v16771_v7, %v4894_v34  ;;  %v4927_v17 = vmul.f32 %v16772_v24, %v4895_v38  ;;  %v13761_v38 = vld [vmem:[%s15284_s6 + $0xf8] sm:$0xff]  }
 0x3f5   :  { %v4929_v34 = vmul.f32 %v13542_v54, %v4897_v21  ;;  %8670 = vmatprep.subr.bf16.mxu0 %v13761_v38  ;;  %v4931_v21 = vmul.f32 %v13570_v61, %v4899_v8 }
 0x3f6   :  { %v4982_v43 = vadd.f32 %v4981_v45, %v4951_v28  ;;  %v4955_v28 = vmul.f32 %v4923_v5, %v4923_v5  ;;  %v4928_v5 = vmul.f32 %v16773_v13, %v4896_v0 }
 0x3f8   :  { %v4983_v10 = vadd.f32 %v4982_v43, %v4952_v44  ;;  %v4956_v44 = vmul.f32 %v4924_v57, %v4924_v57  ;;  %v4959_v57 = vmul.f32 %v4927_v17, %v4927_v17  ;;  %v4960_v0 = vmul.f32 %v4928_v5, %v4928_v5 }
 0x3f9   :  { %v4961_v17 = vmul.f32 %v4929_v34, %v4929_v34 }
 0x3fa   :  { %v4984_v52 = vadd.f32 %v4983_v10, %v4953_v59  ;;  %v4957_v59 = vmul.f32 %v4925_v9, %v4925_v9  ;;  %v4900_v9 = vsub.f32 %v13588_v26, %v13640_v22 }
 0x3fc   :  { %v4985_v45 = vadd.f32 %v4984_v52, %v4954_v27  ;;  %v4958_v27 = vmul.f32 %v4926_v40, %v4926_v40 }
 0x3fe   :  { %v4986_v43 = vadd.f32 %v4985_v45, %v4955_v28  ;;  %v16774_v45 = vld [vmem:[#allocation34_spill] sm:$0xff] }
 0x400   :  { %v4987_v10 = vadd.f32 %v4986_v43, %v4956_v44  ;;  %v4930_v44 = vmul.f32 %v16774_v45, %v4898_v50  ;;  %v4901_v43 = vsub.f32 %v13584_v41, %v13640_v22  ;;  %v4903_v50 = vsub.f32 %v13606_v51, %v13640_v22 }
 0x401   :  { %v4904_v45 = vsub.f32 %v13625_v39, %v13640_v22 }
 0x402   :  { %v4988_v52 = vadd.f32 %v4987_v10, %v4957_v59  ;;  %v4902_v10 = vsub.f32 %v13595_v33, %v13640_v22  ;;  %v4933_v5 = vmul.f32 %v13592_v53, %v4901_v43 }
 0x403   :  { %v4936_v43 = vmul.f32 %v13621_v31, %v4904_v45 }
 0x404   :  { %v4989_v28 = vadd.f32 %v4988_v52, %v4958_v27  ;;  %v4932_v27 = vmul.f32 %v13582_v42, %v4900_v9  ;;  %v4962_v52 = vmul.f32 %v4930_v44, %v4930_v44  ;;  %v4934_v8 = vmul.f32 %v13602_v25, %v4902_v10 }
 0x405   :  { %v4935_v9 = vmul.f32 %v13610_v6, %v4903_v50  ;;  %v4965_v44 = vmul.f32 %v4933_v5, %v4933_v5 }
 0x406   :  { %v4990_v40 = vadd.f32 %v4989_v28, %v4959_v57  ;;  %v4963_v57 = vmul.f32 %v4931_v21, %v4931_v21  ;;  %v4964_v34 = vmul.f32 %v4932_v27, %v4932_v27  ;;  %v4968_v27 = vmul.f32 %v4936_v43, %v4936_v43 }
 0x407   :  { %v4967_v53 = vmul.f32 %v4935_v9, %v4935_v9  ;;  %v5011_v9 = vld [vmem:[%s15285_s4] sm:$0x1] }
 0x408   :  { %v4991_v59 = vadd.f32 %v4990_v40, %v4960_v0  ;;  %v4905_v40 = vsub.f32 %v13616_v11, %v13640_v22 }
 0x40a   :  { %v4992_v54 = vadd.f32 %v4991_v59, %v4961_v17  ;;  %v4906_v59 = vsub.f32 %v13618_v35, %v13640_v22 }
 0x40c   :  { %v4993_v28 = vadd.f32 %v4992_v54, %v4962_v52  ;;  %v4966_v54 = vmul.f32 %v4934_v8, %v4934_v8  ;;  %v4937_v52 = vmul.f32 0.0, %v4905_v40  ;;  %v4938_v10 = vmul.f32 0.0, %v4906_v59 }
 0x40e   :  { %v4994_v0 = vadd.f32 %v4993_v28, %v4963_v57  ;;  %v4969_v28 = vmul.f32 %v4937_v52, %v4937_v52  ;;  %v4970_v61 = vmul.f32 %v4938_v10, %v4938_v10 }
 0x410   :  { %v4995_v17 = vadd.f32 %v4994_v0, %v4964_v34 }
 0x412   :  { %v4996_v21 = vadd.f32 %v4995_v17, %v4965_v44 }
 0x414   :  { %v4997_v42 = vadd.f32 %v4996_v21, %v4966_v54 }
 0x416   :  { %v4998_v57 = vadd.f32 %v4997_v42, %v4967_v53 }
 0x418   :  { %v4999_v25 = vadd.f32 %v4998_v57, %v4968_v27 }
 0x41a   :  { %v5000_v13 = vadd.f32 %v4999_v25, %v4969_v28 }
 0x41c   :  { %v5001_v50 = vadd.f32 %v5000_v13, %v4970_v61  ;;  %v5013_v61 = vld [vmem:[%s15286_s5] sm:$0x1] }
 0x41d   :  { %v16775_v13 = vld [vmem:[#allocation6_spill] sm:$0xff] }
 0x41e   :  { %v5002_v5 = vrot.slane %v5001_v50, 4 }
 0x420   :  { %v5003_v34 = vadd.f32 %v5002_v5, %v5001_v50 }
 0x422   :  { %v5004_v0 = vrot.slane %v5003_v34, 2 }
 0x424   :  { %v5005_v6 = vadd.f32 %v5004_v0, %v5003_v34 }
 0x426   :  { %v5006_v24 = vrot.slane %v5005_v6, 1 }
 0x428   :  { %v5007_v51 = vadd.f32 %v5006_v24, %v5005_v6 }
 0x42a   :  { %v5008_v45 = vmul.f32 0.0051020407, %v5007_v51 }
 0x42c   :  { %v5009_v8 = vadd.f32 1e-05, %v5008_v45 }
 0x42e   :  { %9122 = vrsqrt.f32 %v5009_v8 }
 0x43b   :  { %v9123_v40 = vpop.eup %9122 }
 0x43c   :  { %v5012_v42 = vmul.f32 %v9123_v40, %v5011_v9 }
 0x43e   :  { %v5014_v53 = vmul.f32 %v5012_v42, %v13640_v22  ;;  %v13793_v44 = vrot.slane %v5012_v42, %v16775_v13 }
 0x440   :  { %v5015_v25 = vsub.f32 %v5013_v61, %v5014_v53  ;;  %v5020_v6 = vmul.f32 %v13793_v44, %v13240_v20  ;;  %v5021_v24 = vmul.f32 %v13793_v44, %v13260_v30  ;;  %v5049_v22 = vmul.f32 %v13793_v44, %v13625_v39 }
 0x441   :  { %v5050_v54 = vmul.f32 %v13793_v44, %v13616_v11  ;;  %v5051_v21 = vmul.f32 %v13793_v44, %v13618_v35  ;;  %v5022_v20 = vmul.f32 %v13793_v44, %v13258_v56  ;;  %v5023_v30 = vmul.f32 %v13793_v44, %v13271_v23  ;;  %v16776_v56 = vld [vmem:[#allocation2_spill] sm:$0xff] }
 0x442   :  { %v13796_v51 = vrot.slane %v5015_v25, %v16775_v13  ;;  %v5024_v39 = vmul.f32 %v13793_v44, %v13282_v2  ;;  %v5025_v52 = vmul.f32 %v13793_v44, %v13310_v58  ;;  %v5026_v10 = vmul.f32 %v13793_v44, %v13306_v1 }
 0x443   :  { %v5027_v11 = vmul.f32 %v13793_v44, %v13325_v12  ;;  %vm5186_vm12 = vcmp.lt.s32.totalorder %v16776_v56, 1  ;;  %v5028_v23 = vmul.f32 %v13793_v44, %v13341_v3  ;;  %v5029_v2 = vmul.f32 %v13793_v44, %v13372_v18 }
 0x444   :  { %v5058_v17 = vadd.f32 %v13796_v51, %v5020_v6  ;;  %v5059_v59 = vadd.f32 %v13796_v51, %v5021_v24  ;;  %v5087_v43 = vadd.f32 %v13796_v51, %v5049_v22  ;;  %v5088_v35 = vadd.f32 %v13796_v51, %v5050_v54 }
 0x445   :  { %v5089_v27 = vadd.f32 %v13796_v51, %v5051_v21  ;;  %v5030_v1 = vmul.f32 %v13793_v44, %v13367_v63  ;;  %v5060_v12 = vadd.f32 %v13796_v51, %v5022_v20  ;;  %v5061_v50 = vadd.f32 %v13796_v51, %v5023_v30 }
 0x446   :  { %v5090_v57 = vmax.f32 %v5058_v17, 0.0  ;;  %v5091_v58 = vmax.f32 %v5059_v59, 0.0  ;;  %v5119_v28 = vmax.f32 %v5087_v43, 0.0  ;;  %v5031_v5 = vmul.f32 %v13793_v44, %v13384_v15 }
 0x447   :  { %v13838_v34 = vmul.f32 %v13793_v44, %v16760_v36  ;;  %v13842_v3 = vmul.f32 %v13793_v44, %v16762_v32  ;;  %v5062_v18 = vadd.f32 %v13796_v51, %v5024_v39  ;;  %v5063_v0 = vadd.f32 %v13796_v51, %v5025_v52  ;;  %v16778_v39 = vld [vmem:[#allocation5_spill] sm:$0xff] }
 0x448   :  { %v5064_v63 = vadd.f32 %v13796_v51, %v5026_v10  ;;  %v5120_v45 = vmax.f32 %v5088_v35, 0.0  ;;  %v5121_v8 = vmax.f32 %v5089_v27, 0.0  ;;  %v13849_v40 = vmul.f32 %v13793_v44, %v13423_v48 }
 0x449   :  { %v5065_v15 = vadd.f32 %v13796_v51, %v5027_v11  ;;  %v13852_v36 = vmul.f32 0.0, %v5090_v57  ;;  %v13854_v9 = vmul.f32 0.0, %v5091_v58  ;;  %v13857_v32 = vmul.f32 %v13621_v31, %v5119_v28  ;;  %v16779_v11 = vld [vmem:[#allocation9_spill] sm:$0xff]  ;;  %v16780_v57 = vld [vmem:[#allocation24_spill] sm:$0xff] }
 0x44a   :  { %v13860_v42 = vadd.f32 %v13796_v51, %v5028_v23  ;;  %v5092_v53 = vmax.f32 %v5060_v12, 0.0  ;;  %v5093_v61 = vmax.f32 %v5061_v50, 0.0  ;;  %v13863_v25 = vadd.f32 %v13796_v51, %v5029_v2 }
 0x44b   :  { %v13866_v48 = vadd.f32 %v13796_v51, %v5030_v1  ;;  %v13869_v13 = vadd.f32 %v13796_v51, %v5031_v5  ;;  %v5094_v6 = vmax.f32 %v5062_v18, 0.0  ;;  %v5095_v24 = vmax.f32 %v5063_v0, 0.0  ;;  %v16782_v0 = vld [vmem:[#allocation7_spill] sm:$0xff] }
 0x44c   :  { %v5096_v22 = vmax.f32 %v5064_v63, 0.0  ;;  %v13871_v17 = vmul.f32 0.0, %v5120_v45  ;;  %v13873_v31 = vmul.f32 0.0, %v5121_v8  ;;  %v5097_v59 = vmax.f32 %v5065_v15, 0.0  ;;  %v16783_v45 = vld [vmem:[#allocation46_spill] sm:$0xff] }
 0x44d   :  { %v5154_v43 = vrot.slane %v13852_v36, 7  ;;  %v5155_v54 = vrot.slane %v13854_v9, 7  ;;  %v13879_v21 = vpack.c.bf16 %v13854_v9, %v13852_v36  ;;  %v13886_v30 = vmul.f32 %v13199_v29, %v5092_v53  ;;  %v9049_v29 = vld [vmem:[%s15284_s6 + $0xb0] sm:$0xff]  }
 0x44e   :  { %v13883_v20 = vpack.c.bf16 %v13873_v31, %v13871_v17  ;;  %v13889_v52 = vmul.f32 %v16778_v39, %v5093_v61  ;;  %v15659_v10 = vrot.slane %v13857_v32, 7  ;;  %v13893_v35 = vmul.f32 %v16779_v11, %v5094_v6  ;;  %v9050_v39 = vld [vmem:[%s15284_s6 + $0xa8] sm:$0xff]  }
 0x44f   :  { %v5184_v27 = vrot.slane %v13871_v17, 7  ;;  %v5185_v23 = vrot.slane %v13873_v31, 7  ;;  %v5217_v2 = vsel %vm5186_vm12, %v5154_v43, %v5155_v54  ;;  %v13903_v58 = vmul.f32 %v16780_v57, %v5095_v24 }
 0x450   :  { %16777 = vst [vmem:[#allocation50_spill] sm:$0xff] %v13883_v20  ;;  %8542 = vmatprep.mubr.bf16.mxu1 %v13883_v20  ;;  %v13908_v28 = vpack.c.bf16 %v13889_v52, %v13886_v30  ;;  %v5156_v1 = vrot.slane %v13886_v30, 7  ;;  %v5157_v12 = vrot.slane %v13889_v52, 7  ;;  %v13922_v63 = vmul.f32 %v16782_v0, %v5096_v22  ;;  %v16785_v22 = vld [vmem:[#allocation117_spill] sm:$0xff] }
 0x451   :  { %8543 = vmatmul.mubr.bf16.vlgmr.msra.gmra.mxu1 %v13879_v21  ;;  %v5187_v50 = vsel %vm5186_vm12, %v5184_v27, %v5185_v23  ;;  %v5188_v5 = vsel %vm5186_vm12, %v15659_v10, %v5184_v27  ;;  %v5218_v18 = vsel %vm5186_vm12, %v5185_v23, %v5154_v43  ;;  %v5035_v61 = vmul.f32 %v13793_v44, %v16765_v62 }
 0x452   :  { %16781 = vst [vmem:[#allocation47_spill] sm:$0xff] %v13908_v28  ;;  %8623 = vmatpush3.bf16.msra.mxu1 %v16783_v45  ;;  %8546 = vmatprep.mubr.bf16.mxu1 %v13908_v28  ;;  %v13926_v8 = vpack.c.bf16 %v5187_v50, %v5188_v5  ;;  %v13928_v15 = vpack.c.bf16 %v5217_v2, %v5218_v18  ;;  %v5098_v6 = vmax.f32 %v13860_v42, 0.0  ;;  %v5099_v11 = vmax.f32 %v13863_v25, 0.0 }
 0x453   :  { %v5215_v53 = vsel %vm5186_vm12, %v5156_v1, %v5157_v12  ;;  %v5216_v24 = vsel %vm5186_vm12, %v5155_v54, %v5156_v1  ;;  %8624 = vmatprep.subr.bf16.mxu1 %v9049_v29  ;;  %v13938_v43 = vmul.f32 %v16785_v22, %v5097_v59  ;;  %v5158_v62 = vrot.slane %v13893_v35, 7  ;;  %v9055_v54 = vld [vmem:[%s15284_s6 + $0xf0] sm:$0xff]   ;;  %v16791_v22 = vld [vmem:[#allocation13_spill] sm:$0xff] }
 0x454   :  { %16784 = vst [vmem:[#allocation51_spill] sm:$0xff] %v13926_v8  ;;  %8590 = vmatprep.mubr.bf16.mxu0 %v13926_v8  ;;  %v13945_v27 = vpack.c.bf16 %v5215_v53, %v5216_v24  ;;  %v5159_v42 = vrot.slane %v13903_v58, 7  ;;  %v5100_v59 = vmax.f32 %v13866_v48, 0.0  ;;  %v5101_v23 = vmax.f32 %v13869_v13, 0.0  ;;  %v16786_v13 = vld [vmem:[#allocation10_spill] sm:$0xff]  ;;  %v9056_v53 = vld [vmem:[%s15284_s6 + $0xe8] sm:$0xff]  }
 0x455   :  { %8591 = vmatmul.mubr.bf16.vlgmr.msra.gmra.mxu0 %v13928_v15  ;;  %v5160_v25 = vrot.slane %v13922_v63, 7  ;;  %v5161_v2 = vrot.slane %v13938_v43, 7  ;;  %v5070_v57 = vadd.f32 %v13796_v51, %v13838_v34  ;;  %v5071_v1 = vadd.f32 %v13796_v51, %v13842_v3  ;;  %v9051_v34 = vld [vmem:[%s15284_s6 + $0xa0] sm:$0xff]   ;;  %v16788_v3 = vld [vmem:[#allocation12_spill] sm:$0xff] }
 0x456   :  { %v13963_v50 = vadd.f32 %v13796_v51, %v13849_v40  ;;  %8594 = vmatprep.mubr.bf16.mxu0 %v13945_v27  ;;  %8625 = vmatpush3.bf16.msra.mxu1 %v9049_v29  ;;  %v5073_v48 = vadd.f32 %v13796_v51, %v5035_v61  ;;  %v13968_v5 = vmul.f32 %v16786_v13, %v5098_v6  ;;  %v16790_v6 = vld [vmem:[#allocation11_spill] sm:$0xff]  ;;  %vm5733_vm13 = vcmp.lt.s32.totalorder %v16776_v56, 7 }
 0x457   :  { %v13972_v18 = vpack.c.bf16 %v13903_v58, %v13893_v35  ;;  %8626 = vmatprep.subr.bf16.mxu1 %v9050_v39  ;;  %8671 = vmatpush3.bf16.msra.mxu0 %v13761_v38  ;;  %v13979_v40 = vmul.f32 %v16788_v3, %v5099_v11  ;;  %v13983_v29 = vpack.c.bf16 %v13938_v43, %v13922_v63 }
 0x458   :  { %v5213_v0 = vsel %vm5186_vm12, %v5158_v62, %v5159_v42  ;;  %v5214_v45 = vsel %vm5186_vm12, %v5157_v12, %v5158_v62  ;;  %8672 = vmatprep.subr.bf16.mxu0 %v9055_v54  ;;  %v5211_v38 = vsel %vm5186_vm12, %v5160_v25, %v5161_v2  ;;  %v5212_v61 = vsel %vm5186_vm12, %v5159_v42, %v5160_v25 }
 0x459   :  { %16787 = vst [vmem:[#allocation54_spill] sm:$0xff] %v13972_v18  ;;  %16789 = vst [vmem:[#allocation58_spill] sm:$0xff] %v13983_v29  ;;  %8547 = vmatmul.mubr.bf16.gmra.mxu1 %v13972_v18  ;;  %v13998_v24 = vmul.f32 %v16790_v6, %v5100_v59  ;;  %v14001_v11 = vmul.f32 %v16791_v22, %v5101_v23  ;;  %v5036_v12 = vmul.f32 %v13793_v44, %v13459_v49  ;;  %v9052_v49 = vld [vmem:[%s15284_s6 + $0x98] sm:$0xff]   ;;  %v9054_v22 = vld [vmem:[%s15284_s6 + $0x90] sm:$0xff]  }
 0x45a   :  { %v5037_v62 = vmul.f32 %v13793_v44, %v13488_v37  ;;  %v5038_v13 = vmul.f32 %v13793_v44, %v13483_v60  ;;  %8550 = vmatprep.mubr.bf16.mxu1 %v13983_v29  ;;  %8627 = vmatpush3.bf16.msra.mxu1 %v9050_v39  ;;  %v5039_v42 = vmul.f32 %v13793_v44, %v13498_v14  ;;  %v5102_v23 = vmax.f32 %v5070_v57, 0.0  ;;  %v9058_v14 = vld [vmem:[%s15284_s6 + $0xe0] sm:$0xff]   ;;  %v16802_v29 = vld [vmem:[#allocation39_spill] sm:$0xff] }
 0x45b   :  { %v5040_v59 = vmul.f32 %v13793_v44, %v13513_v19  ;;  %v14014_v25 = vpack.c.bf16 %v5213_v0, %v5214_v45  ;;  %8628 = vmatprep.subr.bf16.mxu1 %v9051_v34  ;;  %8673 = vmatpush3.bf16.msra.mxu0 %v9055_v54  ;;  %v5103_v37 = vmax.f32 %v5071_v1, 0.0  ;;  %v14019_v60 = vpack.c.bf16 %v5211_v38, %v5212_v61  ;;  %v16818_v56 = vld [vmem:[#allocation51_spill] sm:$0xff] }
 0x45c   :  { %v5162_v39 = vrot.slane %v13968_v5, 7  ;;  %v5163_v3 = vrot.slane %v13979_v40, 7  ;;  %8674 = vmatprep.subr.bf16.mxu0 %v9056_v53  ;;  %v5104_v19 = vmax.f32 %v13963_v50, 0.0  ;;  %v5105_v57 = vmax.f32 %v5073_v48, 0.0  ;;  %v16792_v50 = vld [vmem:[#allocation14_spill] sm:$0xff] }
 0x45d   :  { %8595 = vmatmul.mubr.bf16.gmra.mxu0 %v14014_v25  ;;  %v5164_v0 = vrot.slane %v13998_v24, 7  ;;  %v5165_v54 = vrot.slane %v14001_v11, 7  ;;  %v5074_v1 = vadd.f32 %v13796_v51, %v5036_v12  ;;  %v5075_v45 = vadd.f32 %v13796_v51, %v5037_v62 }
 0x45e   :  { %v14033_v38 = vadd.f32 %v13796_v51, %v5038_v13  ;;  %8598 = vmatprep.mubr.bf16.mxu0 %v14019_v60  ;;  %8629 = vmatpush3.bf16.msra.mxu1 %v9051_v34  ;;  %v5077_v61 = vadd.f32 %v13796_v51, %v5039_v42  ;;  %v14038_v48 = vmul.f32 %v16792_v50, %v5102_v23  ;;  %v9059_v42 = vld [vmem:[%s15284_s6 + $0xd8] sm:$0xff]   ;;  %v16796_v50 = vld [vmem:[#allocation20_spill] sm:$0xff] }
 0x45f   :  { %v14042_v6 = vpack.c.bf16 %v13979_v40, %v13968_v5  ;;  %8630 = vmatprep.subr.bf16.mxu1 %v9052_v49  ;;  %8675 = vmatpush3.bf16.msra.mxu0 %v9056_v53  ;;  %v14048_v12 = vmul.f32 %v16766_v55, %v5103_v37  ;;  %v14052_v34 = vpack.c.bf16 %v14001_v11, %v13998_v24  ;;  %v16795_v23 = vld [vmem:[#allocation17_spill] sm:$0xff] }
 0x460   :  { %v5209_v62 = vsel %vm5186_vm12, %v5162_v39, %v5163_v3  ;;  %v5210_v13 = vsel %vm5186_vm12, %v5161_v2, %v5162_v39  ;;  %8676 = vmatprep.subr.bf16.mxu0 %v9058_v14  ;;  %v5207_v55 = vsel %vm5186_vm12, %v5164_v0, %v5165_v54  ;;  %v5208_v53 = vsel %vm5186_vm12, %v5163_v3, %v5164_v0 }
 0x461   :  { %16793 = vst [vmem:[#allocation55_spill] sm:$0xff] %v14042_v6  ;;  %16794 = vst [vmem:[#allocation59_spill] sm:$0xff] %v14052_v34  ;;  %8551 = vmatmul.mubr.bf16.gmra.mxu1 %v14042_v6  ;;  %v14067_v37 = vmul.f32 %v16795_v23, %v5104_v19  ;;  %v14070_v10 = vmul.f32 %v16796_v50, %v5105_v57  ;;  %v5041_v2 = vmul.f32 %v13793_v44, %v13537_v4  ;;  %v16797_v50 = vld [vmem:[#allocation19_spill] sm:$0xff] }
 0x462   :  { %v5042_v39 = vmul.f32 %v13793_v44, %v13532_v46  ;;  %v5043_v20 = vmul.f32 %v13793_v44, %v13548_v16  ;;  %8554 = vmatprep.mubr.bf16.mxu1 %v14052_v34  ;;  %8631 = vmatpush3.bf16.msra.mxu1 %v9052_v49  ;;  %v5044_v3 = vmul.f32 %v13793_v44, %v13562_v47  ;;  %v5106_v57 = vmax.f32 %v5074_v1, 0.0  ;;  %v9057_v46 = vld [vmem:[%s15284_s6 + $0x88] sm:$0xff]   ;;  %v9061_v47 = vld [vmem:[%s15284_s6 + $0xd0] sm:$0xff]  }
 0x463   :  { %v5045_v19 = vmul.f32 %v13793_v44, %v13588_v26  ;;  %v14083_v0 = vpack.c.bf16 %v5209_v62, %v5210_v13  ;;  %8632 = vmatprep.subr.bf16.mxu1 %v9054_v22  ;;  %8677 = vmatpush3.bf16.msra.mxu0 %v9058_v14  ;;  %v5107_v4 = vmax.f32 %v5075_v45, 0.0  ;;  %v14088_v16 = vpack.c.bf16 %v5207_v55, %v5208_v53 }
 0x464   :  { %v5166_v49 = vrot.slane %v14038_v48, 7  ;;  %v5167_v23 = vrot.slane %v14048_v12, 7  ;;  %8678 = vmatprep.subr.bf16.mxu0 %v9059_v42  ;;  %v5108_v26 = vmax.f32 %v14033_v38, 0.0  ;;  %v5109_v1 = vmax.f32 %v5077_v61, 0.0 }
 0x465   :  { %8599 = vmatmul.mubr.bf16.gmra.mxu0 %v14083_v0  ;;  %v5168_v62 = vrot.slane %v14067_v37, 7  ;;  %v5169_v14 = vrot.slane %v14070_v10, 7  ;;  %v5078_v45 = vadd.f32 %v13796_v51, %v5040_v59  ;;  %v5079_v13 = vadd.f32 %v13796_v51, %v5041_v2  ;;  %v9060_v59 = vld [vmem:[%s15284_s6 + $0x80] sm:$0xff]   ;;  %v16799_v2 = vld [vmem:[#allocation21_spill] sm:$0xff] }
 0x466   :  { %v5080_v55 = vadd.f32 %v13796_v51, %v5042_v39  ;;  %8602 = vmatprep.mubr.bf16.mxu0 %v14088_v16  ;;  %8633 = vmatpush3.bf16.msra.mxu1 %v9054_v22  ;;  %v5081_v53 = vadd.f32 %v13796_v51, %v5043_v20  ;;  %v14105_v38 = vmul.f32 %v16797_v50, %v5106_v57 }
 0x467   :  { %v14109_v61 = vpack.c.bf16 %v14048_v12, %v14038_v48  ;;  %8634 = vmatprep.subr.bf16.mxu1 %v9057_v46  ;;  %8679 = vmatpush3.bf16.msra.mxu0 %v9059_v42  ;;  %v14115_v39 = vmul.f32 %v16799_v2, %v5107_v4  ;;  %v14119_v22 = vpack.c.bf16 %v14070_v10, %v14067_v37  ;;  %v9062_v42 = vld [vmem:[%s15284_s6 + $0xc8] sm:$0xff]   ;;  %v16801_v2 = vld [vmem:[#allocation22_spill] sm:$0xff] }
 0x468   :  { %v5205_v20 = vsel %vm5186_vm12, %v5166_v49, %v5167_v23  ;;  %v5206_v57 = vsel %vm5186_vm12, %v5165_v54, %v5166_v49  ;;  %8680 = vmatprep.subr.bf16.mxu0 %v9061_v47  ;;  %v5203_v4 = vsel %vm5186_vm12, %v5168_v62, %v5169_v14  ;;  %v5204_v50 = vsel %vm5186_vm12, %v5167_v23, %v5168_v62 }
 0x469   :  { %16798 = vst [vmem:[#allocation62_spill] sm:$0xff] %v14109_v61  ;;  %16800 = vst [vmem:[#allocation66_spill] sm:$0xff] %v14119_v22  ;;  %8555 = vmatmul.mubr.bf16.gmra.mxu1 %v14109_v61  ;;  %v14134_v34 = vmul.f32 %v16801_v2, %v5108_v26  ;;  %v14137_v6 = vmul.f32 %v16771_v7, %v5109_v1  ;;  %v5046_v54 = vmul.f32 %v13793_v44, %v13584_v41  ;;  %v14152_v41 = vld [vmem:[%s15284_s6 + $0x138] sm:$0xff]  }
 0x46a   :  { %v5047_v49 = vmul.f32 %v13793_v44, %v13595_v33  ;;  %v5048_v61 = vmul.f32 %v13793_v44, %v16802_v29  ;;  %8558 = vmatprep.mubr.bf16.mxu1 %v14119_v22  ;;  %8635 = vmatpush3.bf16.msra.mxu1 %v9057_v46  ;;  %v5082_v23 = vadd.f32 %v13796_v51, %v5044_v3  ;;  %v5110_v62 = vmax.f32 %v5078_v45, 0.0  ;;  %v9063_v3 = vld [vmem:[%s15284_s6 + $0xc0] sm:$0xff]  }
 0x46b   :  { %v5111_v26 = vmax.f32 %v5079_v13, 0.0  ;;  %v14147_v2 = vpack.c.bf16 %v5205_v20, %v5206_v57  ;;  %8636 = vmatprep.subr.bf16.mxu1 %v9060_v59  ;;  %8681 = vmatpush3.bf16.msra.mxu0 %v9061_v47  ;;  %v5112_v33 = vmax.f32 %v5080_v55, 0.0  ;;  %v14154_v7 = vpack.c.bf16 %v5203_v4, %v5204_v50  ;;  %v16803_v57 = vld [vmem:[#allocation23_spill] sm:$0xff] }
 0x46c   :  { %v5170_v44 = vrot.slane %v14105_v38, 7  ;;  %v5171_v29 = vrot.slane %v14115_v39, 7  ;;  %8682 = vmatprep.subr.bf16.mxu0 %v9062_v42  ;;  %v5086_v46 = vadd.f32 %v13796_v51, %v5048_v61  ;;  %v5113_v47 = vmax.f32 %v5081_v53, 0.0  ;;  %v16804_v61 = vld [vmem:[#allocation27_spill] sm:$0xff] }
 0x46d   :  { %8603 = vmatmul.mubr.bf16.gmra.mxu0 %v14147_v2  ;;  %v5172_v1 = vrot.slane %v14134_v34, 7  ;;  %v5173_v45 = vrot.slane %v14137_v6, 7  ;;  %v5083_v13 = vadd.f32 %v13796_v51, %v5045_v19  ;;  %v5084_v55 = vadd.f32 %v13796_v51, %v5046_v54  ;;  %v16807_v54 = vld [vmem:[#allocation30_spill] sm:$0xff] }
 0x46e   :  { %v5085_v20 = vadd.f32 %v13796_v51, %v5047_v49  ;;  %8606 = vmatprep.mubr.bf16.mxu0 %v14154_v7  ;;  %8637 = vmatpush3.bf16.msra.mxu1 %v9060_v59  ;;  %v14170_v4 = vmul.f32 %v16803_v57, %v5110_v62  ;;  %v14173_v53 = vmul.f32 %v16804_v61, %v5111_v26  ;;  %v5118_v62 = vmax.f32 %v5086_v46, 0.0  ;;  %v16808_v61 = vld [vmem:[#allocation34_spill] sm:$0xff] }
 0x46f   :  { %v14177_v50 = vpack.c.bf16 %v14115_v39, %v14105_v38  ;;  %8683 = vmatpush3.bf16.msra.mxu0 %v9062_v42  ;;  %8718 = vmatprep.subr.bf16.mxu1 %v14152_v41  ;;  %v14182_v19 = vpack.c.bf16 %v14137_v6, %v14134_v34  ;;  %v5201_v51 = vsel %vm5186_vm12, %v5170_v44, %v5171_v29  ;;  %v14194_v42 = vld [vmem:[%s15284_s6 + $0x178] sm:$0xff]  }
 0x470   :  { %v5202_v59 = vsel %vm5186_vm12, %v5169_v14, %v5170_v44  ;;  %v14189_v49 = vmul.f32 %v16807_v54, %v5112_v33  ;;  %8684 = vmatprep.subr.bf16.mxu0 %v9063_v3  ;;  %v5199_v26 = vsel %vm5186_vm12, %v5172_v1, %v5173_v45  ;;  %v5200_v57 = vsel %vm5186_vm12, %v5171_v29, %v5172_v1  ;;  %v16809_v1 = vld [vmem:[#allocation43_spill] sm:$0xff] }
 0x471   :  { %16805 = vst [vmem:[#allocation63_spill] sm:$0xff] %v14177_v50  ;;  %16806 = vst [vmem:[#allocation67_spill] sm:$0xff] %v14182_v19  ;;  %8559 = vmatmul.mubr.bf16.gmra.mxu1 %v14177_v50  ;;  %v14202_v14 = vmul.f32 %v16808_v61, %v5113_v47  ;;  %v5114_v33 = vmax.f32 %v5082_v23, 0.0  ;;  %v5115_v44 = vmax.f32 %v5083_v13, 0.0  ;;  %v14205_v54 = vpack.c.bf16 %v5201_v51, %v5202_v59  ;;  %v16811_v51 = vld [vmem:[#allocation35_spill] sm:$0xff] }
 0x472   :  { %8562 = vmatprep.mubr.bf16.mxu1 %v14182_v19  ;;  %v14207_v22 = vpack.c.bf16 %v5199_v26, %v5200_v57  ;;  %v5174_v46 = vrot.slane %v14170_v4, 7  ;;  %v5175_v50 = vrot.slane %v14173_v53, 7  ;;  %v5176_v18 = vrot.slane %v14189_v49, 7 }
 0x473   :  { %8685 = vmatpush3.bf16.msra.mxu0 %v9063_v3  ;;  %v5116_v29 = vmax.f32 %v5084_v55, 0.0  ;;  %v5117_v47 = vmax.f32 %v5085_v20, 0.0  ;;  %v14214_v61 = vmul.f32 %v16809_v1, %v5118_v62  ;;  %v5177_v23 = vrot.slane %v14202_v14, 7  ;;  %v16810_v3 = vld [vmem:[#allocation31_spill] sm:$0xff]  ;;  %v16814_v1 = vld [vmem:[#allocation38_spill] sm:$0xff] }
 0x474   :  { %8766 = vmatprep.subr.bf16.mxu0 %v14194_v42  ;;  %v14221_v13 = vmul.f32 %v16810_v3, %v5114_v33  ;;  %v14224_v59 = vmul.f32 %v16811_v51, %v5115_v44  ;;  %v14228_v55 = vpack.c.bf16 %v14173_v53, %v14170_v4  ;;  %v14232_v20 = vpack.c.bf16 %v14202_v14, %v14189_v49  ;;  %v16815_v51 = vld [vmem:[#allocation42_spill] sm:$0xff] }
 0x475   :  { %8607 = vmatmul.mubr.bf16.gmra.mxu0 %v14205_v54  ;;  %v5197_v62 = vsel %vm5186_vm12, %v5174_v46, %v5175_v50  ;;  %v5198_v26 = vsel %vm5186_vm12, %v5173_v45, %v5174_v46  ;;  %v5196_v57 = vsel %vm5186_vm12, %v5175_v50, %v5176_v18  ;;  %v5731_v33 = vrot.slane %v13871_v17, 1 }
 0x476   :  { %8610 = vmatprep.mubr.bf16.mxu0 %v14207_v22  ;;  %16812 = vst [vmem:[#allocation70_spill] sm:$0xff] %v14228_v55  ;;  %16813 = vst [vmem:[#allocation74_spill] sm:$0xff] %v14232_v20  ;;  %v5195_v44 = vsel %vm5186_vm12, %v5176_v18, %v5177_v23  ;;  %v14245_v3 = vmul.f32 %v16814_v1, %v5116_v29  ;;  %v14248_v19 = vmul.f32 %v16815_v51, %v5117_v47 }
 0x477   :  { %v15680_v28 = vrot.slane %v14214_v61, 1  ;;  %v5730_v45 = vrot.slane %v13857_v32, 1  ;;  %v14253_v50 = vpack.c.bf16 %v5197_v62, %v5198_v26  ;;  %v5178_v17 = vrot.slane %v14221_v13, 7 }
 0x478   :  { %v14256_v46 = vpack.c.bf16 %v5195_v44, %v5196_v57  ;;  %v5179_v18 = vrot.slane %v14224_v59, 7  ;;  %v5180_v1 = vrot.slane %v14245_v3, 7  ;;  %v5181_v62 = vrot.slane %v14248_v19, 7 }
 0x479   :  { %8563 = vmatmul.mubr.bf16.gmra.mxu1 %v14228_v55  ;;  %v5735_v29 = vsel %vm5733_vm13, %v5730_v45, %v5731_v33  ;;  %v5736_v47 = vsel %vm5733_vm13, %v15680_v28, %v5730_v45  ;;  %v14273_v57 = vpack.c.bf16 %v14224_v59, %v14221_v13  ;;  %v14277_v44 = vpack.c.bf16 %v14248_v19, %v14245_v3 }
 0x47a   :  { %8566 = vmatprep.mubr.bf16.mxu1 %v14232_v20  ;;  %v14268_v26 = vpack.c.bf16 %v5735_v29, %v5736_v47  ;;  %v5193_v51 = vsel %vm5186_vm12, %v5178_v17, %v5179_v18  ;;  %v5194_v45 = vsel %vm5186_vm12, %v5177_v23, %v5178_v17  ;;  %v5191_v29 = vsel %vm5186_vm12, %v5180_v1, %v5181_v62 }
 0x47b   :  { %v5192_v47 = vsel %vm5186_vm12, %v5179_v18, %v5180_v1  ;;  %v5701_v28 = vrot.slane %v13852_v36, 1  ;;  %v5732_v20 = vrot.slane %v13873_v31, 1  ;;  %v14291_v55 = vpack.c.bf16 %v5193_v51, %v5194_v45 }
 0x47c   :  { %v14293_v8 = vpack.c.bf16 %v5191_v29, %v5192_v47  ;;  %v5182_v23 = vrot.slane %v14214_v61, 7  ;;  %v5702_v36 = vrot.slane %v13854_v9, 1  ;;  %v14305_v31 = vpack.c.bf16 %v13857_v32, %v14214_v61 }
 0x47d   :  { %8611 = vmatmul.mubr.bf16.gmra.mxu0 %v14253_v50  ;;  %v5734_v17 = vsel %vm5733_vm13, %v5731_v33, %v5732_v20  ;;  %v5765_v18 = vsel %vm5733_vm13, %v5732_v20, %v5701_v28  ;;  %v5703_v1 = vrot.slane %v13886_v30, 1  ;;  %v16816_v45 = vrot.slane %v13857_v32, 7 }
 0x47e   :  { %8614 = vmatprep.mubr.bf16.mxu0 %v14256_v46  ;;  %v14308_v51 = vpack.c.bf16 %v5765_v18, %v5734_v17  ;;  %v5190_v20 = vsel %vm5186_vm12, %v5181_v62, %v5182_v23  ;;  %v5704_v9 = vrot.slane %v13889_v52, 1  ;;  %v5705_v29 = vrot.slane %v13893_v35, 1 }
 0x47f   :  { %v5189_v33 = vsel %vm5186_vm12, %v5182_v23, %v16816_v45  ;;  %v5763_v30 = vsel %vm5733_vm13, %v5702_v36, %v5703_v1  ;;  %v5764_v32 = vsel %vm5733_vm13, %v5701_v28, %v5702_v36  ;;  %v9065_v23 = vld [vmem:[%s15284_s6 + $0x130] sm:$0xff]   ;;  %v5706_v28 = vrot.slane %v13903_v58, 1  ;;  %v9066_v45 = vld [vmem:[%s15284_s6 + $0x128] sm:$0xff]  }
 0x480   :  { %v14320_v47 = vpack.c.bf16 %v5189_v33, %v5190_v20  ;;  %v5761_v62 = vsel %vm5733_vm13, %v5704_v9, %v5705_v29  ;;  %v5762_v52 = vsel %vm5733_vm13, %v5703_v1, %v5704_v9  ;;  %v14332_v35 = vpack.c.bf16 %v5763_v30, %v5764_v32  ;;  %v9067_v20 = vld [vmem:[%s15284_s6 + $0x120] sm:$0xff]   ;;  %v9072_v32 = vld [vmem:[%s15284_s6 + $0x168] sm:$0xff]  }
 0x481   :  { %8567 = vmatmul.mubr.bf16.gmra.mxu1 %v14273_v57  ;;  %v14337_v17 = vpack.c.bf16 %v5761_v62, %v5762_v52  ;;  %v5707_v18 = vrot.slane %v13922_v63, 1  ;;  %v5708_v36 = vrot.slane %v13938_v43, 1  ;;  %v5709_v1 = vrot.slane %v13968_v5, 1  ;;  %v9071_v43 = vld [vmem:[%s15284_s6 + $0x170] sm:$0xff]  }
 0x482   :  { %8570 = vmatprep.mubr.bf16.mxu1 %v14277_v44  ;;  %v5760_v63 = vsel %vm5733_vm13, %v5705_v29, %v5706_v28  ;;  %v5710_v29 = vrot.slane %v13979_v40, 1  ;;  %v5711_v30 = vrot.slane %v13998_v24, 1  ;;  %v5712_v62 = vrot.slane %v14001_v11, 1  ;;  %v9068_v40 = vld [vmem:[%s15284_s6 + $0x118] sm:$0xff]   ;;  %v9074_v11 = vld [vmem:[%s15284_s6 + $0x160] sm:$0xff]  }
 0x483   :  { %v5759_v58 = vsel %vm5733_vm13, %v5706_v28, %v5707_v18  ;;  %v5757_v5 = vsel %vm5733_vm13, %v5708_v36, %v5709_v1  ;;  %v5713_v52 = vrot.slane %v14038_v48, 1 }
 0x484   :  { %v14362_v33 = vpack.c.bf16 %v5759_v58, %v5760_v63  ;;  %v5755_v24 = vsel %vm5733_vm13, %v5710_v29, %v5711_v30  ;;  %v9075_v58 = vld [vmem:[%s15284_s6 + $0x158] sm:$0xff]   ;;  %v5716_v63 = vrot.slane %v14070_v10, 1  ;;  %v9077_v10 = vld [vmem:[%s15284_s6 + $0x150] sm:$0xff]  }
 0x485   :  { %8615 = vmatmul.mubr.bf16.gmra.mxu0 %v14291_v55  ;;  %v5753_v48 = vsel %vm5733_vm13, %v5712_v62, %v5713_v52 }
 0x486   :  { %8618 = vmatprep.mubr.bf16.mxu0 %v14293_v8 }
 0x489   :  { %8571 = vmatmul.mubr.bf16.gmra.mxu1 %v14305_v31 }
 0x48a   :  { %8638 = vmatprep.mubr.bf16.mxu1 %v14308_v51 }
 0x48d   :  { %8619 = vmatmul.mubr.bf16.gmra.mxu0 %v14320_v47 }
 0x48e   :  { %8686 = vmatprep.mubr.bf16.mxu0 %v13928_v15 }
 0x491   :  { %8639 = vmatmul.mubr.bf16.vlgmr.msra.gmra.mxu1 %v14332_v35 }
 0x492   :  { %8719 = vmatpush3.bf16.msra.mxu1 %v14152_v41  ;;  %8642 = vmatprep.mubr.bf16.mxu1 %v14337_v17  ;;  %v5758_v41 = vsel %vm5733_vm13, %v5707_v18, %v5708_v36  ;;  %v9070_v18 = vld [vmem:[%s15284_s6 + $0x110] sm:$0xff]  }
 0x493   :  { %8720 = vmatprep.subr.bf16.mxu1 %v9065_v23  ;;  %v14368_v9 = vpack.c.bf16 %v5757_v5, %v5758_v41 }
 0x495   :  { %8687 = vmatmul.mubr.bf16.vlgmr.msra.gmra.mxu0 %v13945_v27 }
 0x496   :  { %8690 = vmatprep.mubr.bf16.mxu0 %v14014_v25  ;;  %8721 = vmatpush3.bf16.msra.mxu1 %v9065_v23  ;;  %v5754_v23 = vsel %vm5733_vm13, %v5711_v30, %v5712_v62  ;;  %v5719_v62 = vrot.slane %v14134_v34, 1  ;;  %v9080_v34 = vld [vmem:[%s15284_s6 + $0x1b8] sm:$0xff]  }
 0x497   :  { %8722 = vmatprep.subr.bf16.mxu1 %v9066_v45  ;;  %8767 = vmatpush3.bf16.msra.mxu0 %v14194_v42  ;;  %v5756_v42 = vsel %vm5733_vm13, %v5709_v1, %v5710_v29  ;;  %v14400_v36 = vpack.c.bf16 %v5753_v48, %v5754_v23  ;;  %v5714_v1 = vrot.slane %v14048_v12, 1  ;;  %v9073_v12 = vld [vmem:[%s15284_s6 + $0x108] sm:$0xff]   ;;  %v9076_v29 = vld [vmem:[%s15284_s6 + $0x100] sm:$0xff]  }
 0x498   :  { %8768 = vmatprep.subr.bf16.mxu0 %v9071_v43  ;;  %v14395_v28 = vpack.c.bf16 %v5755_v24, %v5756_v42  ;;  %v5721_v24 = vrot.slane %v14170_v4, 1 }
 0x499   :  { %8643 = vmatmul.mubr.bf16.gmra.mxu1 %v14362_v33  ;;  %v5752_v5 = vsel %vm5733_vm13, %v5713_v52, %v5714_v1  ;;  %v9078_v52 = vld [vmem:[%s15284_s6 + $0x148] sm:$0xff]  }
 0x49a   :  { %8646 = vmatprep.mubr.bf16.mxu1 %v14368_v9  ;;  %8723 = vmatpush3.bf16.msra.mxu1 %v9066_v45  ;;  %v5715_v45 = vrot.slane %v14067_v37, 1 }
 0x49b   :  { %8724 = vmatprep.subr.bf16.mxu1 %v9067_v20  ;;  %8769 = vmatpush3.bf16.msra.mxu0 %v9071_v43  ;;  %v5717_v43 = vrot.slane %v14105_v38, 1 }
 0x49c   :  { %8770 = vmatprep.subr.bf16.mxu0 %v9072_v32  ;;  %v5751_v37 = vsel %vm5733_vm13, %v5714_v1, %v5715_v45  ;;  %v5750_v41 = vsel %vm5733_vm13, %v5715_v45, %v5716_v63  ;;  %v5723_v1 = vrot.slane %v14189_v49, 1  ;;  %v9085_v45 = vld [vmem:[%s15284_s6 + $0x1f8] sm:$0xff]  }
 0x49d   :  { %8691 = vmatmul.mubr.bf16.gmra.mxu0 %v14019_v60  ;;  %v5749_v38 = vsel %vm5733_vm13, %v5716_v63, %v5717_v43  ;;  %v5725_v63 = vrot.slane %v14221_v13, 1 }
 0x49e   :  { %8694 = vmatprep.mubr.bf16.mxu0 %v14083_v0  ;;  %8725 = vmatpush3.bf16.msra.mxu1 %v9067_v20  ;;  %v14427_v20 = vpack.c.bf16 %v5751_v37, %v5752_v5  ;;  %v14432_v30 = vpack.c.bf16 %v5749_v38, %v5750_v41  ;;  %v5726_v37 = vrot.slane %v14224_v59, 1  ;;  %v5727_v5 = vrot.slane %v14245_v3, 1 }
 0x49f   :  { %8726 = vmatprep.subr.bf16.mxu1 %v9068_v40  ;;  %8771 = vmatpush3.bf16.msra.mxu0 %v9072_v32  ;;  %v5718_v32 = vrot.slane %v14115_v39, 1 }
 0x4a0   :  { %8772 = vmatprep.subr.bf16.mxu0 %v9074_v11  ;;  %v5739_v38 = vsel %vm5733_vm13, %v5726_v37, %v5727_v5  ;;  %v5740_v41 = vsel %vm5733_vm13, %v5725_v63, %v5726_v37  ;;  %v16826_v37 = vld [vmem:[#allocation63_spill] sm:$0xff] }
 0x4a1   :  { %8647 = vmatmul.mubr.bf16.gmra.mxu1 %v14395_v28  ;;  %v5747_v39 = vsel %vm5733_vm13, %v5718_v32, %v5719_v62  ;;  %v5748_v42 = vsel %vm5733_vm13, %v5717_v43, %v5718_v32 }
 0x4a2   :  { %8650 = vmatprep.mubr.bf16.mxu1 %v14400_v36  ;;  %8727 = vmatpush3.bf16.msra.mxu1 %v9068_v40  ;;  %v5720_v40 = vrot.slane %v14137_v6, 1  ;;  %v9079_v6 = vld [vmem:[%s15284_s6 + $0x140] sm:$0xff]   ;;  %v14459_v48 = vpack.c.bf16 %v5747_v39, %v5748_v42  ;;  %v9088_v39 = vld [vmem:[%s15284_s6 + $0x1e8] sm:$0xff]  }
 0x4a3   :  { %8728 = vmatprep.subr.bf16.mxu1 %v9070_v18  ;;  %8773 = vmatpush3.bf16.msra.mxu0 %v9074_v11  ;;  %v16821_v42 = vld [vmem:[#allocation58_spill] sm:$0xff] }
 0x4a4   :  { %8774 = vmatprep.subr.bf16.mxu0 %v9075_v58  ;;  %v5745_v4 = vsel %vm5733_vm13, %v5720_v40, %v5721_v24  ;;  %v5746_v11 = vsel %vm5733_vm13, %v5719_v62, %v5720_v40  ;;  %v16819_v62 = vld [vmem:[#allocation47_spill] sm:$0xff] }
 0x4a5   :  { %8695 = vmatmul.mubr.bf16.gmra.mxu0 %v14088_v16  ;;  %v14461_v23 = vpack.c.bf16 %v5745_v4, %v5746_v11  ;;  %v9082_v40 = vld [vmem:[%s15284_s6 + $0x1a8] sm:$0xff]   ;;  %v9084_v4 = vld [vmem:[%s15284_s6 + $0x198] sm:$0xff]   ;;  %v9090_v11 = vld [vmem:[%s15284_s6 + $0x1e0] sm:$0xff]  }
 0x4a6   :  { %8698 = vmatprep.mubr.bf16.mxu0 %v14147_v2  ;;  %8729 = vmatpush3.bf16.msra.mxu1 %v9070_v18  ;;  %v5722_v18 = vrot.slane %v14173_v53, 1 }
 0x4a7   :  { %8730 = vmatprep.subr.bf16.mxu1 %v9073_v12  ;;  %8775 = vmatpush3.bf16.msra.mxu0 %v9075_v58  ;;  %v5724_v58 = vrot.slane %v14202_v14, 1 }
 0x4a8   :  { %8776 = vmatprep.subr.bf16.mxu0 %v9077_v10  ;;  %v5743_v43 = vsel %vm5733_vm13, %v5722_v18, %v5723_v1  ;;  %v5744_v53 = vsel %vm5733_vm13, %v5721_v24, %v5722_v18  ;;  %v9087_v24 = vld [vmem:[%s15284_s6 + $0x1f0] sm:$0xff]  }
 0x4a9   :  { %8651 = vmatmul.mubr.bf16.gmra.mxu1 %v14427_v20  ;;  %v5741_v49 = vsel %vm5733_vm13, %v5724_v58, %v5725_v63  ;;  %v5742_v14 = vsel %vm5733_vm13, %v5723_v1, %v5724_v58  ;;  %v14482_v13 = vpack.c.bf16 %v5743_v43, %v5744_v53  ;;  %v9086_v18 = vld [vmem:[%s15284_s6 + $0x190] sm:$0xff]   ;;  %v9091_v1 = vld [vmem:[%s15284_s6 + $0x1d8] sm:$0xff]   ;;  %v16824_v58 = vld [vmem:[#allocation62_spill] sm:$0xff] }
 0x4aa   :  { %8654 = vmatprep.mubr.bf16.mxu1 %v14432_v30  ;;  %8731 = vmatpush3.bf16.msra.mxu1 %v9073_v12  ;;  %v14484_v12 = vpack.c.bf16 %v5741_v49, %v5742_v14  ;;  %v9089_v63 = vld [vmem:[%s15284_s6 + $0x188] sm:$0xff]   ;;  %v9093_v43 = vld [vmem:[%s15284_s6 + $0x1d0] sm:$0xff]   ;;  %v9092_v53 = vld [vmem:[%s15284_s6 + $0x180] sm:$0xff]  }
 0x4ab   :  { %8732 = vmatprep.subr.bf16.mxu1 %v9076_v29  ;;  %8777 = vmatpush3.bf16.msra.mxu0 %v9077_v10  ;;  %v5728_v10 = vrot.slane %v14248_v19, 1  ;;  %v14503_v19 = vpack.c.bf16 %v5739_v38, %v5740_v41  ;;  %v9094_v49 = vld [vmem:[%s15284_s6 + $0x1c8] sm:$0xff]   ;;  %v16825_v14 = vld [vmem:[#allocation66_spill] sm:$0xff] }
 0x4ac   :  { %8778 = vmatprep.subr.bf16.mxu0 %v9078_v52  ;;  %v16827_v38 = vld [vmem:[#allocation67_spill] sm:$0xff]  ;;  %v16828_v41 = vld [vmem:[#allocation70_spill] sm:$0xff] }
 0x4ad   :  { %8699 = vmatmul.mubr.bf16.gmra.mxu0 %v14154_v7  ;;  %v5738_v3 = vsel %vm5733_vm13, %v5727_v5, %v5728_v10  ;;  %v9096_v5 = vld [vmem:[%s15284_s6 + $0x238] sm:$0xff]  }
 0x4ae   :  { %8702 = vmatprep.mubr.bf16.mxu0 %v14205_v54  ;;  %8733 = vmatpush3.bf16.msra.mxu1 %v9076_v29  ;;  %v16817_v29 = vrot.slane %v14214_v61, 1  ;;  %v9081_v61 = vld [vmem:[%s15284_s6 + $0x1b0] sm:$0xff]  }
 0x4af   :  { %8779 = vmatpush3.bf16.msra.mxu0 %v9078_v52  ;;  %8814 = vmatprep.subr.bf16.mxu1 %v9080_v34  ;;  %v16820_v52 = vld [vmem:[#allocation54_spill] sm:$0xff] }
 0x4b0   :  { %8780 = vmatprep.subr.bf16.mxu0 %v9079_v6  ;;  %v5737_v59 = vsel %vm5733_vm13, %v5728_v10, %v16817_v29  ;;  %v9095_v10 = vld [vmem:[%s15284_s6 + $0x1c0] sm:$0xff]  }
 0x4b1   :  { %8655 = vmatmul.mubr.bf16.gmra.mxu1 %v14459_v48  ;;  %v14505_v32 = vpack.c.bf16 %v5737_v59, %v5738_v3  ;;  %v16829_v29 = vld [vmem:[#allocation74_spill] sm:$0xff]  ;;  %v9097_v3 = vld [vmem:[%s15284_s6 + $0x230] sm:$0xff]  }
 0x4b2   :  { %8658 = vmatprep.mubr.bf16.mxu1 %v14461_v23  ;;  %v16830_v59 = vld [vmem:[#allocation50_spill] sm:$0xff] }
 0x4b3   :  { %8781 = vmatpush3.bf16.msra.mxu0 %v9079_v6  ;;  %v16822_v6 = vld [vmem:[#allocation55_spill] sm:$0xff] }
 0x4b4   :  { %8862 = vmatprep.subr.bf16.mxu0 %v9085_v45 }
 0x4b5   :  { %8703 = vmatmul.mubr.bf16.gmra.mxu0 %v14207_v22 }
 0x4b6   :  { %8706 = vmatprep.mubr.bf16.mxu0 %v14253_v50 }
 0x4b9   :  { %8659 = vmatmul.mubr.bf16.gmra.mxu1 %v14482_v13 }
 0x4ba   :  { %8662 = vmatprep.mubr.bf16.mxu1 %v14484_v12 }
 0x4bd   :  { %8707 = vmatmul.mubr.bf16.gmra.mxu0 %v14256_v46 }
 0x4be   :  { %8710 = vmatprep.mubr.bf16.mxu0 %v14291_v55 }
 0x4c1   :  { %8663 = vmatmul.mubr.bf16.gmra.mxu1 %v14503_v19 }
 0x4c2   :  { %8666 = vmatprep.mubr.bf16.mxu1 %v14505_v32 }
 0x4c5   :  { %8711 = vmatmul.mubr.bf16.gmra.mxu0 %v14293_v8 }
 0x4c6   :  { %8714 = vmatprep.mubr.bf16.mxu0 %v14320_v47 }
 0x4c9   :  { %8667 = vmatmul.mubr.bf16.gmra.mxu1 %v14268_v26 }
 0x4ca   :  { %8734 = vmatprep.mubr.bf16.mxu1 %v13879_v21 }
 0x4cd   :  { %8715 = vmatmul.mubr.bf16.gmra.mxu0 %v16818_v56 }
 0x4ce   :  { %8782 = vmatprep.mubr.bf16.mxu0 %v14332_v35 }
 0x4d1   :  { %8735 = vmatmul.mubr.bf16.vlgmr.msra.gmra.mxu1 %v16819_v62 }
 0x4d2   :  { %8815 = vmatpush3.bf16.msra.mxu1 %v9080_v34  ;;  %8738 = vmatprep.mubr.bf16.mxu1 %v16820_v52  ;;  %v9083_v34 = vld [vmem:[%s15284_s6 + $0x1a0] sm:$0xff]  }
 0x4d3   :  { %8816 = vmatprep.subr.bf16.mxu1 %v9081_v61 }
 0x4d5   :  { %8783 = vmatmul.mubr.bf16.vlgmr.msra.gmra.mxu0 %v14337_v17 }
 0x4d6   :  { %8786 = vmatprep.mubr.bf16.mxu0 %v14362_v33  ;;  %8817 = vmatpush3.bf16.msra.mxu1 %v9081_v61 }
 0x4d7   :  { %8818 = vmatprep.subr.bf16.mxu1 %v9082_v40  ;;  %8863 = vmatpush3.bf16.msra.mxu0 %v9085_v45  ;;  %v16823_v45 = vld [vmem:[#allocation59_spill] sm:$0xff] }
 0x4d8   :  { %8864 = vmatprep.subr.bf16.mxu0 %v9087_v24 }
 0x4d9   :  { %8739 = vmatmul.mubr.bf16.gmra.mxu1 %v16821_v42 }
 0x4da   :  { %8742 = vmatprep.mubr.bf16.mxu1 %v16822_v6  ;;  %8819 = vmatpush3.bf16.msra.mxu1 %v9082_v40 }
 0x4db   :  { %8820 = vmatprep.subr.bf16.mxu1 %v9083_v34  ;;  %8865 = vmatpush3.bf16.msra.mxu0 %v9087_v24 }
 0x4dc   :  { %8866 = vmatprep.subr.bf16.mxu0 %v9088_v39 }
 0x4dd   :  { %8787 = vmatmul.mubr.bf16.gmra.mxu0 %v14368_v9 }
 0x4de   :  { %8790 = vmatprep.mubr.bf16.mxu0 %v14395_v28  ;;  %8821 = vmatpush3.bf16.msra.mxu1 %v9083_v34 }
 0x4df   :  { %8822 = vmatprep.subr.bf16.mxu1 %v9084_v4  ;;  %8867 = vmatpush3.bf16.msra.mxu0 %v9088_v39 }
 0x4e0   :  { %8868 = vmatprep.subr.bf16.mxu0 %v9090_v11 }
 0x4e1   :  { %8743 = vmatmul.mubr.bf16.gmra.mxu1 %v16823_v45 }
 0x4e2   :  { %8746 = vmatprep.mubr.bf16.mxu1 %v16824_v58  ;;  %8823 = vmatpush3.bf16.msra.mxu1 %v9084_v4 }
 0x4e3   :  { %8824 = vmatprep.subr.bf16.mxu1 %v9086_v18  ;;  %8869 = vmatpush3.bf16.msra.mxu0 %v9090_v11 }
 0x4e4   :  { %8870 = vmatprep.subr.bf16.mxu0 %v9091_v1 }
 0x4e5   :  { %8791 = vmatmul.mubr.bf16.gmra.mxu0 %v14400_v36 }
 0x4e6   :  { %8794 = vmatprep.mubr.bf16.mxu0 %v14427_v20  ;;  %8825 = vmatpush3.bf16.msra.mxu1 %v9086_v18 }
 0x4e7   :  { %8826 = vmatprep.subr.bf16.mxu1 %v9089_v63  ;;  %8871 = vmatpush3.bf16.msra.mxu0 %v9091_v1 }
 0x4e8   :  { %8872 = vmatprep.subr.bf16.mxu0 %v9093_v43 }
 0x4e9   :  { %8747 = vmatmul.mubr.bf16.gmra.mxu1 %v16825_v14 }
 0x4ea   :  { %8750 = vmatprep.mubr.bf16.mxu1 %v16826_v37  ;;  %8827 = vmatpush3.bf16.msra.mxu1 %v9089_v63  ;;  %v9100_v63 = vld [vmem:[%s15284_s6 + $0x218] sm:$0xff]  }
 0x4eb   :  { %8828 = vmatprep.subr.bf16.mxu1 %v9092_v53  ;;  %8873 = vmatpush3.bf16.msra.mxu0 %v9093_v43 }
 0x4ec   :  { %8874 = vmatprep.subr.bf16.mxu0 %v9094_v49 }
 0x4ed   :  { %8795 = vmatmul.mubr.bf16.gmra.mxu0 %v14432_v30 }
 0x4ee   :  { %8798 = vmatprep.mubr.bf16.mxu0 %v14459_v48  ;;  %8829 = vmatpush3.bf16.msra.mxu1 %v9092_v53 }
 0x4ef   :  { %8875 = vmatpush3.bf16.msra.mxu0 %v9094_v49  ;;  %8910 = vmatprep.subr.bf16.mxu1 %v9096_v5 }
 0x4f0   :  { %8876 = vmatprep.subr.bf16.mxu0 %v9095_v10 }
 0x4f1   :  { %8751 = vmatmul.mubr.bf16.gmra.mxu1 %v16827_v38 }
 0x4f2   :  { %8754 = vmatprep.mubr.bf16.mxu1 %v16828_v41 }
 0x4f3   :  { %8877 = vmatpush3.bf16.msra.mxu0 %v9095_v10  ;;  %v9101_v10 = vld [vmem:[%s15284_s6 + $0x210] sm:$0xff]  }
 0x4f5   :  { %8799 = vmatmul.mubr.bf16.gmra.mxu0 %v14461_v23 }
 0x4f6   :  { %8802 = vmatprep.mubr.bf16.mxu0 %v14482_v13 }
 0x4f9   :  { %8755 = vmatmul.mubr.bf16.gmra.mxu1 %v16829_v29 }
 0x4fa   :  { %8758 = vmatprep.mubr.bf16.mxu1 %v14273_v57 }
 0x4fd   :  { %8803 = vmatmul.mubr.bf16.gmra.mxu0 %v14484_v12 }
 0x4fe   :  { %8806 = vmatprep.mubr.bf16.mxu0 %v14503_v19 }
 0x501   :  { %8759 = vmatmul.mubr.bf16.gmra.mxu1 %v14277_v44 }
 0x502   :  { %8762 = vmatprep.mubr.bf16.mxu1 %v14305_v31 }
 0x505   :  { %8807 = vmatmul.mubr.bf16.gmra.mxu0 %v14505_v32 }
 0x506   :  { %8810 = vmatprep.mubr.bf16.mxu0 %v14268_v26 }
 0x509   :  { %8763 = vmatmul.mubr.bf16.gmra.mxu1 %v16830_v59 }
 0x50a   :  { %8830 = vmatprep.mubr.bf16.mxu1 %v13945_v27  ;;  %v9098_v27 = vld [vmem:[%s15284_s6 + $0x228] sm:$0xff]  }
 0x50d   :  { %8811 = vmatmul.mubr.bf16.gmra.mxu0 %v14308_v51 }
 0x50e   :  { %8878 = vmatprep.mubr.bf16.mxu0 %v16819_v62 }
 0x511   :  { %v8544_v61 = vpop.f32.mrf.mxu1  ;;  %8831 = vmatmul.mubr.bf16.vlgmr.msra.gmra.mxu1 %v14014_v25 }
 0x512   :  { %8911 = vmatpush3.bf16.msra.mxu1 %v9096_v5  ;;  %8834 = vmatprep.mubr.bf16.mxu1 %v14019_v60  ;;  %v9099_v60 = vld [vmem:[%s15284_s6 + $0x220] sm:$0xff]  }
 0x513   :  { %v5365_v40 = vpop.f32.mrf.mxu1  ;;  %8912 = vmatprep.subr.bf16.mxu1 %v9097_v3 }
 0x515   :  { %v8592_v24 = vpop.f32.mrf.mxu0  ;;  %8879 = vmatmul.mubr.bf16.vlgmr.msra.gmra.mxu0 %v16820_v52  ;;  %v8545_v62 = vpop.f32.mrf.mxu1 }
 0x516   :  { %v14601_v34 = vadd.f32 %v8592_v24, %v8544_v61  ;;  %8882 = vmatprep.mubr.bf16.mxu0 %v16821_v42  ;;  %8913 = vmatpush3.bf16.msra.mxu1 %v9097_v3  ;;  %v9102_v24 = vld [vmem:[%s15284_s6 + $0x208] sm:$0xff]  }
 0x517   :  { %v5574_v39 = vpop.f32.mrf.mxu0  ;;  %v5368_v25 = vpop.f32.mrf.mxu1  ;;  %8914 = vmatprep.subr.bf16.mxu1 %v9098_v27 }
 0x518   :  { %v14607_v4 = vadd.f32 %v5574_v39, %v5365_v40 }
 0x519   :  { %v8593_v11 = vpop.f32.mrf.mxu0  ;;  %v8548_v18 = vpop.f32.mrf.mxu1  ;;  %8835 = vmatmul.mubr.bf16.gmra.mxu1 %v14083_v0 }
 0x51a   :  { %v14610_v52 = vadd.f32 %v8593_v11, %v8545_v62  ;;  %8838 = vmatprep.mubr.bf16.mxu1 %v14088_v16  ;;  %8915 = vmatpush3.bf16.msra.mxu1 %v9098_v27  ;;  %v9103_v11 = vld [vmem:[%s15284_s6 + $0x200] sm:$0xff]  }
 0x51b   :  { %v5577_v42 = vpop.f32.mrf.mxu0  ;;  %v5381_v1 = vpop.f32.mrf.mxu1  ;;  %8916 = vmatprep.subr.bf16.mxu1 %v9099_v60 }
 0x51c   :  { %v14616_v43 = vadd.f32 %v5577_v42, %v5368_v25 }
 0x51d   :  { %v8596_v53 = vpop.f32.mrf.mxu0  ;;  %8883 = vmatmul.mubr.bf16.gmra.mxu0 %v16822_v6  ;;  %v8549_v49 = vpop.f32.mrf.mxu1 }
 0x51e   :  { %v14619_v5 = vadd.f32 %v8596_v53, %v8548_v18  ;;  %8886 = vmatprep.mubr.bf16.mxu0 %v16823_v45  ;;  %8917 = vmatpush3.bf16.msra.mxu1 %v9099_v60 }
 0x51f   :  { %v5590_v0 = vpop.f32.mrf.mxu0  ;;  %v5384_v16 = vpop.f32.mrf.mxu1  ;;  %8918 = vmatprep.subr.bf16.mxu1 %v9100_v63 }
 0x520   :  { %v14625_v3 = vadd.f32 %v5590_v0, %v5381_v1 }
 0x521   :  { %v8597_v61 = vpop.f32.mrf.mxu0  ;;  %v8552_v40 = vpop.f32.mrf.mxu1  ;;  %8839 = vmatmul.mubr.bf16.gmra.mxu1 %v14147_v2 }
 0x522   :  { %v14628_v6 = vadd.f32 %v8597_v61, %v8549_v49  ;;  %8842 = vmatprep.mubr.bf16.mxu1 %v14154_v7  ;;  %8919 = vmatpush3.bf16.msra.mxu1 %v9100_v63 }
 0x523   :  { %v5593_v45 = vpop.f32.mrf.mxu0  ;;  %v5397_v27 = vpop.f32.mrf.mxu1  ;;  %8920 = vmatprep.subr.bf16.mxu1 %v9101_v10 }
 0x524   :  { %v14634_v62 = vadd.f32 %v5593_v45, %v5384_v16 }
 0x525   :  { %v8600_v39 = vpop.f32.mrf.mxu0  ;;  %8887 = vmatmul.mubr.bf16.gmra.mxu0 %v16824_v58  ;;  %v8553_v25 = vpop.f32.mrf.mxu1 }
 0x526   :  { %v14637_v60 = vadd.f32 %v8600_v39, %v8552_v40  ;;  %8890 = vmatprep.mubr.bf16.mxu0 %v16825_v14  ;;  %8921 = vmatpush3.bf16.msra.mxu1 %v9101_v10 }
 0x527   :  { %v5606_v2 = vpop.f32.mrf.mxu0  ;;  %v5400_v7 = vpop.f32.mrf.mxu1  ;;  %8922 = vmatprep.subr.bf16.mxu1 %v9102_v24 }
 0x528   :  { %v14643_v18 = vadd.f32 %v5606_v2, %v5397_v27 }
 0x529   :  { %v8601_v42 = vpop.f32.mrf.mxu0  ;;  %v8556_v1 = vpop.f32.mrf.mxu1  ;;  %8843 = vmatmul.mubr.bf16.gmra.mxu1 %v14205_v54 }
 0x52a   :  { %v14646_v58 = vadd.f32 %v8601_v42, %v8553_v25  ;;  %8846 = vmatprep.mubr.bf16.mxu1 %v14207_v22  ;;  %8923 = vmatpush3.bf16.msra.mxu1 %v9102_v24 }
 0x52b   :  { %v5609_v14 = vpop.f32.mrf.mxu0  ;;  %v5413_v63 = vpop.f32.mrf.mxu1  ;;  %8924 = vmatprep.subr.bf16.mxu1 %v9103_v11 }
 0x52c   :  { %v14649_v53 = vadd.f32 %v5609_v14, %v5400_v7 }
 0x52d   :  { %v8604_v49 = vpop.f32.mrf.mxu0  ;;  %8891 = vmatmul.mubr.bf16.gmra.mxu0 %v16826_v37  ;;  %v8557_v0 = vpop.f32.mrf.mxu1 }
 0x52e   :  { %v14652_v16 = vadd.f32 %v8604_v49, %v8556_v1  ;;  %8894 = vmatprep.mubr.bf16.mxu0 %v16827_v38  ;;  %8925 = vmatpush3.bf16.msra.mxu1 %v9103_v11 }
 0x52f   :  { %v5622_v54 = vpop.f32.mrf.mxu0  ;;  %v5416_v10 = vpop.f32.mrf.mxu1 }
 0x530   :  { %v14655_v61 = vadd.f32 %v5622_v54, %v5413_v63 }
 0x531   :  { %v8605_v22 = vpop.f32.mrf.mxu0  ;;  %v8560_v40 = vpop.f32.mrf.mxu1  ;;  %8847 = vmatmul.mubr.bf16.gmra.mxu1 %v14253_v50 }
 0x532   :  { %v14658_v45 = vadd.f32 %v8605_v22, %v8557_v0  ;;  %8850 = vmatprep.mubr.bf16.mxu1 %v14256_v46 }
 0x533   :  { %v5625_v27 = vpop.f32.mrf.mxu0  ;;  %v5429_v37 = vpop.f32.mrf.mxu1 }
 0x534   :  { %v14661_v24 = vadd.f32 %v5625_v27, %v5416_v10 }
 0x535   :  { %v8608_v39 = vpop.f32.mrf.mxu0  ;;  %8895 = vmatmul.mubr.bf16.gmra.mxu0 %v16828_v41  ;;  %v8561_v38 = vpop.f32.mrf.mxu1 }
 0x536   :  { %v14664_v25 = vadd.f32 %v8608_v39, %v8560_v40  ;;  %8898 = vmatprep.mubr.bf16.mxu0 %v16829_v29 }
 0x537   :  { %v5638_v2 = vpop.f32.mrf.mxu0  ;;  %v5432_v7 = vpop.f32.mrf.mxu1 }
 0x538   :  { %v14667_v11 = vadd.f32 %v5638_v2, %v5429_v37 }
 0x539   :  { %v8609_v50 = vpop.f32.mrf.mxu0  ;;  %v8564_v42 = vpop.f32.mrf.mxu1  ;;  %8851 = vmatmul.mubr.bf16.gmra.mxu1 %v14291_v55 }
 0x53a   :  { %v14670_v46 = vadd.f32 %v8609_v50, %v8561_v38  ;;  %8854 = vmatprep.mubr.bf16.mxu1 %v14293_v8 }
 0x53b   :  { %v5641_v1 = vpop.f32.mrf.mxu0  ;;  %v5445_v14 = vpop.f32.mrf.mxu1 }
 0x53c   :  { %v14673_v41 = vadd.f32 %v5641_v1, %v5432_v7 }
 0x53d   :  { %v8612_v63 = vpop.f32.mrf.mxu0  ;;  %8899 = vmatmul.mubr.bf16.gmra.mxu0 %v14273_v57  ;;  %v8565_v29 = vpop.f32.mrf.mxu1 }
 0x53e   :  { %v14676_v49 = vadd.f32 %v8612_v63, %v8564_v42  ;;  %8902 = vmatprep.mubr.bf16.mxu0 %v14277_v44 }
 0x53f   :  { %v5654_v0 = vpop.f32.mrf.mxu0  ;;  %v5448_v54 = vpop.f32.mrf.mxu1 }
 0x540   :  { %v14679_v10 = vadd.f32 %v5654_v0, %v5445_v14 }
 0x541   :  { %v8613_v55 = vpop.f32.mrf.mxu0  ;;  %v8568_v22 = vpop.f32.mrf.mxu1  ;;  %8855 = vmatmul.mubr.bf16.gmra.mxu1 %v14320_v47 }
 0x542   :  { %v14682_v8 = vadd.f32 %v8613_v55, %v8565_v29  ;;  %8858 = vmatprep.mubr.bf16.mxu1 %v16818_v56 }
 0x543   :  { %v5657_v40 = vpop.f32.mrf.mxu0  ;;  %v5461_v27 = vpop.f32.mrf.mxu1 }
 0x544   :  { %v14685_v57 = vadd.f32 %v5657_v40, %v5448_v54 }
 0x545   :  { %v8616_v37 = vpop.f32.mrf.mxu0  ;;  %8903 = vmatmul.mubr.bf16.gmra.mxu0 %v14305_v31  ;;  %v8569_v44 = vpop.f32.mrf.mxu1 }
 0x546   :  { %v14688_v39 = vadd.f32 %v8616_v37, %v8568_v22  ;;  %8906 = vmatprep.mubr.bf16.mxu0 %v16830_v59 }
 0x547   :  { %v5670_v38 = vpop.f32.mrf.mxu0  ;;  %v5464_v2 = vpop.f32.mrf.mxu1 }
 0x548   :  { %v14691_v7 = vadd.f32 %v5670_v38, %v5461_v27 }
 0x549   :  { %v8617_v47 = vpop.f32.mrf.mxu0  ;;  %v8572_v50 = vpop.f32.mrf.mxu1  ;;  %8859 = vmatmul.mubr.bf16.gmra.mxu1 %v13928_v15 }
 0x54a   :  { %v14694_v56 = vadd.f32 %v8617_v47, %v8569_v44  ;;  %8926 = vmatprep.mubr.bf16.mxu1 %v14337_v17 }
 0x54b   :  { %v5673_v42 = vpop.f32.mrf.mxu0  ;;  %v5477_v1 = vpop.f32.mrf.mxu1 }
 0x54c   :  { %v14697_v31 = vadd.f32 %v5673_v42, %v5464_v2 }
 0x54d   :  { %v8620_v14 = vpop.f32.mrf.mxu0  ;;  %8907 = vmatmul.mubr.bf16.gmra.mxu0 %v13879_v21  ;;  %v8573_v59 = vpop.f32.mrf.mxu1 }
 0x54e   :  { %v14700_v63 = vadd.f32 %v8620_v14, %v8572_v50 }
 0x54f   :  { %v5686_v29 = vpop.f32.mrf.mxu0  ;;  %v5480_v0 = vpop.f32.mrf.mxu1 }
 0x550   :  { %v14702_v54 = vadd.f32 %v5686_v29, %v5477_v1 }
 0x551   :  { %v8621_v55 = vpop.f32.mrf.mxu0  ;;  %v8640_v15 = vpop.f32.mrf.mxu1  ;;  %8927 = vmatmul.mubr.bf16.vlgmr.msra.gmra.mxu1 %v14362_v33 }
 0x552   :  { %v14705_v22 = vadd.f32 %v8621_v55, %v8573_v59  ;;  %v6009_v17 = vadd.f32 %v8640_v15, %v14601_v34  ;;  %8930 = vmatprep.mubr.bf16.mxu1 %v14368_v9 }
 0x553   :  { %v5689_v40 = vpop.f32.mrf.mxu0  ;;  %v5880_v27 = vpop.f32.mrf.mxu1 }
 0x554   :  { %v14709_v21 = vadd.f32 %v5689_v40, %v5480_v0  ;;  %v6007_v37 = vadd.f32 %v5880_v27, %v14607_v4 }
 0x555   :  { %v8688_v44 = vpop.f32.mrf.mxu0  ;;  %v8641_v38 = vpop.f32.mrf.mxu1 }
 0x556   :  { %v14712_v2 = vadd.f32 %v8688_v44, %v6009_v17  ;;  %v6010_v47 = vadd.f32 %v8641_v38, %v14610_v52 }
 0x557   :  { %v6137_v50 = vpop.f32.mrf.mxu0  ;;  %v5883_v33 = vpop.f32.mrf.mxu1 }
 0x558   :  { %v14715_v42 = vadd.f32 %v6137_v50, %v6007_v37  ;;  %v6008_v34 = vadd.f32 %v5883_v33, %v14616_v43 }
 0x559   :  { %v8689_v1 = vpop.f32.mrf.mxu0  ;;  %v8644_v9 = vpop.f32.mrf.mxu1  ;;  %8931 = vmatmul.mubr.bf16.gmra.mxu1 %v14395_v28 }
 0x55a   :  { %v14719_v14 = vadd.f32 %v8689_v1, %v6010_v47  ;;  %v6013_v4 = vadd.f32 %v8644_v9, %v14619_v5  ;;  %8934 = vmatprep.mubr.bf16.mxu1 %v14400_v36 }
 0x55b   :  { %v6140_v59 = vpop.f32.mrf.mxu0  ;;  %v5896_v29 = vpop.f32.mrf.mxu1 }
 0x55c   :  { %v14723_v0 = vadd.f32 %v6140_v59, %v6008_v34  ;;  %v6011_v52 = vadd.f32 %v5896_v29, %v14625_v3 }
 0x55d   :  { %v8692_v55 = vpop.f32.mrf.mxu0  ;;  %v8645_v15 = vpop.f32.mrf.mxu1 }
 0x55e   :  { %v14726_v17 = vadd.f32 %v8692_v55, %v6013_v4  ;;  %v6014_v43 = vadd.f32 %v8645_v15, %v14628_v6 }
 0x55f   :  { %v6153_v40 = vpop.f32.mrf.mxu0  ;;  %v5899_v28 = vpop.f32.mrf.mxu1 }
 0x560   :  { %v14729_v27 = vadd.f32 %v6153_v40, %v6011_v52  ;;  %v6012_v5 = vadd.f32 %v5899_v28, %v14634_v62 }
 0x561   :  { %v8693_v37 = vpop.f32.mrf.mxu0  ;;  %v8648_v36 = vpop.f32.mrf.mxu1  ;;  %8935 = vmatmul.mubr.bf16.gmra.mxu1 %v14427_v20 }
 0x562   :  { %v14733_v44 = vadd.f32 %v8693_v37, %v6014_v43  ;;  %v6017_v3 = vadd.f32 %v8648_v36, %v14637_v60  ;;  %8938 = vmatprep.mubr.bf16.mxu1 %v14432_v30 }
 0x563   :  { %v6156_v38 = vpop.f32.mrf.mxu0  ;;  %v5912_v47 = vpop.f32.mrf.mxu1 }
 0x564   :  { %v14737_v50 = vadd.f32 %v6156_v38, %v6012_v5  ;;  %v6015_v6 = vadd.f32 %v5912_v47, %v14643_v18 }
 0x565   :  { %v8696_v33 = vpop.f32.mrf.mxu0  ;;  %v8649_v34 = vpop.f32.mrf.mxu1 }
 0x566   :  { %v14740_v1 = vadd.f32 %v8696_v33, %v6017_v3  ;;  %v6018_v62 = vadd.f32 %v8649_v34, %v14646_v58 }
 0x567   :  { %v6169_v9 = vpop.f32.mrf.mxu0  ;;  %v5915_v20 = vpop.f32.mrf.mxu1 }
 0x568   :  { %v14743_v4 = vadd.f32 %v6169_v9, %v6015_v6  ;;  %v6016_v60 = vadd.f32 %v5915_v20, %v14649_v53 }
 0x569   :  { %v8697_v59 = vpop.f32.mrf.mxu0  ;;  %v8652_v30 = vpop.f32.mrf.mxu1  ;;  %8939 = vmatmul.mubr.bf16.gmra.mxu1 %v14459_v48 }
 0x56a   :  { %v14747_v29 = vadd.f32 %v8697_v59, %v6018_v62  ;;  %v6021_v18 = vadd.f32 %v8652_v30, %v14652_v16  ;;  %8942 = vmatprep.mubr.bf16.mxu1 %v14461_v23 }
 0x56b   :  { %v6172_v52 = vpop.f32.mrf.mxu0  ;;  %v5928_v55 = vpop.f32.mrf.mxu1 }
 0x56c   :  { %v14751_v15 = vadd.f32 %v6172_v52, %v6016_v60  ;;  %v6019_v58 = vadd.f32 %v5928_v55, %v14655_v61 }
 0x56d   :  { %v8700_v43 = vpop.f32.mrf.mxu0  ;;  %v8653_v40 = vpop.f32.mrf.mxu1 }
 0x56e   :  { %v14754_v28 = vadd.f32 %v8700_v43, %v6021_v18  ;;  %v6022_v53 = vadd.f32 %v8653_v40, %v14658_v45 }
 0x56f   :  { %v6185_v5 = vpop.f32.mrf.mxu0  ;;  %v5931_v48 = vpop.f32.mrf.mxu1 }
 0x570   :  { %v14757_v37 = vadd.f32 %v6185_v5, %v6019_v58  ;;  %v6020_v16 = vadd.f32 %v5931_v48, %v14661_v24 }
 0x571   :  { %v8701_v36 = vpop.f32.mrf.mxu0  ;;  %v8656_v23 = vpop.f32.mrf.mxu1  ;;  %8943 = vmatmul.mubr.bf16.gmra.mxu1 %v14482_v13 }
 0x572   :  { %v14761_v3 = vadd.f32 %v8701_v36, %v6022_v53  ;;  %v6025_v61 = vadd.f32 %v8656_v23, %v14664_v25  ;;  %8946 = vmatprep.mubr.bf16.mxu1 %v14484_v12 }
 0x573   :  { %v6188_v38 = vpop.f32.mrf.mxu0  ;;  %v5944_v47 = vpop.f32.mrf.mxu1 }
 0x574   :  { %v14765_v6 = vadd.f32 %v6188_v38, %v6020_v16  ;;  %v6023_v45 = vadd.f32 %v5944_v47, %v14667_v11 }
 0x575   :  { %v8704_v33 = vpop.f32.mrf.mxu0  ;;  %v8657_v34 = vpop.f32.mrf.mxu1 }
 0x576   :  { %v14768_v62 = vadd.f32 %v8704_v33, %v6025_v61  ;;  %v6026_v24 = vadd.f32 %v8657_v34, %v14670_v46 }
 0x577   :  { %v6201_v9 = vpop.f32.mrf.mxu0  ;;  %v5947_v13 = vpop.f32.mrf.mxu1 }
 0x578   :  { %v14771_v20 = vadd.f32 %v6201_v9, %v6023_v45  ;;  %v6024_v25 = vadd.f32 %v5947_v13, %v14673_v41 }
 0x579   :  { %v8705_v60 = vpop.f32.mrf.mxu0  ;;  %v8660_v12 = vpop.f32.mrf.mxu1  ;;  %8947 = vmatmul.mubr.bf16.gmra.mxu1 %v14503_v19 }
 0x57a   :  { %v14775_v59 = vadd.f32 %v8705_v60, %v6026_v24  ;;  %v6029_v11 = vadd.f32 %v8660_v12, %v14676_v49  ;;  %8950 = vmatprep.mubr.bf16.mxu1 %v14505_v32 }
 0x57b   :  { %v6204_v30 = vpop.f32.mrf.mxu0  ;;  %v5960_v18 = vpop.f32.mrf.mxu1 }
 0x57c   :  { %v14779_v52 = vadd.f32 %v6204_v30, %v6024_v25  ;;  %v6027_v46 = vadd.f32 %v5960_v18, %v14679_v10 }
 0x57d   :  { %v8708_v55 = vpop.f32.mrf.mxu0  ;;  %v8661_v58 = vpop.f32.mrf.mxu1 }
 0x57e   :  { %v14782_v43 = vadd.f32 %v8708_v55, %v6029_v11  ;;  %v6030_v41 = vadd.f32 %v8661_v58, %v14682_v8 }
 0x57f   :  { %v6217_v40 = vpop.f32.mrf.mxu0  ;;  %v5963_v19 = vpop.f32.mrf.mxu1 }
 0x580   :  { %v14785_v53 = vadd.f32 %v6217_v40, %v6027_v46  ;;  %v6028_v49 = vadd.f32 %v5963_v19, %v14685_v57 }
 0x581   :  { %v8709_v5 = vpop.f32.mrf.mxu0  ;;  %v8664_v32 = vpop.f32.mrf.mxu1  ;;  %8951 = vmatmul.mubr.bf16.gmra.mxu1 %v14268_v26 }
 0x582   :  { %v14789_v48 = vadd.f32 %v8709_v5, %v6030_v41  ;;  %v6033_v10 = vadd.f32 %v8664_v32, %v14688_v39  ;;  %8954 = vmatprep.mubr.bf16.mxu1 %v14308_v51 }
 0x583   :  { %v6220_v16 = vpop.f32.mrf.mxu0  ;;  %v5976_v36 = vpop.f32.mrf.mxu1 }
 0x584   :  { %v14793_v23 = vadd.f32 %v6220_v16, %v6028_v49  ;;  %v6031_v8 = vadd.f32 %v5976_v36, %v14691_v7 }
 0x585   :  { %v8712_v61 = vpop.f32.mrf.mxu0  ;;  %v8665_v38 = vpop.f32.mrf.mxu1 }
 0x586   :  { %v14796_v47 = vadd.f32 %v8712_v61, %v6033_v10  ;;  %v6034_v57 = vadd.f32 %v8665_v38, %v14694_v56 }
 0x587   :  { %v6233_v45 = vpop.f32.mrf.mxu0  ;;  %v5979_v26 = vpop.f32.mrf.mxu1 }
 0x588   :  { %v14799_v33 = vadd.f32 %v6233_v45, %v6031_v8  ;;  %v6032_v39 = vadd.f32 %v5979_v26, %v14697_v31 }
 0x589   :  { %v8713_v34 = vpop.f32.mrf.mxu0  ;;  %v8668_v51 = vpop.f32.mrf.mxu1  ;;  %8955 = vmatmul.mubr.bf16.gmra.mxu1 %v14332_v35 }
 0x58a   :  { %v14803_v24 = vadd.f32 %v8713_v34, %v6034_v57  ;;  %v6037_v7 = vadd.f32 %v8668_v51, %v14700_v63 }
 0x58b   :  { %v6236_v9 = vpop.f32.mrf.mxu0  ;;  %v5992_v13 = vpop.f32.mrf.mxu1 }
 0x58c   :  { %v14806_v25 = vadd.f32 %v6236_v9, %v6032_v39  ;;  %v6035_v56 = vadd.f32 %v5992_v13, %v14702_v54 }
 0x58d   :  { %v8716_v60 = vpop.f32.mrf.mxu0  ;;  %v8669_v12 = vpop.f32.mrf.mxu1 }
 0x58e   :  { %v14809_v11 = vadd.f32 %v8716_v60, %v6037_v7  ;;  %v6038_v31 = vadd.f32 %v8669_v12, %v14705_v22 }
 0x58f   :  { %v6249_v30 = vpop.f32.mrf.mxu0  ;;  %v5995_v18 = vpop.f32.mrf.mxu1 }
 0x590   :  { %v14812_v46 = vadd.f32 %v6249_v30, %v6035_v56  ;;  %v6036_v35 = vadd.f32 %v5995_v18, %v14709_v21 }
 0x591   :  { %v8717_v55 = vpop.f32.mrf.mxu0  ;;  %v8736_v63 = vpop.f32.mrf.mxu1 }
 0x592   :  { %v14815_v58 = vadd.f32 %v8717_v55, %v6038_v31  ;;  %v14818_v41 = vadd.f32 %v8736_v63, %v14712_v2 }
 0x593   :  { %v6252_v54 = vpop.f32.mrf.mxu0  ;;  %v6394_v40 = vpop.f32.mrf.mxu1 }
 0x594   :  { %v14820_v19 = vadd.f32 %v6252_v54, %v6036_v35  ;;  %v14823_v49 = vadd.f32 %v6394_v40, %v14715_v42 }
 0x595   :  { %v14825_v22 = vpop.f32.mrf.mxu0  ;;  %v8737_v5 = vpop.f32.mrf.mxu1 }
 0x596   :  { %v14828_v32 = vadd.f32 %v8737_v5, %v14719_v14 }
 0x597   :  { %v14830_v21 = vpop.f32.mrf.mxu0  ;;  %v6397_v10 = vpop.f32.mrf.mxu1 }
 0x598   :  { %v14833_v16 = vadd.f32 %v6397_v10, %v14723_v0 }
 0x599   :  { %v14835_v2 = vpop.f32.mrf.mxu0  ;;  %v8740_v36 = vpop.f32.mrf.mxu1 }
 0x59a   :  { %v14838_v8 = vadd.f32 %v8740_v36, %v14726_v17 }
 0x59b   :  { %v14840_v42 = vpop.f32.mrf.mxu0  ;;  %v6410_v61 = vpop.f32.mrf.mxu1 }
 0x59c   :  { %v14843_v38 = vadd.f32 %v6410_v61, %v14729_v27 }
 0x59d   :  { %v14845_v14 = vpop.f32.mrf.mxu0  ;;  %v8741_v57 = vpop.f32.mrf.mxu1 }
 0x59e   :  { %v14848_v45 = vadd.f32 %v8741_v57, %v14733_v44 }
 0x59f   :  { %v14850_v0 = vpop.f32.mrf.mxu0  ;;  %v6413_v26 = vpop.f32.mrf.mxu1 }
 0x5a0   :  { %v14853_v39 = vadd.f32 %v6413_v26, %v14737_v50 }
 0x5a1   :  { %v14855_v17 = vpop.f32.mrf.mxu0  ;;  %v8744_v34 = vpop.f32.mrf.mxu1 }
 0x5a2   :  { %v14858_v51 = vadd.f32 %v8744_v34, %v14740_v1 }
 0x5a3   :  { %v14860_v27 = vpop.f32.mrf.mxu0  ;;  %v6426_v7 = vpop.f32.mrf.mxu1 }
 0x5a4   :  { %v14863_v9 = vadd.f32 %v6426_v7, %v14743_v4 }
 0x5a5   :  { %v14865_v44 = vpop.f32.mrf.mxu0  ;;  %v8745_v13 = vpop.f32.mrf.mxu1 }
 0x5a6   :  { %v14868_v56 = vadd.f32 %v8745_v13, %v14747_v29 }
 0x5a7   :  { %v14870_v50 = vpop.f32.mrf.mxu0  ;;  %v6429_v60 = vpop.f32.mrf.mxu1 }
 0x5a8   :  { %v14873_v12 = vadd.f32 %v6429_v60, %v14751_v15 }
 0x5a9   :  { %v14875_v1 = vpop.f32.mrf.mxu0  ;;  %v8748_v31 = vpop.f32.mrf.mxu1 }
 0x5aa   :  { %v14878_v30 = vadd.f32 %v8748_v31, %v14754_v28 }
 0x5ab   :  { %v14880_v4 = vpop.f32.mrf.mxu0  ;;  %v6442_v18 = vpop.f32.mrf.mxu1 }
 0x5ac   :  { %v14883_v35 = vadd.f32 %v6442_v18, %v14757_v37 }
 0x5ad   :  { %v14885_v29 = vpop.f32.mrf.mxu0  ;;  %v8749_v55 = vpop.f32.mrf.mxu1 }
 0x5ae   :  { %v14888_v63 = vadd.f32 %v8749_v55, %v14761_v3 }
 0x5af   :  { %v14890_v15 = vpop.f32.mrf.mxu0  ;;  %v6445_v54 = vpop.f32.mrf.mxu1 }
 0x5b0   :  { %v14893_v40 = vadd.f32 %v6445_v54, %v14765_v6 }
 0x5b1   :  { %v14895_v28 = vpop.f32.mrf.mxu0  ;;  %v8752_v5 = vpop.f32.mrf.mxu1 }
 0x5b2   :  { %16831 = vst [vmem:[#allocation71_spill] sm:$0xff] %v14893_v40  ;;  %16832 = vst [vmem:[#allocation75_spill] sm:$0xff] %v14895_v28  ;;  %v14898_v10 = vadd.f32 %v8752_v5, %v14768_v62 }
 0x5b3   :  { %v14900_v37 = vpop.f32.mrf.mxu0  ;;  %v6458_v36 = vpop.f32.mrf.mxu1 }
 0x5b4   :  { %16833 = vst [vmem:[#allocation78_spill] sm:$0xff] %v14898_v10  ;;  %16834 = vst [vmem:[#allocation82_spill] sm:$0xff] %v14900_v37  ;;  %v14903_v61 = vadd.f32 %v6458_v36, %v14771_v20 }
 0x5b5   :  { %v14905_v3 = vpop.f32.mrf.mxu0  ;;  %v8753_v57 = vpop.f32.mrf.mxu1 }
 0x5b6   :  { %16835 = vst [vmem:[#allocation79_spill] sm:$0xff] %v14903_v61  ;;  %16836 = vst [vmem:[#allocation83_spill] sm:$0xff] %v14905_v3  ;;  %v14908_v26 = vadd.f32 %v8753_v57, %v14775_v59 }
 0x5b7   :  { %v14910_v6 = vpop.f32.mrf.mxu0  ;;  %v6461_v34 = vpop.f32.mrf.mxu1 }
 0x5b8   :  { %16837 = vst [vmem:[#allocation86_spill] sm:$0xff] %v14908_v26  ;;  %16838 = vst [vmem:[#allocation90_spill] sm:$0xff] %v14910_v6  ;;  %v14913_v7 = vadd.f32 %v6461_v34, %v14779_v52 }
 0x5b9   :  { %v14915_v62 = vpop.f32.mrf.mxu0  ;;  %v8756_v13 = vpop.f32.mrf.mxu1 }
 0x5ba   :  { %16839 = vst [vmem:[#allocation87_spill] sm:$0xff] %v14913_v7  ;;  %16840 = vst [vmem:[#allocation91_spill] sm:$0xff] %v14915_v62  ;;  %v14918_v60 = vadd.f32 %v8756_v13, %v14782_v43 }
 0x5bb   :  { %v14920_v20 = vpop.f32.mrf.mxu0  ;;  %v6474_v31 = vpop.f32.mrf.mxu1 }
 0x5bc   :  { %16841 = vst [vmem:[#allocation94_spill] sm:$0xff] %v14918_v60  ;;  %16842 = vst [vmem:[#allocation98_spill] sm:$0xff] %v14920_v20  ;;  %v14923_v18 = vadd.f32 %v6474_v31, %v14785_v53 }
 0x5bd   :  { %v14925_v59 = vpop.f32.mrf.mxu0  ;;  %v8757_v55 = vpop.f32.mrf.mxu1 }
 0x5be   :  { %16843 = vst [vmem:[#allocation95_spill] sm:$0xff] %v14923_v18  ;;  %16844 = vst [vmem:[#allocation99_spill] sm:$0xff] %v14925_v59  ;;  %v14928_v54 = vadd.f32 %v8757_v55, %v14789_v48 }
 0x5bf   :  { %v14930_v52 = vpop.f32.mrf.mxu0  ;;  %v6477_v5 = vpop.f32.mrf.mxu1 }
 0x5c0   :  { %16845 = vst [vmem:[#allocation102_spill] sm:$0xff] %v14928_v54  ;;  %16846 = vst [vmem:[#allocation106_spill] sm:$0xff] %v14930_v52  ;;  %v14933_v36 = vadd.f32 %v6477_v5, %v14793_v23 }
 0x5c1   :  { %v14935_v43 = vpop.f32.mrf.mxu0  ;;  %v8760_v57 = vpop.f32.mrf.mxu1 }
 0x5c2   :  { %16847 = vst [vmem:[#allocation103_spill] sm:$0xff] %v14933_v36  ;;  %16848 = vst [vmem:[#allocation107_spill] sm:$0xff] %v14935_v43  ;;  %v14938_v34 = vadd.f32 %v8760_v57, %v14796_v47 }
 0x5c3   :  { %v14940_v53 = vpop.f32.mrf.mxu0  ;;  %v6490_v13 = vpop.f32.mrf.mxu1 }
 0x5c4   :  { %16849 = vst [vmem:[#allocation110_spill] sm:$0xff] %v14938_v34  ;;  %16850 = vst [vmem:[#allocation114_spill] sm:$0xff] %v14940_v53  ;;  %v14943_v31 = vadd.f32 %v6490_v13, %v14799_v33 }
 0x5c5   :  { %v14945_v48 = vpop.f32.mrf.mxu0  ;;  %v8761_v55 = vpop.f32.mrf.mxu1 }
 0x5c6   :  { %16851 = vst [vmem:[#allocation111_spill] sm:$0xff] %v14943_v31  ;;  %16852 = vst [vmem:[#allocation115_spill] sm:$0xff] %v14945_v48  ;;  %v14948_v54 = vadd.f32 %v8761_v55, %v14803_v24 }
 0x5c7   :  { %v14950_v23 = vpop.f32.mrf.mxu0  ;;  %v6493_v5 = vpop.f32.mrf.mxu1 }
 0x5c8   :  { %16853 = vst [vmem:[#allocation3_spill] sm:$0xff] %v14948_v54  ;;  %16854 = vst [vmem:[#allocation40_spill] sm:$0xff] %v14950_v23  ;;  %v14953_v36 = vadd.f32 %v6493_v5, %v14806_v25 }
 0x5c9   :  { %v14955_v47 = vpop.f32.mrf.mxu0  ;;  %v8764_v57 = vpop.f32.mrf.mxu1 }
 0x5ca   :  { %16855 = vst [vmem:[#allocation25_spill] sm:$0xff] %v14953_v36  ;;  %16856 = vst [vmem:[#allocation28_spill] sm:$0xff] %v14955_v47  ;;  %v14958_v34 = vadd.f32 %v8764_v57, %v14809_v11 }
 0x5cb   :  { %v14960_v33 = vpop.f32.mrf.mxu0  ;;  %v6506_v13 = vpop.f32.mrf.mxu1 }
 0x5cc   :  { %16857 = vst [vmem:[#allocation37_spill] sm:$0xff] %v14958_v34  ;;  %16858 = vst [vmem:[#allocation44_spill] sm:$0xff] %v14960_v33  ;;  %v14963_v31 = vadd.f32 %v6506_v13, %v14812_v46 }
 0x5cd   :  { %v14965_v24 = vpop.f32.mrf.mxu0  ;;  %v8765_v55 = vpop.f32.mrf.mxu1 }
 0x5ce   :  { %16859 = vst [vmem:[#allocation45_spill] sm:$0xff] %v14963_v31  ;;  %16860 = vst [vmem:[#allocation32_spill] sm:$0xff] %v14965_v24  ;;  %v14968_v54 = vadd.f32 %v8765_v55, %v14815_v58 }
 0x5cf   :  { %v14970_v25 = vpop.f32.mrf.mxu0  ;;  %v6509_v5 = vpop.f32.mrf.mxu1 }
 0x5d0   :  { %16861 = vst [vmem:[#allocation29_spill] sm:$0xff] %v14968_v54  ;;  %16862 = vst [vmem:[#allocation49_spill] sm:$0xff] %v14970_v25  ;;  %v14973_v36 = vadd.f32 %v6509_v5, %v14820_v19 }
 0x5d1   :  { %v14975_v11 = vpop.f32.mrf.mxu0  ;;  %v8832_v57 = vpop.f32.mrf.mxu1 }
 0x5d2   :  { %16863 = vst [vmem:[#allocation56_spill] sm:$0xff] %v14973_v36  ;;  %16864 = vst [vmem:[#allocation33_spill] sm:$0xff] %v14975_v11 }
 0x5d3   :  { %v14977_v34 = vpop.f32.mrf.mxu0  ;;  %v6908_v33 = vpop.f32.mrf.mxu1 }
 0x5d4   :  { %16865 = vst [vmem:[#allocation36_spill] sm:$0xff] %v14977_v34 }
 0x5d5   :  { %v8880_v46 = vpop.f32.mrf.mxu0  ;;  %v8833_v13 = vpop.f32.mrf.mxu1 }
 0x5d7   :  { %v7165_v31 = vpop.f32.mrf.mxu0  ;;  %v6911_v24 = vpop.f32.mrf.mxu1 }
 0x5d9   :  { %v8881_v47 = vpop.f32.mrf.mxu0  ;;  %v8836_v23 = vpop.f32.mrf.mxu1 }
 0x5db   :  { %v14979_v58 = vpop.f32.mrf.mxu0  ;;  %v14981_v55 = vpop.f32.mrf.mxu1 }
 0x5dd   :  { %v14983_v54 = vpop.f32.mrf.mxu1  ;;  %v14985_v19 = vpop.f32.mrf.mxu0 }
 0x5df   :  { %v14987_v5 = vpop.f32.mrf.mxu1  ;;  %v14991_v34 = vpop.f32.mrf.mxu0 }
 0x5e1   :  { %v14989_v36 = vpop.f32.mrf.mxu1  ;;  %v14997_v48 = vpop.f32.mrf.mxu0 }
 0x5e3   :  { %v14993_v11 = vpop.f32.mrf.mxu1  ;;  %v15003_v52 = vpop.f32.mrf.mxu0 }
 0x5e5   :  { %v14995_v25 = vpop.f32.mrf.mxu1  ;;  %v15009_v60 = vpop.f32.mrf.mxu0 }
 0x5e7   :  { %v14999_v53 = vpop.f32.mrf.mxu1  ;;  %v15015_v62 = vpop.f32.mrf.mxu0 }
 0x5e9   :  { %v15001_v43 = vpop.f32.mrf.mxu1  ;;  %v15021_v61 = vpop.f32.mrf.mxu0 }
 0x5eb   :  { %v15005_v18 = vpop.f32.mrf.mxu1  ;;  %v15027_v37 = vpop.f32.mrf.mxu0 }
 0x5ec   :  { %16866 = vst [vmem:[#allocation41_spill] sm:$0xff] %v15005_v18  ;;  %16874 = vst [vmem:[#allocation65_spill] sm:$0xff] %v15027_v37 }
 0x5ed   :  { %v15007_v59 = vpop.f32.mrf.mxu1 }
 0x5ee   :  { %16867 = vst [vmem:[#allocation48_spill] sm:$0xff] %v15007_v59 }
 0x5ef   :  { %v15011_v20 = vpop.f32.mrf.mxu1 }
 0x5f0   :  { %16868 = vst [vmem:[#allocation52_spill] sm:$0xff] %v15011_v20  ;;  %v15033_v20 = vpop.f32.mrf.mxu0 }
 0x5f1   :  { %v15013_v7 = vpop.f32.mrf.mxu1 }
 0x5f2   :  { %16869 = vst [vmem:[#allocation53_spill] sm:$0xff] %v15013_v7 }
 0x5f3   :  { %v15017_v26 = vpop.f32.mrf.mxu1 }
 0x5f4   :  { %16870 = vst [vmem:[#allocation57_spill] sm:$0xff] %v15017_v26  ;;  %v15039_v26 = vpop.f32.mrf.mxu0 }
 0x5f5   :  { %v15019_v6 = vpop.f32.mrf.mxu1  ;;  %16879 = vst [vmem:[#allocation101_spill] sm:$0xff] %v15039_v26 }
 0x5f6   :  { %16871 = vst [vmem:[#allocation60_spill] sm:$0xff] %v15019_v6 }
 0x5f7   :  { %v15023_v3 = vpop.f32.mrf.mxu1 }
 0x5f8   :  { %16872 = vst [vmem:[#allocation64_spill] sm:$0xff] %v15023_v3  ;;  %v15045_v3 = vpop.f32.mrf.mxu0 }
 0x5f9   :  { %v15025_v10 = vpop.f32.mrf.mxu1  ;;  %16882 = vst [vmem:[#allocation76_spill] sm:$0xff] %v15045_v3 }
 0x5fa   :  { %16873 = vst [vmem:[#allocation61_spill] sm:$0xff] %v15025_v10 }
 0x5fb   :  { %v15029_v59 = vpop.f32.mrf.mxu1 }
 0x5fc   :  { %16875 = vst [vmem:[#allocation68_spill] sm:$0xff] %v15029_v59  ;;  %v15053_v59 = vpop.f32.mrf.mxu0 }
 0x5fd   :  { %v15031_v40 = vpop.f32.mrf.mxu1  ;;  %16885 = vst [vmem:[#allocation77_spill] sm:$0xff] %v15053_v59 }
 0x5fe   :  { %16876 = vst [vmem:[#allocation72_spill] sm:$0xff] %v15031_v40  ;;  %v6780_v40 = vadd.f32 %v14825_v22, %v14818_v41  ;;  %v6779_v41 = vadd.f32 %v14840_v42, %v14833_v16 }
 0x5ff   :  { %v15035_v7 = vpop.f32.mrf.mxu1 }
 0x600   :  { %16877 = vst [vmem:[#allocation69_spill] sm:$0xff] %v15035_v7  ;;  %v7037_v26 = vadd.f32 %v8832_v57, %v6780_v40  ;;  %v7036_v40 = vadd.f32 %v6911_v24, %v6779_v41  ;;  %v6786_v24 = vadd.f32 %v14870_v50, %v14863_v9 }
 0x601   :  { %v15037_v18 = vpop.f32.mrf.mxu1 }
 0x602   :  { %16878 = vst [vmem:[#allocation73_spill] sm:$0xff] %v15037_v18  ;;  %v6778_v18 = vadd.f32 %v14830_v21, %v14823_v49  ;;  %v7294_v22 = vadd.f32 %v8880_v46, %v7037_v26  ;;  %v6784_v49 = vadd.f32 %v14845_v14, %v14838_v8  ;;  %v6785_v8 = vadd.f32 %v14855_v17, %v14848_v45 }
 0x603   :  { %v15041_v6 = vpop.f32.mrf.mxu1  ;;  %v7293_v14 = vadd.f32 %v14979_v58, %v7036_v40  ;;  %v6783_v26 = vadd.f32 %v14860_v27, %v14853_v39 }
 0x604   :  { %16880 = vst [vmem:[#allocation105_spill] sm:$0xff] %v15041_v6  ;;  %v7035_v3 = vadd.f32 %v6908_v33, %v6778_v18  ;;  %v7041_v33 = vadd.f32 %v8836_v23, %v6784_v49 }
 0x605   :  { %v15043_v28 = vpop.f32.mrf.mxu1 }
 0x606   :  { %16881 = vst [vmem:[#allocation108_spill] sm:$0xff] %v15043_v28  ;;  %v6781_v28 = vadd.f32 %v14835_v2, %v14828_v32  ;;  %v7292_v21 = vadd.f32 %v7165_v31, %v7035_v3  ;;  %v6782_v2 = vadd.f32 %v14850_v0, %v14843_v38  ;;  %v6788_v31 = vadd.f32 %v14865_v44, %v14858_v51 }
 0x607   :  { %v15047_v10 = vpop.f32.mrf.mxu1 }
 0x608   :  { %16883 = vst [vmem:[#allocation80_spill] sm:$0xff] %v15047_v10  ;;  %v15063_v10 = vpop.f32.mrf.mxu0  ;;  %v7038_v59 = vadd.f32 %v8833_v13, %v6781_v28  ;;  %v7039_v28 = vadd.f32 %v14981_v55, %v6782_v2  ;;  %v7045_v13 = vadd.f32 %v14989_v36, %v6788_v31  ;;  %v7043_v55 = vadd.f32 %v14993_v11, %v6786_v24  ;;  %v16892_v2 = vld [vmem:[#allocation82_spill] sm:$0xff]  ;;  %v16898_v31 = vld [vmem:[#allocation79_spill] sm:$0xff]  ;;  %v16901_v24 = vld [vmem:[#allocation53_spill] sm:$0xff] }
 0x609   :  { %v15049_v37 = vpop.f32.mrf.mxu1 }
 0x60a   :  { %16884 = vst [vmem:[#allocation112_spill] sm:$0xff] %v15049_v37  ;;  %v7295_v18 = vadd.f32 %v8881_v47, %v7038_v59  ;;  %v7042_v59 = vadd.f32 %v14983_v54, %v6785_v8  ;;  %v7296_v23 = vadd.f32 %v14991_v34, %v7039_v28  ;;  %v7040_v47 = vadd.f32 %v14987_v5, %v6783_v26  ;;  %v16895_v28 = vld [vmem:[#allocation83_spill] sm:$0xff] }
 0x60b   :  { %v15055_v7 = vpop.f32.mrf.mxu1  ;;  %v6789_v34 = vadd.f32 %v14875_v1, %v14868_v56  ;;  %v7300_v11 = vadd.f32 %v15015_v62, %v7043_v55  ;;  %v16888_v62 = vld [vmem:[#allocation75_spill] sm:$0xff]  ;;  %v16904_v55 = vld [vmem:[#allocation77_spill] sm:$0xff] }
 0x60c   :  { %16886 = vst [vmem:[#allocation109_spill] sm:$0xff] %v15055_v7  ;;  %v7299_v46 = vadd.f32 %v14997_v48, %v7042_v59  ;;  %v7297_v58 = vadd.f32 %v15003_v52, %v7040_v47  ;;  %v6787_v48 = vadd.f32 %v14880_v4, %v14873_v12  ;;  %v6792_v52 = vadd.f32 %v14885_v29, %v14878_v30 }
 0x60d   :  { %v15059_v6 = vpop.f32.mrf.mxu1  ;;  %v7046_v5 = vadd.f32 %v14995_v25, %v6789_v34  ;;  %v6790_v25 = vadd.f32 %v14890_v15, %v14883_v35  ;;  %v16903_v34 = vld [vmem:[#allocation91_spill] sm:$0xff] }
 0x60e   :  { %16887 = vst [vmem:[#allocation113_spill] sm:$0xff] %v15059_v6  ;;  %v15071_v6 = vpop.f32.mrf.mxu0  ;;  %v7044_v41 = vadd.f32 %v14999_v53, %v6787_v48  ;;  %v7049_v49 = vadd.f32 %v15001_v43, %v6792_v52  ;;  %v6793_v53 = vadd.f32 %v16888_v62, %v14888_v63  ;;  %v16891_v43 = vld [vmem:[#allocation71_spill] sm:$0xff]  ;;  %v16907_v52 = vld [vmem:[#allocation98_spill] sm:$0xff] }
 0x60f   :  { %v15065_v37 = vpop.f32.mrf.mxu1 }
 0x610   :  { %v15085_v0 = vpop.f32.mrf.mxu0 }
 0x611   :  { %v8928_v7 = vpop.f32.mrf.mxu1 }
 0x612   :  { %v7551_v57 = vadd.f32 %v8928_v7, %v7294_v22  ;;  %v7298_v7 = vadd.f32 %v14985_v19, %v7041_v33  ;;  %v15101_v27 = vpop.f32.mrf.mxu0  ;;  %v7302_v19 = vadd.f32 %v15009_v60, %v7045_v13  ;;  %v7303_v22 = vadd.f32 %v15021_v61, %v7046_v5 }
 0x613   :  { %v7422_v32 = vpop.f32.mrf.mxu1  ;;  %v7306_v33 = vadd.f32 %v15033_v20, %v7049_v49  ;;  %v16909_v49 = vld [vmem:[#allocation94_spill] sm:$0xff] }
 0x614   :  { %7583 = vst [vmem:[%s15287_s7 + $0x10] sm:$0xff] %v7551_v57  ;;  %v7549_v16 = vadd.f32 %v7422_v32, %v7292_v21  ;;  %v15117_v50 = vpop.f32.mrf.mxu0  ;;  %v16889_v21 = vld [vmem:[#allocation65_spill] sm:$0xff] }
 0x615   :  { %v8929_v42 = vpop.f32.mrf.mxu1  ;;  %v7301_v40 = vadd.f32 %v16889_v21, %v7044_v41  ;;  %v16890_v57 = vld [vmem:[#allocation41_spill] sm:$0xff] }
 0x616   :  { %7581 = vst [vmem:[%s15287_s7] sm:$0xff] %v7549_v16  ;;  %v7552_v38 = vadd.f32 %v8929_v42, %v7295_v18  ;;  %v15133_v4 = vpop.f32.mrf.mxu0  ;;  %v7047_v32 = vadd.f32 %v16890_v57, %v6790_v25  ;;  %v6791_v18 = vadd.f32 %v16892_v2, %v16891_v43  ;;  %v16893_v16 = vld [vmem:[#allocation48_spill] sm:$0xff]  ;;  %v16914_v2 = vld [vmem:[#allocation61_spill] sm:$0xff] }
 0x617   :  { %v7425_v3 = vpop.f32.mrf.mxu1  ;;  %v7050_v42 = vadd.f32 %v16893_v16, %v6793_v53  ;;  %v16911_v53 = vld [vmem:[#allocation64_spill] sm:$0xff]  ;;  %v16915_v16 = vld [vmem:[#allocation102_spill] sm:$0xff] }
 0x618   :  { %7584 = vst [vmem:[%s15287_s7 + $0x18] sm:$0xff] %v7552_v38  ;;  %v7550_v45 = vadd.f32 %v7425_v3, %v7293_v14  ;;  %v15149_v15 = vpop.f32.mrf.mxu0  ;;  %v16894_v14 = vld [vmem:[#allocation78_spill] sm:$0xff]  ;;  %v16896_v3 = vld [vmem:[#allocation101_spill] sm:$0xff] }
 0x619   :  { %v8932_v17 = vpop.f32.mrf.mxu1  ;;  %v6796_v38 = vadd.f32 %v16895_v28, %v16894_v14  ;;  %v7304_v26 = vadd.f32 %v16896_v3, %v7047_v32  ;;  %v16912_v32 = vld [vmem:[#allocation95_spill] sm:$0xff]  ;;  %v16917_v14 = vld [vmem:[#allocation68_spill] sm:$0xff] }
 0x61a   :  { %7582 = vst [vmem:[%s15287_s7 + $0x8] sm:$0xff] %v7550_v45  ;;  %v7555_v39 = vadd.f32 %v8932_v17, %v7298_v7  ;;  %v16897_v7 = vld [vmem:[#allocation52_spill] sm:$0xff]  ;;  %v7248_v45 = vpop.f32.mrf.mxu0 }
 0x61b   :  { %v7438_v54 = vpop.f32.mrf.mxu1  ;;  %v7048_v59 = vadd.f32 %v16897_v7, %v6791_v18  ;;  %v16919_v7 = vld [vmem:[#allocation114_spill] sm:$0xff] }
 0x61c   :  { %7587 = vst [vmem:[%s15287_s7 + $0x30] sm:$0xff] %v7555_v39  ;;  %v7553_v51 = vadd.f32 %v7438_v54, %v7296_v23  ;;  %v16899_v23 = vld [vmem:[#allocation90_spill] sm:$0xff]  ;;  %v16900_v39 = vld [vmem:[#allocation76_spill] sm:$0xff]  ;;  %v8904_v5 = vpop.f32.mrf.mxu0 }
 0x61d   :  { %v8933_v44 = vpop.f32.mrf.mxu1  ;;  %v6794_v47 = vadd.f32 %v16899_v23, %v16898_v31  ;;  %v7307_v54 = vadd.f32 %v16900_v39, %v7050_v42  ;;  %v16916_v42 = vld [vmem:[#allocation107_spill] sm:$0xff] }
 0x61e   :  { %7585 = vst [vmem:[%s15287_s7 + $0x20] sm:$0xff] %v7553_v51  ;;  %v7556_v9 = vadd.f32 %v8933_v44, %v7299_v46  ;;  %v7053_v46 = vadd.f32 %v16901_v24, %v6796_v38  ;;  %v16902_v44 = vld [vmem:[#allocation86_spill] sm:$0xff]  ;;  %v16922_v39 = vld [vmem:[#allocation115_spill] sm:$0xff] }
 0x61f   :  { %v7441_v36 = vpop.f32.mrf.mxu1 }
 0x620   :  { %7588 = vst [vmem:[%s15287_s7 + $0x38] sm:$0xff] %v7556_v9  ;;  %v7554_v56 = vadd.f32 %v7441_v36, %v7297_v58  ;;  %v6797_v58 = vadd.f32 %v16903_v34, %v16902_v44  ;;  %v7305_v9 = vadd.f32 %v16904_v55, %v7048_v59  ;;  %v16905_v36 = vld [vmem:[#allocation57_spill] sm:$0xff]  ;;  %v7310_v41 = vadd.f32 %v15063_v10, %v7053_v46  ;;  %v16924_v34 = vld [vmem:[#allocation111_spill] sm:$0xff] }
 0x621   :  { %v8936_v1 = vpop.f32.mrf.mxu1  ;;  %v7051_v48 = vadd.f32 %v16905_v36, %v6794_v47  ;;  %v16921_v47 = vld [vmem:[#allocation110_spill] sm:$0xff]  ;;  %v16923_v46 = vld [vmem:[#allocation69_spill] sm:$0xff] }
 0x622   :  { %7586 = vst [vmem:[%s15287_s7 + $0x28] sm:$0xff] %v7554_v56  ;;  %v7559_v12 = vadd.f32 %v8936_v1, %v7302_v19  ;;  %v16906_v1 = vld [vmem:[#allocation87_spill] sm:$0xff]  ;;  %v16926_v36 = vld [vmem:[#allocation73_spill] sm:$0xff] }
 0x623   :  { %v7454_v60 = vpop.f32.mrf.mxu1  ;;  %v7308_v62 = vadd.f32 %v15071_v6, %v7051_v48 }
 0x624   :  { %7591 = vst [vmem:[%s15287_s7 + $0x50] sm:$0xff] %v7559_v12  ;;  %v7557_v30 = vadd.f32 %v7454_v60, %v7300_v11  ;;  %v6795_v11 = vadd.f32 %v16907_v52, %v16906_v1  ;;  %v16908_v12 = vld [vmem:[#allocation60_spill] sm:$0xff] }
 0x625   :  { %v8937_v29 = vpop.f32.mrf.mxu1  ;;  %v7054_v60 = vadd.f32 %v16908_v12, %v6797_v58  ;;  %v16925_v58 = vld [vmem:[#allocation40_spill] sm:$0xff] }
 0x626   :  { %7589 = vst [vmem:[%s15287_s7 + $0x40] sm:$0xff] %v7557_v30  ;;  %v7560_v35 = vadd.f32 %v8937_v29, %v7303_v22  ;;  %v16910_v30 = vld [vmem:[#allocation99_spill] sm:$0xff]  ;;  %v7052_v21 = vadd.f32 %v16911_v53, %v6795_v11  ;;  %v6802_v55 = vadd.f32 %v16925_v58, %v16924_v34  ;;  %v16928_v1 = vld [vmem:[#allocation28_spill] sm:$0xff] }
 0x627   :  { %v7457_v61 = vpop.f32.mrf.mxu1  ;;  %v6800_v29 = vadd.f32 %v16910_v30, %v16909_v49  ;;  %v7311_v43 = vadd.f32 %v15085_v0, %v7054_v60  ;;  %v16931_v49 = vld [vmem:[#allocation44_spill] sm:$0xff] }
 0x628   :  { %7592 = vst [vmem:[%s15287_s7 + $0x58] sm:$0xff] %v7560_v35  ;;  %v7558_v63 = vadd.f32 %v7457_v61, %v7301_v40  ;;  %v7261_v40 = vpop.f32.mrf.mxu0  ;;  %v16913_v35 = vld [vmem:[#allocation106_spill] sm:$0xff] }
 0x629   :  { %v8940_v8 = vpop.f32.mrf.mxu1  ;;  %v6798_v61 = vadd.f32 %v16913_v35, %v16912_v32  ;;  %v7057_v18 = vadd.f32 %v16914_v2, %v6800_v29 }
 0x62a   :  { %7590 = vst [vmem:[%s15287_s7 + $0x48] sm:$0xff] %v7558_v63  ;;  %v7563_v20 = vadd.f32 %v8940_v8, %v7306_v33  ;;  %v6801_v63 = vadd.f32 %v16916_v42, %v16915_v16  ;;  %v7309_v8 = vadd.f32 %v15101_v27, %v7052_v21  ;;  %v8905_v38 = vpop.f32.mrf.mxu0 }
 0x62b   :  { %v7470_v17 = vpop.f32.mrf.mxu1  ;;  %v7055_v28 = vadd.f32 %v16917_v14, %v6798_v61  ;;  %v16935_v61 = vld [vmem:[#allocation80_spill] sm:$0xff] }
 0x62c   :  { %7595 = vst [vmem:[%s15287_s7 + $0x70] sm:$0xff] %v7563_v20  ;;  %v7561_v13 = vadd.f32 %v7470_v17, %v7304_v26  ;;  %v16918_v26 = vld [vmem:[#allocation103_spill] sm:$0xff]  ;;  %v7314_v20 = vadd.f32 %v15117_v50, %v7057_v18  ;;  %v16920_v17 = vld [vmem:[#allocation72_spill] sm:$0xff] }
 0x62d   :  { %v8941_v51 = vpop.f32.mrf.mxu1  ;;  %v6799_v59 = vadd.f32 %v16919_v7, %v16918_v26  ;;  %v7058_v31 = vadd.f32 %v16920_v17, %v6801_v63  ;;  %v7312_v24 = vadd.f32 %v15133_v4, %v7055_v28  ;;  %v16938_v63 = vld [vmem:[#allocation112_spill] sm:$0xff]  ;;  %v16939_v28 = vld [vmem:[#allocation29_spill] sm:$0xff] }
 0x62e   :  { %7593 = vst [vmem:[%s15287_s7 + $0x60] sm:$0xff] %v7561_v13  ;;  %v7564_v19 = vadd.f32 %v8941_v51, %v7307_v54  ;;  %v6804_v54 = vadd.f32 %v16922_v39, %v16921_v47  ;;  %v7264_v51 = vpop.f32.mrf.mxu0  ;;  %v16941_v7 = vld [vmem:[#allocation109_spill] sm:$0xff] }
 0x62f   :  { %v7473_v56 = vpop.f32.mrf.mxu1  ;;  %v7056_v13 = vadd.f32 %v16923_v46, %v6799_v59  ;;  %v16944_v39 = vld [vmem:[#allocation113_spill] sm:$0xff] }
 0x630   :  { %7596 = vst [vmem:[%s15287_s7 + $0x78] sm:$0xff] %v7564_v19  ;;  %v7562_v25 = vadd.f32 %v7473_v56, %v7305_v9  ;;  %v7315_v9 = vadd.f32 %v15149_v15, %v7058_v31  ;;  %v7061_v48 = vadd.f32 %v16926_v36, %v6804_v54  ;;  %v16927_v56 = vld [vmem:[#allocation3_spill] sm:$0xff]  ;;  %v8908_v15 = vpop.f32.mrf.mxu0  ;;  %v16942_v31 = vld [vmem:[#allocation56_spill] sm:$0xff] }
 0x631   :  { %v8944_v22 = vpop.f32.mrf.mxu1  ;;  %v6805_v52 = vadd.f32 %v16928_v1, %v16927_v56  ;;  %v7313_v11 = vadd.f32 %v7248_v45, %v7056_v13 }
 0x632   :  { %7594 = vst [vmem:[%s15287_s7 + $0x68] sm:$0xff] %v7562_v25  ;;  %v7567_v10 = vadd.f32 %v8944_v22, %v7310_v41  ;;  %v16929_v41 = vld [vmem:[#allocation105_spill] sm:$0xff]  ;;  %v7318_v29 = vadd.f32 %v8904_v5, %v7061_v48  ;;  %v7277_v5 = vpop.f32.mrf.mxu0 }
 0x633   :  { %v7486_v57 = vpop.f32.mrf.mxu1  ;;  %v7059_v12 = vadd.f32 %v16929_v41, %v6802_v55  ;;  %v16930_v22 = vld [vmem:[#allocation25_spill] sm:$0xff] }
 0x634   :  { %7599 = vst [vmem:[%s15287_s7 + $0x90] sm:$0xff] %v7567_v10  ;;  %v7565_v6 = vadd.f32 %v7486_v57, %v7308_v62  ;;  %v6803_v30 = vadd.f32 %v16931_v49, %v16930_v22  ;;  %v16932_v62 = vld [vmem:[#allocation108_spill] sm:$0xff]  ;;  %v16933_v10 = vld [vmem:[#allocation37_spill] sm:$0xff] }
 0x635   :  { %v8945_v33 = vpop.f32.mrf.mxu1  ;;  %v7062_v53 = vadd.f32 %v16932_v62, %v6805_v52  ;;  %v16934_v57 = vld [vmem:[#allocation32_spill] sm:$0xff]  ;;  %v7316_v35 = vadd.f32 %v7261_v40, %v7059_v12 }
 0x636   :  { %7597 = vst [vmem:[%s15287_s7 + $0x80] sm:$0xff] %v7565_v6  ;;  %v7568_v0 = vadd.f32 %v8945_v33, %v7311_v43  ;;  %v6808_v32 = vadd.f32 %v16934_v57, %v16933_v10  ;;  %v7060_v43 = vadd.f32 %v16935_v61, %v6803_v30  ;;  %v16936_v6 = vld [vmem:[#allocation45_spill] sm:$0xff] }
 0x637   :  { %v7489_v3 = vpop.f32.mrf.mxu1  ;;  %v16937_v33 = vld [vmem:[#allocation49_spill] sm:$0xff]  ;;  %v7319_v42 = vadd.f32 %v8905_v38, %v7062_v53  ;;  %v8909_v38 = vpop.f32.mrf.mxu0 }
 0x638   :  { %7600 = vst [vmem:[%s15287_s7 + $0x98] sm:$0xff] %v7568_v0  ;;  %v7566_v27 = vadd.f32 %v7489_v3, %v7309_v8  ;;  %v6806_v16 = vadd.f32 %v16937_v33, %v16936_v6  ;;  %v7065_v8 = vadd.f32 %v16938_v63, %v6808_v32  ;;  %v16940_v0 = vld [vmem:[#allocation33_spill] sm:$0xff]  ;;  %v7317_v26 = vadd.f32 %v7264_v51, %v7060_v43 }
 0x639   :  { %v8948_v23 = vpop.f32.mrf.mxu1  ;;  %v6809_v3 = vadd.f32 %v16940_v0, %v16939_v28 }
 0x63a   :  { %7598 = vst [vmem:[%s15287_s7 + $0x88] sm:$0xff] %v7566_v27  ;;  %v7571_v50 = vadd.f32 %v8948_v23, %v7314_v20  ;;  %v7063_v59 = vadd.f32 %v16941_v7, %v6806_v16  ;;  %v16943_v27 = vld [vmem:[#allocation36_spill] sm:$0xff]  ;;  %v7322_v47 = vadd.f32 %v8908_v15, %v7065_v8 }
 0x63b   :  { %v7502_v44 = vpop.f32.mrf.mxu1  ;;  %v6807_v23 = vadd.f32 %v16943_v27, %v16942_v31  ;;  %v7066_v54 = vadd.f32 %v16944_v39, %v6809_v3 }
 0x63c   :  { %7603 = vst [vmem:[%s15287_s7 + $0xb0] sm:$0xff] %v7571_v50  ;;  %v7569_v4 = vadd.f32 %v7502_v44, %v7312_v24  ;;  %v7320_v13 = vadd.f32 %v7277_v5, %v7063_v59  ;;  %v7280_v44 = vpop.f32.mrf.mxu0 }
 0x63d   :  { %v8949_v19 = vpop.f32.mrf.mxu1  ;;  %v7064_v50 = vadd.f32 %v15065_v37, %v6807_v23  ;;  %v7323_v58 = vadd.f32 %v8909_v38, %v7066_v54 }
 0x63e   :  { %7601 = vst [vmem:[%s15287_s7 + $0xa0] sm:$0xff] %v7569_v4  ;;  %v7572_v60 = vadd.f32 %v8949_v19, %v7315_v9 }
 0x63f   :  { %v7505_v25 = vpop.f32.mrf.mxu1  ;;  %v7321_v36 = vadd.f32 %v7280_v44, %v7064_v50 }
 0x640   :  { %7604 = vst [vmem:[%s15287_s7 + $0xb8] sm:$0xff] %v7572_v60  ;;  %v7570_v45 = vadd.f32 %v7505_v25, %v7313_v11 }
 0x641   :  { %v8952_v21 = vpop.f32.mrf.mxu1 }
 0x642   :  { %7602 = vst [vmem:[%s15287_s7 + $0xa8] sm:$0xff] %v7570_v45  ;;  %v7575_v2 = vadd.f32 %v8952_v21, %v7318_v29 }
 0x643   :  { %v7518_v18 = vpop.f32.mrf.mxu1 }
 0x644   :  { %7607 = vst [vmem:[%s15287_s7 + $0xd0] sm:$0xff] %v7575_v2  ;;  %v7573_v40 = vadd.f32 %v7518_v18, %v7316_v35 }
 0x645   :  { %v8953_v14 = vpop.f32.mrf.mxu1 }
 0x646   :  { %7605 = vst [vmem:[%s15287_s7 + $0xc0] sm:$0xff] %v7573_v40  ;;  %v7576_v20 = vadd.f32 %v8953_v14, %v7319_v42 }
 0x647   :  { %v7521_v17 = vpop.f32.mrf.mxu1 }
 0x648   :  { %7608 = vst [vmem:[%s15287_s7 + $0xd8] sm:$0xff] %v7576_v20  ;;  %v7574_v24 = vadd.f32 %v7521_v17, %v7317_v26 }
 0x649   :  { %v8956_v46 = vpop.f32.mrf.mxu1 }
 0x64a   :  { %7606 = vst [vmem:[%s15287_s7 + $0xc8] sm:$0xff] %v7574_v24  ;;  %v7579_v51 = vadd.f32 %v8956_v46, %v7322_v47 }
 0x64b   :  { %v7534_v34 = vpop.f32.mrf.mxu1 }
 0x64c   :  { %7611 = vst [vmem:[%s15287_s7 + $0xf0] sm:$0xff] %v7579_v51  ;;  %v7577_v55 = vadd.f32 %v7534_v34, %v7320_v13 }
 0x64d   :  { %v8957_v9 = vpop.f32.mrf.mxu1 }
 0x64e   :  { %7609 = vst [vmem:[%s15287_s7 + $0xe0] sm:$0xff] %v7577_v55  ;;  %v7580_v37 = vadd.f32 %v8957_v9, %v7323_v58 }
 0x64f   :  { %v7537_v48 = vpop.f32.mrf.mxu1 }
 0x650   :  { %7612 = vst [vmem:[%s15287_s7 + $0xf8] sm:$0xff] %v7580_v37  ;;  %v7578_v4 = vadd.f32 %v7537_v48, %v7321_v36 }
 0x652   :  { %7610 = vst [vmem:[%s15287_s7 + $0xe8] sm:$0xff] %v7578_v4 }

</bundles_post_ra>
